<compile_context>
chip_gen: v6e
topology: v6e:2x2x1
jax: 0.10.0
libtpu: 0.0.40
codegen_flags: <defaults>
</compile_context>

<pallas_src>
import numpy as np

import jax
import jax.numpy as jnp
from jax.experimental import pallas as pl
from jax.experimental.pallas import tpu as pltpu

BN_EPS = 1e-5

# Columns of the stage-B activation (length 349) holding the valid 7x7 map of
# block 7's output.  After the fused 2x2 max-pool the grid keeps row stride
# 56 (= 2*28) and column stride 2, so pooled pixel (i, j) lives at i*56 + j*2.
_HEAD_LEN = 349
_HEAD_MASK = np.zeros((1, _HEAD_LEN), np.float32)
for _i in range(7):
    for _j in range(7):
        _HEAD_MASK[0, _i * 56 + _j * 2] = 1.0


# ----------------------------- in-kernel helpers ---------------------------

def _conv3x3_relu_bn(x, w_ref, scale_ref, bias_ref, row_stride, col_stride):
    """Valid 3x3 conv + ReLU + folded eval-BatchNorm on a (Cin, L) activation.

    `x` is channels-on-sublanes / flattened-spatial-on-lanes with the given
    row/column strides.  `w_ref` holds (9, Cout, Cin) with k = ki*3 + kj.
    Output length shrinks by 2*row_stride + 2*col_stride (valid conv).
    """
    _, cout, cin = w_ref.shape
    l_out = x.shape[1] - 2 * row_stride - 2 * col_stride
    acc = jnp.zeros((cout, l_out), jnp.float32)
    for ki in range(3):
        for kj in range(3):
            shift = ki * row_stride + kj * col_stride
            xs = x[:, shift:shift + l_out]            # static lane slice
            wk = w_ref[ki * 3 + kj]                   # (Cout, Cin)
            if cin == 1:
                acc = acc + wk * xs                   # broadcast; avoids K=1 matmul
            else:
                acc = acc + jnp.dot(wk, xs, preferred_element_type=jnp.float32)
    # ReLU then BatchNorm (eval, folded), matching Conv -> ReLU -> BN in Net5.
    return jnp.maximum(acc, 0.0) * scale_ref[...] + bias_ref[...]


def _conv1x1_relu_bn(x, w_ref, scale_ref, bias_ref):
    """1x1 conv + ReLU + folded eval-BatchNorm: a per-position channel matmul."""
    y = jnp.dot(w_ref[...], x, preferred_element_type=jnp.float32)
    return jnp.maximum(y, 0.0) * scale_ref[...] + bias_ref[...]


# ----------------------------- the fused kernel ----------------------------

def _net5_kernel(x_ref,
                 w1, g1, b1, w2, g2, b2, w3, g3, b3,
                 w4, g4, b4, w5, g5, b5, w6, g6, b6, w7, g7, b7,
                 mask_ref, out_ref):
    # Dropout(0.05) layers are identity in eval mode (no-ops here).
    # ----- stage A: 28-wide grid (row stride 28, col stride 1) --------------
    x = x_ref[0]                                        # (1, 784)   28x28
    y = _conv3x3_relu_bn(x, w1, g1, b1, 28, 1)          # (10, 726)  26x26 valid
    y = _conv3x3_relu_bn(y, w2, g2, b2, 28, 1)          # (10, 668)  24x24 valid
    y = _conv3x3_relu_bn(y, w3, g3, b3, 28, 1)          # (10, 610)  22x22 valid
    # ----- fused MaxPool2d(2, 2): shift-and-max, no gather ------------------
    # pooled value for output pixel (pi, pj) lands at column pi*56 + pj*2
    h = jnp.maximum(y[:, :-1], y[:, 1:])                # max over the 2 columns
    y = jnp.maximum(h[:, :-28], h[:, 28:])              # (10, 581)  11x11 valid
    # ----- stage B: pooled grid (row stride 56, col stride 2) ---------------
    y = _conv1x1_relu_bn(y, w4, g4, b4)                 # (16, 581)  11x11 valid
    y = _conv3x3_relu_bn(y, w5, g5, b5, 56, 2)          # (16, 465)   9x9 valid
    y = _conv3x3_relu_bn(y, w6, g6, b6, 56, 2)          # (10, 349)   7x7 valid
    y = _conv1x1_relu_bn(y, w7, g7, b7)                 # (10, 349)   7x7 valid
    # ----- fused AvgPool2d(7) + view(-1, 10) + log_softmax ------------------
    valid = mask_ref[...] > 0.5                         # (1, 349), 49 ones
    total = jnp.sum(jnp.where(valid, y, 0.0), axis=1, keepdims=True)   # (10, 1)
    avg = total * (1.0 / 49.0)
    z = avg - jnp.max(avg, axis=0, keepdims=True)
    logp = z - jnp.log(jnp.sum(jnp.exp(z), axis=0, keepdims=True))
    out_ref[0] = logp                                   # (10, 1)


# ----------------------------- host-side wrapper ---------------------------

def _full_block_spec(arr):
    rank = arr.ndim
    return pl.BlockSpec(arr.shape, lambda n: (0,) * rank)


@jax.jit
def net5_forward(x_nchw, params):
    """Net5 forward: x_nchw (N, 1, 28, 28) float32 -> (N, 10) log-probabilities."""
    assert x_nchw.shape[1:] == (1, 28, 28), x_nchw.shape
    n_batch = x_nchw.shape[0]
    x_flat = x_nchw.reshape(n_batch, 1, 28 * 28).astype(jnp.float32)

    operands = [x_flat]
    in_specs = [pl.BlockSpec((1, 1, 28 * 28), lambda n: (n, 0, 0))]

    for name in ("b1", "b2", "b3", "b4", "b5", "b6", "b7"):
        w, gamma, beta, rmean, rvar = params[name]
        cout, cin, kh, kw = w.shape
        if (kh, kw) == (3, 3):
            # (Cout, Cin, 3, 3) -> (9, Cout, Cin) with k = ki*3 + kj
            w_mat = jnp.transpose(w, (2, 3, 0, 1)).reshape(9, cout, cin)
        else:                                            # 1x1 conv
            w_mat = w.reshape(cout, cin)
        inv_std = gamma / jnp.sqrt(rvar + BN_EPS)        # eval-mode BN folding
        scale = inv_std.reshape(cout, 1)
        bias = (beta - rmean * inv_std).reshape(cout, 1)
        for arr in (w_mat, scale, bias):
            operands.append(arr)
            in_specs.append(_full_block_spec(arr))

    head_mask = jnp.asarray(_HEAD_MASK)
    operands.append(head_mask)
    in_specs.append(_full_block_spec(head_mask))

    out = pl.pallas_call(
        _net5_kernel,
        out_shape=jax.ShapeDtypeStruct((n_batch, 10, 1), jnp.float32),
        grid=(n_batch,),
        in_specs=in_specs,
        out_specs=pl.BlockSpec((1, 10, 1), lambda n: (n, 0, 0)),
        compiler_params=pltpu.CompilerParams(
            dimension_semantics=("parallel",),           # megacore-shard batch
            vmem_limit_bytes=32 * 1024 * 1024),
    )(*operands)
    return out[:, :, 0]


# ----------------------------- XLA reference (for validation) --------------

@jax.jit
def _reference_forward(x_nchw, params):
    def block(h, w, gamma, beta, rmean, rvar):
        h = jax.lax.conv_general_dilated(
            h, w, window_strides=(1, 1), padding="VALID",
            dimension_numbers=("NCHW", "OIHW", "NCHW"),
            precision=jax.lax.Precision.HIGHEST)
        h = jnp.maximum(h, 0.0)
        inv_std = gamma / jnp.sqrt(rvar + BN_EPS)
        return (h * inv_std[None, :, None, None]
                + (beta - rmean * inv_std)[None, :, None, None])

    h = x_nchw
    for name in ("b1", "b2", "b3"):
        h = block(h, *params[name])
    h = jax.lax.reduce_window(h, -jnp.inf, jax.lax.max,
                              (1, 1, 2, 2), (1, 1, 2, 2), "VALID")
    for name in ("b4", "b5", "b6", "b7"):
        h = block(h, *params[name])
    h = jnp.mean(h, axis=(2, 3))
    return jax.nn.log_softmax(h, axis=-1)


# ----------------------------- parameter init ------------------------------

def init_params(key):
    cfgs = {
        "b1": (10, 1, 3, 3),
        "b2": (10, 10, 3, 3),
        "b3": (10, 10, 3, 3),
        "b4": (16, 10, 1, 1),
        "b5": (16, 16, 3, 3),
        "b6": (10, 16, 3, 3),
        "b7": (10, 10, 1, 1),
    }
    params = {}
    for name, (cout, cin, kh, kw) in cfgs.items():
        key, kw_, kg, kb, km, kv = jax.random.split(key, 6)
        w = 0.1 * jax.random.normal(kw_, (cout, cin, kh, kw), jnp.float32)
        gamma = jax.random.uniform(kg, (cout,), jnp.float32, 0.8, 1.2)
        beta = 0.1 * jax.random.normal(kb, (cout,), jnp.float32)
        rmean = 0.1 * jax.random.normal(km, (cout,), jnp.float32)
        rvar = jax.random.uniform(kv, (cout,), jnp.float32, 0.5, 1.5)
        params[name] = (w, gamma, beta, rmean, rvar)
    return params


if __name__ == "__main__":
    key = jax.random.PRNGKey(0)
    kx, kp = jax.random.split(key)
    # 28x28 single-channel input is what the architecture implies:
    # three valid 3x3 convs -> 22, MaxPool2d(2,2) -> 11, two more valid 3x3
    # convs -> 7, AvgPool2d(7) -> 1x1, view(-1, 10).
    x = jax.random.normal(kx, (2, 1, 28, 28), jnp.float32)
    params = init_params(kp)

    out = jax.block_until_ready(net5_forward(x, params))
    ref = jax.block_until_ready(_reference_forward(x, params))

    assert out.shape == (2, 10), out.shape
    # log_softmax rows must exp-sum to 1
    assert bool(jnp.allclose(jnp.sum(jnp.exp(out), axis=-1), 1.0, atol=1e-4))
    # match the XLA reference (tolerance covers TPU default matmul precision)
    assert bool(jnp.allclose(out, ref, atol=2e-2)), (out, ref)
    print("KERNEL_OK")
</pallas_src>

<mosaic_0001>
module attributes {stable_mosaic.version = 11 : i64} {
  func.func @_net5_kernel(%arg0: i32, %arg1: memref<1x1x784xf32, #tpu.memory_space<vmem>>, %arg2: memref<9x10x1xf32, #tpu.memory_space<vmem>>, %arg3: memref<10x1xf32, #tpu.memory_space<vmem>>, %arg4: memref<10x1xf32, #tpu.memory_space<vmem>>, %arg5: memref<9x10x10xf32, #tpu.memory_space<vmem>>, %arg6: memref<10x1xf32, #tpu.memory_space<vmem>>, %arg7: memref<10x1xf32, #tpu.memory_space<vmem>>, %arg8: memref<9x10x10xf32, #tpu.memory_space<vmem>>, %arg9: memref<10x1xf32, #tpu.memory_space<vmem>>, %arg10: memref<10x1xf32, #tpu.memory_space<vmem>>, %arg11: memref<16x10xf32, #tpu.memory_space<vmem>>, %arg12: memref<16x1xf32, #tpu.memory_space<vmem>>, %arg13: memref<16x1xf32, #tpu.memory_space<vmem>>, %arg14: memref<9x16x16xf32, #tpu.memory_space<vmem>>, %arg15: memref<16x1xf32, #tpu.memory_space<vmem>>, %arg16: memref<16x1xf32, #tpu.memory_space<vmem>>, %arg17: memref<9x10x16xf32, #tpu.memory_space<vmem>>, %arg18: memref<10x1xf32, #tpu.memory_space<vmem>>, %arg19: memref<10x1xf32, #tpu.memory_space<vmem>>, %arg20: memref<10x10xf32, #tpu.memory_space<vmem>>, %arg21: memref<10x1xf32, #tpu.memory_space<vmem>>, %arg22: memref<10x1xf32, #tpu.memory_space<vmem>>, %arg23: memref<1x349xf32, #tpu.memory_space<vmem>>, %arg24: memref<1x10x1xf32, #tpu.memory_space<vmem>>) attributes {dimension_semantics = [#tpu.dimension_semantics<parallel>], iteration_bounds = array<i64: 2>, scalar_prefetch = 0 : i64, scratch_operands = 0 : i64, tpu.core_type = #tpu.core_type<tc>, window_params = [{transform_indices = @transform_0, window_bounds = array<i64: 1, 1, 784>}, {pipeline_mode = #tpu.pipeline_mode<synchronous>, transform_indices = @transform_1, window_bounds = array<i64: 9, 10, 1>}, {pipeline_mode = #tpu.pipeline_mode<synchronous>, transform_indices = @transform_2, window_bounds = array<i64: 10, 1>}, {pipeline_mode = #tpu.pipeline_mode<synchronous>, transform_indices = @transform_3, window_bounds = array<i64: 10, 1>}, {pipeline_mode = #tpu.pipeline_mode<synchronous>, transform_indices = @transform_4, window_bounds = array<i64: 9, 10, 10>}, {pipeline_mode = #tpu.pipeline_mode<synchronous>, transform_indices = @transform_5, window_bounds = array<i64: 10, 1>}, {pipeline_mode = #tpu.pipeline_mode<synchronous>, transform_indices = @transform_6, window_bounds = array<i64: 10, 1>}, {pipeline_mode = #tpu.pipeline_mode<synchronous>, transform_indices = @transform_7, window_bounds = array<i64: 9, 10, 10>}, {pipeline_mode = #tpu.pipeline_mode<synchronous>, transform_indices = @transform_8, window_bounds = array<i64: 10, 1>}, {pipeline_mode = #tpu.pipeline_mode<synchronous>, transform_indices = @transform_9, window_bounds = array<i64: 10, 1>}, {pipeline_mode = #tpu.pipeline_mode<synchronous>, transform_indices = @transform_10, window_bounds = array<i64: 16, 10>}, {pipeline_mode = #tpu.pipeline_mode<synchronous>, transform_indices = @transform_11, window_bounds = array<i64: 16, 1>}, {pipeline_mode = #tpu.pipeline_mode<synchronous>, transform_indices = @transform_12, window_bounds = array<i64: 16, 1>}, {pipeline_mode = #tpu.pipeline_mode<synchronous>, transform_indices = @transform_13, window_bounds = array<i64: 9, 16, 16>}, {pipeline_mode = #tpu.pipeline_mode<synchronous>, transform_indices = @transform_14, window_bounds = array<i64: 16, 1>}, {pipeline_mode = #tpu.pipeline_mode<synchronous>, transform_indices = @transform_15, window_bounds = array<i64: 16, 1>}, {pipeline_mode = #tpu.pipeline_mode<synchronous>, transform_indices = @transform_16, window_bounds = array<i64: 9, 10, 16>}, {pipeline_mode = #tpu.pipeline_mode<synchronous>, transform_indices = @transform_17, window_bounds = array<i64: 10, 1>}, {pipeline_mode = #tpu.pipeline_mode<synchronous>, transform_indices = @transform_18, window_bounds = array<i64: 10, 1>}, {pipeline_mode = #tpu.pipeline_mode<synchronous>, transform_indices = @transform_19, window_bounds = array<i64: 10, 10>}, {pipeline_mode = #tpu.pipeline_mode<synchronous>, transform_indices = @transform_20, window_bounds = array<i64: 10, 1>}, {pipeline_mode = #tpu.pipeline_mode<synchronous>, transform_indices = @transform_21, window_bounds = array<i64: 10, 1>}, {pipeline_mode = #tpu.pipeline_mode<synchronous>, transform_indices = @transform_22, window_bounds = array<i64: 1, 349>}, {transform_indices = @transform_23, window_bounds = array<i64: 1, 10, 1>}]} {
    %c0 = arith.constant 0 : index
    %c0_0 = arith.constant 0 : index
    %c0_1 = arith.constant 0 : index
    %0 = vector.load %arg1[%c0, %c0_0, %c0_1] : memref<1x1x784xf32, #tpu.memory_space<vmem>>, vector<1x1x784xf32>
    %1 = vector.shape_cast %0 : vector<1x1x784xf32> to vector<1x784xf32>
    %cst = arith.constant 0.000000e+00 : f32
    %2 = vector.broadcast %cst : f32 to vector<10x726xf32>
    %3 = vector.extract_strided_slice %1 {offsets = [0, 0], sizes = [1, 726], strides = [1, 1]} : vector<1x784xf32> to vector<1x726xf32>
    %c0_2 = arith.constant 0 : index
    %c0_3 = arith.constant 0 : index
    %c0_4 = arith.constant 0 : index
    %4 = vector.load %arg2[%c0_2, %c0_3, %c0_4] : memref<9x10x1xf32, #tpu.memory_space<vmem>>, vector<1x10x1xf32>
    %5 = vector.shape_cast %4 : vector<1x10x1xf32> to vector<10x1xf32>
    %6 = vector.broadcast %5 : vector<10x1xf32> to vector<10x726xf32>
    %7 = vector.broadcast %3 : vector<1x726xf32> to vector<10x726xf32>
    %8 = arith.mulf %6, %7 : vector<10x726xf32>
    %9 = arith.addf %2, %8 : vector<10x726xf32>
    %10 = vector.extract_strided_slice %1 {offsets = [0, 1], sizes = [1, 726], strides = [1, 1]} : vector<1x784xf32> to vector<1x726xf32>
    %c1 = arith.constant 1 : index
    %c0_5 = arith.constant 0 : index
    %c0_6 = arith.constant 0 : index
    %11 = vector.load %arg2[%c1, %c0_5, %c0_6] : memref<9x10x1xf32, #tpu.memory_space<vmem>>, vector<1x10x1xf32>
    %12 = vector.shape_cast %11 : vector<1x10x1xf32> to vector<10x1xf32>
    %13 = vector.broadcast %12 : vector<10x1xf32> to vector<10x726xf32>
    %14 = vector.broadcast %10 : vector<1x726xf32> to vector<10x726xf32>
    %15 = arith.mulf %13, %14 : vector<10x726xf32>
    %16 = arith.addf %9, %15 : vector<10x726xf32>
    %17 = vector.extract_strided_slice %1 {offsets = [0, 2], sizes = [1, 726], strides = [1, 1]} : vector<1x784xf32> to vector<1x726xf32>
    %c2 = arith.constant 2 : index
    %c0_7 = arith.constant 0 : index
    %c0_8 = arith.constant 0 : index
    %18 = vector.load %arg2[%c2, %c0_7, %c0_8] : memref<9x10x1xf32, #tpu.memory_space<vmem>>, vector<1x10x1xf32>
    %19 = vector.shape_cast %18 : vector<1x10x1xf32> to vector<10x1xf32>
    %20 = vector.broadcast %19 : vector<10x1xf32> to vector<10x726xf32>
    %21 = vector.broadcast %17 : vector<1x726xf32> to vector<10x726xf32>
    %22 = arith.mulf %20, %21 : vector<10x726xf32>
    %23 = arith.addf %16, %22 : vector<10x726xf32>
    %24 = vector.extract_strided_slice %1 {offsets = [0, 28], sizes = [1, 726], strides = [1, 1]} : vector<1x784xf32> to vector<1x726xf32>
    %c3 = arith.constant 3 : index
    %c0_9 = arith.constant 0 : index
    %c0_10 = arith.constant 0 : index
    %25 = vector.load %arg2[%c3, %c0_9, %c0_10] : memref<9x10x1xf32, #tpu.memory_space<vmem>>, vector<1x10x1xf32>
    %26 = vector.shape_cast %25 : vector<1x10x1xf32> to vector<10x1xf32>
    %27 = vector.broadcast %26 : vector<10x1xf32> to vector<10x726xf32>
    %28 = vector.broadcast %24 : vector<1x726xf32> to vector<10x726xf32>
    %29 = arith.mulf %27, %28 : vector<10x726xf32>
    %30 = arith.addf %23, %29 : vector<10x726xf32>
    %31 = vector.extract_strided_slice %1 {offsets = [0, 29], sizes = [1, 726], strides = [1, 1]} : vector<1x784xf32> to vector<1x726xf32>
    %c4 = arith.constant 4 : index
    %c0_11 = arith.constant 0 : index
    %c0_12 = arith.constant 0 : index
    %32 = vector.load %arg2[%c4, %c0_11, %c0_12] : memref<9x10x1xf32, #tpu.memory_space<vmem>>, vector<1x10x1xf32>
    %33 = vector.shape_cast %32 : vector<1x10x1xf32> to vector<10x1xf32>
    %34 = vector.broadcast %33 : vector<10x1xf32> to vector<10x726xf32>
    %35 = vector.broadcast %31 : vector<1x726xf32> to vector<10x726xf32>
    %36 = arith.mulf %34, %35 : vector<10x726xf32>
    %37 = arith.addf %30, %36 : vector<10x726xf32>
    %38 = vector.extract_strided_slice %1 {offsets = [0, 30], sizes = [1, 726], strides = [1, 1]} : vector<1x784xf32> to vector<1x726xf32>
    %c5 = arith.constant 5 : index
    %c0_13 = arith.constant 0 : index
    %c0_14 = arith.constant 0 : index
    %39 = vector.load %arg2[%c5, %c0_13, %c0_14] : memref<9x10x1xf32, #tpu.memory_space<vmem>>, vector<1x10x1xf32>
    %40 = vector.shape_cast %39 : vector<1x10x1xf32> to vector<10x1xf32>
    %41 = vector.broadcast %40 : vector<10x1xf32> to vector<10x726xf32>
    %42 = vector.broadcast %38 : vector<1x726xf32> to vector<10x726xf32>
    %43 = arith.mulf %41, %42 : vector<10x726xf32>
    %44 = arith.addf %37, %43 : vector<10x726xf32>
    %45 = vector.extract_strided_slice %1 {offsets = [0, 56], sizes = [1, 726], strides = [1, 1]} : vector<1x784xf32> to vector<1x726xf32>
    %c6 = arith.constant 6 : index
    %c0_15 = arith.constant 0 : index
    %c0_16 = arith.constant 0 : index
    %46 = vector.load %arg2[%c6, %c0_15, %c0_16] : memref<9x10x1xf32, #tpu.memory_space<vmem>>, vector<1x10x1xf32>
    %47 = vector.shape_cast %46 : vector<1x10x1xf32> to vector<10x1xf32>
    %48 = vector.broadcast %47 : vector<10x1xf32> to vector<10x726xf32>
    %49 = vector.broadcast %45 : vector<1x726xf32> to vector<10x726xf32>
    %50 = arith.mulf %48, %49 : vector<10x726xf32>
    %51 = arith.addf %44, %50 : vector<10x726xf32>
    %52 = vector.extract_strided_slice %1 {offsets = [0, 57], sizes = [1, 726], strides = [1, 1]} : vector<1x784xf32> to vector<1x726xf32>
    %c7 = arith.constant 7 : index
    %c0_17 = arith.constant 0 : index
    %c0_18 = arith.constant 0 : index
    %53 = vector.load %arg2[%c7, %c0_17, %c0_18] : memref<9x10x1xf32, #tpu.memory_space<vmem>>, vector<1x10x1xf32>
    %54 = vector.shape_cast %53 : vector<1x10x1xf32> to vector<10x1xf32>
    %55 = vector.broadcast %54 : vector<10x1xf32> to vector<10x726xf32>
    %56 = vector.broadcast %52 : vector<1x726xf32> to vector<10x726xf32>
    %57 = arith.mulf %55, %56 : vector<10x726xf32>
    %58 = arith.addf %51, %57 : vector<10x726xf32>
    %59 = vector.extract_strided_slice %1 {offsets = [0, 58], sizes = [1, 726], strides = [1, 1]} : vector<1x784xf32> to vector<1x726xf32>
    %c8 = arith.constant 8 : index
    %c0_19 = arith.constant 0 : index
    %c0_20 = arith.constant 0 : index
    %60 = vector.load %arg2[%c8, %c0_19, %c0_20] : memref<9x10x1xf32, #tpu.memory_space<vmem>>, vector<1x10x1xf32>
    %61 = vector.shape_cast %60 : vector<1x10x1xf32> to vector<10x1xf32>
    %62 = vector.broadcast %61 : vector<10x1xf32> to vector<10x726xf32>
    %63 = vector.broadcast %59 : vector<1x726xf32> to vector<10x726xf32>
    %64 = arith.mulf %62, %63 : vector<10x726xf32>
    %65 = arith.addf %58, %64 : vector<10x726xf32>
    %cst_21 = arith.constant 0.000000e+00 : f32
    %66 = vector.broadcast %cst_21 : f32 to vector<10x726xf32>
    %67 = arith.maximumf %65, %66 : vector<10x726xf32>
    %c0_22 = arith.constant 0 : index
    %c0_23 = arith.constant 0 : index
    %68 = vector.load %arg3[%c0_22, %c0_23] : memref<10x1xf32, #tpu.memory_space<vmem>>, vector<10x1xf32>
    %69 = vector.broadcast %68 : vector<10x1xf32> to vector<10x726xf32>
    %70 = arith.mulf %67, %69 : vector<10x726xf32>
    %c0_24 = arith.constant 0 : index
    %c0_25 = arith.constant 0 : index
    %71 = vector.load %arg4[%c0_24, %c0_25] : memref<10x1xf32, #tpu.memory_space<vmem>>, vector<10x1xf32>
    %72 = vector.broadcast %71 : vector<10x1xf32> to vector<10x726xf32>
    %73 = arith.addf %70, %72 : vector<10x726xf32>
    %cst_26 = arith.constant 0.000000e+00 : f32
    %74 = vector.broadcast %cst_26 : f32 to vector<10x668xf32>
    %75 = vector.extract_strided_slice %73 {offsets = [0, 0], sizes = [10, 668], strides = [1, 1]} : vector<10x726xf32> to vector<10x668xf32>
    %c0_27 = arith.constant 0 : index
    %c0_28 = arith.constant 0 : index
    %c0_29 = arith.constant 0 : index
    %76 = vector.load %arg5[%c0_27, %c0_28, %c0_29] : memref<9x10x10xf32, #tpu.memory_space<vmem>>, vector<1x10x10xf32>
    %77 = vector.shape_cast %76 : vector<1x10x10xf32> to vector<10x10xf32>
    %cst_30 = arith.constant dense<0.000000e+00> : vector<10x668xf32>
    %78 = tpu.matmul %77, %75, %cst_30 {dimension_numbers = #tpu.dot_dimension_numbers<[1], [0], [0], [1], [0, 0, 1, 1], [], []>} : vector<10x10xf32>, vector<10x668xf32>, vector<10x668xf32> -> vector<10x668xf32>
    %79 = arith.addf %74, %78 : vector<10x668xf32>
    %80 = vector.extract_strided_slice %73 {offsets = [0, 1], sizes = [10, 668], strides = [1, 1]} : vector<10x726xf32> to vector<10x668xf32>
    %c1_31 = arith.constant 1 : index
    %c0_32 = arith.constant 0 : index
    %c0_33 = arith.constant 0 : index
    %81 = vector.load %arg5[%c1_31, %c0_32, %c0_33] : memref<9x10x10xf32, #tpu.memory_space<vmem>>, vector<1x10x10xf32>
    %82 = vector.shape_cast %81 : vector<1x10x10xf32> to vector<10x10xf32>
    %cst_34 = arith.constant dense<0.000000e+00> : vector<10x668xf32>
    %83 = tpu.matmul %82, %80, %cst_34 {dimension_numbers = #tpu.dot_dimension_numbers<[1], [0], [0], [1], [0, 0, 1, 1], [], []>} : vector<10x10xf32>, vector<10x668xf32>, vector<10x668xf32> -> vector<10x668xf32>
    %84 = arith.addf %79, %83 : vector<10x668xf32>
    %85 = vector.extract_strided_slice %73 {offsets = [0, 2], sizes = [10, 668], strides = [1, 1]} : vector<10x726xf32> to vector<10x668xf32>
    %c2_35 = arith.constant 2 : index
    %c0_36 = arith.constant 0 : index
    %c0_37 = arith.constant 0 : index
    %86 = vector.load %arg5[%c2_35, %c0_36, %c0_37] : memref<9x10x10xf32, #tpu.memory_space<vmem>>, vector<1x10x10xf32>
    %87 = vector.shape_cast %86 : vector<1x10x10xf32> to vector<10x10xf32>
    %cst_38 = arith.constant dense<0.000000e+00> : vector<10x668xf32>
    %88 = tpu.matmul %87, %85, %cst_38 {dimension_numbers = #tpu.dot_dimension_numbers<[1], [0], [0], [1], [0, 0, 1, 1], [], []>} : vector<10x10xf32>, vector<10x668xf32>, vector<10x668xf32> -> vector<10x668xf32>
    %89 = arith.addf %84, %88 : vector<10x668xf32>
    %90 = vector.extract_strided_slice %73 {offsets = [0, 28], sizes = [10, 668], strides = [1, 1]} : vector<10x726xf32> to vector<10x668xf32>
    %c3_39 = arith.constant 3 : index
    %c0_40 = arith.constant 0 : index
    %c0_41 = arith.constant 0 : index
    %91 = vector.load %arg5[%c3_39, %c0_40, %c0_41] : memref<9x10x10xf32, #tpu.memory_space<vmem>>, vector<1x10x10xf32>
    %92 = vector.shape_cast %91 : vector<1x10x10xf32> to vector<10x10xf32>
    %cst_42 = arith.constant dense<0.000000e+00> : vector<10x668xf32>
    %93 = tpu.matmul %92, %90, %cst_42 {dimension_numbers = #tpu.dot_dimension_numbers<[1], [0], [0], [1], [0, 0, 1, 1], [], []>} : vector<10x10xf32>, vector<10x668xf32>, vector<10x668xf32> -> vector<10x668xf32>
    %94 = arith.addf %89, %93 : vector<10x668xf32>
    %95 = vector.extract_strided_slice %73 {offsets = [0, 29], sizes = [10, 668], strides = [1, 1]} : vector<10x726xf32> to vector<10x668xf32>
    %c4_43 = arith.constant 4 : index
    %c0_44 = arith.constant 0 : index
    %c0_45 = arith.constant 0 : index
    %96 = vector.load %arg5[%c4_43, %c0_44, %c0_45] : memref<9x10x10xf32, #tpu.memory_space<vmem>>, vector<1x10x10xf32>
    %97 = vector.shape_cast %96 : vector<1x10x10xf32> to vector<10x10xf32>
    %cst_46 = arith.constant dense<0.000000e+00> : vector<10x668xf32>
    %98 = tpu.matmul %97, %95, %cst_46 {dimension_numbers = #tpu.dot_dimension_numbers<[1], [0], [0], [1], [0, 0, 1, 1], [], []>} : vector<10x10xf32>, vector<10x668xf32>, vector<10x668xf32> -> vector<10x668xf32>
    %99 = arith.addf %94, %98 : vector<10x668xf32>
    %100 = vector.extract_strided_slice %73 {offsets = [0, 30], sizes = [10, 668], strides = [1, 1]} : vector<10x726xf32> to vector<10x668xf32>
    %c5_47 = arith.constant 5 : index
    %c0_48 = arith.constant 0 : index
    %c0_49 = arith.constant 0 : index
    %101 = vector.load %arg5[%c5_47, %c0_48, %c0_49] : memref<9x10x10xf32, #tpu.memory_space<vmem>>, vector<1x10x10xf32>
    %102 = vector.shape_cast %101 : vector<1x10x10xf32> to vector<10x10xf32>
    %cst_50 = arith.constant dense<0.000000e+00> : vector<10x668xf32>
    %103 = tpu.matmul %102, %100, %cst_50 {dimension_numbers = #tpu.dot_dimension_numbers<[1], [0], [0], [1], [0, 0, 1, 1], [], []>} : vector<10x10xf32>, vector<10x668xf32>, vector<10x668xf32> -> vector<10x668xf32>
    %104 = arith.addf %99, %103 : vector<10x668xf32>
    %105 = vector.extract_strided_slice %73 {offsets = [0, 56], sizes = [10, 668], strides = [1, 1]} : vector<10x726xf32> to vector<10x668xf32>
    %c6_51 = arith.constant 6 : index
    %c0_52 = arith.constant 0 : index
    %c0_53 = arith.constant 0 : index
    %106 = vector.load %arg5[%c6_51, %c0_52, %c0_53] : memref<9x10x10xf32, #tpu.memory_space<vmem>>, vector<1x10x10xf32>
    %107 = vector.shape_cast %106 : vector<1x10x10xf32> to vector<10x10xf32>
    %cst_54 = arith.constant dense<0.000000e+00> : vector<10x668xf32>
    %108 = tpu.matmul %107, %105, %cst_54 {dimension_numbers = #tpu.dot_dimension_numbers<[1], [0], [0], [1], [0, 0, 1, 1], [], []>} : vector<10x10xf32>, vector<10x668xf32>, vector<10x668xf32> -> vector<10x668xf32>
    %109 = arith.addf %104, %108 : vector<10x668xf32>
    %110 = vector.extract_strided_slice %73 {offsets = [0, 57], sizes = [10, 668], strides = [1, 1]} : vector<10x726xf32> to vector<10x668xf32>
    %c7_55 = arith.constant 7 : index
    %c0_56 = arith.constant 0 : index
    %c0_57 = arith.constant 0 : index
    %111 = vector.load %arg5[%c7_55, %c0_56, %c0_57] : memref<9x10x10xf32, #tpu.memory_space<vmem>>, vector<1x10x10xf32>
    %112 = vector.shape_cast %111 : vector<1x10x10xf32> to vector<10x10xf32>
    %cst_58 = arith.constant dense<0.000000e+00> : vector<10x668xf32>
    %113 = tpu.matmul %112, %110, %cst_58 {dimension_numbers = #tpu.dot_dimension_numbers<[1], [0], [0], [1], [0, 0, 1, 1], [], []>} : vector<10x10xf32>, vector<10x668xf32>, vector<10x668xf32> -> vector<10x668xf32>
    %114 = arith.addf %109, %113 : vector<10x668xf32>
    %115 = vector.extract_strided_slice %73 {offsets = [0, 58], sizes = [10, 668], strides = [1, 1]} : vector<10x726xf32> to vector<10x668xf32>
    %c8_59 = arith.constant 8 : index
    %c0_60 = arith.constant 0 : index
    %c0_61 = arith.constant 0 : index
    %116 = vector.load %arg5[%c8_59, %c0_60, %c0_61] : memref<9x10x10xf32, #tpu.memory_space<vmem>>, vector<1x10x10xf32>
    %117 = vector.shape_cast %116 : vector<1x10x10xf32> to vector<10x10xf32>
    %cst_62 = arith.constant dense<0.000000e+00> : vector<10x668xf32>
    %118 = tpu.matmul %117, %115, %cst_62 {dimension_numbers = #tpu.dot_dimension_numbers<[1], [0], [0], [1], [0, 0, 1, 1], [], []>} : vector<10x10xf32>, vector<10x668xf32>, vector<10x668xf32> -> vector<10x668xf32>
    %119 = arith.addf %114, %118 : vector<10x668xf32>
    %cst_63 = arith.constant 0.000000e+00 : f32
    %120 = vector.broadcast %cst_63 : f32 to vector<10x668xf32>
    %121 = arith.maximumf %119, %120 : vector<10x668xf32>
    %c0_64 = arith.constant 0 : index
    %c0_65 = arith.constant 0 : index
    %122 = vector.load %arg6[%c0_64, %c0_65] : memref<10x1xf32, #tpu.memory_space<vmem>>, vector<10x1xf32>
    %123 = vector.broadcast %122 : vector<10x1xf32> to vector<10x668xf32>
    %124 = arith.mulf %121, %123 : vector<10x668xf32>
    %c0_66 = arith.constant 0 : index
    %c0_67 = arith.constant 0 : index
    %125 = vector.load %arg7[%c0_66, %c0_67] : memref<10x1xf32, #tpu.memory_space<vmem>>, vector<10x1xf32>
    %126 = vector.broadcast %125 : vector<10x1xf32> to vector<10x668xf32>
    %127 = arith.addf %124, %126 : vector<10x668xf32>
    %cst_68 = arith.constant 0.000000e+00 : f32
    %128 = vector.broadcast %cst_68 : f32 to vector<10x610xf32>
    %129 = vector.extract_strided_slice %127 {offsets = [0, 0], sizes = [10, 610], strides = [1, 1]} : vector<10x668xf32> to vector<10x610xf32>
    %c0_69 = arith.constant 0 : index
    %c0_70 = arith.constant 0 : index
    %c0_71 = arith.constant 0 : index
    %130 = vector.load %arg8[%c0_69, %c0_70, %c0_71] : memref<9x10x10xf32, #tpu.memory_space<vmem>>, vector<1x10x10xf32>
    %131 = vector.shape_cast %130 : vector<1x10x10xf32> to vector<10x10xf32>
    %cst_72 = arith.constant dense<0.000000e+00> : vector<10x610xf32>
    %132 = tpu.matmul %131, %129, %cst_72 {dimension_numbers = #tpu.dot_dimension_numbers<[1], [0], [0], [1], [0, 0, 1, 1], [], []>} : vector<10x10xf32>, vector<10x610xf32>, vector<10x610xf32> -> vector<10x610xf32>
    %133 = arith.addf %128, %132 : vector<10x610xf32>
    %134 = vector.extract_strided_slice %127 {offsets = [0, 1], sizes = [10, 610], strides = [1, 1]} : vector<10x668xf32> to vector<10x610xf32>
    %c1_73 = arith.constant 1 : index
    %c0_74 = arith.constant 0 : index
    %c0_75 = arith.constant 0 : index
    %135 = vector.load %arg8[%c1_73, %c0_74, %c0_75] : memref<9x10x10xf32, #tpu.memory_space<vmem>>, vector<1x10x10xf32>
    %136 = vector.shape_cast %135 : vector<1x10x10xf32> to vector<10x10xf32>
    %cst_76 = arith.constant dense<0.000000e+00> : vector<10x610xf32>
    %137 = tpu.matmul %136, %134, %cst_76 {dimension_numbers = #tpu.dot_dimension_numbers<[1], [0], [0], [1], [0, 0, 1, 1], [], []>} : vector<10x10xf32>, vector<10x610xf32>, vector<10x610xf32> -> vector<10x610xf32>
    %138 = arith.addf %133, %137 : vector<10x610xf32>
    %139 = vector.extract_strided_slice %127 {offsets = [0, 2], sizes = [10, 610], strides = [1, 1]} : vector<10x668xf32> to vector<10x610xf32>
    %c2_77 = arith.constant 2 : index
    %c0_78 = arith.constant 0 : index
    %c0_79 = arith.constant 0 : index
    %140 = vector.load %arg8[%c2_77, %c0_78, %c0_79] : memref<9x10x10xf32, #tpu.memory_space<vmem>>, vector<1x10x10xf32>
    %141 = vector.shape_cast %140 : vector<1x10x10xf32> to vector<10x10xf32>
    %cst_80 = arith.constant dense<0.000000e+00> : vector<10x610xf32>
    %142 = tpu.matmul %141, %139, %cst_80 {dimension_numbers = #tpu.dot_dimension_numbers<[1], [0], [0], [1], [0, 0, 1, 1], [], []>} : vector<10x10xf32>, vector<10x610xf32>, vector<10x610xf32> -> vector<10x610xf32>
    %143 = arith.addf %138, %142 : vector<10x610xf32>
    %144 = vector.extract_strided_slice %127 {offsets = [0, 28], sizes = [10, 610], strides = [1, 1]} : vector<10x668xf32> to vector<10x610xf32>
    %c3_81 = arith.constant 3 : index
    %c0_82 = arith.constant 0 : index
    %c0_83 = arith.constant 0 : index
    %145 = vector.load %arg8[%c3_81, %c0_82, %c0_83] : memref<9x10x10xf32, #tpu.memory_space<vmem>>, vector<1x10x10xf32>
    %146 = vector.shape_cast %145 : vector<1x10x10xf32> to vector<10x10xf32>
    %cst_84 = arith.constant dense<0.000000e+00> : vector<10x610xf32>
    %147 = tpu.matmul %146, %144, %cst_84 {dimension_numbers = #tpu.dot_dimension_numbers<[1], [0], [0], [1], [0, 0, 1, 1], [], []>} : vector<10x10xf32>, vector<10x610xf32>, vector<10x610xf32> -> vector<10x610xf32>
    %148 = arith.addf %143, %147 : vector<10x610xf32>
    %149 = vector.extract_strided_slice %127 {offsets = [0, 29], sizes = [10, 610], strides = [1, 1]} : vector<10x668xf32> to vector<10x610xf32>
    %c4_85 = arith.constant 4 : index
    %c0_86 = arith.constant 0 : index
    %c0_87 = arith.constant 0 : index
    %150 = vector.load %arg8[%c4_85, %c0_86, %c0_87] : memref<9x10x10xf32, #tpu.memory_space<vmem>>, vector<1x10x10xf32>
    %151 = vector.shape_cast %150 : vector<1x10x10xf32> to vector<10x10xf32>
    %cst_88 = arith.constant dense<0.000000e+00> : vector<10x610xf32>
    %152 = tpu.matmul %151, %149, %cst_88 {dimension_numbers = #tpu.dot_dimension_numbers<[1], [0], [0], [1], [0, 0, 1, 1], [], []>} : vector<10x10xf32>, vector<10x610xf32>, vector<10x610xf32> -> vector<10x610xf32>
    %153 = arith.addf %148, %152 : vector<10x610xf32>
    %154 = vector.extract_strided_slice %127 {offsets = [0, 30], sizes = [10, 610], strides = [1, 1]} : vector<10x668xf32> to vector<10x610xf32>
    %c5_89 = arith.constant 5 : index
    %c0_90 = arith.constant 0 : index
    %c0_91 = arith.constant 0 : index
    %155 = vector.load %arg8[%c5_89, %c0_90, %c0_91] : memref<9x10x10xf32, #tpu.memory_space<vmem>>, vector<1x10x10xf32>
    %156 = vector.shape_cast %155 : vector<1x10x10xf32> to vector<10x10xf32>
    %cst_92 = arith.constant dense<0.000000e+00> : vector<10x610xf32>
    %157 = tpu.matmul %156, %154, %cst_92 {dimension_numbers = #tpu.dot_dimension_numbers<[1], [0], [0], [1], [0, 0, 1, 1], [], []>} : vector<10x10xf32>, vector<10x610xf32>, vector<10x610xf32> -> vector<10x610xf32>
    %158 = arith.addf %153, %157 : vector<10x610xf32>
    %159 = vector.extract_strided_slice %127 {offsets = [0, 56], sizes = [10, 610], strides = [1, 1]} : vector<10x668xf32> to vector<10x610xf32>
    %c6_93 = arith.constant 6 : index
    %c0_94 = arith.constant 0 : index
    %c0_95 = arith.constant 0 : index
    %160 = vector.load %arg8[%c6_93, %c0_94, %c0_95] : memref<9x10x10xf32, #tpu.memory_space<vmem>>, vector<1x10x10xf32>
    %161 = vector.shape_cast %160 : vector<1x10x10xf32> to vector<10x10xf32>
    %cst_96 = arith.constant dense<0.000000e+00> : vector<10x610xf32>
    %162 = tpu.matmul %161, %159, %cst_96 {dimension_numbers = #tpu.dot_dimension_numbers<[1], [0], [0], [1], [0, 0, 1, 1], [], []>} : vector<10x10xf32>, vector<10x610xf32>, vector<10x610xf32> -> vector<10x610xf32>
    %163 = arith.addf %158, %162 : vector<10x610xf32>
    %164 = vector.extract_strided_slice %127 {offsets = [0, 57], sizes = [10, 610], strides = [1, 1]} : vector<10x668xf32> to vector<10x610xf32>
    %c7_97 = arith.constant 7 : index
    %c0_98 = arith.constant 0 : index
    %c0_99 = arith.constant 0 : index
    %165 = vector.load %arg8[%c7_97, %c0_98, %c0_99] : memref<9x10x10xf32, #tpu.memory_space<vmem>>, vector<1x10x10xf32>
    %166 = vector.shape_cast %165 : vector<1x10x10xf32> to vector<10x10xf32>
    %cst_100 = arith.constant dense<0.000000e+00> : vector<10x610xf32>
    %167 = tpu.matmul %166, %164, %cst_100 {dimension_numbers = #tpu.dot_dimension_numbers<[1], [0], [0], [1], [0, 0, 1, 1], [], []>} : vector<10x10xf32>, vector<10x610xf32>, vector<10x610xf32> -> vector<10x610xf32>
    %168 = arith.addf %163, %167 : vector<10x610xf32>
    %169 = vector.extract_strided_slice %127 {offsets = [0, 58], sizes = [10, 610], strides = [1, 1]} : vector<10x668xf32> to vector<10x610xf32>
    %c8_101 = arith.constant 8 : index
    %c0_102 = arith.constant 0 : index
    %c0_103 = arith.constant 0 : index
    %170 = vector.load %arg8[%c8_101, %c0_102, %c0_103] : memref<9x10x10xf32, #tpu.memory_space<vmem>>, vector<1x10x10xf32>
    %171 = vector.shape_cast %170 : vector<1x10x10xf32> to vector<10x10xf32>
    %cst_104 = arith.constant dense<0.000000e+00> : vector<10x610xf32>
    %172 = tpu.matmul %171, %169, %cst_104 {dimension_numbers = #tpu.dot_dimension_numbers<[1], [0], [0], [1], [0, 0, 1, 1], [], []>} : vector<10x10xf32>, vector<10x610xf32>, vector<10x610xf32> -> vector<10x610xf32>
    %173 = arith.addf %168, %172 : vector<10x610xf32>
    %cst_105 = arith.constant 0.000000e+00 : f32
    %174 = vector.broadcast %cst_105 : f32 to vector<10x610xf32>
    %175 = arith.maximumf %173, %174 : vector<10x610xf32>
    %c0_106 = arith.constant 0 : index
    %c0_107 = arith.constant 0 : index
    %176 = vector.load %arg9[%c0_106, %c0_107] : memref<10x1xf32, #tpu.memory_space<vmem>>, vector<10x1xf32>
    %177 = vector.broadcast %176 : vector<10x1xf32> to vector<10x610xf32>
    %178 = arith.mulf %175, %177 : vector<10x610xf32>
    %c0_108 = arith.constant 0 : index
    %c0_109 = arith.constant 0 : index
    %179 = vector.load %arg10[%c0_108, %c0_109] : memref<10x1xf32, #tpu.memory_space<vmem>>, vector<10x1xf32>
    %180 = vector.broadcast %179 : vector<10x1xf32> to vector<10x610xf32>
    %181 = arith.addf %178, %180 : vector<10x610xf32>
    %182 = vector.extract_strided_slice %181 {offsets = [0, 0], sizes = [10, 609], strides = [1, 1]} : vector<10x610xf32> to vector<10x609xf32>
    %183 = vector.extract_strided_slice %181 {offsets = [0, 1], sizes = [10, 609], strides = [1, 1]} : vector<10x610xf32> to vector<10x609xf32>
    %184 = arith.maximumf %182, %183 : vector<10x609xf32>
    %185 = vector.extract_strided_slice %184 {offsets = [0, 0], sizes = [10, 581], strides = [1, 1]} : vector<10x609xf32> to vector<10x581xf32>
    %186 = vector.extract_strided_slice %184 {offsets = [0, 28], sizes = [10, 581], strides = [1, 1]} : vector<10x609xf32> to vector<10x581xf32>
    %187 = arith.maximumf %185, %186 : vector<10x581xf32>
    %c0_110 = arith.constant 0 : index
    %c0_111 = arith.constant 0 : index
    %188 = vector.load %arg11[%c0_110, %c0_111] : memref<16x10xf32, #tpu.memory_space<vmem>>, vector<16x10xf32>
    %cst_112 = arith.constant dense<0.000000e+00> : vector<16x581xf32>
    %189 = tpu.matmul %188, %187, %cst_112 {dimension_numbers = #tpu.dot_dimension_numbers<[1], [0], [0], [1], [0, 0, 1, 1], [], []>} : vector<16x10xf32>, vector<10x581xf32>, vector<16x581xf32> -> vector<16x581xf32>
    %cst_113 = arith.constant 0.000000e+00 : f32
    %190 = vector.broadcast %cst_113 : f32 to vector<16x581xf32>
    %191 = arith.maximumf %189, %190 : vector<16x581xf32>
    %c0_114 = arith.constant 0 : index
    %c0_115 = arith.constant 0 : index
    %192 = vector.load %arg12[%c0_114, %c0_115] : memref<16x1xf32, #tpu.memory_space<vmem>>, vector<16x1xf32>
    %193 = vector.broadcast %192 : vector<16x1xf32> to vector<16x581xf32>
    %194 = arith.mulf %191, %193 : vector<16x581xf32>
    %c0_116 = arith.constant 0 : index
    %c0_117 = arith.constant 0 : index
    %195 = vector.load %arg13[%c0_116, %c0_117] : memref<16x1xf32, #tpu.memory_space<vmem>>, vector<16x1xf32>
    %196 = vector.broadcast %195 : vector<16x1xf32> to vector<16x581xf32>
    %197 = arith.addf %194, %196 : vector<16x581xf32>
    %cst_118 = arith.constant 0.000000e+00 : f32
    %198 = vector.broadcast %cst_118 : f32 to vector<16x465xf32>
    %199 = vector.extract_strided_slice %197 {offsets = [0, 0], sizes = [16, 465], strides = [1, 1]} : vector<16x581xf32> to vector<16x465xf32>
    %c0_119 = arith.constant 0 : index
    %c0_120 = arith.constant 0 : index
    %c0_121 = arith.constant 0 : index
    %200 = vector.load %arg14[%c0_119, %c0_120, %c0_121] : memref<9x16x16xf32, #tpu.memory_space<vmem>>, vector<1x16x16xf32>
    %201 = vector.shape_cast %200 : vector<1x16x16xf32> to vector<16x16xf32>
    %cst_122 = arith.constant dense<0.000000e+00> : vector<16x465xf32>
    %202 = tpu.matmul %201, %199, %cst_122 {dimension_numbers = #tpu.dot_dimension_numbers<[1], [0], [0], [1], [0, 0, 1, 1], [], []>} : vector<16x16xf32>, vector<16x465xf32>, vector<16x465xf32> -> vector<16x465xf32>
    %203 = arith.addf %198, %202 : vector<16x465xf32>
    %204 = vector.extract_strided_slice %197 {offsets = [0, 2], sizes = [16, 465], strides = [1, 1]} : vector<16x581xf32> to vector<16x465xf32>
    %c1_123 = arith.constant 1 : index
    %c0_124 = arith.constant 0 : index
    %c0_125 = arith.constant 0 : index
    %205 = vector.load %arg14[%c1_123, %c0_124, %c0_125] : memref<9x16x16xf32, #tpu.memory_space<vmem>>, vector<1x16x16xf32>
    %206 = vector.shape_cast %205 : vector<1x16x16xf32> to vector<16x16xf32>
    %cst_126 = arith.constant dense<0.000000e+00> : vector<16x465xf32>
    %207 = tpu.matmul %206, %204, %cst_126 {dimension_numbers = #tpu.dot_dimension_numbers<[1], [0], [0], [1], [0, 0, 1, 1], [], []>} : vector<16x16xf32>, vector<16x465xf32>, vector<16x465xf32> -> vector<16x465xf32>
    %208 = arith.addf %203, %207 : vector<16x465xf32>
    %209 = vector.extract_strided_slice %197 {offsets = [0, 4], sizes = [16, 465], strides = [1, 1]} : vector<16x581xf32> to vector<16x465xf32>
    %c2_127 = arith.constant 2 : index
    %c0_128 = arith.constant 0 : index
    %c0_129 = arith.constant 0 : index
    %210 = vector.load %arg14[%c2_127, %c0_128, %c0_129] : memref<9x16x16xf32, #tpu.memory_space<vmem>>, vector<1x16x16xf32>
    %211 = vector.shape_cast %210 : vector<1x16x16xf32> to vector<16x16xf32>
    %cst_130 = arith.constant dense<0.000000e+00> : vector<16x465xf32>
    %212 = tpu.matmul %211, %209, %cst_130 {dimension_numbers = #tpu.dot_dimension_numbers<[1], [0], [0], [1], [0, 0, 1, 1], [], []>} : vector<16x16xf32>, vector<16x465xf32>, vector<16x465xf32> -> vector<16x465xf32>
    %213 = arith.addf %208, %212 : vector<16x465xf32>
    %214 = vector.extract_strided_slice %197 {offsets = [0, 56], sizes = [16, 465], strides = [1, 1]} : vector<16x581xf32> to vector<16x465xf32>
    %c3_131 = arith.constant 3 : index
    %c0_132 = arith.constant 0 : index
    %c0_133 = arith.constant 0 : index
    %215 = vector.load %arg14[%c3_131, %c0_132, %c0_133] : memref<9x16x16xf32, #tpu.memory_space<vmem>>, vector<1x16x16xf32>
    %216 = vector.shape_cast %215 : vector<1x16x16xf32> to vector<16x16xf32>
    %cst_134 = arith.constant dense<0.000000e+00> : vector<16x465xf32>
    %217 = tpu.matmul %216, %214, %cst_134 {dimension_numbers = #tpu.dot_dimension_numbers<[1], [0], [0], [1], [0, 0, 1, 1], [], []>} : vector<16x16xf32>, vector<16x465xf32>, vector<16x465xf32> -> vector<16x465xf32>
    %218 = arith.addf %213, %217 : vector<16x465xf32>
    %219 = vector.extract_strided_slice %197 {offsets = [0, 58], sizes = [16, 465], strides = [1, 1]} : vector<16x581xf32> to vector<16x465xf32>
    %c4_135 = arith.constant 4 : index
    %c0_136 = arith.constant 0 : index
    %c0_137 = arith.constant 0 : index
    %220 = vector.load %arg14[%c4_135, %c0_136, %c0_137] : memref<9x16x16xf32, #tpu.memory_space<vmem>>, vector<1x16x16xf32>
    %221 = vector.shape_cast %220 : vector<1x16x16xf32> to vector<16x16xf32>
    %cst_138 = arith.constant dense<0.000000e+00> : vector<16x465xf32>
    %222 = tpu.matmul %221, %219, %cst_138 {dimension_numbers = #tpu.dot_dimension_numbers<[1], [0], [0], [1], [0, 0, 1, 1], [], []>} : vector<16x16xf32>, vector<16x465xf32>, vector<16x465xf32> -> vector<16x465xf32>
    %223 = arith.addf %218, %222 : vector<16x465xf32>
    %224 = vector.extract_strided_slice %197 {offsets = [0, 60], sizes = [16, 465], strides = [1, 1]} : vector<16x581xf32> to vector<16x465xf32>
    %c5_139 = arith.constant 5 : index
    %c0_140 = arith.constant 0 : index
    %c0_141 = arith.constant 0 : index
    %225 = vector.load %arg14[%c5_139, %c0_140, %c0_141] : memref<9x16x16xf32, #tpu.memory_space<vmem>>, vector<1x16x16xf32>
    %226 = vector.shape_cast %225 : vector<1x16x16xf32> to vector<16x16xf32>
    %cst_142 = arith.constant dense<0.000000e+00> : vector<16x465xf32>
    %227 = tpu.matmul %226, %224, %cst_142 {dimension_numbers = #tpu.dot_dimension_numbers<[1], [0], [0], [1], [0, 0, 1, 1], [], []>} : vector<16x16xf32>, vector<16x465xf32>, vector<16x465xf32> -> vector<16x465xf32>
    %228 = arith.addf %223, %227 : vector<16x465xf32>
    %229 = vector.extract_strided_slice %197 {offsets = [0, 112], sizes = [16, 465], strides = [1, 1]} : vector<16x581xf32> to vector<16x465xf32>
    %c6_143 = arith.constant 6 : index
    %c0_144 = arith.constant 0 : index
    %c0_145 = arith.constant 0 : index
    %230 = vector.load %arg14[%c6_143, %c0_144, %c0_145] : memref<9x16x16xf32, #tpu.memory_space<vmem>>, vector<1x16x16xf32>
    %231 = vector.shape_cast %230 : vector<1x16x16xf32> to vector<16x16xf32>
    %cst_146 = arith.constant dense<0.000000e+00> : vector<16x465xf32>
    %232 = tpu.matmul %231, %229, %cst_146 {dimension_numbers = #tpu.dot_dimension_numbers<[1], [0], [0], [1], [0, 0, 1, 1], [], []>} : vector<16x16xf32>, vector<16x465xf32>, vector<16x465xf32> -> vector<16x465xf32>
    %233 = arith.addf %228, %232 : vector<16x465xf32>
    %234 = vector.extract_strided_slice %197 {offsets = [0, 114], sizes = [16, 465], strides = [1, 1]} : vector<16x581xf32> to vector<16x465xf32>
    %c7_147 = arith.constant 7 : index
    %c0_148 = arith.constant 0 : index
    %c0_149 = arith.constant 0 : index
    %235 = vector.load %arg14[%c7_147, %c0_148, %c0_149] : memref<9x16x16xf32, #tpu.memory_space<vmem>>, vector<1x16x16xf32>
    %236 = vector.shape_cast %235 : vector<1x16x16xf32> to vector<16x16xf32>
    %cst_150 = arith.constant dense<0.000000e+00> : vector<16x465xf32>
    %237 = tpu.matmul %236, %234, %cst_150 {dimension_numbers = #tpu.dot_dimension_numbers<[1], [0], [0], [1], [0, 0, 1, 1], [], []>} : vector<16x16xf32>, vector<16x465xf32>, vector<16x465xf32> -> vector<16x465xf32>
    %238 = arith.addf %233, %237 : vector<16x465xf32>
    %239 = vector.extract_strided_slice %197 {offsets = [0, 116], sizes = [16, 465], strides = [1, 1]} : vector<16x581xf32> to vector<16x465xf32>
    %c8_151 = arith.constant 8 : index
    %c0_152 = arith.constant 0 : index
    %c0_153 = arith.constant 0 : index
    %240 = vector.load %arg14[%c8_151, %c0_152, %c0_153] : memref<9x16x16xf32, #tpu.memory_space<vmem>>, vector<1x16x16xf32>
    %241 = vector.shape_cast %240 : vector<1x16x16xf32> to vector<16x16xf32>
    %cst_154 = arith.constant dense<0.000000e+00> : vector<16x465xf32>
    %242 = tpu.matmul %241, %239, %cst_154 {dimension_numbers = #tpu.dot_dimension_numbers<[1], [0], [0], [1], [0, 0, 1, 1], [], []>} : vector<16x16xf32>, vector<16x465xf32>, vector<16x465xf32> -> vector<16x465xf32>
    %243 = arith.addf %238, %242 : vector<16x465xf32>
    %cst_155 = arith.constant 0.000000e+00 : f32
    %244 = vector.broadcast %cst_155 : f32 to vector<16x465xf32>
    %245 = arith.maximumf %243, %244 : vector<16x465xf32>
    %c0_156 = arith.constant 0 : index
    %c0_157 = arith.constant 0 : index
    %246 = vector.load %arg15[%c0_156, %c0_157] : memref<16x1xf32, #tpu.memory_space<vmem>>, vector<16x1xf32>
    %247 = vector.broadcast %246 : vector<16x1xf32> to vector<16x465xf32>
    %248 = arith.mulf %245, %247 : vector<16x465xf32>
    %c0_158 = arith.constant 0 : index
    %c0_159 = arith.constant 0 : index
    %249 = vector.load %arg16[%c0_158, %c0_159] : memref<16x1xf32, #tpu.memory_space<vmem>>, vector<16x1xf32>
    %250 = vector.broadcast %249 : vector<16x1xf32> to vector<16x465xf32>
    %251 = arith.addf %248, %250 : vector<16x465xf32>
    %cst_160 = arith.constant 0.000000e+00 : f32
    %252 = vector.broadcast %cst_160 : f32 to vector<10x349xf32>
    %253 = vector.extract_strided_slice %251 {offsets = [0, 0], sizes = [16, 349], strides = [1, 1]} : vector<16x465xf32> to vector<16x349xf32>
    %c0_161 = arith.constant 0 : index
    %c0_162 = arith.constant 0 : index
    %c0_163 = arith.constant 0 : index
    %254 = vector.load %arg17[%c0_161, %c0_162, %c0_163] : memref<9x10x16xf32, #tpu.memory_space<vmem>>, vector<1x10x16xf32>
    %255 = vector.shape_cast %254 : vector<1x10x16xf32> to vector<10x16xf32>
    %cst_164 = arith.constant dense<0.000000e+00> : vector<10x349xf32>
    %256 = tpu.matmul %255, %253, %cst_164 {dimension_numbers = #tpu.dot_dimension_numbers<[1], [0], [0], [1], [0, 0, 1, 1], [], []>} : vector<10x16xf32>, vector<16x349xf32>, vector<10x349xf32> -> vector<10x349xf32>
    %257 = arith.addf %252, %256 : vector<10x349xf32>
    %258 = vector.extract_strided_slice %251 {offsets = [0, 2], sizes = [16, 349], strides = [1, 1]} : vector<16x465xf32> to vector<16x349xf32>
    %c1_165 = arith.constant 1 : index
    %c0_166 = arith.constant 0 : index
    %c0_167 = arith.constant 0 : index
    %259 = vector.load %arg17[%c1_165, %c0_166, %c0_167] : memref<9x10x16xf32, #tpu.memory_space<vmem>>, vector<1x10x16xf32>
    %260 = vector.shape_cast %259 : vector<1x10x16xf32> to vector<10x16xf32>
    %cst_168 = arith.constant dense<0.000000e+00> : vector<10x349xf32>
    %261 = tpu.matmul %260, %258, %cst_168 {dimension_numbers = #tpu.dot_dimension_numbers<[1], [0], [0], [1], [0, 0, 1, 1], [], []>} : vector<10x16xf32>, vector<16x349xf32>, vector<10x349xf32> -> vector<10x349xf32>
    %262 = arith.addf %257, %261 : vector<10x349xf32>
    %263 = vector.extract_strided_slice %251 {offsets = [0, 4], sizes = [16, 349], strides = [1, 1]} : vector<16x465xf32> to vector<16x349xf32>
    %c2_169 = arith.constant 2 : index
    %c0_170 = arith.constant 0 : index
    %c0_171 = arith.constant 0 : index
    %264 = vector.load %arg17[%c2_169, %c0_170, %c0_171] : memref<9x10x16xf32, #tpu.memory_space<vmem>>, vector<1x10x16xf32>
    %265 = vector.shape_cast %264 : vector<1x10x16xf32> to vector<10x16xf32>
    %cst_172 = arith.constant dense<0.000000e+00> : vector<10x349xf32>
    %266 = tpu.matmul %265, %263, %cst_172 {dimension_numbers = #tpu.dot_dimension_numbers<[1], [0], [0], [1], [0, 0, 1, 1], [], []>} : vector<10x16xf32>, vector<16x349xf32>, vector<10x349xf32> -> vector<10x349xf32>
    %267 = arith.addf %262, %266 : vector<10x349xf32>
    %268 = vector.extract_strided_slice %251 {offsets = [0, 56], sizes = [16, 349], strides = [1, 1]} : vector<16x465xf32> to vector<16x349xf32>
    %c3_173 = arith.constant 3 : index
    %c0_174 = arith.constant 0 : index
    %c0_175 = arith.constant 0 : index
    %269 = vector.load %arg17[%c3_173, %c0_174, %c0_175] : memref<9x10x16xf32, #tpu.memory_space<vmem>>, vector<1x10x16xf32>
    %270 = vector.shape_cast %269 : vector<1x10x16xf32> to vector<10x16xf32>
    %cst_176 = arith.constant dense<0.000000e+00> : vector<10x349xf32>
    %271 = tpu.matmul %270, %268, %cst_176 {dimension_numbers = #tpu.dot_dimension_numbers<[1], [0], [0], [1], [0, 0, 1, 1], [], []>} : vector<10x16xf32>, vector<16x349xf32>, vector<10x349xf32> -> vector<10x349xf32>
    %272 = arith.addf %267, %271 : vector<10x349xf32>
    %273 = vector.extract_strided_slice %251 {offsets = [0, 58], sizes = [16, 349], strides = [1, 1]} : vector<16x465xf32> to vector<16x349xf32>
    %c4_177 = arith.constant 4 : index
    %c0_178 = arith.constant 0 : index
    %c0_179 = arith.constant 0 : index
    %274 = vector.load %arg17[%c4_177, %c0_178, %c0_179] : memref<9x10x16xf32, #tpu.memory_space<vmem>>, vector<1x10x16xf32>
    %275 = vector.shape_cast %274 : vector<1x10x16xf32> to vector<10x16xf32>
    %cst_180 = arith.constant dense<0.000000e+00> : vector<10x349xf32>
    %276 = tpu.matmul %275, %273, %cst_180 {dimension_numbers = #tpu.dot_dimension_numbers<[1], [0], [0], [1], [0, 0, 1, 1], [], []>} : vector<10x16xf32>, vector<16x349xf32>, vector<10x349xf32> -> vector<10x349xf32>
    %277 = arith.addf %272, %276 : vector<10x349xf32>
    %278 = vector.extract_strided_slice %251 {offsets = [0, 60], sizes = [16, 349], strides = [1, 1]} : vector<16x465xf32> to vector<16x349xf32>
    %c5_181 = arith.constant 5 : index
    %c0_182 = arith.constant 0 : index
    %c0_183 = arith.constant 0 : index
    %279 = vector.load %arg17[%c5_181, %c0_182, %c0_183] : memref<9x10x16xf32, #tpu.memory_space<vmem>>, vector<1x10x16xf32>
    %280 = vector.shape_cast %279 : vector<1x10x16xf32> to vector<10x16xf32>
    %cst_184 = arith.constant dense<0.000000e+00> : vector<10x349xf32>
    %281 = tpu.matmul %280, %278, %cst_184 {dimension_numbers = #tpu.dot_dimension_numbers<[1], [0], [0], [1], [0, 0, 1, 1], [], []>} : vector<10x16xf32>, vector<16x349xf32>, vector<10x349xf32> -> vector<10x349xf32>
    %282 = arith.addf %277, %281 : vector<10x349xf32>
    %283 = vector.extract_strided_slice %251 {offsets = [0, 112], sizes = [16, 349], strides = [1, 1]} : vector<16x465xf32> to vector<16x349xf32>
    %c6_185 = arith.constant 6 : index
    %c0_186 = arith.constant 0 : index
    %c0_187 = arith.constant 0 : index
    %284 = vector.load %arg17[%c6_185, %c0_186, %c0_187] : memref<9x10x16xf32, #tpu.memory_space<vmem>>, vector<1x10x16xf32>
    %285 = vector.shape_cast %284 : vector<1x10x16xf32> to vector<10x16xf32>
    %cst_188 = arith.constant dense<0.000000e+00> : vector<10x349xf32>
    %286 = tpu.matmul %285, %283, %cst_188 {dimension_numbers = #tpu.dot_dimension_numbers<[1], [0], [0], [1], [0, 0, 1, 1], [], []>} : vector<10x16xf32>, vector<16x349xf32>, vector<10x349xf32> -> vector<10x349xf32>
    %287 = arith.addf %282, %286 : vector<10x349xf32>
    %288 = vector.extract_strided_slice %251 {offsets = [0, 114], sizes = [16, 349], strides = [1, 1]} : vector<16x465xf32> to vector<16x349xf32>
    %c7_189 = arith.constant 7 : index
    %c0_190 = arith.constant 0 : index
    %c0_191 = arith.constant 0 : index
    %289 = vector.load %arg17[%c7_189, %c0_190, %c0_191] : memref<9x10x16xf32, #tpu.memory_space<vmem>>, vector<1x10x16xf32>
    %290 = vector.shape_cast %289 : vector<1x10x16xf32> to vector<10x16xf32>
    %cst_192 = arith.constant dense<0.000000e+00> : vector<10x349xf32>
    %291 = tpu.matmul %290, %288, %cst_192 {dimension_numbers = #tpu.dot_dimension_numbers<[1], [0], [0], [1], [0, 0, 1, 1], [], []>} : vector<10x16xf32>, vector<16x349xf32>, vector<10x349xf32> -> vector<10x349xf32>
    %292 = arith.addf %287, %291 : vector<10x349xf32>
    %293 = vector.extract_strided_slice %251 {offsets = [0, 116], sizes = [16, 349], strides = [1, 1]} : vector<16x465xf32> to vector<16x349xf32>
    %c8_193 = arith.constant 8 : index
    %c0_194 = arith.constant 0 : index
    %c0_195 = arith.constant 0 : index
    %294 = vector.load %arg17[%c8_193, %c0_194, %c0_195] : memref<9x10x16xf32, #tpu.memory_space<vmem>>, vector<1x10x16xf32>
    %295 = vector.shape_cast %294 : vector<1x10x16xf32> to vector<10x16xf32>
    %cst_196 = arith.constant dense<0.000000e+00> : vector<10x349xf32>
    %296 = tpu.matmul %295, %293, %cst_196 {dimension_numbers = #tpu.dot_dimension_numbers<[1], [0], [0], [1], [0, 0, 1, 1], [], []>} : vector<10x16xf32>, vector<16x349xf32>, vector<10x349xf32> -> vector<10x349xf32>
    %297 = arith.addf %292, %296 : vector<10x349xf32>
    %cst_197 = arith.constant 0.000000e+00 : f32
    %298 = vector.broadcast %cst_197 : f32 to vector<10x349xf32>
    %299 = arith.maximumf %297, %298 : vector<10x349xf32>
    %c0_198 = arith.constant 0 : index
    %c0_199 = arith.constant 0 : index
    %300 = vector.load %arg18[%c0_198, %c0_199] : memref<10x1xf32, #tpu.memory_space<vmem>>, vector<10x1xf32>
    %301 = vector.broadcast %300 : vector<10x1xf32> to vector<10x349xf32>
    %302 = arith.mulf %299, %301 : vector<10x349xf32>
    %c0_200 = arith.constant 0 : index
    %c0_201 = arith.constant 0 : index
    %303 = vector.load %arg19[%c0_200, %c0_201] : memref<10x1xf32, #tpu.memory_space<vmem>>, vector<10x1xf32>
    %304 = vector.broadcast %303 : vector<10x1xf32> to vector<10x349xf32>
    %305 = arith.addf %302, %304 : vector<10x349xf32>
    %c0_202 = arith.constant 0 : index
    %c0_203 = arith.constant 0 : index
    %306 = vector.load %arg20[%c0_202, %c0_203] : memref<10x10xf32, #tpu.memory_space<vmem>>, vector<10x10xf32>
    %cst_204 = arith.constant dense<0.000000e+00> : vector<10x349xf32>
    %307 = tpu.matmul %306, %305, %cst_204 {dimension_numbers = #tpu.dot_dimension_numbers<[1], [0], [0], [1], [0, 0, 1, 1], [], []>} : vector<10x10xf32>, vector<10x349xf32>, vector<10x349xf32> -> vector<10x349xf32>
    %cst_205 = arith.constant 0.000000e+00 : f32
    %308 = vector.broadcast %cst_205 : f32 to vector<10x349xf32>
    %309 = arith.maximumf %307, %308 : vector<10x349xf32>
    %c0_206 = arith.constant 0 : index
    %c0_207 = arith.constant 0 : index
    %310 = vector.load %arg21[%c0_206, %c0_207] : memref<10x1xf32, #tpu.memory_space<vmem>>, vector<10x1xf32>
    %311 = vector.broadcast %310 : vector<10x1xf32> to vector<10x349xf32>
    %312 = arith.mulf %309, %311 : vector<10x349xf32>
    %c0_208 = arith.constant 0 : index
    %c0_209 = arith.constant 0 : index
    %313 = vector.load %arg22[%c0_208, %c0_209] : memref<10x1xf32, #tpu.memory_space<vmem>>, vector<10x1xf32>
    %314 = vector.broadcast %313 : vector<10x1xf32> to vector<10x349xf32>
    %315 = arith.addf %312, %314 : vector<10x349xf32>
    %c0_210 = arith.constant 0 : index
    %c0_211 = arith.constant 0 : index
    %316 = vector.load %arg23[%c0_210, %c0_211] : memref<1x349xf32, #tpu.memory_space<vmem>>, vector<1x349xf32>
    %cst_212 = arith.constant 5.000000e-01 : f32
    %317 = vector.broadcast %cst_212 : f32 to vector<1x349xf32>
    %318 = arith.cmpf ogt, %316, %317 : vector<1x349xf32>
    %cst_213 = arith.constant 0.000000e+00 : f32
    %319 = vector.shape_cast %318 : vector<1x349xi1> to vector<1x349xi1>
    %320 = vector.broadcast %319 : vector<1x349xi1> to vector<10x349xi1>
    %321 = vector.broadcast %cst_213 : f32 to vector<10x349xf32>
    %322 = arith.select %320, %315, %321 : vector<10x349xi1>, vector<10x349xf32>
    %cst_214 = arith.constant dense<0.000000e+00> : vector<10xf32>
    %323 = vector.multi_reduction <add>, %322, %cst_214 [1] : vector<10x349xf32> to vector<10xf32>
    %324 = vector.shape_cast %323 : vector<10xf32> to vector<10x1xf32>
    %cst_215 = arith.constant 0.0204081628 : f32
    %325 = vector.broadcast %cst_215 : f32 to vector<10x1xf32>
    %326 = arith.mulf %324, %325 : vector<10x1xf32>
    %cst_216 = arith.constant dense<0xFF800000> : vector<1xf32>
    %327 = vector.multi_reduction <maximumf>, %326, %cst_216 [0] : vector<10x1xf32> to vector<1xf32>
    %328 = vector.shape_cast %327 : vector<1xf32> to vector<1x1xf32>
    %329 = vector.broadcast %328 : vector<1x1xf32> to vector<10x1xf32>
    %330 = arith.subf %326, %329 : vector<10x1xf32>
    %331 = math.exp %330 : vector<10x1xf32>
    %cst_217 = arith.constant dense<0.000000e+00> : vector<1xf32>
    %332 = vector.multi_reduction <add>, %331, %cst_217 [0] : vector<10x1xf32> to vector<1xf32>
    %333 = vector.shape_cast %332 : vector<1xf32> to vector<1x1xf32>
    %334 = math.log %333 : vector<1x1xf32>
    %335 = vector.broadcast %334 : vector<1x1xf32> to vector<10x1xf32>
    %336 = arith.subf %330, %335 : vector<10x1xf32>
    %c0_218 = arith.constant 0 : index
    %c0_219 = arith.constant 0 : index
    %c0_220 = arith.constant 0 : index
    %337 = vector.load %arg24[%c0_218, %c0_219, %c0_220] : memref<1x10x1xf32, #tpu.memory_space<vmem>>, vector<1x10x1xf32>
    %338 = vector.shape_cast %337 : vector<1x10x1xf32> to vector<10x1xf32>
    %339 = vector.shape_cast %336 : vector<10x1xf32> to vector<1x10x1xf32>
    tpu.vector_store %arg24[%c0_218, %c0_219, %c0_220], %339 {strides = array<i32>} : memref<1x10x1xf32, #tpu.memory_space<vmem>>, vector<1x10x1xf32>,
    return
  }
  func.func @transform_0(%arg0: i32) -> (i32, i32, i32) {
    %c0_i32 = arith.constant 0 : i32
    %c0_i32_0 = arith.constant 0 : i32
    %c0_i32_1 = arith.constant 0 : i32
    return %arg0, %c0_i32, %c0_i32_0 : i32, i32, i32
  }
  func.func @transform_1(%arg0: i32) -> (i32, i32, i32) {
    %c0_i32 = arith.constant 0 : i32
    %c0_i32_0 = arith.constant 0 : i32
    %c0_i32_1 = arith.constant 0 : i32
    %c0_i32_2 = arith.constant 0 : i32
    return %c0_i32, %c0_i32_0, %c0_i32_1 : i32, i32, i32
  }
  func.func @transform_2(%arg0: i32) -> (i32, i32) {
    %c0_i32 = arith.constant 0 : i32
    %c0_i32_0 = arith.constant 0 : i32
    %c0_i32_1 = arith.constant 0 : i32
    return %c0_i32, %c0_i32_0 : i32, i32
  }
  func.func @transform_3(%arg0: i32) -> (i32, i32) {
    %c0_i32 = arith.constant 0 : i32
    %c0_i32_0 = arith.constant 0 : i32
    %c0_i32_1 = arith.constant 0 : i32
    return %c0_i32, %c0_i32_0 : i32, i32
  }
  func.func @transform_4(%arg0: i32) -> (i32, i32, i32) {
    %c0_i32 = arith.constant 0 : i32
    %c0_i32_0 = arith.constant 0 : i32
    %c0_i32_1 = arith.constant 0 : i32
    %c0_i32_2 = arith.constant 0 : i32
    return %c0_i32, %c0_i32_0, %c0_i32_1 : i32, i32, i32
  }
  func.func @transform_5(%arg0: i32) -> (i32, i32) {
    %c0_i32 = arith.constant 0 : i32
    %c0_i32_0 = arith.constant 0 : i32
    %c0_i32_1 = arith.constant 0 : i32
    return %c0_i32, %c0_i32_0 : i32, i32
  }
  func.func @transform_6(%arg0: i32) -> (i32, i32) {
    %c0_i32 = arith.constant 0 : i32
    %c0_i32_0 = arith.constant 0 : i32
    %c0_i32_1 = arith.constant 0 : i32
    return %c0_i32, %c0_i32_0 : i32, i32
  }
  func.func @transform_7(%arg0: i32) -> (i32, i32, i32) {
    %c0_i32 = arith.constant 0 : i32
    %c0_i32_0 = arith.constant 0 : i32
    %c0_i32_1 = arith.constant 0 : i32
    %c0_i32_2 = arith.constant 0 : i32
    return %c0_i32, %c0_i32_0, %c0_i32_1 : i32, i32, i32
  }
  func.func @transform_8(%arg0: i32) -> (i32, i32) {
    %c0_i32 = arith.constant 0 : i32
    %c0_i32_0 = arith.constant 0 : i32
    %c0_i32_1 = arith.constant 0 : i32
    return %c0_i32, %c0_i32_0 : i32, i32
  }
  func.func @transform_9(%arg0: i32) -> (i32, i32) {
    %c0_i32 = arith.constant 0 : i32
    %c0_i32_0 = arith.constant 0 : i32
    %c0_i32_1 = arith.constant 0 : i32
    return %c0_i32, %c0_i32_0 : i32, i32
  }
  func.func @transform_10(%arg0: i32) -> (i32, i32) {
    %c0_i32 = arith.constant 0 : i32
    %c0_i32_0 = arith.constant 0 : i32
    %c0_i32_1 = arith.constant 0 : i32
    return %c0_i32, %c0_i32_0 : i32, i32
  }
  func.func @transform_11(%arg0: i32) -> (i32, i32) {
    %c0_i32 = arith.constant 0 : i32
    %c0_i32_0 = arith.constant 0 : i32
    %c0_i32_1 = arith.constant 0 : i32
    return %c0_i32, %c0_i32_0 : i32, i32
  }
  func.func @transform_12(%arg0: i32) -> (i32, i32) {
    %c0_i32 = arith.constant 0 : i32
    %c0_i32_0 = arith.constant 0 : i32
    %c0_i32_1 = arith.constant 0 : i32
    return %c0_i32, %c0_i32_0 : i32, i32
  }
  func.func @transform_13(%arg0: i32) -> (i32, i32, i32) {
    %c0_i32 = arith.constant 0 : i32
    %c0_i32_0 = arith.constant 0 : i32
    %c0_i32_1 = arith.constant 0 : i32
    %c0_i32_2 = arith.constant 0 : i32
    return %c0_i32, %c0_i32_0, %c0_i32_1 : i32, i32, i32
  }
  func.func @transform_14(%arg0: i32) -> (i32, i32) {
    %c0_i32 = arith.constant 0 : i32
    %c0_i32_0 = arith.constant 0 : i32
    %c0_i32_1 = arith.constant 0 : i32
    return %c0_i32, %c0_i32_0 : i32, i32
  }
  func.func @transform_15(%arg0: i32) -> (i32, i32) {
    %c0_i32 = arith.constant 0 : i32
    %c0_i32_0 = arith.constant 0 : i32
    %c0_i32_1 = arith.constant 0 : i32
    return %c0_i32, %c0_i32_0 : i32, i32
  }
  func.func @transform_16(%arg0: i32) -> (i32, i32, i32) {
    %c0_i32 = arith.constant 0 : i32
    %c0_i32_0 = arith.constant 0 : i32
    %c0_i32_1 = arith.constant 0 : i32
    %c0_i32_2 = arith.constant 0 : i32
    return %c0_i32, %c0_i32_0, %c0_i32_1 : i32, i32, i32
  }
  func.func @transform_17(%arg0: i32) -> (i32, i32) {
    %c0_i32 = arith.constant 0 : i32
    %c0_i32_0 = arith.constant 0 : i32
    %c0_i32_1 = arith.constant 0 : i32
    return %c0_i32, %c0_i32_0 : i32, i32
  }
  func.func @transform_18(%arg0: i32) -> (i32, i32) {
    %c0_i32 = arith.constant 0 : i32
    %c0_i32_0 = arith.constant 0 : i32
    %c0_i32_1 = arith.constant 0 : i32
    return %c0_i32, %c0_i32_0 : i32, i32
  }
  func.func @transform_19(%arg0: i32) -> (i32, i32) {
    %c0_i32 = arith.constant 0 : i32
    %c0_i32_0 = arith.constant 0 : i32
    %c0_i32_1 = arith.constant 0 : i32
    return %c0_i32, %c0_i32_0 : i32, i32
  }
  func.func @transform_20(%arg0: i32) -> (i32, i32) {
    %c0_i32 = arith.constant 0 : i32
    %c0_i32_0 = arith.constant 0 : i32
    %c0_i32_1 = arith.constant 0 : i32
    return %c0_i32, %c0_i32_0 : i32, i32
  }
  func.func @transform_21(%arg0: i32) -> (i32, i32) {
    %c0_i32 = arith.constant 0 : i32
    %c0_i32_0 = arith.constant 0 : i32
    %c0_i32_1 = arith.constant 0 : i32
    return %c0_i32, %c0_i32_0 : i32, i32
  }
  func.func @transform_22(%arg0: i32) -> (i32, i32) {
    %c0_i32 = arith.constant 0 : i32
    %c0_i32_0 = arith.constant 0 : i32
    %c0_i32_1 = arith.constant 0 : i32
    return %c0_i32, %c0_i32_0 : i32, i32
  }
  func.func @transform_23(%arg0: i32) -> (i32, i32, i32) {
    %c0_i32 = arith.constant 0 : i32
    %c0_i32_0 = arith.constant 0 : i32
    %c0_i32_1 = arith.constant 0 : i32
    return %arg0, %c0_i32, %c0_i32_0 : i32, i32, i32
  }
}

</mosaic_0001>

<bundles_post_ra>
// kernel: net5_forward.1
= control target key start
LH: loop header
LB: loop body
LE: loop exit
PB: predicated region body
PF: predicated region fallthrough
CT: control target
= control target key end

     0   :  { %s15808_s0 = inlined_call_operand.vmem [shape: f32[2,1,784], index: 0, kind: input, shape index: {}]   ;;  %s15809_s1 = inlined_call_operand.vmem [shape: f32[9,10,1], index: 1, kind: input, shape index: {}]   ;;  %s15810_s2 = inlined_call_operand.vmem [shape: f32[10,1], index: 2, kind: input, shape index: {}]   ;;  %s15811_s3 = inlined_call_operand.vmem [shape: f32[10,1], index: 3, kind: input, shape index: {}]   ;;  %s15812_s4 = inlined_call_operand.vmem [shape: f32[9,10,10], index: 4, kind: input, shape index: {}]   ;;  %s15813_s5 = inlined_call_operand.vmem [shape: f32[10,1], index: 5, kind: input, shape index: {}]   ;;  %s15814_s6 = inlined_call_operand.vmem [shape: f32[10,1], index: 6, kind: input, shape index: {}]   ;;  %s15815_s7 = inlined_call_operand.vmem [shape: f32[9,10,10], index: 7, kind: input, shape index: {}]   ;;  %s15816_s8 = inlined_call_operand.vmem [shape: f32[10,1], index: 8, kind: input, shape index: {}]   ;;  %s15817_s9 = inlined_call_operand.vmem [shape: f32[10,1], index: 9, kind: input, shape index: {}]   ;;  %s15818_s10 = inlined_call_operand.vmem [shape: f32[16,10], index: 10, kind: input, shape index: {}]   ;;  %s15819_s11 = inlined_call_operand.vmem [shape: f32[16,1], index: 11, kind: input, shape index: {}]   ;;  %s15820_s12 = inlined_call_operand.vmem [shape: f32[16,1], index: 12, kind: input, shape index: {}]   ;;  %s15821_s13 = inlined_call_operand.vmem [shape: f32[9,16,16], index: 13, kind: input, shape index: {}]   ;;  %s15822_s14 = inlined_call_operand.vmem [shape: f32[16,1], index: 14, kind: input, shape index: {}]   ;;  %s15823_s15 = inlined_call_operand.vmem [shape: f32[16,1], index: 15, kind: input, shape index: {}]   ;;  %s15824_s16 = inlined_call_operand.vmem [shape: f32[9,10,16], index: 16, kind: input, shape index: {}]   ;;  %s15825_s17 = inlined_call_operand.vmem [shape: f32[10,1], index: 17, kind: input, shape index: {}]   ;;  %s15826_s18 = inlined_call_operand.vmem [shape: f32[10,1], index: 18, kind: input, shape index: {}]   ;;  %s15827_s19 = inlined_call_operand.vmem [shape: f32[10,10], index: 19, kind: input, shape index: {}]   ;;  %s15828_s20 = inlined_call_operand.vmem [shape: f32[10,1], index: 20, kind: input, shape index: {}]   ;;  %s15829_s21 = inlined_call_operand.vmem [shape: f32[10,1], index: 21, kind: input, shape index: {}]   ;;  %s15830_s22 = inlined_call_operand.vmem [shape: f32[1,349], index: 22, kind: input, shape index: {}]   ;;  %s15831_s23 = inlined_call_operand.vmem [shape: f32[2,10,1], index: 23, kind: output, shape index: {}]  }
   0x1   :  { %15900 = sst [smem:[#allocation43_spill]] %s15808_s0 }
   0x2   :  { %15901 = sst [smem:[#allocation44_spill]] %s15809_s1 }
   0x3   :  { %15902 = sst [smem:[#allocation45_spill]] %s15810_s2 }
   0x4   :  { %15903 = sst [smem:[#allocation46_spill]] %s15811_s3 }
   0x5   :  { %15904 = sst [smem:[#allocation47_spill]] %s15812_s4  ;;  %s12186_s4 = smov 0  }
   0x6   :  { %15905 = sst [smem:[#allocation48_spill]] %s15813_s5 }
   0x7   :  { %15906 = sst [smem:[#allocation49_spill]] %s15814_s6 }
   0x8   :  { %15907 = sst [smem:[#allocation50_spill]] %s15815_s7 }
   0x9   :  { %15908 = sst [smem:[#allocation51_spill]] %s15816_s8 }
   0xa   :  { %15909 = sst [smem:[#allocation52_spill]] %s15817_s9 }
   0xb   :  { %15910 = sst [smem:[#allocation53_spill]] %s15830_s22 }
   0xc LB: > { %s11404_s30 = sadd.s32 4294967295, %s12049_s4   ;;  %p11408_p0 = scmp.ge.s32.totalorder %s12049_s4, 1  ;;  %s12049_s4 = sphi %s12186_s4, %s33_s4  }
   0xd   : > { %p636_p1 = scmp.lt.s32.totalorder %s12049_s4, 3 }
   0xf   : > { %p637_p2 = pnand %p11408_p0, %p636_p1 }
  0x11   : > { %640 = sbr.rel (%p637_p2) target bundleno = 3273 (0xcc9), region = 112 }
  0x16   : > { %v722_v0 = vlaneseq  ;;  %s15911_s22 = sld [smem:[#allocation53_spill]]  ;;  %v12051_v3 = vmov 0   ;;  %p699_p3 = scmp.lt.s32.totalorder %s11404_s30, 1  ;;  %vm837_vm1 = vcmask 1039360   ;;  %vm933_vm2 = vcmask 1031168  }
  0x17   : > { %s15912_s26 = sld [smem:[#allocation44_spill]]  ;;  %12036 = vset.pattern.permute.xlu1 %v12051_v3  ;;  %12035 = vset.pattern.permute.xlu0 %v12051_v3  ;;  %s15890_s27 = smov 127   ;;  %vm1029_vm3 = vcmask 818176   ;;  %vm1125_vm4 = vcmask 809984   ;;  %vm1221_vm5 = vcmask 801792   ;;  %vm1330_vm6 = vcmask 588800  }
  0x18   : > { %v12203_v5 = vshrl.u32 %v722_v0, 7  ;;  %s16079_s30 = smov (!%p699_p3, %s11404_s30), 1  ;;  %s15916_s29 = sld [smem:[#allocation43_spill]]  ;;  %vm1436_vm7 = vcmask 580608   ;;  %vm1542_vm8 = vcmask 572416   ;;  %vm1703_vm9 = vcmask 1041408  }
  0x19   : > { %s12011_s5 = smul.u32 7, %s16079_s30  ;;  %s15876_s7 = smov 99   ;;  %vm1696_vm10 = vcmask 80896   ;;  %vm7498_vm11 = vcmask 130048   ;;  %vm7838_vm12 = vcmask 1014784   ;;  %vm8460_vm13 = vcmask 556032  }
  0x1a   : > { %v724_v9 = vsub.s32 0, %v12203_v5  ;;  %v728_v10 = vsub.s32 1, %v12203_v5  ;;  %v732_v11 = vsub.s32 2, %v12203_v5  ;;  %v1271_v21 = vsub.s32 6, %v12203_v5  ;;  %s15839_s28 = smov 98   ;;  %s15886_s0 = smov 70  }
  0x1b   : > { %v736_v32 = vsub.s32 3, %v12203_v5  ;;  %v740_v40 = vsub.s32 4, %v12203_v5  ;;  %v744_v44 = vsub.s32 5, %v12203_v5  ;;  %s15919_s1 = sld [smem:[#allocation45_spill]]  ;;  %s15995_s6 = smov 98   ;;  %vm8875_vm14 = vcmask 113664  }
  0x1c   : > { %v11279_v1 = vld [vmem:[%s15911_s22] sm:$0x7]  ;;  %s15878_s22 = smov 100   ;;  %s15920_s24 = sld [smem:[#allocation46_spill]]  ;;  %vm9083_vm15 = vcmask 97280  }
  0x1d   : > { %v11414_v2 = vld [vmem:[%s15912_s26 + $0x28] sm:$0x3]  ;;  %vm11280_vm0 = vcmp.gt.f32.partialorder %v11279_v1, 0.5  ;;  %v11412_v4 = vld [vmem:[%s15912_s26 + $0x18] sm:$0x3]  ;;  %v11413_v7 = vld [vmem:[%s15912_s26 + $0x20] sm:$0xff] }
  0x1e   : > { %882 = vperm.xlu1 %12036, %v11414_v2   ;;  %786 = vperm.xlu0 %12035, %v11412_v4   ;;  %v11281_v6 = vsel %vm11280_vm0, 1, %v12051_v3  ;;  %v11411_v8 = vld [vmem:[%s15912_s26 + $0x10] sm:$0xff]  ;;  %v11416_v16 = vld [vmem:[%s15912_s26 + $0x38] sm:$0x3]  ;;  %v11417_v17 = vld [vmem:[%s15912_s26 + $0x40] sm:$0xff]  ;;  %s702_s3 = scalar_lea.vmem %s15916_s29, %s12011_s5  ;;  %s15884_s5 = smov 126  }
  0x1f   : > { %v12214_v12 = vrot.slane %v11281_v6, %v724_v9  ;;  %v12216_v13 = vrot.slane %v11281_v6, %v728_v10  ;;  %v12218_v14 = vrot.slane %v11281_v6, %v732_v11  ;;  %v11415_v15 = vld [vmem:[%s15912_s26 + $0x30] sm:$0xff]  ;;  %v11418_v18 = vld [vmem:[%s15912_s26 + $0x48] sm:$0x3]  ;;  %v11420_v20 = vld [vmem:[%s15912_s26 + $0x58] sm:$0x3]  ;;  %s15882_s29 = smov 72  }
  0x20   : > { %v11419_v19 = vld [vmem:[%s15912_s26 + $0x50] sm:$0xff]  ;;  %v708_v22 = vld [vmem:[%s702_s3] sm:$0x7f]  ;;  %v11422_v24 = vld [vmem:[%s15912_s26 + $0x68] sm:$0x3]  ;;  %s15880_s3 = smov 71  }
  0x21   : > { %15913 = vst [vmem:[#allocation2_spill] sm:$0xff] %v12214_v12  ;;  %15914 = vst [vmem:[#allocation3_spill] sm:$0xff] %v12216_v13  ;;  %v11421_v23 = vld [vmem:[%s15912_s26 + $0x60] sm:$0xff]  ;;  %v12251_v25 = vrot.slane %v708_v22, %v1271_v21  ;;  %v11423_v26 = vld [vmem:[%s15912_s26 + $0x70] sm:$0xff]  ;;  %v12272_v33 = vrot.slane %v708_v22, %v728_v10  ;;  %v12274_v34 = vrot.slane %v708_v22, %v732_v11  ;;  %s15996_s2 = sld [smem:[#allocation47_spill]] }
  0x22   : > { %15915 = vst [vmem:[#allocation4_spill] sm:$0xff] %v12218_v14  ;;  %877 = vperm.xlu1 %12036, %v11413_v7   ;;  %781 = vperm.xlu0 %12035, %v11411_v8   ;;  %v11424_v27 = vld [vmem:[%s15912_s26 + $0x78] sm:$0x3]  ;;  %v11425_v28 = vld [vmem:[%s15912_s26 + $0x80] sm:$0xff]  ;;  %v11426_v29 = vld [vmem:[%s15912_s26 + $0x88] sm:$0x3]  ;;  %v12276_v36 = vrot.slane %v708_v22, %v724_v9  ;;  %v12278_v37 = vrot.slane %v708_v22, %v736_v32 }
  0x23   : > { %v710_v30 = vld [vmem:[%s15912_s26 + $0x8] sm:$0x3]  ;;  %v709_v31 = vld [vmem:[%s15912_s26] sm:$0xff]  ;;  %v12290_v45 = vrot.slane %v708_v22, %v740_v40  ;;  %v12296_v48 = vrot.slane %v708_v22, %v744_v44  ;;  %s15997_s25 = sld [smem:[#allocation48_spill]] }
  0x24   : > { %s16035_s8 = sld [smem:[#allocation51_spill]] }
  0x25   : > { %15917 = vst [vmem:[#allocation5_spill] sm:$0xff] %v12296_v48  ;;  %s16036_s9 = sld [smem:[#allocation52_spill]] }
  0x26   : > { %973 = vperm.xlu1 %12036, %v11415_v15   ;;  %978 = vperm.xlu0 %12035, %v11416_v16  }
  0x2a   : > { %1069 = vperm.xlu1 %12036, %v11417_v17   ;;  %1074 = vperm.xlu0 %12035, %v11418_v18  }
  0x2e   : > { %1165 = vperm.xlu1 %12036, %v11419_v19   ;;  %1170 = vperm.xlu0 %12035, %v11420_v20  }
  0x32   : > { %1261 = vperm.xlu1 %12036, %v11421_v23   ;;  %1266 = vperm.xlu0 %12035, %v11422_v24  }
  0x36   : > { %1372 = vperm.xlu1 %12036, %v11423_v26   ;;  %1377 = vperm.xlu0 %12035, %v11424_v27  }
  0x3a   : > { %1478 = vperm.xlu1 %12036, %v11425_v28   ;;  %1483 = vperm.xlu0 %12035, %v11426_v29  }
  0x3e   : > { %718 = vperm.xlu0 %12035, %v710_v30   ;;  %713 = vperm.xlu1 %12036, %v709_v31  }
  0x99   : > { %v787_v35 = vpop.permute.xlu0 %786  ;;  %v883_v51 = vpop.permute.xlu1 %882 }
  0x9a   : > { %v797_v38 = vmul.f32 %v787_v35, %v12274_v34  ;;  %v796_v39 = vmul.f32 %v787_v35, %v12272_v33  ;;  %v798_v41 = vmul.f32 %v787_v35, %v12278_v37  ;;  %v795_v42 = vmul.f32 %v787_v35, %v12276_v36 }
  0x9b   : > { %v799_v50 = vmul.f32 %v787_v35, %v12290_v45  ;;  %v892_v52 = vmul.f32 %v883_v51, %v12272_v33  ;;  %v800_v53 = vmul.f32 %v787_v35, %v12296_v48  ;;  %v893_v54 = vmul.f32 %v883_v51, %v12274_v34 }
  0x9c   : > { %829 = vrot.lane.b32.xlu1 %v797_v38, %s15890_s27  ;;  %827 = vrot.lane.b32.xlu0 %v796_v39, %s15890_s27  ;;  %v894_v55 = vmul.f32 %v883_v51, %v12278_v37  ;;  %v891_v56 = vmul.f32 %v883_v51, %v12276_v36  ;;  %v895_v63 = vmul.f32 %v883_v51, %v12290_v45 }
  0x9d   : > { %v782_v43 = vpop.permute.xlu0 %781  ;;  %v878_v60 = vpop.permute.xlu1 %877  ;;  %v896_v3 = vmul.f32 %v883_v51, %v12296_v48 }
  0x9e   : > { %v790_v46 = vmul.f32 %v782_v43, %v12272_v33  ;;  %v791_v47 = vmul.f32 %v782_v43, %v12274_v34  ;;  %v792_v49 = vmul.f32 %v782_v43, %v12278_v37  ;;  %v789_v57 = vmul.f32 %v782_v43, %v12276_v36 }
  0x9f   : > { %v794_v58 = vmul.f32 %v782_v43, %v12296_v48  ;;  %v793_v59 = vmul.f32 %v782_v43, %v12290_v45  ;;  %v887_v61 = vmul.f32 %v878_v60, %v12274_v34  ;;  %v886_v62 = vmul.f32 %v878_v60, %v12272_v33 }
  0xa0   : > { %831 = vrot.lane.b32.xlu0 %v798_v41, %s15890_s27  ;;  %825 = vrot.lane.b32.xlu1 %v795_v42, %s15890_s27  ;;  %v888_v0 = vmul.f32 %v878_v60, %v12278_v37  ;;  %v885_v7 = vmul.f32 %v878_v60, %v12276_v36  ;;  %v890_v8 = vmul.f32 %v878_v60, %v12296_v48 }
  0xa1   : > { %v979_v1 = vpop.permute.xlu0 %978  ;;  %v889_v9 = vmul.f32 %v878_v60, %v12290_v45  ;;  %v974_v10 = vpop.permute.xlu1 %973 }
  0xa2   : > { %v988_v2 = vmul.f32 %v979_v1, %v12272_v33  ;;  %v990_v4 = vmul.f32 %v979_v1, %v12278_v37  ;;  %v989_v5 = vmul.f32 %v979_v1, %v12274_v34  ;;  %v987_v6 = vmul.f32 %v979_v1, %v12276_v36 }
  0xa3   : > { %v983_v11 = vmul.f32 %v974_v10, %v12274_v34  ;;  %v982_v15 = vmul.f32 %v974_v10, %v12272_v33  ;;  %v991_v16 = vmul.f32 %v979_v1, %v12290_v45  ;;  %v984_v17 = vmul.f32 %v974_v10, %v12278_v37 }
  0xa4   : > { %815 = vrot.lane.b32.xlu0 %v790_v46, %s15890_s27  ;;  %817 = vrot.lane.b32.xlu1 %v791_v47, %s15890_s27  ;;  %v992_v20 = vmul.f32 %v979_v1, %v12296_v48  ;;  %v981_v24 = vmul.f32 %v974_v10, %v12276_v36  ;;  %v986_v26 = vmul.f32 %v974_v10, %v12296_v48 }
  0xa5   : > { %v1075_v18 = vpop.permute.xlu0 %1074  ;;  %v985_v27 = vmul.f32 %v974_v10, %v12290_v45  ;;  %v1070_v28 = vpop.permute.xlu1 %1069 }
  0xa6   : > { %v1084_v19 = vmul.f32 %v1075_v18, %v12272_v33  ;;  %v1086_v21 = vmul.f32 %v1075_v18, %v12278_v37  ;;  %v1085_v22 = vmul.f32 %v1075_v18, %v12274_v34  ;;  %v1083_v23 = vmul.f32 %v1075_v18, %v12276_v36 }
  0xa7   : > { %v1079_v29 = vmul.f32 %v1070_v28, %v12274_v34  ;;  %v1078_v30 = vmul.f32 %v1070_v28, %v12272_v33  ;;  %v1087_v31 = vmul.f32 %v1075_v18, %v12290_v45  ;;  %v1080_v32 = vmul.f32 %v1070_v28, %v12278_v37 }
  0xa8   : > { %819 = vrot.lane.b32.xlu0 %v792_v49, %s15890_s27  ;;  %833 = vrot.lane.b32.xlu1 %v799_v50, %s15890_s27  ;;  %v1088_v40 = vmul.f32 %v1075_v18, %v12296_v48  ;;  %v1077_v47 = vmul.f32 %v1070_v28, %v12276_v36  ;;  %v1082_v51 = vmul.f32 %v1070_v28, %v12296_v48 }
  0xa9   : > { %v1171_v35 = vpop.permute.xlu0 %1170  ;;  %v1166_v38 = vpop.permute.xlu1 %1165 }
  0xaa   : > { %v1180_v39 = vmul.f32 %v1171_v35, %v12272_v33  ;;  %v1182_v41 = vmul.f32 %v1171_v35, %v12278_v37  ;;  %v1181_v42 = vmul.f32 %v1171_v35, %v12274_v34  ;;  %v1179_v46 = vmul.f32 %v1171_v35, %v12276_v36 }
  0xab   : > { %v1177_v10 = vmul.f32 %v1166_v38, %v12290_v45 }
  0xac   : > { %835 = vrot.lane.b32.xlu0 %v800_v53, %s15890_s27  ;;  %923 = vrot.lane.b32.xlu1 %v892_v52, %s15884_s5  ;;  %v1081_v52 = vmul.f32 %v1070_v28, %v12290_v45  ;;  %v1175_v53 = vmul.f32 %v1166_v38, %v12274_v34 }
  0xad   : > { %v12380_v43 = vpop.permute.xlu1 %1261  ;;  %v12382_v44 = vpop.permute.xlu0 %1266 }
  0xae   : > { %v1284_v1 = vmul.f32 %v12382_v44, %v12278_v37 }
  0xb0   : > { %925 = vrot.lane.b32.xlu0 %v893_v54, %s15884_s5  ;;  %927 = vrot.lane.b32.xlu1 %v894_v55, %s15884_s5  ;;  %v1174_v54 = vmul.f32 %v1166_v38, %v12272_v33 }
  0xb1   : > { %v12390_v49 = vpop.permute.xlu1 %1372  ;;  %v12392_v50 = vpop.permute.xlu0 %1377 }
  0xb4   : > { %921 = vrot.lane.b32.xlu1 %v891_v56, %s15884_s5  ;;  %813 = vrot.lane.b32.xlu0 %v789_v57, %s15890_s27  ;;  %v1183_v57 = vmul.f32 %v1171_v35, %v12290_v45 }
  0xb5   : > { %v12400_v55 = vpop.permute.xlu1 %1478  ;;  %v12402_v56 = vpop.permute.xlu0 %1483 }
  0xb8   : > { %823 = vrot.lane.b32.xlu1 %v794_v58, %s15890_s27  ;;  %821 = vrot.lane.b32.xlu0 %v793_v59, %s15890_s27  ;;  %v1176_v58 = vmul.f32 %v1166_v38, %v12278_v37 }
  0xb9   : > { %v12410_v59 = vpop.permute.xlu0 %718  ;;  %v12412_v60 = vpop.permute.xlu1 %713 }
  0xba   : > { %15918 = vst [vmem:[#allocation6_spill] sm:$0xff] %v12410_v59 }
  0xbc   : > { %913 = vrot.lane.b32.xlu1 %v887_v61, %s15884_s5  ;;  %911 = vrot.lane.b32.xlu0 %v886_v62, %s15884_s5  ;;  %v1282_v61 = vmul.f32 %v12382_v44, %v12272_v33  ;;  %v1184_v62 = vmul.f32 %v1171_v35, %v12296_v48  ;;  %v1387_v35 = vmul.f32 %v12392_v50, %v12276_v36 }
  0xc0   : > { %929 = vrot.lane.b32.xlu1 %v895_v63, %s15884_s5  ;;  %915 = vrot.lane.b32.xlu0 %v888_v0, %s15884_s5 }
  0xc4   : > { %1019 = vrot.lane.b32.xlu1 %v988_v2, %s15878_s22  ;;  %931 = vrot.lane.b32.xlu0 %v896_v3, %s15884_s5  ;;  %v1283_v2 = vmul.f32 %v12382_v44, %v12274_v34 }
  0xc8   : > { %1023 = vrot.lane.b32.xlu1 %v990_v4, %s15878_s22  ;;  %1021 = vrot.lane.b32.xlu0 %v989_v5, %s15878_s22  ;;  %v1281_v5 = vmul.f32 %v12382_v44, %v12276_v36 }
  0xcc   : > { %1017 = vrot.lane.b32.xlu1 %v987_v6, %s15878_s22  ;;  %909 = vrot.lane.b32.xlu0 %v885_v7, %s15884_s5  ;;  %v1173_v6 = vmul.f32 %v1166_v38, %v12276_v36 }
  0xd0   : > { %919 = vrot.lane.b32.xlu1 %v890_v8, %s15884_s5  ;;  %917 = vrot.lane.b32.xlu0 %v889_v9, %s15884_s5  ;;  %v1178_v9 = vmul.f32 %v1166_v38, %v12296_v48  ;;  %v1274_v38 = vmul.f32 %v12380_v43, %v12276_v36 }
  0xd4   : > { %1009 = vrot.lane.b32.xlu1 %v983_v11, %s15878_s22  ;;  %1007 = vrot.lane.b32.xlu0 %v982_v15, %s15878_s22 }
  0xd8   : > { %1025 = vrot.lane.b32.xlu1 %v991_v16, %s15878_s22  ;;  %1011 = vrot.lane.b32.xlu0 %v984_v17, %s15878_s22  ;;  %v1276_v16 = vmul.f32 %v12380_v43, %v12274_v34  ;;  %v1275_v17 = vmul.f32 %v12380_v43, %v12272_v33 }
  0xdc   : > { %1115 = vrot.lane.b32.xlu1 %v1084_v19, %s15876_s7  ;;  %1027 = vrot.lane.b32.xlu0 %v992_v20, %s15878_s22  ;;  %v1285_v20 = vmul.f32 %v12382_v44, %v12290_v45 }
  0xe0   : > { %1119 = vrot.lane.b32.xlu1 %v1086_v21, %s15876_s7  ;;  %1117 = vrot.lane.b32.xlu0 %v1085_v22, %s15876_s7  ;;  %v1277_v21 = vmul.f32 %v12380_v43, %v12278_v37 }
  0xe4   : > { %1113 = vrot.lane.b32.xlu1 %v1083_v23, %s15876_s7  ;;  %1005 = vrot.lane.b32.xlu0 %v981_v24, %s15878_s22  ;;  %v1388_v24 = vmul.f32 %v12392_v50, %v12272_v33 }
  0xe8   : > { %1015 = vrot.lane.b32.xlu1 %v986_v26, %s15878_s22  ;;  %1013 = vrot.lane.b32.xlu0 %v985_v27, %s15878_s22  ;;  %v1286_v26 = vmul.f32 %v12382_v44, %v12296_v48 }
  0xec   : > { %1105 = vrot.lane.b32.xlu1 %v1079_v29, %s15876_s7  ;;  %1103 = vrot.lane.b32.xlu0 %v1078_v30, %s15876_s7  ;;  %v1390_v29 = vmul.f32 %v12392_v50, %v12278_v37  ;;  %v1389_v30 = vmul.f32 %v12392_v50, %v12274_v34 }
  0xf0   : > { %1121 = vrot.lane.b32.xlu1 %v1087_v31, %s15876_s7  ;;  %1107 = vrot.lane.b32.xlu0 %v1080_v32, %s15876_s7 }
  0xf4   : > { %1211 = vrot.lane.b32.xlu1 %v1180_v39, %s15839_s28  ;;  %1123 = vrot.lane.b32.xlu0 %v1088_v40, %s15876_s7 }
  0xf8   : > { %1215 = vrot.lane.b32.xlu1 %v1182_v41, %s15839_s28  ;;  %1213 = vrot.lane.b32.xlu0 %v1181_v42, %s15839_s28  ;;  %v1279_v41 = vmul.f32 %v12380_v43, %v12296_v48  ;;  %v1278_v42 = vmul.f32 %v12380_v43, %v12290_v45 }
  0xfc   : > { %1209 = vrot.lane.b32.xlu1 %v1179_v46, %s15839_s28  ;;  %1101 = vrot.lane.b32.xlu0 %v1077_v47, %s15876_s7 }
 0x100   : > { %1111 = vrot.lane.b32.xlu1 %v1082_v51, %s15876_s7  ;;  %1109 = vrot.lane.b32.xlu0 %v1081_v52, %s15876_s7  ;;  %v1382_v51 = vmul.f32 %v12390_v49, %v12274_v34  ;;  %v1381_v52 = vmul.f32 %v12390_v49, %v12272_v33 }
 0x104   : > { %1201 = vrot.lane.b32.xlu1 %v1175_v53, %s15839_s28  ;;  %1199 = vrot.lane.b32.xlu0 %v1174_v54, %s15839_s28 }
 0x108   : > { %1217 = vrot.lane.b32.xlu1 %v1183_v57, %s15839_s28  ;;  %1203 = vrot.lane.b32.xlu0 %v1176_v58, %s15839_s28  ;;  %v1391_v57 = vmul.f32 %v12392_v50, %v12290_v45  ;;  %v1383_v58 = vmul.f32 %v12390_v49, %v12278_v37 }
 0x10c   : > { %1318 = vrot.lane.b32.xlu1 %v1282_v61, %s15882_s29  ;;  %1219 = vrot.lane.b32.xlu0 %v1184_v62, %s15839_s28 }
 0x10e   : > { %v12419_v63 = vpop.permute.xlu1 %829  ;;  %v12421_v0 = vpop.permute.xlu0 %827 }
 0x110   : > { %1322 = vrot.lane.b32.xlu1 %v1284_v1, %s15882_s29  ;;  %1320 = vrot.lane.b32.xlu0 %v1283_v2, %s15882_s29  ;;  %v1494_v1 = vmul.f32 %v12402_v56, %v12272_v33  ;;  %v1392_v2 = vmul.f32 %v12392_v50, %v12296_v48 }
 0x112   : > { %v12429_v3 = vpop.permute.xlu0 %831  ;;  %v12431_v4 = vpop.permute.xlu1 %825 }
 0x114   : > { %1316 = vrot.lane.b32.xlu1 %v1281_v5, %s15882_s29  ;;  %1197 = vrot.lane.b32.xlu0 %v1173_v6, %s15839_s28 }
 0x116   : > { %v12438_v7 = vpop.permute.xlu0 %815  ;;  %v12440_v8 = vpop.permute.xlu1 %817 }
 0x118   : > { %1207 = vrot.lane.b32.xlu1 %v1178_v9, %s15839_s28  ;;  %1205 = vrot.lane.b32.xlu0 %v1177_v10, %s15839_s28  ;;  %v1496_v9 = vmul.f32 %v12402_v56, %v12278_v37  ;;  %v1495_v10 = vmul.f32 %v12402_v56, %v12274_v34  ;;  %s16071_s28 = smov 127  }
 0x11a   : > { %v12446_v11 = vpop.permute.xlu0 %819  ;;  %v12448_v15 = vpop.permute.xlu1 %833 }
 0x11c   : > { %1306 = vrot.lane.b32.xlu1 %v1276_v16, %s15882_s29  ;;  %1304 = vrot.lane.b32.xlu0 %v1275_v17, %s15882_s29  ;;  %v1592_v16 = vld [vmem:[%s15919_s1 + $0x8] sm:$0x3] }
 0x11e   : > { %v12456_v18 = vpop.permute.xlu0 %835  ;;  %v12458_v19 = vpop.permute.xlu1 %923 }
 0x120   : > { %1324 = vrot.lane.b32.xlu1 %v1285_v20, %s15882_s29  ;;  %1308 = vrot.lane.b32.xlu0 %v1277_v21, %s15882_s29  ;;  %v1380_v21 = vmul.f32 %v12390_v49, %v12276_v36 }
 0x122   : > { %v12466_v22 = vpop.permute.xlu0 %925  ;;  %v12468_v23 = vpop.permute.xlu1 %927 }
 0x124   : > { %1424 = vrot.lane.b32.xlu1 %v1388_v24, %s15880_s3  ;;  %1326 = vrot.lane.b32.xlu0 %v1286_v26, %s15882_s29 }
 0x126   : > { %v12476_v27 = vpop.permute.xlu1 %921  ;;  %v12478_v28 = vpop.permute.xlu0 %813 }
 0x128   : > { %1428 = vrot.lane.b32.xlu1 %v1390_v29, %s15880_s3  ;;  %1426 = vrot.lane.b32.xlu0 %v1389_v30, %s15880_s3  ;;  %v1384_v29 = vmul.f32 %v12390_v49, %v12290_v45  ;;  %v1493_v30 = vmul.f32 %v12402_v56, %v12276_v36 }
 0x12a   : > { %v12486_v31 = vpop.permute.xlu1 %823  ;;  %v12488_v32 = vpop.permute.xlu0 %821 }
 0x12c   : > { %1422 = vrot.lane.b32.xlu1 %v1387_v35, %s15880_s3  ;;  %1302 = vrot.lane.b32.xlu0 %v1274_v38, %s15882_s29 }
 0x12e   : > { %v12496_v39 = vpop.permute.xlu1 %913  ;;  %v12498_v40 = vpop.permute.xlu0 %911 }
 0x130   : > { %1312 = vrot.lane.b32.xlu1 %v1279_v41, %s15882_s29  ;;  %1310 = vrot.lane.b32.xlu0 %v1278_v42, %s15882_s29  ;;  %v1487_v41 = vmul.f32 %v12400_v55, %v12272_v33  ;;  %v1385_v42 = vmul.f32 %v12390_v49, %v12296_v48 }
 0x132   : > { %v12506_v46 = vpop.permute.xlu1 %929  ;;  %v12508_v47 = vpop.permute.xlu0 %915 }
 0x134   : > { %1412 = vrot.lane.b32.xlu1 %v1382_v51, %s15880_s3  ;;  %1410 = vrot.lane.b32.xlu0 %v1381_v52, %s15880_s3 }
 0x136   : > { %v12516_v53 = vpop.permute.xlu1 %1019  ;;  %v12518_v54 = vpop.permute.xlu0 %931 }
 0x138   : > { %1430 = vrot.lane.b32.xlu1 %v1391_v57, %s15880_s3  ;;  %1414 = vrot.lane.b32.xlu0 %v1383_v58, %s15880_s3  ;;  %v1489_v57 = vmul.f32 %v12400_v55, %v12278_v37  ;;  %v1488_v58 = vmul.f32 %v12400_v55, %v12274_v34 }
 0x13a   : > { %v12526_v61 = vpop.permute.xlu1 %1023  ;;  %v12528_v62 = vpop.permute.xlu0 %1021 }
 0x13c   : > { %1530 = vrot.lane.b32.xlu1 %v1494_v1, %s15886_s0  ;;  %1432 = vrot.lane.b32.xlu0 %v1392_v2, %s15880_s3 }
 0x13e   : > { %v12536_v5 = vpop.permute.xlu1 %1017  ;;  %v12538_v6 = vpop.permute.xlu0 %909 }
 0x140   : > { %1534 = vrot.lane.b32.xlu1 %v1496_v9, %s15886_s0  ;;  %1532 = vrot.lane.b32.xlu0 %v1495_v10, %s15886_s0  ;;  %v1498_v9 = vmul.f32 %v12402_v56, %v12296_v48  ;;  %v1497_v10 = vmul.f32 %v12402_v56, %v12290_v45 }
 0x142   : > { %v12549_v17 = vpop.permute.xlu1 %919  ;;  %v12551_v20 = vpop.permute.xlu0 %917 }
 0x144   : > { %1408 = vrot.lane.b32.xlu1 %v1380_v21, %s15880_s3  ;;  %1600 = vperm.xlu0 %12035, %v1592_v16   ;;  %v1616_v16 = vld [vmem:[%s15920_s24 + $0x8] sm:$0x3]  ;;  %v1591_v21 = vld [vmem:[%s15919_s1] sm:$0xff]  ;;  %s15898_s1 = smov 16  }
 0x146   : > { %v12556_v24 = vpop.permute.xlu1 %1009  ;;  %v12558_v26 = vpop.permute.xlu0 %1007 }
 0x148   : > { %1416 = vrot.lane.b32.xlu1 %v1384_v29, %s15880_s3  ;;  %1528 = vrot.lane.b32.xlu0 %v1493_v30, %s15886_s0 }
 0x14a   : > { %v12566_v35 = vpop.permute.xlu1 %1025  ;;  %v12568_v38 = vpop.permute.xlu0 %1011 }
 0x14c   : > { %1516 = vrot.lane.b32.xlu1 %v1487_v41, %s15886_s0  ;;  %1418 = vrot.lane.b32.xlu0 %v1385_v42, %s15880_s3 }
 0x14e   : > { %v12576_v51 = vpop.permute.xlu1 %1115  ;;  %v12578_v52 = vpop.permute.xlu0 %1027 }
 0x150   : > { %1520 = vrot.lane.b32.xlu1 %v1489_v57, %s15886_s0  ;;  %1518 = vrot.lane.b32.xlu0 %v1488_v58, %s15886_s0  ;;  %v1490_v57 = vmul.f32 %v12400_v55, %v12290_v45  ;;  %v1486_v58 = vmul.f32 %v12400_v55, %v12276_v36 }
 0x152   : > { %v12586_v1 = vpop.permute.xlu1 %1119  ;;  %v12588_v2 = vpop.permute.xlu0 %1117 }
 0x154   : > { %1538 = vrot.lane.b32.xlu1 %v1498_v9, %s15886_s0  ;;  %1536 = vrot.lane.b32.xlu0 %v1497_v10, %s15886_s0  ;;  %v1615_v9 = vld [vmem:[%s15920_s24] sm:$0xff] }
 0x156   : > { %v12602_v29 = vpop.permute.xlu1 %1113  ;;  %v12604_v30 = vpop.permute.xlu0 %1005 }
 0x158   : > { %1624 = vperm.xlu1 %12036, %v1616_v16   ;;  %1595 = vperm.xlu0 %12035, %v1591_v21   ;;  %v1491_v21 = vmul.f32 %v12400_v55, %v12296_v48 }
 0x15a   : > { %v12606_v41 = vpop.permute.xlu1 %1015  ;;  %v12608_v42 = vpop.permute.xlu0 %1013 }
 0x15c   : > { %1522 = vrot.lane.b32.xlu1 %v1490_v57, %s15886_s0  ;;  %1514 = vrot.lane.b32.xlu0 %v1486_v58, %s15886_s0  ;;  %v1280_v57 = vmul.f32 %v12251_v25, %v12380_v43  ;;  %v1287_v58 = vmul.f32 %v12251_v25, %v12382_v44 }
 0x15e   : > { %v12619_v10 = vpop.permute.xlu1 %1105  ;;  %v12621_v16 = vpop.permute.xlu0 %1103 }
 0x160   : > { %1619 = vperm.xlu1 %12036, %v1615_v9   ;;  %1524 = vrot.lane.b32.xlu0 %v1491_v21, %s15886_s0  ;;  %v1386_v9 = vmul.f32 %v12390_v49, %v12251_v25  ;;  %v1393_v21 = vmul.f32 %v12392_v50, %v12251_v25 }
 0x162   : > { %v12626_v14 = vpop.permute.xlu1 %1121  ;;  %v12628_v13 = vpop.permute.xlu0 %1107 }
 0x163   : > { %15921 = vst [vmem:[#allocation7_spill] sm:$0xff] %v12628_v13 }
 0x164   : > { %1314 = vrot.lane.b32.xlu1 %v1280_v57, %s15882_s29  ;;  %1328 = vrot.lane.b32.xlu0 %v1287_v58, %s15882_s29  ;;  %v1492_v57 = vmul.f32 %v12400_v55, %v12251_v25  ;;  %v1499_v58 = vmul.f32 %v12402_v56, %v12251_v25 }
 0x166   : > { %v12636_v12 = vpop.permute.xlu1 %1211  ;;  %v12638_v48 = vpop.permute.xlu0 %1123 }
 0x167   : > { %15922 = vst [vmem:[#allocation8_spill] sm:$0xff] %v12636_v12  ;;  %15923 = vst [vmem:[#allocation9_spill] sm:$0xff] %v12638_v48 }
 0x168   : > { %1420 = vrot.lane.b32.xlu1 %v1386_v9, %s15880_s3  ;;  %1434 = vrot.lane.b32.xlu0 %v1393_v21, %s15880_s3 }
 0x16a   : > { %v12646_v43 = vpop.permute.xlu1 %1215  ;;  %v12648_v44 = vpop.permute.xlu0 %1213 }
 0x16b   : > { %15924 = vst [vmem:[#allocation10_spill] sm:$0xff] %v12646_v43  ;;  %15925 = vst [vmem:[#allocation11_spill] sm:$0xff] %v12648_v44 }
 0x16c   : > { %1526 = vrot.lane.b32.xlu1 %v1492_v57, %s15886_s0  ;;  %1540 = vrot.lane.b32.xlu0 %v1499_v58, %s15886_s0 }
 0x16e   : > { %v12656_v49 = vpop.permute.xlu1 %1209  ;;  %v12658_v50 = vpop.permute.xlu0 %1101 }
 0x16f   : > { %15926 = vst [vmem:[#allocation12_spill] sm:$0xff] %v12656_v49  ;;  %15927 = vst [vmem:[#allocation13_spill] sm:$0xff] %v12658_v50 }
 0x172   : > { %v12660_v9 = vpop.permute.xlu1 %1111  ;;  %v12662_v21 = vpop.permute.xlu0 %1109 }
 0x173   : > { %15928 = vst [vmem:[#allocation14_spill] sm:$0xff] %v12660_v9  ;;  %15929 = vst [vmem:[#allocation15_spill] sm:$0xff] %v12662_v21 }
 0x176   : > { %v12664_v43 = vpop.permute.xlu1 %1201  ;;  %v12666_v12 = vpop.permute.xlu0 %1199 }
 0x177   : > { %15930 = vst [vmem:[#allocation16_spill] sm:$0xff] %v12664_v43  ;;  %15931 = vst [vmem:[#allocation17_spill] sm:$0xff] %v12666_v12 }
 0x17a   : > { %v12668_v55 = vpop.permute.xlu1 %1217  ;;  %v12670_v44 = vpop.permute.xlu0 %1203 }
 0x17b   : > { %15932 = vst [vmem:[#allocation18_spill] sm:$0xff] %v12668_v55  ;;  %15933 = vst [vmem:[#allocation19_spill] sm:$0xff] %v12670_v44 }
 0x17e   : > { %v12672_v25 = vpop.permute.xlu1 %1318  ;;  %v12674_v56 = vpop.permute.xlu0 %1219 }
 0x17f   : > { %15934 = vst [vmem:[#allocation20_spill] sm:$0xff] %v12672_v25  ;;  %15935 = vst [vmem:[#allocation21_spill] sm:$0xff] %v12674_v56 }
 0x182   : > { %v12676_v57 = vpop.permute.xlu1 %1322  ;;  %v12678_v58 = vpop.permute.xlu0 %1320 }
 0x183   : > { %15936 = vst [vmem:[#allocation22_spill] sm:$0xff] %v12676_v57  ;;  %15937 = vst [vmem:[#allocation23_spill] sm:$0xff] %v12678_v58 }
 0x186   : > { %v12680_v50 = vpop.permute.xlu1 %1316  ;;  %v12682_v9 = vpop.permute.xlu0 %1197 }
 0x187   : > { %15938 = vst [vmem:[#allocation24_spill] sm:$0xff] %v12680_v50  ;;  %15939 = vst [vmem:[#allocation25_spill] sm:$0xff] %v12682_v9 }
 0x18a   : > { %v12684_v21 = vpop.permute.xlu1 %1207  ;;  %v12686_v43 = vpop.permute.xlu0 %1205 }
 0x18b   : > { %15940 = vst [vmem:[#allocation26_spill] sm:$0xff] %v12684_v21  ;;  %15941 = vst [vmem:[#allocation27_spill] sm:$0xff] %v12686_v43 }
 0x18e   : > { %v12688_v12 = vpop.permute.xlu1 %1306  ;;  %v12690_v55 = vpop.permute.xlu0 %1304 }
 0x18f   : > { %15942 = vst [vmem:[#allocation28_spill] sm:$0xff] %v12688_v12  ;;  %15943 = vst [vmem:[#allocation29_spill] sm:$0xff] %v12690_v55 }
 0x192   : > { %v12692_v44 = vpop.permute.xlu1 %1324  ;;  %v12694_v25 = vpop.permute.xlu0 %1308 }
 0x193   : > { %15944 = vst [vmem:[#allocation30_spill] sm:$0xff] %v12692_v44  ;;  %15945 = vst [vmem:[#allocation31_spill] sm:$0xff] %v12694_v25 }
 0x196   : > { %v12696_v56 = vpop.permute.xlu1 %1424  ;;  %v12698_v57 = vpop.permute.xlu0 %1326 }
 0x197   : > { %15946 = vst [vmem:[#allocation32_spill] sm:$0xff] %v12696_v56  ;;  %15947 = vst [vmem:[#allocation33_spill] sm:$0xff] %v12698_v57  ;;  %v759_v57 = vmul.f32 %v12272_v33, %v12410_v59  ;;  %v762_v56 = vmul.f32 %v12290_v45, %v12410_v59 }
 0x19a   : > { %v12700_v58 = vpop.permute.xlu1 %1428  ;;  %v12702_v50 = vpop.permute.xlu0 %1426 }
 0x19b   : > { %15948 = vst [vmem:[#allocation34_spill] sm:$0xff] %v12700_v58  ;;  %15949 = vst [vmem:[#allocation35_spill] sm:$0xff] %v12702_v50  ;;  %v760_v58 = vmul.f32 %v12274_v34, %v12410_v59 }
 0x19e   : > { %v12704_v9 = vpop.permute.xlu1 %1422  ;;  %v12706_v21 = vpop.permute.xlu0 %1302 }
 0x19f   : > { %15950 = vst [vmem:[#allocation36_spill] sm:$0xff] %v12704_v9  ;;  %15951 = vst [vmem:[#allocation37_spill] sm:$0xff] %v12706_v21  ;;  %v843_v21 = vsel %vm837_vm1, %v12431_v4, %v12421_v0  ;;  %v761_v9 = vmul.f32 %v12278_v37, %v12410_v59  ;;  %v840_v4 = vsel %vm837_vm1, %v12440_v8, %v12446_v11 }
 0x1a2   : > { %v12708_v43 = vpop.permute.xlu1 %1312  ;;  %v12710_v12 = vpop.permute.xlu0 %1310 }
 0x1a3   : > { %15952 = vst [vmem:[#allocation38_spill] sm:$0xff] %v12708_v43  ;;  %15953 = vst [vmem:[#allocation39_spill] sm:$0xff] %v12710_v12  ;;  %v844_v43 = vsel %vm837_vm1, %v12421_v0, %v12419_v63  ;;  %v758_v12 = vmul.f32 %v12276_v36, %v12410_v59  ;;  %v756_v59 = vmul.f32 %v12290_v45, %v12412_v60 }
 0x1a4   : > { %v867_v0 = vadd.f32 %v844_v43, %v759_v57  ;;  %v941_v45 = vsel %vm933_vm2, %v12466_v22, %v12468_v23 }
 0x1a5   : > { %v866_v13 = vadd.f32 %v843_v21, %v758_v12  ;;  %v939_v12 = vsel %vm933_vm2, %v12476_v27, %v12458_v19 }
 0x1a6   : > { %v12712_v55 = vpop.permute.xlu1 %1412  ;;  %v12714_v25 = vpop.permute.xlu0 %1410 }
 0x1a7   : > { %15954 = vst [vmem:[#allocation40_spill] sm:$0xff] %v12712_v55  ;;  %15955 = vst [vmem:[#allocation41_spill] sm:$0xff] %v12714_v25  ;;  %v753_v55 = vmul.f32 %v12272_v33, %v12412_v60  ;;  %v845_v25 = vsel %vm837_vm1, %v12419_v63, %v12429_v3  ;;  %v839_v33 = vsel %vm837_vm1, %v12438_v7, %v12440_v8 }
 0x1a8   : > { %v755_v63 = vmul.f32 %v12278_v37, %v12412_v60  ;;  %v868_v48 = vadd.f32 %v845_v25, %v760_v58  ;;  %v847_v37 = vsel %vm837_vm1, %v12448_v15, %v12456_v18  ;;  %v940_v8 = vsel %vm933_vm2, %v12458_v19, %v12466_v22 }
 0x1a9   : > { %v861_v43 = vadd.f32 %v839_v33, %v753_v55  ;;  %v842_v55 = vsel %vm837_vm1, %v12488_v32, %v12486_v31  ;;  %v870_v57 = vadd.f32 %v847_v37, %v762_v56  ;;  %v935_v19 = vsel %vm933_vm2, %v12498_v40, %v12496_v39 }
 0x1aa   : > { %v12716_v44 = vpop.permute.xlu1 %1430  ;;  %v12755_v49 = vpop.permute.xlu0 %1414  ;;  %v963_v27 = vadd.f32 %v940_v8, %v867_v0  ;;  %v943_v56 = vsel %vm933_vm2, %v12506_v46, %v12518_v54  ;;  %v1031_v0 = vsel %vm1029_vm3, %v12558_v26, %v12556_v24  ;;  %v1132_v8 = vsel %vm1125_vm4, %v12576_v51, %v12588_v2 }
 0x1ab   : > { %15956 = vst [vmem:[#allocation42_spill] sm:$0xff] %v12716_v44  ;;  %v754_v44 = vmul.f32 %v12274_v34, %v12412_v60  ;;  %v752_v34 = vmul.f32 %v12276_v36, %v12412_v60  ;;  %v846_v36 = vsel %vm837_vm1, %v12429_v3, %v12448_v15  ;;  %v838_v3 = vsel %vm837_vm1, %v12478_v28, %v12438_v7 }
 0x1ac   : > { %v841_v15 = vsel %vm837_vm1, %v12446_v11, %v12488_v32  ;;  %v869_v22 = vadd.f32 %v846_v36, %v761_v9  ;;  %v942_v7 = vsel %vm933_vm2, %v12468_v23, %v12506_v46  ;;  %v964_v28 = vadd.f32 %v941_v45, %v868_v48 }
 0x1ad   : > { %v862_v21 = vadd.f32 %v840_v4, %v754_v44  ;;  %v962_v44 = vadd.f32 %v939_v12, %v866_v13  ;;  %v936_v11 = vsel %vm933_vm2, %v12496_v39, %v12508_v47  ;;  %v860_v32 = vadd.f32 %v838_v3, %v752_v34 }
 0x1ae   : > { %v12748_v50 = vpop.permute.xlu1 %1530  ;;  %v863_v58 = vadd.f32 %v841_v15, %v755_v63  ;;  %v864_v9 = vadd.f32 %v842_v55, %v756_v59  ;;  %v12795_v33 = vpop.permute.xlu0 %1432  ;;  %v957_v4 = vadd.f32 %v935_v19, %v861_v43  ;;  %v965_v36 = vadd.f32 %v942_v7, %v869_v22 }
 0x1af   : > { %v1036_v13 = vsel %vm1029_vm3, %v12516_v53, %v12528_v62  ;;  %v1037_v48 = vsel %vm1029_vm3, %v12528_v62, %v12526_v61  ;;  %v958_v23 = vadd.f32 %v936_v11, %v862_v21  ;;  %v1035_v59 = vsel %vm1029_vm3, %v12536_v5, %v12516_v53  ;;  %v15960_v11 = vld [vmem:[#allocation8_spill] sm:$0xff] }
 0x1b0   : > { %v934_v39 = vsel %vm933_vm2, %v12538_v6, %v12498_v40  ;;  %v937_v46 = vsel %vm933_vm2, %v12508_v47, %v12551_v20  ;;  %v966_v63 = vadd.f32 %v943_v56, %v870_v57  ;;  %v938_v62 = vsel %vm933_vm2, %v12551_v20, %v12549_v17 }
 0x1b1   : > { %v1038_v53 = vsel %vm1029_vm3, %v12526_v61, %v12566_v35  ;;  %v1059_v40 = vadd.f32 %v1036_v13, %v963_v27  ;;  %v1060_v5 = vadd.f32 %v1037_v48, %v964_v28  ;;  %v1032_v47 = vsel %vm1029_vm3, %v12556_v24, %v12568_v38 }
 0x1b2   : > { %v12781_v25 = vpop.permute.xlu1 %1534  ;;  %v1039_v6 = vsel %vm1029_vm3, %v12566_v35, %v12578_v52  ;;  %v1058_v20 = vadd.f32 %v1035_v59, %v962_v44  ;;  %v956_v37 = vadd.f32 %v934_v39, %v860_v32  ;;  %v959_v43 = vadd.f32 %v937_v46, %v863_v58  ;;  %v12835_v24 = vpop.permute.xlu0 %1532  ;;  %v15959_v44 = vld [vmem:[#allocation11_spill] sm:$0xff]  ;;  %v15961_v58 = vld [vmem:[#allocation10_spill] sm:$0xff]  ;;  %v15963_v59 = vld [vmem:[#allocation13_spill] sm:$0xff] }
 0x1b3   : > { %v960_v45 = vadd.f32 %v938_v62, %v864_v9  ;;  %v1053_v61 = vadd.f32 %v1031_v0, %v957_v4  ;;  %v1061_v12 = vadd.f32 %v1038_v53, %v965_v36  ;;  %v1133_v21 = vsel %vm1125_vm4, %v12588_v2, %v12586_v1  ;;  %v15964_v62 = vld [vmem:[#allocation15_spill] sm:$0xff]  ;;  %v15965_v53 = vld [vmem:[#allocation14_spill] sm:$0xff] }
 0x1b4   : > { %v1054_v3 = vadd.f32 %v1032_v47, %v958_v23  ;;  %v1062_v35 = vadd.f32 %v1039_v6, %v966_v63  ;;  %v1131_v15 = vsel %vm1125_vm4, %v12602_v29, %v12576_v51  ;;  %v1030_v55 = vsel %vm1029_vm3, %v12604_v30, %v12558_v26  ;;  %v15957_v29 = vld [vmem:[#allocation7_spill] sm:$0xff]  ;;  %v15958_v30 = vld [vmem:[#allocation9_spill] sm:$0xff]  ;;  %v15966_v47 = vld [vmem:[#allocation16_spill] sm:$0xff] }
 0x1b5   : > { %v1155_v22 = vadd.f32 %v1132_v8, %v1059_v40  ;;  %v1033_v57 = vsel %vm1029_vm3, %v12568_v38, %v12608_v42  ;;  %v1034_v2 = vsel %vm1029_vm3, %v12608_v42, %v12606_v41  ;;  %v1127_v19 = vsel %vm1125_vm4, %v12621_v16, %v12619_v10  ;;  %v15967_v6 = vld [vmem:[#allocation17_spill] sm:$0xff] }
 0x1b6   : > { %v12812_v34 = vpop.permute.xlu1 %1408  ;;  %v1156_v51 = vadd.f32 %v1133_v21, %v1060_v5  ;;  %v1134_v26 = vsel %vm1125_vm4, %v12586_v1, %v12626_v14  ;;  %v1128_v38 = vsel %vm1125_vm4, %v12619_v10, %v15957_v29  ;;  %v1135_v42 = vsel %vm1125_vm4, %v12626_v14, %v15958_v30  ;;  %v15962_v10 = vld [vmem:[#allocation12_spill] sm:$0xff]  ;;  %v15970_v21 = vld [vmem:[#allocation21_spill] sm:$0xff] }
 0x1b7   : > { %v1154_v27 = vadd.f32 %v1131_v15, %v1058_v20  ;;  %v1052_v28 = vadd.f32 %v1030_v55, %v956_v37  ;;  %v1228_v32 = vsel %vm1221_vm5, %v15960_v11, %v15959_v44  ;;  %v1229_v9 = vsel %vm1221_vm5, %v15959_v44, %v15961_v58  ;;  %v15968_v37 = vld [vmem:[#allocation18_spill] sm:$0xff]  ;;  %v15972_v15 = vld [vmem:[#allocation20_spill] sm:$0xff]  ;;  %v15976_v44 = vld [vmem:[#allocation35_spill] sm:$0xff] }
 0x1b8   : > { %v1055_v1 = vadd.f32 %v1033_v57, %v959_v43  ;;  %v1056_v4 = vadd.f32 %v1034_v2, %v960_v45  ;;  %v1149_v36 = vadd.f32 %v1127_v19, %v1053_v61  ;;  %v1227_v13 = vsel %vm1221_vm5, %v15962_v10, %v15960_v11  ;;  %v15977_v11 = vld [vmem:[#allocation32_spill] sm:$0xff] }
 0x1b9   : > { %v1157_v14 = vadd.f32 %v1134_v26, %v1061_v12  ;;  %v1150_v48 = vadd.f32 %v1128_v38, %v1054_v3  ;;  %v1158_v23 = vadd.f32 %v1135_v42, %v1062_v35  ;;  %v1126_v39 = vsel %vm1125_vm4, %v15963_v59, %v12621_v16  ;;  %v15969_v16 = vld [vmem:[#allocation19_spill] sm:$0xff] }
 0x1ba   : > { %v12852_v7 = vpop.permute.xlu1 %1416  ;;  %v1251_v46 = vadd.f32 %v1228_v32, %v1155_v22  ;;  %v1252_v63 = vadd.f32 %v1229_v9, %v1156_v51  ;;  %v1129_v0 = vsel %vm1125_vm4, %v15957_v29, %v15964_v62  ;;  %v1130_v40 = vsel %vm1125_vm4, %v15964_v62, %v15965_v53  ;;  %v15971_v35 = vld [vmem:[#allocation23_spill] sm:$0xff]  ;;  %v15973_v22 = vld [vmem:[#allocation22_spill] sm:$0xff]  ;;  %v15974_v51 = vld [vmem:[#allocation24_spill] sm:$0xff] }
 0x1bb   : > { %v1250_v5 = vadd.f32 %v1227_v13, %v1154_v27  ;;  %v1223_v20 = vsel %vm1221_vm5, %v15967_v6, %v15966_v47  ;;  %v1230_v43 = vsel %vm1221_vm5, %v15961_v58, %v15968_v37  ;;  %v1224_v8 = vsel %vm1221_vm5, %v15966_v47, %v15969_v16  ;;  %v15975_v29 = vld [vmem:[#allocation25_spill] sm:$0xff]  ;;  %v15979_v62 = vld [vmem:[#allocation27_spill] sm:$0xff] }
 0x1bc   : > { %v1148_v12 = vadd.f32 %v1126_v39, %v1052_v28  ;;  %v1231_v3 = vsel %vm1221_vm5, %v15968_v37, %v15970_v21  ;;  %v1338_v55 = vsel %vm1330_vm6, %v15972_v15, %v15971_v35  ;;  %v1339_v57 = vsel %vm1330_vm6, %v15971_v35, %v15973_v22  ;;  %v15984_v37 = vld [vmem:[#allocation31_spill] sm:$0xff] }
 0x1bd   : > { %v1151_v2 = vadd.f32 %v1129_v0, %v1055_v1  ;;  %v12903_v19 = vadd.f32 %v1130_v40, %v1056_v4  ;;  %v1337_v26 = vsel %vm1330_vm6, %v15974_v51, %v15972_v15  ;;  %v1222_v38 = vsel %vm1221_vm5, %v15975_v29, %v15967_v6  ;;  %v15978_v4 = vld [vmem:[#allocation34_spill] sm:$0xff]  ;;  %v15982_v0 = vld [vmem:[#allocation36_spill] sm:$0xff]  ;;  %v15987_v51 = vld [vmem:[#allocation37_spill] sm:$0xff] }
 0x1be   : > { %v12892_v45 = vpop.permute.xlu1 %1516  ;;  %v1245_v42 = vadd.f32 %v1223_v20, %v1149_v36  ;;  %v1253_v27 = vadd.f32 %v1230_v43, %v1157_v14  ;;  %v1246_v28 = vadd.f32 %v1224_v8, %v1150_v48  ;;  %v1444_v32 = vsel %vm1436_vm7, %v15977_v11, %v15976_v44  ;;  %v15980_v48 = vld [vmem:[#allocation28_spill] sm:$0xff]  ;;  %v15983_v6 = vld [vmem:[#allocation30_spill] sm:$0xff] }
 0x1bf   : > { %v12869_v56 = vpop.permute.xlu0 %1600  ;;  %v1254_v58 = vadd.f32 %v1231_v3, %v1158_v23  ;;  %v1362_v9 = vadd.f32 %v1338_v55, %v1251_v46  ;;  %v1363_v1 = vadd.f32 %v1339_v57, %v1252_v63  ;;  %v1445_v10 = vsel %vm1436_vm7, %v15976_v44, %v15978_v4  ;;  %v15981_v23 = vld [vmem:[#allocation29_spill] sm:$0xff]  ;;  %v15986_v3 = vld [vmem:[#allocation26_spill] sm:$0xff]  ;;  %v15988_v29 = vld [vmem:[#allocation40_spill] sm:$0xff] }
 0x1c0   : > { %v1361_v59 = vadd.f32 %v1337_v26, %v1250_v5  ;;  %v1244_v39 = vadd.f32 %v1222_v38, %v1148_v12  ;;  %v1225_v36 = vsel %vm1221_vm5, %v15969_v16, %v15979_v62  ;;  %v1550_v14 = vsel %vm1542_vm8, %v12748_v50, %v12835_v24  ;;  %v15985_v16 = vld [vmem:[#allocation33_spill] sm:$0xff] }
 0x1c1   : > { %v1332_v46 = vsel %vm1330_vm6, %v15981_v23, %v15980_v48  ;;  %v1468_v63 = vadd.f32 %v1444_v32, %v1362_v9  ;;  %v1443_v40 = vsel %vm1436_vm7, %v15982_v0, %v15977_v11  ;;  %v1551_v5 = vsel %vm1542_vm8, %v12835_v24, %v12781_v25  ;;  %v15989_v38 = vld [vmem:[#allocation41_spill] sm:$0xff] }
 0x1c2   : > { %v12934_v47 = vpop.permute.xlu1 %1520  ;;  %v1340_v20 = vsel %vm1330_vm6, %v15973_v22, %v15983_v6  ;;  %v1333_v43 = vsel %vm1330_vm6, %v15980_v48, %v15984_v37  ;;  %v1341_v8 = vsel %vm1330_vm6, %v15983_v6, %v15985_v16  ;;  %v1469_v12 = vadd.f32 %v1445_v10, %v1363_v1 }
 0x1c3   : > { %v1529_v61 = vpop.permute.xlu0 %1528  ;;  %v1226_v35 = vsel %vm1221_vm5, %v15979_v62, %v15986_v3  ;;  %v1247_v24 = vadd.f32 %v1225_v36, %v1151_v2  ;;  %v1574_v15 = vadd.f32 %v1550_v14, %v1468_v63  ;;  %v1467_v22 = vadd.f32 %v1443_v40, %v1361_v59  ;;  %v15990_v2 = vld [vmem:[#allocation42_spill] sm:$0xff]  ;;  %v15991_v14 = vld [vmem:[#allocation39_spill] sm:$0xff] }
 0x1c4   : > { %v1549_v55 = vsel %vm1542_vm8, %v1529_v61, %v12748_v50  ;;  %v1331_v26 = vsel %vm1330_vm6, %v15987_v51, %v15981_v23  ;;  %v1438_v44 = vsel %vm1436_vm7, %v15989_v38, %v15988_v29  ;;  %v1575_v11 = vadd.f32 %v1551_v5, %v1469_v12 }
 0x1c5   : > { %v1356_v32 = vadd.f32 %v1332_v46, %v1245_v42  ;;  %v1364_v9 = vadd.f32 %v1340_v20, %v1253_v27  ;;  %v1357_v1 = vadd.f32 %v1333_v43, %v1246_v28  ;;  %v1365_v10 = vadd.f32 %v1341_v8, %v1254_v58 }
 0x1c6   : > { %v1446_v62 = vsel %vm1436_vm7, %v15978_v4, %v15990_v2  ;;  %v1439_v50 = vsel %vm1436_vm7, %v15988_v29, %v12755_v49  ;;  %v1447_v61 = vsel %vm1436_vm7, %v15990_v2, %v12795_v33  ;;  %v1573_v59 = vadd.f32 %v1549_v55, %v1467_v22  ;;  %v12968_v58 = vpop.permute.xlu1 %1538  ;;  %v15992_v29 = vld [vmem:[#allocation6_spill] sm:$0xff] }
 0x1c7   : > { %v12917_v13 = vpop.permute.xlu0 %1418  ;;  %v1355_v36 = vadd.f32 %v1331_v26, %v1244_v39  ;;  %v1334_v42 = vsel %vm1330_vm6, %v15984_v37, %v15991_v14  ;;  %v1462_v27 = vadd.f32 %v1438_v44, %v1356_v32  ;;  %v1586_v28 = vmax.f32 %v1574_v15, 0.0  ;;  %v15994_v32 = vld [vmem:[#allocation38_spill] sm:$0xff] }
 0x1c8   : > { %v1587_v4 = vmax.f32 %v1575_v11, 0.0  ;;  %v1470_v39 = vadd.f32 %v1446_v62, %v1364_v9  ;;  %v1463_v0 = vadd.f32 %v1439_v50, %v1357_v1  ;;  %v1471_v40 = vadd.f32 %v1447_v61, %v1365_v10 }
 0x1c9   : > { %v1437_v6 = vsel %vm1436_vm7, %v12812_v34, %v15989_v38  ;;  %v1610_v20 = vmul.f32 %v12869_v56, %v1586_v28  ;;  %v1585_v43 = vmax.f32 %v1573_v59, 0.0  ;;  %v15993_v38 = vld [vmem:[#allocation5_spill] sm:$0xff]  ;;  %v1248_v11 = vadd.f32 %v1226_v35, %v12903_v19 }
 0x1ca   : > { %v1611_v37 = vmul.f32 %v12869_v56, %v1587_v4  ;;  %v763_v44 = vmul.f32 %v15993_v38, %v15992_v29  ;;  %v1335_v9 = vsel %vm1330_vm6, %v15991_v14, %v15994_v32 }
 0x1cb   : > { %v1519_v57 = vpop.permute.xlu0 %1518  ;;  %v1609_v10 = vmul.f32 %v12869_v56, %v1585_v43 }
 0x1cc   : > { %v1544_v23 = vsel %vm1542_vm8, %v12892_v45, %v1519_v57  ;;  %v1545_v5 = vsel %vm1542_vm8, %v1519_v57, %v12934_v47  ;;  %v1358_v57 = vadd.f32 %v1334_v42, %v1247_v24  ;;  %v1461_v24 = vadd.f32 %v1437_v6, %v1355_v36 }
 0x1cd   : > { %v1568_v8 = vadd.f32 %v1544_v23, %v1462_v27  ;;  %v1569_v51 = vadd.f32 %v1545_v5, %v1463_v0  ;;  %v1359_v42 = vadd.f32 %v1335_v9, %v1248_v11 }
 0x1cf   : > { %v1537_v48 = vpop.permute.xlu0 %1536  ;;  %v1580_v2 = vmax.f32 %v1568_v8, 0.0  ;;  %v1581_v61 = vmax.f32 %v1569_v51, 0.0 }
 0x1d0   : > { %v1552_v46 = vsel %vm1542_vm8, %v12781_v25, %v1537_v48  ;;  %v1553_v63 = vsel %vm1542_vm8, %v1537_v48, %v12968_v58  ;;  %v1440_v25 = vsel %vm1436_vm7, %v12755_v49, %v12852_v7  ;;  %v757_v49 = vmul.f32 %v15993_v38, %v12412_v60 }
 0x1d1   : > { %v1576_v12 = vadd.f32 %v1552_v46, %v1470_v39  ;;  %v1577_v15 = vadd.f32 %v1553_v63, %v1471_v40  ;;  %v1464_v1 = vadd.f32 %v1440_v25, %v1358_v57  ;;  %v1441_v60 = vsel %vm1436_vm7, %v12852_v7, %v12917_v13 }
 0x1d2   : > { %v871_v7 = vadd.f32 %v12456_v18, %v763_v44  ;;  %v865_v48 = vadd.f32 %v12486_v31, %v757_v49  ;;  %v1465_v46 = vadd.f32 %v1441_v60, %v1359_v42  ;;  %v15888_v57 = vmov 0.0  }
 0x1d3   : > { %v12986_v55 = vpop.permute.xlu1 %1624  ;;  %v12988_v22 = vpop.permute.xlu0 %1595  ;;  %v1588_v19 = vmax.f32 %v1576_v12, 0.0  ;;  %v1589_v35 = vmax.f32 %v1577_v15, 0.0  ;;  %1780 = vmatprep.mubr.f32.mxu0 %v15888_v57  ;;  %1857 = vmatprep.mubr.f32.mxu1 %v15888_v57 }
 0x1d4   : > { %v12991_v34 = vadd.f32 %v12986_v55, %v1610_v20  ;;  %v12994_v26 = vadd.f32 %v12986_v55, %v1611_v37  ;;  %v13013_v59 = vadd.f32 %v12986_v55, %v1609_v10  ;;  %v1604_v4 = vmul.f32 %v12988_v22, %v1580_v2 }
 0x1d5   : > { %v1605_v23 = vmul.f32 %v12988_v22, %v1581_v61  ;;  %v1613_v63 = vmul.f32 %v12869_v56, %v1589_v35  ;;  %v967_v6 = vadd.f32 %v12518_v54, %v871_v7  ;;  %v961_v20 = vadd.f32 %v12549_v17, %v865_v48 }
 0x1d6   : > { %1672 = vrot.lane.b32.xlu1 %v12994_v26, %s15890_s27  ;;  %1670 = vrot.lane.b32.xlu0 %v12991_v34, %s15890_s27 }
 0x1d7   : > { %v1523_v62 = vpop.permute.xlu1 %1522  ;;  %v1515_v50 = vpop.permute.xlu0 %1514  ;;  %v1063_v43 = vadd.f32 %v12578_v52, %v967_v6  ;;  %v1057_v25 = vadd.f32 %v12606_v41, %v961_v20  ;;  %v13047_v17 = vadd.f32 %v12986_v55, %v1613_v63  ;;  %v11428_v20 = vld [vmem:[%s15996_s2 + $0x18] sm:$0x3] }
 0x1d8   : > { %v1546_v36 = vsel %vm1542_vm8, %v12934_v47, %v1523_v62  ;;  %v1543_v14 = vsel %vm1542_vm8, %v1515_v50, %v12892_v45  ;;  %v1612_v47 = vmul.f32 %v12869_v56, %v1588_v19 }
 0x1d9   : > { %v1570_v27 = vadd.f32 %v1546_v36, %v1464_v1  ;;  %v1567_v28 = vadd.f32 %v1543_v14, %v1461_v24  ;;  %v1159_v41 = vadd.f32 %v15958_v30, %v1063_v43  ;;  %v1153_v29 = vadd.f32 %v15965_v53, %v1057_v25 }
 0x1da   : > { %1668 = vrot.lane.b32.xlu0 %v13013_v59, %s15890_s27  ;;  %v13044_v54 = vadd.f32 %v12986_v55, %v1612_v47 }
 0x1db   : > { %v1579_v45 = vmax.f32 %v1567_v28, 0.0  ;;  %v1620_v39 = vpop.permute.xlu1 %1619  ;;  %v1525_v0 = vpop.permute.xlu0 %1524  ;;  %v1582_v40 = vmax.f32 %v1570_v27, 0.0  ;;  %v1255_v49 = vadd.f32 %v15970_v21, %v1159_v41  ;;  %v1249_v11 = vadd.f32 %v15986_v3, %v1153_v29 }
 0x1dc   : > { %v13027_v5 = vadd.f32 %v1620_v39, %v1604_v4  ;;  %v13029_v18 = vadd.f32 %v1620_v39, %v1605_v23  ;;  %v1547_v31 = vsel %vm1542_vm8, %v1523_v62, %v1525_v0 }
 0x1dd   : > { %v1571_v37 = vadd.f32 %v1547_v31, %v1465_v46  ;;  %v1603_v8 = vmul.f32 %v12988_v22, %v1579_v45  ;;  %v1606_v51 = vmul.f32 %v12988_v22, %v1582_v40 }
 0x1de   : > { %1658 = vrot.lane.b32.xlu1 %v13027_v5, %s15890_s27  ;;  %1660 = vrot.lane.b32.xlu0 %v13029_v18, %s15890_s27 }
 0x1df   : > { %v1315_v12 = vpop.permute.xlu1 %1314  ;;  %v1329_v15 = vpop.permute.xlu0 %1328  ;;  %v1583_v52 = vmax.f32 %v1571_v37, 0.0  ;;  %v13062_v9 = vadd.f32 %v1620_v39, %v1603_v8  ;;  %v13064_v24 = vadd.f32 %v1620_v39, %v1606_v51 }
 0x1e0   : > { %v1336_v38 = vsel %vm1330_vm6, %v15994_v32, %v1315_v12  ;;  %v1342_v44 = vsel %vm1330_vm6, %v15985_v16, %v1329_v15  ;;  %v1639_v15 = vld [vmem:[%s15996_s2] sm:$0xff] }
 0x1e1   : > { %v1607_v32 = vmul.f32 %v12988_v22, %v1583_v52  ;;  %v1360_v10 = vadd.f32 %v1336_v38, %v1249_v11  ;;  %v1366_v60 = vadd.f32 %v1342_v44, %v1255_v49 }
 0x1e2   : > { %1674 = vrot.lane.b32.xlu1 %v13044_v54, %s15890_s27  ;;  %1676 = vrot.lane.b32.xlu0 %v13047_v17, %s15890_s27 }
 0x1e3   : > { %v1421_v30 = vpop.permute.xlu1 %1420  ;;  %v1435_v53 = vpop.permute.xlu0 %1434  ;;  %v13075_v35 = vadd.f32 %v1620_v39, %v1607_v32 }
 0x1e4   : > { %v1442_v16 = vsel %vm1436_vm7, %v12917_v13, %v1421_v30  ;;  %v1448_v1 = vsel %vm1436_vm7, %v12795_v33, %v1435_v53  ;;  %v1640_v30 = vld [vmem:[%s15996_s2 + $0x8] sm:$0x3] }
 0x1e5   : > { %v1466_v21 = vadd.f32 %v1442_v16, %v1360_v10  ;;  %v1472_v3 = vadd.f32 %v1448_v1, %v1366_v60 }
 0x1e6   : > { %1662 = vrot.lane.b32.xlu0 %v13064_v24, %s15890_s27  ;;  %1656 = vrot.lane.b32.xlu1 %v13062_v9, %s15890_s27 }
 0x1e7   : > { %v1527_v2 = vpop.permute.xlu1 %1526  ;;  %v1541_v19 = vpop.permute.xlu0 %1540 }
 0x1e8   : > { %v1548_v62 = vsel %vm1542_vm8, %v1525_v0, %v1527_v2  ;;  %v1554_v13 = vsel %vm1542_vm8, %v12968_v58, %v1541_v19  ;;  %v11427_v0 = vld [vmem:[%s15996_s2 + $0x10] sm:$0xff] }
 0x1e9   : > { %v1572_v33 = vadd.f32 %v1548_v62, %v1466_v21  ;;  %v1578_v50 = vadd.f32 %v1554_v13, %v1472_v3 }
 0x1ea   : > { %1664 = vrot.lane.b32.xlu1 %v13075_v35, %s15890_s27 }
 0x1eb   : > { %v1584_v61 = vmax.f32 %v1572_v33, 0.0  ;;  %v1590_v36 = vmax.f32 %v1578_v50, 0.0  ;;  %v11453_v50 = vld [vmem:[%s15996_s2 + $0x20] sm:$0xff] }
 0x1ed   : > { %v1608_v14 = vmul.f32 %v12988_v22, %v1584_v61  ;;  %v1614_v42 = vmul.f32 %v12869_v56, %v1590_v36 }
 0x1ef   : > { %v13084_v27 = vadd.f32 %v1620_v39, %v1608_v14  ;;  %v13087_v28 = vadd.f32 %v12986_v55, %v1614_v42 }
 0x1f1   : > { %1678 = vrot.lane.b32.xlu0 %v13087_v28, %s15890_s27  ;;  %1666 = vrot.lane.b32.xlu1 %v13084_v27, %s15890_s27 }
 0x1f5   : > { %2213 = vrot.lane.b32.xlu0 %v12991_v34, %s15884_s5  ;;  %2215 = vrot.lane.b32.xlu1 %v12994_v26, %s15884_s5 }
 0x1f9   : > { %2211 = vrot.lane.b32.xlu0 %v13013_v59, %s15884_s5  ;;  %2201 = vrot.lane.b32.xlu1 %v13027_v5, %s15884_s5 }
 0x1fd   : > { %2203 = vrot.lane.b32.xlu0 %v13029_v18, %s15884_s5  ;;  %2217 = vrot.lane.b32.xlu1 %v13044_v54, %s15884_s5 }
 0x201   : > { %2219 = vrot.lane.b32.xlu0 %v13047_v17, %s15884_s5  ;;  %2199 = vrot.lane.b32.xlu1 %v13062_v9, %s15884_s5 }
 0x205   : > { %2205 = vrot.lane.b32.xlu0 %v13064_v24, %s15884_s5  ;;  %2207 = vrot.lane.b32.xlu1 %v13075_v35, %s15884_s5 }
 0x209   : > { %2221 = vrot.lane.b32.xlu0 %v13087_v28, %s15884_s5  ;;  %2517 = vrot.lane.b32.xlu1 %v12991_v34, %s15878_s22 }
 0x20d   : > { %2519 = vrot.lane.b32.xlu0 %v12994_v26, %s15878_s22  ;;  %2209 = vrot.lane.b32.xlu1 %v13084_v27, %s15884_s5  ;;  %s16014_s5 = smov 126  }
 0x211   : > { %2515 = vrot.lane.b32.xlu0 %v13013_v59, %s15878_s22  ;;  %2505 = vrot.lane.b32.xlu1 %v13027_v5, %s15878_s22 }
 0x215   : > { %2507 = vrot.lane.b32.xlu0 %v13029_v18, %s15878_s22  ;;  %2503 = vrot.lane.b32.xlu1 %v13062_v9, %s15878_s22 }
 0x219   : > { %2521 = vrot.lane.b32.xlu0 %v13044_v54, %s15878_s22  ;;  %2523 = vrot.lane.b32.xlu1 %v13047_v17, %s15878_s22 }
 0x21d   : > { %2509 = vrot.lane.b32.xlu0 %v13064_v24, %s15878_s22  ;;  %2511 = vrot.lane.b32.xlu1 %v13075_v35, %s15878_s22 }
 0x221   : > { %2525 = vrot.lane.b32.xlu0 %v13087_v28, %s15878_s22  ;;  %2513 = vrot.lane.b32.xlu1 %v13084_v27, %s15878_s22  ;;  %s15998_s22 = sld [smem:[#allocation49_spill]] }
 0x225   : > { %2821 = vrot.lane.b32.xlu0 %v12991_v34, %s15876_s7  ;;  %2823 = vrot.lane.b32.xlu1 %v12994_v26, %s15876_s7 }
 0x229   : > { %2819 = vrot.lane.b32.xlu0 %v13013_v59, %s15876_s7  ;;  %2809 = vrot.lane.b32.xlu1 %v13027_v5, %s15876_s7 }
 0x22d   : > { %2811 = vrot.lane.b32.xlu0 %v13029_v18, %s15876_s7  ;;  %2825 = vrot.lane.b32.xlu1 %v13044_v54, %s15876_s7 }
 0x231   : > { %2827 = vrot.lane.b32.xlu0 %v13047_v17, %s15876_s7  ;;  %2807 = vrot.lane.b32.xlu1 %v13062_v9, %s15876_s7 }
 0x235   : > { %2813 = vrot.lane.b32.xlu0 %v13064_v24, %s15876_s7  ;;  %2815 = vrot.lane.b32.xlu1 %v13075_v35, %s15876_s7 }
 0x239   : > { %2829 = vrot.lane.b32.xlu0 %v13087_v28, %s15876_s7  ;;  %3125 = vrot.lane.b32.xlu1 %v12991_v34, %s15995_s6 }
 0x23d   : > { %3127 = vrot.lane.b32.xlu0 %v12994_v26, %s15995_s6  ;;  %2817 = vrot.lane.b32.xlu1 %v13084_v27, %s15876_s7  ;;  %s16017_s7 = smov 72  }
 0x241   : > { %3123 = vrot.lane.b32.xlu0 %v13013_v59, %s15995_s6  ;;  %3113 = vrot.lane.b32.xlu1 %v13027_v5, %s15995_s6 }
 0x245   : > { %3115 = vrot.lane.b32.xlu0 %v13029_v18, %s15995_s6  ;;  %3111 = vrot.lane.b32.xlu1 %v13062_v9, %s15995_s6 }
 0x248   : > { %v1673_v56 = vpop.permute.xlu1 %1672  ;;  %v1671_v58 = vpop.permute.xlu0 %1670 }
 0x249   : > { %3129 = vrot.lane.b32.xlu0 %v13044_v54, %s15995_s6  ;;  %3131 = vrot.lane.b32.xlu1 %v13047_v17, %s15995_s6  ;;  %v1686_v55 = vsel %vm837_vm1, %v1671_v58, %v1673_v56 }
 0x24a   : > { %11429 = vmatprep.subr.msk.mxu0 %vm1703_vm9, %v1686_v55 }
 0x24c   : > { %v1669_v22 = vpop.permute.xlu0 %1668 }
 0x24d   : > { %3117 = vrot.lane.b32.xlu0 %v13064_v24, %s15995_s6  ;;  %3119 = vrot.lane.b32.xlu1 %v13075_v35, %s15995_s6  ;;  %v1685_v7 = vsel %vm837_vm1, %v1669_v22, %v1671_v58  ;;  %v11454_v58 = vld [vmem:[%s15996_s2 + $0x28] sm:$0x3] }
 0x24e   : > { %11430 = vmatpush1.msk.msra.mxu0 %vm1703_vm9, %v1685_v7 }
 0x250   : > { %v1659_v48 = vpop.permute.xlu1 %1658  ;;  %v1661_v4 = vpop.permute.xlu0 %1660 }
 0x251   : > { %3133 = vrot.lane.b32.xlu0 %v13087_v28, %s15995_s6  ;;  %3121 = vrot.lane.b32.xlu1 %v13084_v27, %s15995_s6  ;;  %v1681_v23 = vsel %vm837_vm1, %v1659_v48, %v1661_v4 }
 0x252   : > { %1746 = vmatprep.subr.mxu0 %v1681_v23 }
 0x254   : > { %v1675_v46 = vpop.permute.xlu1 %1674  ;;  %v1677_v47 = vpop.permute.xlu0 %1676 }
 0x255   : > { %3429 = vrot.lane.b32.xlu0 %v12991_v34, %s15882_s29  ;;  %3431 = vrot.lane.b32.xlu1 %v12994_v26, %s15882_s29  ;;  %v1688_v63 = vsel %vm837_vm1, %v1675_v46, %v1677_v47  ;;  %v1687_v45 = vsel %vm837_vm1, %v1673_v56, %v1675_v46 }
 0x256   : > { %11433 = vmatprep.subr.msk.mxu1 %vm1703_vm9, %v1688_v63 }
 0x257   : > { %11434 = vmatpush1.msk.msra.mxu1 %vm1703_vm9, %v1687_v45 }
 0x258   : > { %v1657_v39 = vpop.permute.xlu1 %1656  ;;  %v1663_v31 = vpop.permute.xlu0 %1662 }
 0x259   : > { %3427 = vrot.lane.b32.xlu0 %v13013_v59, %s15882_s29  ;;  %3417 = vrot.lane.b32.xlu1 %v13027_v5, %s15882_s29  ;;  %v1680_v40 = vsel %vm837_vm1, %v1657_v39, %v1659_v48  ;;  %v1682_v43 = vsel %vm837_vm1, %v1661_v4, %v1663_v31 }
 0x25a   : > { %1747 = vmatpush1.msra.mxu0 %v1680_v40 }
 0x25b   : > { %11431 = vmatmul.mubr.msk.f32.vlgmr.msra.gmra.mxu0 %vm1696_vm10, %v11427_v0 }
 0x25c   : > { %v1665_v6 = vpop.permute.xlu1 %1664  ;;  %1786 = vmatprep.mubr.f32.mxu0 %v15888_v57 }
 0x25d   : > { %3419 = vrot.lane.b32.xlu0 %v13029_v18, %s15882_s29  ;;  %3433 = vrot.lane.b32.xlu1 %v13044_v54, %s15882_s29  ;;  %v1683_v37 = vsel %vm837_vm1, %v1663_v31, %v1665_v6 }
 0x25e   : > { %1823 = vmatprep.subr.mxu1 %v1683_v37 }
 0x25f   : > { %1824 = vmatpush1.msra.mxu1 %v1682_v43  ;;  %11432 = vmatmul.mubr.msk.f32.gmra.mxu0 %vm1696_vm10, %v11428_v20 }
 0x260   : > { %11435 = vmatmul.mubr.msk.f32.vlgmr.msra.gmra.mxu1 %vm1696_vm10, %v11427_v0  ;;  %11441 = vmatprep.subr.msk.mxu1 %vm1703_vm9, %v12991_v34 }
 0x261   : > { %3435 = vrot.lane.b32.xlu0 %v13047_v17, %s15882_s29  ;;  %3415 = vrot.lane.b32.xlu1 %v13062_v9, %s15882_s29 }
 0x262   : > { %11442 = vmatpush1.msk.msra.mxu1 %vm1703_vm9, %v13013_v59  ;;  %1863 = vmatprep.mubr.f32.mxu1 %v15888_v57 }
 0x263   : > { %1995 = vmatprep.subr.mxu1 %v13027_v5  ;;  %v1679_v25 = vpop.permute.xlu0 %1678  ;;  %v1667_v8 = vpop.permute.xlu1 %1666  ;;  %1934 = vmatprep.mubr.f32.mxu0 %v15888_v57 }
 0x264   : > { %v1689_v12 = vsel %vm837_vm1, %v1677_v47, %v1679_v25  ;;  %1996 = vmatpush1.msra.mxu1 %v13062_v9  ;;  %11437 = vmatprep.subr.msk.mxu0 %vm1703_vm9, %v1679_v25  ;;  %v1684_v41 = vsel %vm837_vm1, %v1665_v6, %v1667_v8  ;;  %v11467_v47 = vld [vmem:[%s15996_s2 + $0x30] sm:$0xff]  ;;  %v4337_v25 = vld [vmem:[%s15997_s25 + $0x8] sm:$0x3] }
 0x265   : > { %11436 = vmatmul.mubr.msk.f32.gmra.mxu1 %vm1696_vm10, %v11428_v20  ;;  %11449 = vmatprep.subr.msk.mxu1 %vm1703_vm9, %v13087_v28 }
 0x266   : > { %3421 = vrot.lane.b32.xlu0 %v13064_v24, %s15882_s29  ;;  %3423 = vrot.lane.b32.xlu1 %v13075_v35, %s15882_s29 }
 0x267   : > { %11438 = vmatpush1.msk.msra.mxu0 %vm1703_vm9, %v1689_v12  ;;  %v2214_v51 = vpop.permute.xlu0 %2213  ;;  %2029 = vmatprep.mubr.f32.mxu1 %v15888_v57  ;;  %v2216_v52 = vpop.permute.xlu1 %2215  ;;  %v4361_v12 = vld [vmem:[%s15998_s22 + $0x8] sm:$0x3] }
 0x268   : > { %1900 = vmatprep.subr.mxu0 %v1667_v8  ;;  %v2229_v44 = vsel %vm933_vm2, %v2214_v51, %v2216_v52 }
 0x269   : > { %1901 = vmatpush1.msra.mxu0 %v1684_v41  ;;  %11443 = vmatmul.mubr.msk.f32.vlgmr.msra.gmra.mxu1 %vm1696_vm10, %v1639_v15  ;;  %v11481_v41 = vld [vmem:[%s15996_s2 + $0x40] sm:$0xff] }
 0x26a   : > { %11439 = vmatmul.mubr.msk.f32.vlgmr.msra.gmra.mxu0 %vm1696_vm10, %v11427_v0  ;;  %11445 = vmatprep.subr.msk.mxu0 %vm1703_vm9, %v13044_v54 }
 0x26b   : > { %11450 = vmatpush1.msk.msra.mxu1 %vm1703_vm9, %v13047_v17  ;;  %3437 = vrot.lane.b32.xlu0 %v13087_v28, %s15882_s29  ;;  %v2212_v29 = vpop.permute.xlu0 %2211  ;;  %v2202_v38 = vpop.permute.xlu1 %2201 }
 0x26c   : > { %3733 = vrot.lane.b32.xlu1 %v12991_v34, %s15880_s3  ;;  %11446 = vmatpush1.msk.msra.mxu0 %vm1703_vm9, %v12994_v26  ;;  %v2228_v1 = vsel %vm933_vm2, %v2212_v29, %v2214_v51 }
 0x26d   : > { %2149 = vmatprep.subr.mxu1 %v13084_v27  ;;  %2072 = vmatprep.subr.mxu0 %v13064_v24 }
 0x26e   : > { %2150 = vmatpush1.msra.mxu1 %v13075_v35  ;;  %1940 = vmatprep.mubr.f32.mxu0 %v15888_v57 }
 0x26f   : > { %2073 = vmatpush1.msra.mxu0 %v13029_v18  ;;  %3735 = vrot.lane.b32.xlu0 %v12994_v26, %s15880_s3  ;;  %v2204_v49 = vpop.permute.xlu0 %2203  ;;  %v2218_v11 = vpop.permute.xlu1 %2217 }
 0x270   : > { %11440 = vmatmul.mubr.msk.f32.gmra.mxu0 %vm1696_vm10, %v11428_v20  ;;  %11455 = vmatprep.subr.msk.mxu0 %vm1703_vm9, %v2229_v44  ;;  %v2224_v53 = vsel %vm933_vm2, %v2202_v38, %v2204_v49  ;;  %v2230_v2 = vsel %vm933_vm2, %v2216_v52, %v2218_v11 }
 0x271   : > { %3425 = vrot.lane.b32.xlu1 %v13084_v27, %s15882_s29  ;;  %2106 = vmatprep.mubr.f32.mxu0 %v15888_v57  ;;  %s16015_s29 = smov 100  }
 0x272   : > { %2035 = vmatprep.mubr.f32.mxu1 %v15888_v57 }
 0x273   : > { %3731 = vrot.lane.b32.xlu0 %v13013_v59, %s15880_s3  ;;  %11444 = vmatmul.mubr.msk.f32.gmra.mxu1 %vm1696_vm10, %v1640_v30  ;;  %v2220_v32 = vpop.permute.xlu0 %2219  ;;  %v2200_v16 = vpop.permute.xlu1 %2199 }
 0x274   : > { %11447 = vmatmul.mubr.msk.f32.vlgmr.msra.gmra.mxu0 %vm1696_vm10, %v1639_v15  ;;  %v2223_v10 = vsel %vm933_vm2, %v2200_v16, %v2202_v38  ;;  %2183 = vmatprep.mubr.f32.mxu1 %v15888_v57  ;;  %v2231_v60 = vsel %vm933_vm2, %v2218_v11, %v2220_v32 }
 0x275   : > { %11456 = vmatpush1.msk.msra.mxu0 %vm1703_vm9, %v2228_v1  ;;  %3721 = vrot.lane.b32.xlu1 %v13027_v5, %s15880_s3 }
 0x276   : > { %2287 = vmatprep.subr.mxu0 %v2224_v53  ;;  %11459 = vmatprep.subr.msk.mxu1 %vm1703_vm9, %v2231_v60 }
 0x277   : > { %3723 = vrot.lane.b32.xlu0 %v13029_v18, %s15880_s3  ;;  %2288 = vmatpush1.msra.mxu0 %v2223_v10  ;;  %v2206_v21 = vpop.permute.xlu0 %2205  ;;  %v2208_v3 = vpop.permute.xlu1 %2207 }
 0x278   : > { %11451 = vmatmul.mubr.msk.f32.vlgmr.msra.gmra.mxu1 %vm1696_vm10, %v1639_v15  ;;  %2112 = vmatprep.mubr.f32.mxu0 %v15888_v57  ;;  %v2226_v19 = vsel %vm933_vm2, %v2206_v21, %v2208_v3  ;;  %v2225_v62 = vsel %vm933_vm2, %v2204_v49, %v2206_v21 }
 0x279   : > { %3719 = vrot.lane.b32.xlu1 %v13062_v9, %s15880_s3  ;;  %11460 = vmatpush1.msk.msra.mxu1 %vm1703_vm9, %v2230_v2 }
 0x27a   : > { %11448 = vmatmul.mubr.msk.f32.gmra.mxu0 %vm1696_vm10, %v1640_v30  ;;  %2364 = vmatprep.subr.mxu1 %v2226_v19 }
 0x27b   : > { %3737 = vrot.lane.b32.xlu0 %v13044_v54, %s15880_s3  ;;  %2365 = vmatpush1.msra.mxu1 %v2225_v62  ;;  %v2222_v13 = vpop.permute.xlu0 %2221  ;;  %v2518_v33 = vpop.permute.xlu1 %2517 }
 0x27c   : > { %v2232_v61 = vsel %vm933_vm2, %v2220_v32, %v2222_v13  ;;  %2321 = vmatprep.mubr.f32.mxu0 %v15888_v57  ;;  %11463 = vmatprep.subr.msk.mxu0 %vm1703_vm9, %v2222_v13 }
 0x27d   : > { %3739 = vrot.lane.b32.xlu1 %v13047_v17, %s15880_s3  ;;  %2189 = vmatprep.mubr.f32.mxu1 %v15888_v57 }
 0x27e   : > { %11457 = vmatmul.mubr.msk.f32.vlgmr.msra.gmra.mxu0 %vm1696_vm10, %v11453_v50  ;;  %11452 = vmatmul.mubr.msk.f32.gmra.mxu1 %vm1696_vm10, %v1640_v30  ;;  %v11482_v30 = vld [vmem:[%s15996_s2 + $0x48] sm:$0x3] }
 0x27f   : > { %3725 = vrot.lane.b32.xlu0 %v13064_v24, %s15880_s3  ;;  %11464 = vmatpush1.msk.msra.mxu0 %vm1703_vm9, %v2232_v61  ;;  %v2520_v36 = vpop.permute.xlu0 %2519  ;;  %v2210_v14 = vpop.permute.xlu1 %2209 }
 0x280   : > { %2441 = vmatprep.subr.mxu0 %v2210_v14  ;;  %v2227_v42 = vsel %vm933_vm2, %v2208_v3, %v2210_v14  ;;  %v2533_v56 = vsel %vm1029_vm3, %v2518_v33, %v2520_v36  ;;  %2398 = vmatprep.mubr.f32.mxu1 %v15888_v57  ;;  %v11495_v14 = vld [vmem:[%s15996_s2 + $0x50] sm:$0xff] }
 0x281   : > { %3727 = vrot.lane.b32.xlu1 %v13075_v35, %s15880_s3  ;;  %2442 = vmatpush1.msra.mxu0 %v2227_v42 }
 0x282   : > { %11469 = vmatprep.subr.msk.mxu1 %vm1703_vm9, %v2533_v56  ;;  %11461 = vmatmul.mubr.msk.f32.vlgmr.msra.gmra.mxu1 %vm1696_vm10, %v11453_v50 }
 0x283   : > { %3741 = vrot.lane.b32.xlu0 %v13087_v28, %s15880_s3  ;;  %v2516_v55 = vpop.permute.xlu0 %2515  ;;  %v2506_v22 = vpop.permute.xlu1 %2505  ;;  %2327 = vmatprep.mubr.f32.mxu0 %v15888_v57 }
 0x284   : > { %v2532_v7 = vsel %vm1029_vm3, %v2516_v55, %v2518_v33  ;;  %11458 = vmatmul.mubr.msk.f32.gmra.mxu0 %vm1696_vm10, %v11454_v58  ;;  %2404 = vmatprep.mubr.f32.mxu1 %v15888_v57 }
 0x285   : > { %3729 = vrot.lane.b32.xlu1 %v13084_v27, %s15880_s3  ;;  %11470 = vmatpush1.msk.msra.mxu1 %vm1703_vm9, %v2532_v7  ;;  %s16022_s3 = smov 71  }
 0x286   : > { %2475 = vmatprep.mubr.f32.mxu0 %v15888_v57  ;;  %11462 = vmatmul.mubr.msk.f32.gmra.mxu1 %vm1696_vm10, %v11454_v58 }
 0x287   : > { %4037 = vrot.lane.b32.xlu0 %v12991_v34, %s15886_s0  ;;  %v2508_v48 = vpop.permute.xlu0 %2507  ;;  %v2504_v4 = vpop.permute.xlu1 %2503  ;;  %2625 = vmatprep.mubr.f32.mxu1 %v15888_v57 }
 0x288   : > { %v2527_v23 = vsel %vm1029_vm3, %v2504_v4, %v2506_v22  ;;  %v2528_v46 = vsel %vm1029_vm3, %v2506_v22, %v2508_v48  ;;  %11465 = vmatmul.mubr.msk.f32.vlgmr.msra.gmra.mxu0 %vm1696_vm10, %v11453_v50  ;;  %v11496_v22 = vld [vmem:[%s15996_s2 + $0x58] sm:$0x3] }
 0x289   : > { %4039 = vrot.lane.b32.xlu1 %v12994_v26, %s15886_s0  ;;  %2591 = vmatprep.subr.mxu1 %v2528_v46  ;;  %v11468_v26 = vld [vmem:[%s15996_s2 + $0x38] sm:$0x3] }
 0x28a   : > { %2592 = vmatpush1.msra.mxu1 %v2527_v23  ;;  %2481 = vmatprep.mubr.f32.mxu0 %v15888_v57 }
 0x28b   : > { %4035 = vrot.lane.b32.xlu0 %v13013_v59, %s15886_s0  ;;  %v2522_v34 = vpop.permute.xlu0 %2521  ;;  %v2524_v63 = vpop.permute.xlu1 %2523  ;;  %11471 = vmatmul.mubr.msk.f32.vlgmr.msra.gmra.mxu1 %vm1696_vm10, %v11467_v47 }
 0x28c   : > { %v2534_v45 = vsel %vm1029_vm3, %v2520_v36, %v2522_v34  ;;  %v2535_v39 = vsel %vm1029_vm3, %v2522_v34, %v2524_v63  ;;  %11466 = vmatmul.mubr.msk.f32.gmra.mxu0 %vm1696_vm10, %v11454_v58  ;;  %2631 = vmatprep.mubr.f32.mxu1 %v15888_v57 }
 0x28d   : > { %4025 = vrot.lane.b32.xlu1 %v13027_v5, %s15886_s0  ;;  %11473 = vmatprep.subr.msk.mxu0 %vm1703_vm9, %v2535_v39 }
 0x28e   : > { %11474 = vmatpush1.msk.msra.mxu0 %vm1703_vm9, %v2534_v45  ;;  %2702 = vmatprep.mubr.f32.mxu0 %v15888_v57 }
 0x28f   : > { %4027 = vrot.lane.b32.xlu0 %v13029_v18, %s15886_s0  ;;  %v2510_v59 = vpop.permute.xlu0 %2509  ;;  %v2512_v0 = vpop.permute.xlu1 %2511  ;;  %11472 = vmatmul.mubr.msk.f32.gmra.mxu1 %vm1696_vm10, %v11468_v26 }
 0x290   : > { %v2530_v40 = vsel %vm1029_vm3, %v2510_v59, %v2512_v0  ;;  %v2529_v31 = vsel %vm1029_vm3, %v2508_v48, %v2510_v59  ;;  %2779 = vmatprep.mubr.f32.mxu1 %v15888_v57 }
 0x291   : > { %4041 = vrot.lane.b32.xlu1 %v13044_v54, %s15886_s0  ;;  %2668 = vmatprep.subr.mxu0 %v2530_v40 }
 0x292   : > { %2669 = vmatpush1.msra.mxu0 %v2529_v31 }
 0x293   : > { %4043 = vrot.lane.b32.xlu0 %v13047_v17, %s15886_s0  ;;  %v2526_v5 = vpop.permute.xlu0 %2525  ;;  %v2514_v18 = vpop.permute.xlu1 %2513  ;;  %11475 = vmatmul.mubr.msk.f32.vlgmr.msra.gmra.mxu0 %vm1696_vm10, %v11467_v47 }
 0x294   : > { %v2536_v6 = vsel %vm1029_vm3, %v2524_v63, %v2526_v5  ;;  %11477 = vmatprep.subr.msk.mxu1 %vm1703_vm9, %v2526_v5  ;;  %2708 = vmatprep.mubr.f32.mxu0 %v15888_v57  ;;  %v2531_v54 = vsel %vm1029_vm3, %v2512_v0, %v2514_v18 }
 0x295   : > { %4023 = vrot.lane.b32.xlu1 %v13062_v9, %s15886_s0  ;;  %11478 = vmatpush1.msk.msra.mxu1 %vm1703_vm9, %v2536_v6 }
 0x296   : > { %2745 = vmatprep.subr.mxu1 %v2514_v18 }
 0x297   : > { %4029 = vrot.lane.b32.xlu0 %v13064_v24, %s15886_s0  ;;  %v2822_v17 = vpop.permute.xlu0 %2821  ;;  %2746 = vmatpush1.msra.mxu1 %v2531_v54  ;;  %v2824_v20 = vpop.permute.xlu1 %2823 }
 0x298   : > { %v2837_v37 = vsel %vm1125_vm4, %v2822_v17, %v2824_v20  ;;  %11479 = vmatmul.mubr.msk.f32.vlgmr.msra.gmra.mxu1 %vm1696_vm10, %v11467_v47  ;;  %11476 = vmatmul.mubr.msk.f32.gmra.mxu0 %vm1696_vm10, %v11468_v26 }
 0x299   : > { %4031 = vrot.lane.b32.xlu1 %v13075_v35, %s15886_s0  ;;  %11483 = vmatprep.subr.msk.mxu0 %vm1703_vm9, %v2837_v37  ;;  %v4336_v35 = vld [vmem:[%s15997_s25] sm:$0xff] }
 0x29a   : > { %2785 = vmatprep.mubr.f32.mxu1 %v15888_v57  ;;  %2929 = vmatprep.mubr.f32.mxu0 %v15888_v57 }
 0x29b   : > { %4045 = vrot.lane.b32.xlu0 %v13087_v28, %s15886_s0  ;;  %v2820_v9 = vpop.permute.xlu0 %2819  ;;  %v2810_v24 = vpop.permute.xlu1 %2809 }
 0x29c   : > { %v2836_v43 = vsel %vm1125_vm4, %v2820_v9, %v2822_v17  ;;  %11480 = vmatmul.mubr.msk.f32.gmra.mxu1 %vm1696_vm10, %v11468_v26  ;;  %v11509_v17 = vld [vmem:[%s15996_s2 + $0x60] sm:$0xff] }
 0x29d   : > { %4033 = vrot.lane.b32.xlu1 %v13084_v27, %s15886_s0  ;;  %11484 = vmatpush1.msk.msra.mxu0 %vm1703_vm9, %v2836_v43  ;;  %v4360_v27 = vld [vmem:[%s15998_s22] sm:$0xff]  ;;  %s16016_s0 = smov 99  }
 0x29e   : > { %3006 = vmatprep.mubr.f32.mxu1 %v15888_v57 }
 0x29f   : > { %4345 = vperm.xlu0 %12035, %v4337_v25   ;;  %v2812_v28 = vpop.permute.xlu0 %2811  ;;  %v2826_v8 = vpop.permute.xlu1 %2825 }
 0x2a0   : > { %v2832_v15 = vsel %vm1125_vm4, %v2810_v24, %v2812_v28  ;;  %v2838_v44 = vsel %vm1125_vm4, %v2824_v20, %v2826_v8 }
 0x2a1   : > { %4340 = vperm.xlu1 %12036, %v4336_v35   ;;  %2895 = vmatprep.subr.mxu0 %v2832_v15 }
 0x2a3   : > { %4369 = vperm.xlu0 %12035, %v4361_v12   ;;  %v2828_v51 = vpop.permute.xlu0 %2827  ;;  %v2808_v52 = vpop.permute.xlu1 %2807 }
 0x2a4   : > { %v2831_v29 = vsel %vm1125_vm4, %v2808_v52, %v2810_v24  ;;  %v2839_v38 = vsel %vm1125_vm4, %v2826_v8, %v2828_v51  ;;  %v11510_v24 = vld [vmem:[%s15996_s2 + $0x68] sm:$0x3] }
 0x2a5   : > { %4364 = vperm.xlu1 %12036, %v4360_v27   ;;  %2896 = vmatpush1.msra.mxu0 %v2831_v29 }
 0x2a6   : > { %11487 = vmatprep.subr.msk.mxu1 %vm1703_vm9, %v2839_v38  ;;  %11485 = vmatmul.mubr.msk.f32.vlgmr.msra.gmra.mxu0 %vm1696_vm10, %v11481_v41 }
 0x2a7   : > { %11488 = vmatpush1.msk.msra.mxu1 %vm1703_vm9, %v2838_v44  ;;  %v2814_v49 = vpop.permute.xlu0 %2813  ;;  %v2816_v11 = vpop.permute.xlu1 %2815  ;;  %2935 = vmatprep.mubr.f32.mxu0 %v15888_v57 }
 0x2a8   : > { %v2834_v53 = vsel %vm1125_vm4, %v2814_v49, %v2816_v11  ;;  %v2833_v32 = vsel %vm1125_vm4, %v2812_v28, %v2814_v49 }
 0x2a9   : > { %2972 = vmatprep.subr.mxu1 %v2834_v53  ;;  %v11523_v53 = vld [vmem:[%s15996_s2 + $0x70] sm:$0xff] }
 0x2aa   : > { %2973 = vmatpush1.msra.mxu1 %v2833_v32  ;;  %11486 = vmatmul.mubr.msk.f32.gmra.mxu0 %vm1696_vm10, %v11482_v30 }
 0x2ab   : > { %v2830_v16 = vpop.permute.xlu0 %2829  ;;  %v3126_v1 = vpop.permute.xlu1 %3125  ;;  %11489 = vmatmul.mubr.msk.f32.vlgmr.msra.gmra.mxu1 %vm1696_vm10, %v11481_v41  ;;  %3083 = vmatprep.mubr.f32.mxu0 %v15888_v57 }
 0x2ac   : > { %v2840_v10 = vsel %vm1125_vm4, %v2828_v51, %v2830_v16  ;;  %11491 = vmatprep.subr.msk.mxu0 %vm1703_vm9, %v2830_v16  ;;  %3012 = vmatprep.mubr.f32.mxu1 %v15888_v57 }
 0x2ad   : > { %11492 = vmatpush1.msk.msra.mxu0 %vm1703_vm9, %v2840_v10 }
 0x2af   : > { %v3128_v60 = vpop.permute.xlu0 %3127  ;;  %v2818_v21 = vpop.permute.xlu1 %2817  ;;  %11490 = vmatmul.mubr.msk.f32.gmra.mxu1 %vm1696_vm10, %v11482_v30 }
 0x2b0   : > { %3049 = vmatprep.subr.mxu0 %v2818_v21  ;;  %v2835_v3 = vsel %vm1125_vm4, %v2816_v11, %v2818_v21  ;;  %v3141_v2 = vsel %vm1221_vm5, %v3126_v1, %v3128_v60  ;;  %3233 = vmatprep.mubr.f32.mxu1 %v15888_v57 }
 0x2b1   : > { %3050 = vmatpush1.msra.mxu0 %v2835_v3  ;;  %11497 = vmatprep.subr.msk.mxu1 %vm1703_vm9, %v3141_v2 }
 0x2b2   : > { %11493 = vmatmul.mubr.msk.f32.vlgmr.msra.gmra.mxu0 %vm1696_vm10, %v11481_v41 }
 0x2b3   : > { %v3124_v19 = vpop.permute.xlu0 %3123  ;;  %v3114_v62 = vpop.permute.xlu1 %3113  ;;  %3089 = vmatprep.mubr.f32.mxu0 %v15888_v57 }
 0x2b4   : > { %v3140_v13 = vsel %vm1221_vm5, %v3124_v19, %v3126_v1 }
 0x2b5   : > { %11498 = vmatpush1.msk.msra.mxu1 %vm1703_vm9, %v3140_v13 }
 0x2b6   : > { %11494 = vmatmul.mubr.msk.f32.gmra.mxu0 %vm1696_vm10, %v11482_v30 }
 0x2b7   : > { %v3116_v33 = vpop.permute.xlu0 %3115  ;;  %v3112_v50 = vpop.permute.xlu1 %3111  ;;  %3310 = vmatprep.mubr.f32.mxu0 %v15888_v57 }
 0x2b8   : > { %v3135_v61 = vsel %vm1221_vm5, %v3112_v50, %v3114_v62  ;;  %v3136_v36 = vsel %vm1221_vm5, %v3114_v62, %v3116_v33 }
 0x2b9   : > { %3199 = vmatprep.subr.mxu1 %v3136_v36 }
 0x2ba   : > { %3200 = vmatpush1.msra.mxu1 %v3135_v61 }
 0x2bb   : > { %v3130_v42 = vpop.permute.xlu0 %3129  ;;  %11499 = vmatmul.mubr.msk.f32.vlgmr.msra.gmra.mxu1 %vm1696_vm10, %v11495_v14  ;;  %v3132_v56 = vpop.permute.xlu1 %3131 }
 0x2bc   : > { %v3142_v58 = vsel %vm1221_vm5, %v3128_v60, %v3130_v42  ;;  %v3143_v55 = vsel %vm1221_vm5, %v3130_v42, %v3132_v56  ;;  %3239 = vmatprep.mubr.f32.mxu1 %v15888_v57  ;;  %v11524_v60 = vld [vmem:[%s15996_s2 + $0x78] sm:$0x3] }
 0x2bd   : > { %11501 = vmatprep.subr.msk.mxu0 %vm1703_vm9, %v3143_v55 }
 0x2be   : > { %11502 = vmatpush1.msk.msra.mxu0 %vm1703_vm9, %v3142_v58 }
 0x2bf   : > { %v3118_v7 = vpop.permute.xlu0 %3117  ;;  %11500 = vmatmul.mubr.msk.f32.gmra.mxu1 %vm1696_vm10, %v11496_v22  ;;  %v3120_v48 = vpop.permute.xlu1 %3119 }
 0x2c0   : > { %v3138_v4 = vsel %vm1221_vm5, %v3118_v7, %v3120_v48  ;;  %v3137_v23 = vsel %vm1221_vm5, %v3116_v33, %v3118_v7  ;;  %3387 = vmatprep.mubr.f32.mxu1 %v15888_v57 }
 0x2c1   : > { %3276 = vmatprep.subr.mxu0 %v3138_v4 }
 0x2c2   : > { %3277 = vmatpush1.msra.mxu0 %v3137_v23 }
 0x2c3   : > { %v3134_v46 = vpop.permute.xlu0 %3133  ;;  %11503 = vmatmul.mubr.msk.f32.vlgmr.msra.gmra.mxu0 %vm1696_vm10, %v11495_v14  ;;  %v3122_v47 = vpop.permute.xlu1 %3121 }
 0x2c4   : > { %v3144_v34 = vsel %vm1221_vm5, %v3132_v56, %v3134_v46  ;;  %11505 = vmatprep.subr.msk.mxu1 %vm1703_vm9, %v3134_v46  ;;  %3316 = vmatprep.mubr.f32.mxu0 %v15888_v57  ;;  %v3139_v63 = vsel %vm1221_vm5, %v3120_v48, %v3122_v47 }
 0x2c5   : > { %11506 = vmatpush1.msk.msra.mxu1 %vm1703_vm9, %v3144_v34  ;;  %v11537_v34 = vld [vmem:[%s15996_s2 + $0x80] sm:$0xff] }
 0x2c6   : > { %3353 = vmatprep.subr.mxu1 %v3122_v47 }
 0x2c7   : > { %v3430_v45 = vpop.permute.xlu0 %3429  ;;  %11504 = vmatmul.mubr.msk.f32.gmra.mxu0 %vm1696_vm10, %v11496_v22  ;;  %3354 = vmatpush1.msra.mxu1 %v3139_v63  ;;  %v3432_v39 = vpop.permute.xlu1 %3431 }
 0x2c8   : > { %11507 = vmatmul.mubr.msk.f32.vlgmr.msra.gmra.mxu1 %vm1696_vm10, %v11495_v14  ;;  %v3445_v26 = vsel %vm1330_vm6, %v3430_v45, %v3432_v39  ;;  %3537 = vmatprep.mubr.f32.mxu0 %v15888_v57 }
 0x2c9   : > { %11511 = vmatprep.subr.msk.mxu0 %vm1703_vm9, %v3445_v26  ;;  %3393 = vmatprep.mubr.f32.mxu1 %v15888_v57  ;;  %v11538_v26 = vld [vmem:[%s15996_s2 + $0x88] sm:$0x3]  ;;  %s15896_s2 = smov 14  }
 0x2cb   : > { %v3428_v59 = vpop.permute.xlu0 %3427  ;;  %v3418_v0 = vpop.permute.xlu1 %3417 }
 0x2cc   : > { %v3444_v40 = vsel %vm1330_vm6, %v3428_v59, %v3430_v45  ;;  %11508 = vmatmul.mubr.msk.f32.gmra.mxu1 %vm1696_vm10, %v11496_v22 }
 0x2cd   : > { %11512 = vmatpush1.msk.msra.mxu0 %vm1703_vm9, %v3444_v40  ;;  %3614 = vmatprep.mubr.f32.mxu1 %v15888_v57 }
 0x2cf   : > { %v3420_v31 = vpop.permute.xlu0 %3419  ;;  %v3434_v5 = vpop.permute.xlu1 %3433 }
 0x2d0   : > { %v3440_v18 = vsel %vm1330_vm6, %v3418_v0, %v3420_v31  ;;  %v3446_v9 = vsel %vm1330_vm6, %v3432_v39, %v3434_v5 }
 0x2d1   : > { %3503 = vmatprep.subr.mxu0 %v3440_v18 }
 0x2d3   : > { %v3436_v6 = vpop.permute.xlu0 %3435  ;;  %v3416_v54 = vpop.permute.xlu1 %3415 }
 0x2d4   : > { %v3439_v20 = vsel %vm1330_vm6, %v3416_v54, %v3418_v0  ;;  %v3447_v37 = vsel %vm1330_vm6, %v3434_v5, %v3436_v6 }
 0x2d5   : > { %3504 = vmatpush1.msra.mxu0 %v3439_v20  ;;  %11515 = vmatprep.subr.msk.mxu1 %vm1703_vm9, %v3447_v37 }
 0x2d6   : > { %11513 = vmatmul.mubr.msk.f32.vlgmr.msra.gmra.mxu0 %vm1696_vm10, %v11509_v17  ;;  %11516 = vmatpush1.msk.msra.mxu1 %vm1703_vm9, %v3446_v9 }
 0x2d7   : > { %3543 = vmatprep.mubr.f32.mxu0 %v15888_v57 }
 0x2d8   : > { %v3422_v43 = vpop.permute.xlu0 %3421  ;;  %v3424_v25 = vpop.permute.xlu1 %3423 }
 0x2d9   : > { %v3442_v35 = vsel %vm1330_vm6, %v3422_v43, %v3424_v25  ;;  %v3441_v28 = vsel %vm1330_vm6, %v3420_v31, %v3422_v43 }
 0x2da   : > { %3580 = vmatprep.subr.mxu1 %v3442_v35  ;;  %11514 = vmatmul.mubr.msk.f32.gmra.mxu0 %vm1696_vm10, %v11510_v24 }
 0x2db   : > { %3581 = vmatpush1.msra.mxu1 %v3441_v28  ;;  %3691 = vmatprep.mubr.f32.mxu0 %v15888_v57 }
 0x2dc   : > { %11517 = vmatmul.mubr.msk.f32.vlgmr.msra.gmra.mxu1 %vm1696_vm10, %v11509_v17 }
 0x2dd   : > { %v3438_v8 = vpop.permute.xlu0 %3437  ;;  %3620 = vmatprep.mubr.f32.mxu1 %v15888_v57 }
 0x2de   : > { %v3448_v12 = vsel %vm1330_vm6, %v3436_v6, %v3438_v8  ;;  %v3734_v15 = vpop.permute.xlu1 %3733  ;;  %11519 = vmatprep.subr.msk.mxu0 %vm1703_vm9, %v3438_v8 }
 0x2df   : > { %11520 = vmatpush1.msk.msra.mxu0 %vm1703_vm9, %v3448_v12 }
 0x2e0   : > { %11518 = vmatmul.mubr.msk.f32.gmra.mxu1 %vm1696_vm10, %v11510_v24 }
 0x2e1   : > { %v3736_v27 = vpop.permute.xlu0 %3735  ;;  %3841 = vmatprep.mubr.f32.mxu1 %v15888_v57 }
 0x2e2   : > { %v3749_v51 = vsel %vm1436_vm7, %v3734_v15, %v3736_v27 }
 0x2e3   : > { %v3426_v52 = vpop.permute.xlu1 %3425  ;;  %11525 = vmatprep.subr.msk.mxu1 %vm1703_vm9, %v3749_v51 }
 0x2e4   : > { %3657 = vmatprep.subr.mxu0 %v3426_v52  ;;  %v3443_v41 = vsel %vm1330_vm6, %v3424_v25, %v3426_v52 }
 0x2e5   : > { %3658 = vmatpush1.msra.mxu0 %v3443_v41  ;;  %v3732_v29 = vpop.permute.xlu0 %3731 }
 0x2e6   : > { %11521 = vmatmul.mubr.msk.f32.vlgmr.msra.gmra.mxu0 %vm1696_vm10, %v11509_v17  ;;  %v3748_v38 = vsel %vm1436_vm7, %v3732_v29, %v3734_v15 }
 0x2e7   : > { %v3722_v44 = vpop.permute.xlu1 %3721  ;;  %3697 = vmatprep.mubr.f32.mxu0 %v15888_v57  ;;  %11526 = vmatpush1.msk.msra.mxu1 %vm1703_vm9, %v3748_v38 }
 0x2e9   : > { %v3724_v49 = vpop.permute.xlu0 %3723 }
 0x2ea   : > { %11522 = vmatmul.mubr.msk.f32.gmra.mxu0 %vm1696_vm10, %v11510_v24  ;;  %v3744_v11 = vsel %vm1436_vm7, %v3722_v44, %v3724_v49 }
 0x2eb   : > { %v3720_v30 = vpop.permute.xlu1 %3719  ;;  %3807 = vmatprep.subr.mxu1 %v3744_v11  ;;  %3918 = vmatprep.mubr.f32.mxu0 %v15888_v57 }
 0x2ec   : > { %v3743_v32 = vsel %vm1436_vm7, %v3720_v30, %v3722_v44 }
 0x2ed   : > { %3808 = vmatpush1.msra.mxu1 %v3743_v32  ;;  %v3738_v16 = vpop.permute.xlu0 %3737 }
 0x2ee   : > { %11527 = vmatmul.mubr.msk.f32.vlgmr.msra.gmra.mxu1 %vm1696_vm10, %v11523_v53  ;;  %v3750_v1 = vsel %vm1436_vm7, %v3736_v27, %v3738_v16 }
 0x2ef   : > { %v3740_v10 = vpop.permute.xlu1 %3739  ;;  %3847 = vmatprep.mubr.f32.mxu1 %v15888_v57 }
 0x2f0   : > { %v3751_v21 = vsel %vm1436_vm7, %v3738_v16, %v3740_v10 }
 0x2f1   : > { %11529 = vmatprep.subr.msk.mxu0 %vm1703_vm9, %v3751_v21  ;;  %v3726_v3 = vpop.permute.xlu0 %3725 }
 0x2f2   : > { %11530 = vmatpush1.msk.msra.mxu0 %vm1703_vm9, %v3750_v1  ;;  %11528 = vmatmul.mubr.msk.f32.gmra.mxu1 %vm1696_vm10, %v11524_v60  ;;  %v3745_v19 = vsel %vm1436_vm7, %v3724_v49, %v3726_v3 }
 0x2f3   : > { %v3728_v2 = vpop.permute.xlu1 %3727  ;;  %3995 = vmatprep.mubr.f32.mxu1 %v15888_v57 }
 0x2f4   : > { %v3746_v62 = vsel %vm1436_vm7, %v3726_v3, %v3728_v2 }
 0x2f5   : > { %3884 = vmatprep.subr.mxu0 %v3746_v62  ;;  %v3742_v13 = vpop.permute.xlu0 %3741 }
 0x2f6   : > { %3885 = vmatpush1.msra.mxu0 %v3745_v19  ;;  %v3752_v33 = vsel %vm1436_vm7, %v3740_v10, %v3742_v13  ;;  %11533 = vmatprep.subr.msk.mxu1 %vm1703_vm9, %v3742_v13 }
 0x2f7   : > { %11531 = vmatmul.mubr.msk.f32.vlgmr.msra.gmra.mxu0 %vm1696_vm10, %v11523_v53  ;;  %v3730_v50 = vpop.permute.xlu1 %3729  ;;  %11534 = vmatpush1.msk.msra.mxu1 %vm1703_vm9, %v3752_v33 }
 0x2f8   : > { %3924 = vmatprep.mubr.f32.mxu0 %v15888_v57  ;;  %3961 = vmatprep.subr.mxu1 %v3730_v50  ;;  %v3747_v61 = vsel %vm1436_vm7, %v3728_v2, %v3730_v50 }
 0x2f9   : > { %v4038_v36 = vpop.permute.xlu0 %4037  ;;  %3962 = vmatpush1.msra.mxu1 %v3747_v61 }
 0x2fa   : > { %11535 = vmatmul.mubr.msk.f32.vlgmr.msra.gmra.mxu1 %vm1696_vm10, %v11523_v53 }
 0x2fb   : > { %11532 = vmatmul.mubr.msk.f32.gmra.mxu0 %vm1696_vm10, %v11524_v60  ;;  %v4040_v14 = vpop.permute.xlu1 %4039  ;;  %4001 = vmatprep.mubr.f32.mxu1 %v15888_v57 }
 0x2fc   : > { %v4053_v42 = vsel %vm1542_vm8, %v4038_v36, %v4040_v14  ;;  %4145 = vmatprep.mubr.f32.mxu0 %v15888_v57 }
 0x2fd   : > { %11539 = vmatprep.subr.msk.mxu0 %vm1703_vm9, %v4053_v42  ;;  %v4036_v56 = vpop.permute.xlu0 %4035 }
 0x2fe   : > { %v4052_v58 = vsel %vm1542_vm8, %v4036_v56, %v4038_v36  ;;  %11536 = vmatmul.mubr.msk.f32.gmra.mxu1 %vm1696_vm10, %v11524_v60 }
 0x2ff   : > { %v4026_v55 = vpop.permute.xlu1 %4025  ;;  %11540 = vmatpush1.msk.msra.mxu0 %vm1703_vm9, %v4052_v58  ;;  %4222 = vmatprep.mubr.f32.mxu1 %v15888_v57 }
 0x301   : > { %v4028_v22 = vpop.permute.xlu0 %4027 }
 0x302   : > { %v4048_v7 = vsel %vm1542_vm8, %v4026_v55, %v4028_v22 }
 0x303   : > { %v4042_v48 = vpop.permute.xlu1 %4041  ;;  %4111 = vmatprep.subr.mxu0 %v4048_v7 }
 0x304   : > { %v4054_v46 = vsel %vm1542_vm8, %v4040_v14, %v4042_v48 }
 0x305   : > { %v4044_v4 = vpop.permute.xlu0 %4043 }
 0x306   : > { %v4055_v23 = vsel %vm1542_vm8, %v4042_v48, %v4044_v4 }
 0x307   : > { %v4024_v47 = vpop.permute.xlu1 %4023  ;;  %11543 = vmatprep.subr.msk.mxu1 %vm1703_vm9, %v4055_v23 }
 0x308   : > { %v4047_v63 = vsel %vm1542_vm8, %v4024_v47, %v4026_v55  ;;  %11544 = vmatpush1.msk.msra.mxu1 %vm1703_vm9, %v4054_v46 }
 0x309   : > { %4112 = vmatpush1.msra.mxu0 %v4047_v63  ;;  %v4030_v45 = vpop.permute.xlu0 %4029 }
 0x30a   : > { %11541 = vmatmul.mubr.msk.f32.vlgmr.msra.gmra.mxu0 %vm1696_vm10, %v11537_v34  ;;  %v4049_v59 = vsel %vm1542_vm8, %v4028_v22, %v4030_v45 }
 0x30b   : > { %v4032_v39 = vpop.permute.xlu1 %4031  ;;  %4151 = vmatprep.mubr.f32.mxu0 %v15888_v57 }
 0x30c   : > { %v4050_v0 = vsel %vm1542_vm8, %v4030_v45, %v4032_v39 }
 0x30d   : > { %4188 = vmatprep.subr.mxu1 %v4050_v0  ;;  %v4046_v40 = vpop.permute.xlu0 %4045 }
 0x30e   : > { %11542 = vmatmul.mubr.msk.f32.gmra.mxu0 %vm1696_vm10, %v11538_v26  ;;  %4189 = vmatpush1.msra.mxu1 %v4049_v59  ;;  %v4056_v31 = vsel %vm1542_vm8, %v4044_v4, %v4046_v40 }
 0x30f   : > { %11545 = vmatmul.mubr.msk.f32.vlgmr.msra.gmra.mxu1 %vm1696_vm10, %v11537_v34  ;;  %v4034_v5 = vpop.permute.xlu1 %4033  ;;  %11547 = vmatprep.subr.msk.mxu0 %vm1703_vm9, %v4046_v40 }
 0x310   : > { %11548 = vmatpush1.msk.msra.mxu0 %vm1703_vm9, %v4056_v31  ;;  %4228 = vmatprep.mubr.f32.mxu1 %v15888_v57  ;;  %v4051_v18 = vsel %vm1542_vm8, %v4032_v39, %v4034_v5 }
 0x311   : > { %4265 = vmatprep.subr.mxu0 %v4034_v5  ;;  %4299 = vmatprep.mubr.f32.mxu0 %v15888_v57 }
 0x312   : > { %4266 = vmatpush1.msra.mxu0 %v4051_v18 }
 0x313   : > { %11546 = vmatmul.mubr.msk.f32.gmra.mxu1 %vm1696_vm10, %v11538_v26  ;;  %11549 = vmatmul.mubr.msk.f32.vlgmr.msra.gmra.mxu0 %vm1696_vm10, %v11537_v34 }
 0x314   : > { %4305 = vmatprep.mubr.f32.mxu0 %v15888_v57  ;;  %4512 = vmatprep.mubr.f32.mxu1 %v15888_v57 }
 0x317   : > { %11550 = vmatmul.mubr.msk.f32.gmra.mxu0 %vm1696_vm10, %v11538_v26 }
 0x318   : > { %4589 = vmatprep.mubr.f32.mxu0 %v15888_v57 }
 0x31b   : > { %v1782_v6 = vpop.f32.mrf.mxu0 }
 0x31d   : > { %v13581_v54 = vpop.f32.mrf.mxu0 }
 0x31f   : > { %v1788_v37 = vpop.f32.mrf.mxu0 }
 0x320   : > { %v1859_v17 = vpop.f32.mrf.mxu1 }
 0x321   : > { %v13585_v24 = vpop.f32.mrf.mxu0 }
 0x322   : > { %v13583_v20 = vpop.f32.mrf.mxu1 }
 0x325   : > { %v1865_v9 = vpop.f32.mrf.mxu1 }
 0x327   : > { %v13587_v43 = vpop.f32.mrf.mxu1 }
 0x329   : > { %v2031_v25 = vpop.f32.mrf.mxu1 }
 0x32a   : > { %v1936_v35 = vpop.f32.mrf.mxu0  ;;  %v13589_v28 = vadd.f32 %v2031_v25, %v1782_v6 }
 0x32b   : > { %v13593_v12 = vpop.f32.mrf.mxu1 }
 0x32c   : > { %v13591_v8 = vpop.f32.mrf.mxu0 }
 0x32d   : > { %15999 = vst [vmem:[#allocation7_spill] sm:$0xff] %v13591_v8 }
 0x330   : > { %v1942_v15 = vpop.f32.mrf.mxu0 }
 0x332   : > { %v13595_v27 = vpop.f32.mrf.mxu0 }
 0x333   : > { %16000 = vst [vmem:[#allocation9_spill] sm:$0xff] %v13595_v27  ;;  %v2037_v51 = vpop.f32.mrf.mxu1 }
 0x334   : > { %v2038_v52 = vadd.f32 %v2037_v51, %v1788_v37  ;;  %v2108_v41 = vpop.f32.mrf.mxu0 }
 0x335   : > { %v13597_v29 = vpop.f32.mrf.mxu1  ;;  %v13599_v38 = vadd.f32 %v2108_v41, %v1859_v17 }
 0x336   : > { %v13601_v44 = vpop.f32.mrf.mxu0 }
 0x338   : > { %v2185_v49 = vpop.f32.mrf.mxu1 }
 0x339   : > { %v2186_v11 = vadd.f32 %v2185_v49, %v1936_v35 }
 0x33a   : > { %v13603_v30 = vpop.f32.mrf.mxu1  ;;  %v2114_v53 = vpop.f32.mrf.mxu0 }
 0x33b   : > { %16001 = vst [vmem:[#allocation11_spill] sm:$0xff] %v13603_v30  ;;  %v2115_v32 = vadd.f32 %v2114_v53, %v1865_v9 }
 0x33c   : > { %v13605_v16 = vpop.f32.mrf.mxu0 }
 0x33e   : > { %v2191_v1 = vpop.f32.mrf.mxu1  ;;  %v13607_v10 = vpop.f32.mrf.mxu0 }
 0x33f   : > { %v2192_v60 = vadd.f32 %v2191_v1, %v1942_v15 }
 0x340   : > { %v13609_v21 = vpop.f32.mrf.mxu1  ;;  %v13611_v3 = vpop.f32.mrf.mxu0 }
 0x341   : > { %16002 = vst [vmem:[#allocation8_spill] sm:$0xff] %v13609_v21 }
 0x342   : > { %v13613_v2 = vpop.f32.mrf.mxu1 }
 0x344   : > { %v13615_v19 = vpop.f32.mrf.mxu1  ;;  %v2329_v62 = vpop.f32.mrf.mxu0 }
 0x345   : > { %v2494_v13 = vadd.f32 %v2329_v62, %v2038_v52 }
 0x346   : > { %v2406_v33 = vpop.f32.mrf.mxu1  ;;  %v13617_v50 = vpop.f32.mrf.mxu0 }
 0x347   : > { %v2496_v61 = vadd.f32 %v2406_v33, %v2115_v32 }
 0x348   : > { %v13619_v36 = vpop.f32.mrf.mxu1  ;;  %v2477_v14 = vpop.f32.mrf.mxu0 }
 0x349   : > { %v2492_v42 = vadd.f32 %v2477_v14, %v2186_v11 }
 0x34a   : > { %v13621_v56 = vpop.f32.mrf.mxu0 }
 0x34b   : > { %16003 = vst [vmem:[#allocation10_spill] sm:$0xff] %v13621_v56  ;;  %v13623_v58 = vpop.f32.mrf.mxu1 }
 0x34c   : > { %v2483_v55 = vpop.f32.mrf.mxu0 }
 0x34d   : > { %v13625_v22 = vpop.f32.mrf.mxu1  ;;  %v2498_v7 = vadd.f32 %v2483_v55, %v2192_v60 }
 0x34e   : > { %v13627_v4 = vpop.f32.mrf.mxu0 }
 0x34f   : > { %v2633_v48 = vpop.f32.mrf.mxu1  ;;  %16004 = vst [vmem:[#allocation12_spill] sm:$0xff] %v13627_v4 }
 0x350   : > { %v2798_v23 = vadd.f32 %v2633_v48, %v2494_v13 }
 0x351   : > { %v13631_v47 = vpop.f32.mrf.mxu1 }
 0x353   : > { %v13629_v46 = vpop.f32.mrf.mxu0 }
 0x355   : > { %v13633_v34 = vpop.f32.mrf.mxu0 }
 0x358   : > { %v2781_v63 = vpop.f32.mrf.mxu1  ;;  %v2710_v45 = vpop.f32.mrf.mxu0 }
 0x359   : > { %v2796_v39 = vadd.f32 %v2781_v63, %v2492_v42  ;;  %v2800_v26 = vadd.f32 %v2710_v45, %v2496_v61 }
 0x35a   : > { %v13635_v59 = vpop.f32.mrf.mxu1  ;;  %v13637_v31 = vpop.f32.mrf.mxu0 }
 0x35b   : > { %16005 = vst [vmem:[#allocation13_spill] sm:$0xff] %v13635_v59  ;;  %v2490_v59 = vadd.f32 %v13613_v2, %v13599_v38  ;;  %v2111_v38 = vadd.f32 %v13601_v44, %v13583_v20 }
 0x35c   : > { %v2787_v0 = vpop.f32.mrf.mxu1 }
 0x35d   : > { %v2802_v40 = vadd.f32 %v2787_v0, %v2498_v7 }
 0x35e   : > { %v13639_v18 = vpop.f32.mrf.mxu1 }
 0x35f   : > { %16006 = vst [vmem:[#allocation15_spill] sm:$0xff] %v13639_v18 }
 0x366   : > { %v2931_v5 = vpop.f32.mrf.mxu0 }
 0x368   : > { %v13641_v6 = vpop.f32.mrf.mxu0 }
 0x36a   : > { %v2937_v17 = vpop.f32.mrf.mxu0 }
 0x36b   : > { %v3008_v37 = vpop.f32.mrf.mxu1  ;;  %v13643_v9 = vadd.f32 %v2937_v17, %v2798_v23 }
 0x36c   : > { %v13647_v35 = vpop.f32.mrf.mxu0 }
 0x36d   : > { %v13645_v25 = vpop.f32.mrf.mxu1 }
 0x36f   : > { %v3014_v15 = vpop.f32.mrf.mxu1 }
 0x370   : > { %v3104_v51 = vadd.f32 %v3014_v15, %v2800_v26 }
 0x371   : > { %v13651_v32 = vpop.f32.mrf.mxu1 }
 0x372   : > { %v3085_v52 = vpop.f32.mrf.mxu0 }
 0x373   : > { %v3100_v41 = vadd.f32 %v3085_v52, %v2796_v39 }
 0x374   : > { %v13649_v49 = vpop.f32.mrf.mxu0 }
 0x375   : > { %16007 = vst [vmem:[#allocation14_spill] sm:$0xff] %v13649_v49 }
 0x376   : > { %v3091_v11 = vpop.f32.mrf.mxu0 }
 0x377   : > { %v3106_v53 = vadd.f32 %v3091_v11, %v2802_v40 }
 0x378   : > { %v13655_v62 = vpop.f32.mrf.mxu0 }
 0x379   : > { %16008 = vst [vmem:[#allocation16_spill] sm:$0xff] %v13655_v62 }
 0x37b   : > { %v3235_v1 = vpop.f32.mrf.mxu1 }
 0x37d   : > { %v13653_v60 = vpop.f32.mrf.mxu1 }
 0x37f   : > { %v13657_v13 = vpop.f32.mrf.mxu1 }
 0x381   : > { %v13661_v14 = vpop.f32.mrf.mxu1 }
 0x383   : > { %v3312_v33 = vpop.f32.mrf.mxu0 }
 0x385   : > { %v13659_v61 = vpop.f32.mrf.mxu0 }
 0x387   : > { %v3318_v42 = vpop.f32.mrf.mxu0 }
 0x388   : > { %v13663_v55 = vadd.f32 %v3318_v42, %v3104_v51  ;;  %v3389_v7 = vpop.f32.mrf.mxu1 }
 0x389   : > { %v3404_v48 = vadd.f32 %v3389_v7, %v3100_v41  ;;  %v13667_v39 = vpop.f32.mrf.mxu0 }
 0x38a   : > { %v13665_v23 = vpop.f32.mrf.mxu1 }
 0x38b   : > { %16009 = vst [vmem:[#allocation17_spill] sm:$0xff] %v13665_v23 }
 0x38c   : > { %v3395_v63 = vpop.f32.mrf.mxu1 }
 0x38d   : > { %v3410_v45 = vadd.f32 %v3395_v63, %v3106_v53 }
 0x38e   : > { %v13669_v40 = vpop.f32.mrf.mxu1 }
 0x38f   : > { %16010 = vst [vmem:[#allocation18_spill] sm:$0xff] %v13669_v40 }
 0x396   : > { %v3539_v26 = vpop.f32.mrf.mxu0 }
 0x398   : > { %v3541_v0 = vpop.f32.mrf.mxu0 }
 0x39a   : > { %v13671_v17 = vpop.f32.mrf.mxu0 }
 0x39c   : > { %v3616_v15 = vpop.f32.mrf.mxu1  ;;  %v13673_v52 = vpop.f32.mrf.mxu0 }
 0x39e   : > { %v13675_v11 = vpop.f32.mrf.mxu1 }
 0x3a0   : > { %v13677_v41 = vpop.f32.mrf.mxu1 }
 0x3a2   : > { %v13681_v57 = vpop.f32.mrf.mxu1 }
 0x3a6   : > { %v3693_v51 = vpop.f32.mrf.mxu0 }
 0x3a7   : > { %v3708_v42 = vadd.f32 %v3693_v51, %v3404_v48  ;;  %v2488_v48 = vadd.f32 %v13607_v10, %v13589_v28  ;;  %v2034_v28 = vadd.f32 %v13593_v12, %v13581_v54 }
 0x3a8   : > { %v13679_v7 = vpop.f32.mrf.mxu0 }
 0x3a9   : > { %16011 = vst [vmem:[#allocation19_spill] sm:$0xff] %v13679_v7 }
 0x3aa   : > { %v3699_v53 = vpop.f32.mrf.mxu0 }
 0x3ab   : > { %v3714_v63 = vadd.f32 %v3699_v53, %v3410_v45  ;;  %v2792_v53 = vadd.f32 %v13623_v58, %v2488_v48  ;;  %v2489_v58 = vadd.f32 %v13611_v3, %v2034_v28  ;;  %v13708_v48 = vpop.permute.xlu1 %4340 }
 0x3ac   : > { %v13687_v21 = vpop.f32.mrf.mxu0 }
 0x3ad   : > { %16012 = vst [vmem:[#allocation21_spill] sm:$0xff] %v13687_v21  ;;  %v3096_v30 = vadd.f32 %v2931_v5, %v2792_v53  ;;  %v2794_v21 = vadd.f32 %v13629_v46, %v2490_v59 }
 0x3ae   : > { %v3843_v62 = vpop.f32.mrf.mxu1 }
 0x3b0   : > { %v3845_v18 = vpop.f32.mrf.mxu1 }
 0x3b2   : > { %v13683_v40 = vpop.f32.mrf.mxu1 }
 0x3b4   : > { %v13685_v4 = vpop.f32.mrf.mxu1 }
 0x3b7   : > { %v3920_v23 = vpop.f32.mrf.mxu0 }
 0x3b9   : > { %v3922_v56 = vpop.f32.mrf.mxu0 }
 0x3ba   : > { %v3997_v27 = vpop.f32.mrf.mxu1 }
 0x3bb   : > { %v13691_v51 = vadd.f32 %v3997_v27, %v3708_v42  ;;  %v13701_v8 = vpop.f32.mrf.mxu0  ;;  %v3400_v27 = vadd.f32 %v3235_v1, %v3096_v30  ;;  %v3098_v42 = vadd.f32 %v3008_v37, %v2794_v21  ;;  %v2491_v30 = vadd.f32 %v13615_v19, %v2111_v38  ;;  %v13717_v1 = vpop.permute.xlu1 %4364 }
 0x3bc   : > { %v13693_v7 = vpop.f32.mrf.mxu1 }
 0x3bd   : > { %16013 = vst [vmem:[#allocation23_spill] sm:$0xff] %v13693_v7  ;;  %v3704_v10 = vadd.f32 %v3539_v26, %v3400_v27  ;;  %v13705_v7 = vpop.f32.mrf.mxu0  ;;  %v3402_v2 = vadd.f32 %v3312_v33, %v3098_v42  ;;  %v2795_v33 = vadd.f32 %v13633_v34, %v2491_v30 }
 0x3be   : > { %v4003_v45 = vpop.f32.mrf.mxu1 }
 0x3bf   : > { %v13696_v49 = vadd.f32 %v4003_v45, %v3714_v63  ;;  %v4008_v63 = vadd.f32 %v3843_v62, %v3704_v10  ;;  %v3706_v5 = vadd.f32 %v3616_v15, %v3402_v2  ;;  %v2793_v45 = vadd.f32 %v13625_v22, %v2489_v58 }
 0x3c0   : > { %v13713_v54 = vpop.f32.mrf.mxu1  ;;  %v3099_v15 = vadd.f32 %v13645_v25, %v2795_v33 }
 0x3c1   : > { %v4010_v21 = vadd.f32 %v3920_v23, %v3706_v5  ;;  %v3097_v20 = vadd.f32 %v13641_v6, %v2793_v45  ;;  %v2117_v5 = vadd.f32 %v13605_v16, %v13587_v43 }
 0x3c2   : > { %v3403_v34 = vadd.f32 %v13659_v61, %v3099_v15 }
 0x3c3   : > { %v3401_v26 = vadd.f32 %v13653_v60, %v3097_v20 }
 0x3c4   : > { %v3707_v27 = vadd.f32 %v13675_v11, %v3403_v34 }
 0x3c5   : > { %v3705_v23 = vadd.f32 %v3541_v0, %v3401_v26 }
 0x3c6   : > { %v4011_v25 = vadd.f32 %v3922_v56, %v3707_v27  ;;  %v3406_v56 = vadd.f32 %v13657_v13, %v13643_v9 }
 0x3c7   : > { %v4009_v6 = vadd.f32 %v3845_v18, %v3705_v23 }
 0x3c8   : > { %v3710_v58 = vadd.f32 %v13671_v17, %v3406_v56  ;;  %v2040_v17 = vadd.f32 %v13597_v29, %v13585_v24 }
 0x3ca   : > { %v4147_v46 = vpop.f32.mrf.mxu0  ;;  %v4014_v2 = vadd.f32 %v13683_v40, %v3710_v58  ;;  %v3712_v40 = vadd.f32 %v13677_v41, %v13663_v55  ;;  %v2495_v45 = vadd.f32 %v13617_v50, %v2040_v17  ;;  %v2497_v55 = vadd.f32 %v13619_v36, %v2117_v5  ;;  %v16021_v58 = vld [vmem:[#allocation13_spill] sm:$0xff]  ;;  %v16026_v5 = vld [vmem:[#allocation23_spill] sm:$0xff] }
 0x3cb   : > { %v4312_v59 = vadd.f32 %v4147_v46, %v4008_v63 }
 0x3cc   : > { %v4149_v53 = vpop.f32.mrf.mxu0  ;;  %v4016_v29 = vadd.f32 %v13701_v8, %v3712_v40  ;;  %v2799_v43 = vadd.f32 %v13631_v47, %v2495_v45  ;;  %v2801_v50 = vadd.f32 %v13637_v31, %v2497_v55  ;;  %v16028_v55 = vld [vmem:[#allocation8_spill] sm:$0xff] }
 0x3cd   : > { %v4324_v12 = vmax.f32 %v4312_v59, 0.0  ;;  %v4313_v60 = vadd.f32 %v4149_v53, %v4009_v6  ;;  %v13772_v59 = vpop.permute.xlu0 %4345 }
 0x3ce   : > { %v4153_v38 = vpop.f32.mrf.mxu0  ;;  %v3103_v41 = vadd.f32 %v13647_v35, %v2799_v43 }
 0x3cf   : > { %v4348_v3 = vmul.f32 %v13708_v48, %v4324_v12  ;;  %v4224_v37 = vpop.f32.mrf.mxu1  ;;  %v4325_v18 = vmax.f32 %v4313_v60, 0.0  ;;  %v4318_v9 = vadd.f32 %v4153_v38, %v4014_v2  ;;  %v16023_v38 = vld [vmem:[#allocation14_spill] sm:$0xff] }
 0x3d0   : > { %v4314_v62 = vadd.f32 %v4224_v37, %v4010_v21  ;;  %v3407_v36 = vadd.f32 %v13661_v14, %v3103_v41 }
 0x3d1   : > { %v13721_v44 = vadd.f32 %v13717_v1, %v4348_v3  ;;  %v4226_v10 = vpop.f32.mrf.mxu1  ;;  %v4349_v61 = vmul.f32 %v13708_v48, %v4325_v18  ;;  %v4330_v46 = vmax.f32 %v4318_v9, 0.0  ;;  %v13789_v30 = vpop.permute.xlu0 %4369  ;;  %v3105_v3 = vadd.f32 %v13651_v32, %v2801_v50  ;;  %v16018_v18 = vld [vmem:[#allocation7_spill] sm:$0xff]  ;;  %v16024_v9 = vld [vmem:[#allocation17_spill] sm:$0xff] }
 0x3d2   : > { %v4326_v22 = vmax.f32 %v4314_v62, 0.0  ;;  %v4315_v0 = vadd.f32 %v4226_v10, %v4011_v25  ;;  %v3711_v37 = vadd.f32 %v13673_v52, %v3407_v36  ;;  %v4155_v62 = vpop.f32.mrf.mxu0  ;;  %v16029_v36 = vld [vmem:[#allocation12_spill] sm:$0xff] }
 0x3d3   : > { %4399 = vrot.lane.b32.xlu1 %v13721_v44, %s15890_s27  ;;  %v13754_v11 = vadd.f32 %v13717_v1, %v4349_v61  ;;  %v4354_v12 = vmul.f32 %v13772_v59, %v4330_v46  ;;  %v4230_v24 = vpop.f32.mrf.mxu1  ;;  %v3409_v31 = vadd.f32 %v13667_v39, %v3105_v3  ;;  %v16025_v46 = vld [vmem:[#allocation19_spill] sm:$0xff] }
 0x3d4   : > { %v4350_v19 = vmul.f32 %v13708_v48, %v4326_v22  ;;  %v4327_v42 = vmax.f32 %v4315_v0, 0.0  ;;  %v4320_v21 = vadd.f32 %v4230_v24, %v4016_v29  ;;  %v4015_v35 = vadd.f32 %v13685_v4, %v3711_v37  ;;  %v4301_v22 = vpop.f32.mrf.mxu0  ;;  %v16019_v0 = vld [vmem:[#allocation11_spill] sm:$0xff] }
 0x3d5   : > { %v13794_v16 = vadd.f32 %v13789_v30, %v4354_v12  ;;  %v3713_v20 = vadd.f32 %v13681_v57, %v3409_v31  ;;  %v4232_v32 = vpop.f32.mrf.mxu1  ;;  %v2188_v61 = vadd.f32 %v16019_v0, %v16018_v18  ;;  %v16030_v31 = vld [vmem:[#allocation15_spill] sm:$0xff] }
 0x3d6   : > { %v13730_v28 = vadd.f32 %v13717_v1, %v4350_v19  ;;  %v4351_v63 = vmul.f32 %v13708_v48, %v4327_v42  ;;  %v4332_v8 = vmax.f32 %v4320_v21, 0.0  ;;  %v4319_v33 = vadd.f32 %v4155_v62, %v4015_v35  ;;  %v4303_v6 = vpop.f32.mrf.mxu0  ;;  %v16020_v42 = vld [vmem:[#allocation10_spill] sm:$0xff]  ;;  %v16027_v21 = vld [vmem:[#allocation9_spill] sm:$0xff] }
 0x3d7   : > { %4925 = vrot.lane.b32.xlu1 %v13721_v44, %s16014_s5  ;;  %v4017_v52 = vadd.f32 %v13705_v7, %v3713_v20  ;;  %v4316_v7 = vadd.f32 %v4301_v22, %v13691_v51  ;;  %v2493_v56 = vadd.f32 %v16020_v42, %v2188_v61  ;;  %v2194_v43 = vadd.f32 %v16028_v55, %v16027_v21  ;;  %v16033_v22 = vld [vmem:[#allocation21_spill] sm:$0xff]  ;;  %v6990_v21 = vld [vmem:[%s16035_s8 + $0x8] sm:$0x3] }
 0x3d8   : > { %4403 = vrot.lane.b32.xlu0 %v13730_v28, %s15890_s27  ;;  %v13764_v13 = vadd.f32 %v13717_v1, %v4351_v63  ;;  %v4356_v47 = vmul.f32 %v13772_v59, %v4332_v8  ;;  %v4331_v39 = vmax.f32 %v4319_v33, 0.0  ;;  %v4307_v34 = vpop.f32.mrf.mxu0 }
 0x3d9   : > { %v4321_v4 = vadd.f32 %v4232_v32, %v4017_v52  ;;  %v4328_v15 = vmax.f32 %v4316_v7, 0.0  ;;  %v4322_v27 = vadd.f32 %v4307_v34, %v13696_v49  ;;  %v2797_v63 = vadd.f32 %v16021_v58, %v2493_v56  ;;  %v16031_v32 = vld [vmem:[#allocation16_spill] sm:$0xff] }
 0x3da   : > { %v13817_v14 = vadd.f32 %v13789_v30, %v4356_v47  ;;  %v4355_v57 = vmul.f32 %v13772_v59, %v4331_v39  ;;  %v2499_v47 = vadd.f32 %v16029_v36, %v2194_v43 }
 0x3db   : > { %5216 = vrot.lane.b32.xlu1 %v13721_v44, %s16015_s29  ;;  %v4333_v26 = vmax.f32 %v4321_v4, 0.0  ;;  %v4352_v51 = vmul.f32 %v13708_v48, %v4328_v15  ;;  %v4334_v10 = vmax.f32 %v4322_v27, 0.0  ;;  %v3101_v2 = vadd.f32 %v16023_v38, %v2797_v63  ;;  %v16032_v4 = vld [vmem:[#allocation18_spill] sm:$0xff] }
 0x3dc   : > { %4929 = vrot.lane.b32.xlu0 %v13730_v28, %s16014_s5  ;;  %v13836_v19 = vadd.f32 %v13789_v30, %v4355_v57  ;;  %v2803_v35 = vadd.f32 %v16030_v31, %v2499_v47 }
 0x3dd   : > { %v4357_v23 = vmul.f32 %v13772_v59, %v4333_v26  ;;  %v13856_v60 = vadd.f32 %v13717_v1, %v4352_v51  ;;  %v4358_v25 = vmul.f32 %v13772_v59, %v4334_v10  ;;  %v3405_v17 = vadd.f32 %v16024_v9, %v3101_v2 }
 0x3de   : > { %v3107_v52 = vadd.f32 %v16031_v32, %v2803_v35 }
 0x3df   : > { %5507 = vrot.lane.b32.xlu1 %v13721_v44, %s16016_s0  ;;  %v13844_v53 = vadd.f32 %v13789_v30, %v4357_v23  ;;  %v13873_v49 = vadd.f32 %v13789_v30, %v4358_v25  ;;  %v3709_v40 = vadd.f32 %v16025_v46, %v3405_v17  ;;  %v4309_v23 = vpop.f32.mrf.mxu0  ;;  %v6989_v46 = vld [vmem:[%s16035_s8] sm:$0xff] }
 0x3e0   : > { %5220 = vrot.lane.b32.xlu0 %v13730_v28, %s16015_s29  ;;  %v3411_v57 = vadd.f32 %v16032_v4, %v3107_v52  ;;  %v16038_v52 = vmov 0.0  }
 0x3e1   : > { %v4013_v45 = vadd.f32 %v16026_v5, %v3709_v40 }
 0x3e2   : > { %v3715_v26 = vadd.f32 %v16033_v22, %v3411_v57 }
 0x3e3   : > { %5798 = vrot.lane.b32.xlu1 %v13721_v44, %s15995_s6  ;;  %v4317_v24 = vadd.f32 %v4303_v6, %v4013_v45  ;;  %v7011_v45 = vld [vmem:[%s16036_s9] sm:$0xff] }
 0x3e4   : > { %5511 = vrot.lane.b32.xlu0 %v13730_v28, %s16016_s0  ;;  %v4019_v15 = vadd.f32 %v13713_v54, %v3715_v26 }
 0x3e5   : > { %v4329_v8 = vmax.f32 %v4317_v24, 0.0 }
 0x3e6   : > { %v4323_v51 = vadd.f32 %v4309_v23, %v4019_v15 }
 0x3e7   : > { %4401 = vrot.lane.b32.xlu1 %v13754_v11, %s15890_s27  ;;  %v4353_v3 = vmul.f32 %v13708_v48, %v4329_v8 }
 0x3e8   : > { %5802 = vrot.lane.b32.xlu0 %v13730_v28, %s15995_s6  ;;  %v4335_v10 = vmax.f32 %v4323_v51, 0.0 }
 0x3e9   : > { %v4377_v20 = vadd.f32 %v13717_v1, %v4353_v3  ;;  %v7012_v3 = vld [vmem:[%s16036_s9 + $0x8] sm:$0x3]  ;;  %s11790_s9 = sshll.u32 %s16079_s30, 4 }
 0x3ea   : > { %v4359_v18 = vmul.f32 %v13772_v59, %v4335_v10 }
 0x3eb   : > { %4927 = vrot.lane.b32.xlu1 %v13754_v11, %s16014_s5 }
 0x3ec   : > { %4405 = vrot.lane.b32.xlu0 %v13764_v13, %s15890_s27  ;;  %v4383_v42 = vadd.f32 %v13789_v30, %v4359_v18 }
 0x3ef   : > { %4931 = vrot.lane.b32.xlu1 %v13764_v13, %s16014_s5 }
 0x3f0   : > { %5222 = vrot.lane.b32.xlu0 %v13764_v13, %s16015_s29 }
 0x3f3   : > { %5218 = vrot.lane.b32.xlu1 %v13754_v11, %s16015_s29 }
 0x3f4   : > { %5804 = vrot.lane.b32.xlu0 %v13764_v13, %s15995_s6 }
 0x3f7   : > { %5509 = vrot.lane.b32.xlu1 %v13754_v11, %s16016_s0 }
 0x3f8   : > { %4409 = vrot.lane.b32.xlu0 %v13794_v16, %s15890_s27 }
 0x3fb   : > { %5513 = vrot.lane.b32.xlu1 %v13764_v13, %s16016_s0 }
 0x3fc   : > { %4935 = vrot.lane.b32.xlu0 %v13794_v16, %s16014_s5 }
 0x3ff   : > { %5800 = vrot.lane.b32.xlu1 %v13754_v11, %s15995_s6 }
 0x400   : > { %5226 = vrot.lane.b32.xlu0 %v13794_v16, %s16015_s29 }
 0x403   : > { %4413 = vrot.lane.b32.xlu1 %v13817_v14, %s15890_s27 }
 0x404   : > { %5517 = vrot.lane.b32.xlu0 %v13794_v16, %s16016_s0 }
 0x407   : > { %4939 = vrot.lane.b32.xlu1 %v13817_v14, %s16014_s5 }
 0x408   : > { %5808 = vrot.lane.b32.xlu0 %v13794_v16, %s15995_s6 }
 0x40b   : > { %5230 = vrot.lane.b32.xlu1 %v13817_v14, %s16015_s29 }
 0x40c   : > { %6103 = vrot.lane.b32.xlu0 %v13794_v16, %s16017_s7 }
 0x40f   : > { %5521 = vrot.lane.b32.xlu1 %v13817_v14, %s16016_s0 }
 0x410   : > { %4411 = vrot.lane.b32.xlu0 %v13836_v19, %s15890_s27 }
 0x413   : > { %5812 = vrot.lane.b32.xlu1 %v13817_v14, %s15995_s6 }
 0x414   : > { %4415 = vrot.lane.b32.xlu0 %v13844_v53, %s15890_s27 }
 0x417   : > { %6107 = vrot.lane.b32.xlu1 %v13817_v14, %s16017_s7 }
 0x418   : > { %4937 = vrot.lane.b32.xlu0 %v13836_v19, %s16014_s5 }
 0x41b   : > { %4407 = vrot.lane.b32.xlu1 %v13856_v60, %s15890_s27 }
 0x41c   : > { %4941 = vrot.lane.b32.xlu0 %v13844_v53, %s16014_s5 }
 0x41f   : > { %5224 = vrot.lane.b32.xlu1 %v13856_v60, %s16015_s29 }
 0x420   : > { %5228 = vrot.lane.b32.xlu0 %v13836_v19, %s16015_s29 }
 0x423   : > { %5806 = vrot.lane.b32.xlu1 %v13856_v60, %s15995_s6 }
 0x424   : > { %5232 = vrot.lane.b32.xlu0 %v13844_v53, %s16015_s29 }
 0x427   : > { %4417 = vrot.lane.b32.xlu1 %v13873_v49, %s15890_s27  ;;  %s12062_s27 = smov 68  }
 0x428   : > { %5519 = vrot.lane.b32.xlu0 %v13836_v19, %s16016_s0 }
 0x42b   : > { %6093 = vrot.lane.b32.xlu1 %v13754_v11, %s16017_s7 }
 0x42c   : > { %5523 = vrot.lane.b32.xlu0 %v13844_v53, %s16016_s0 }
 0x42f   : > { %6097 = vrot.lane.b32.xlu1 %v13764_v13, %s16017_s7 }
 0x430   : > { %5810 = vrot.lane.b32.xlu0 %v13836_v19, %s15995_s6 }
 0x433   : > { %6091 = vrot.lane.b32.xlu1 %v13721_v44, %s16017_s7 }
 0x434   : > { %5814 = vrot.lane.b32.xlu0 %v13844_v53, %s15995_s6 }
 0x437   : > { %4943 = vrot.lane.b32.xlu1 %v13873_v49, %s16014_s5 }
 0x438   : > { %6105 = vrot.lane.b32.xlu0 %v13836_v19, %s16017_s7 }
 0x43b   : > { %6402 = vrot.lane.b32.xlu1 %v13836_v19, %s16022_s3 }
 0x43c   : > { %6109 = vrot.lane.b32.xlu0 %v13844_v53, %s16017_s7 }
 0x43f   : > { %6400 = vrot.lane.b32.xlu1 %v13794_v16, %s16022_s3 }
 0x440   : > { %4933 = vrot.lane.b32.xlu0 %v13856_v60, %s16014_s5 }
 0x443   : > { %5234 = vrot.lane.b32.xlu1 %v13873_v49, %s16015_s29 }
 0x444   : > { %5515 = vrot.lane.b32.xlu0 %v13856_v60, %s16016_s0 }
 0x445   : > { %v13915_v12 = vpop.permute.xlu1 %4399 }
 0x447   : > { %6390 = vrot.lane.b32.xlu1 %v13754_v11, %s16022_s3 }
 0x448   : > { %6095 = vrot.lane.b32.xlu0 %v13730_v28, %s16017_s7 }
 0x449   : > { %v13921_v29 = vpop.permute.xlu1 %4925 }
 0x44a   : > { %v13925_v50 = vpop.permute.xlu0 %4403 }
 0x44b   : > { %5525 = vrot.lane.b32.xlu1 %v13873_v49, %s16016_s0  ;;  %s16037_s0 = sld [smem:[#allocation50_spill]] }
 0x44c   : > { %6099 = vrot.lane.b32.xlu0 %v13856_v60, %s16017_s7 }
 0x44d   : > { %v13931_v41 = vpop.permute.xlu1 %5216 }
 0x44e   : > { %v13935_v37 = vpop.permute.xlu0 %4929 }
 0x44f   : > { %6388 = vrot.lane.b32.xlu1 %v13721_v44, %s16022_s3 }
 0x450   : > { %6404 = vrot.lane.b32.xlu0 %v13817_v14, %s16022_s3 }
 0x451   : > { %v13941_v62 = vpop.permute.xlu1 %5507  ;;  %v11551_v31 = vld [vmem:[%s16037_s0 + $0x10] sm:$0xff]  ;;  %v11552_v4 = vld [vmem:[%s16037_s0 + $0x18] sm:$0x3] }
 0x452   : > { %v13945_v33 = vpop.permute.xlu0 %5220 }
 0x453   : > { %6396 = vrot.lane.b32.xlu1 %v13856_v60, %s16022_s3 }
 0x454   : > { %6101 = vrot.lane.b32.xlu0 %v4377_v20, %s16017_s7 }
 0x455   : > { %v13950_v48 = vpop.permute.xlu1 %5798 }
 0x456   : > { %v13953_v39 = vpop.permute.xlu0 %5511 }
 0x457   : > { %5816 = vrot.lane.b32.xlu1 %v13873_v49, %s15995_s6  ;;  %s16034_s6 = smov 70  }
 0x458   : > { %6392 = vrot.lane.b32.xlu0 %v13730_v28, %s16022_s3 }
 0x459   : > { %v13960_v1 = vpop.permute.xlu1 %4401 }
 0x45a   : > { %v13963_v7 = vpop.permute.xlu0 %5802  ;;  %v4420_v47 = vsel %vm837_vm1, %v13960_v1, %v13925_v50 }
 0x45b   : > { %6398 = vrot.lane.b32.xlu1 %v4377_v20, %s16022_s3 }
 0x45c   : > { %6406 = vrot.lane.b32.xlu0 %v13844_v53, %s16022_s3 }
 0x45d   : > { %v13969_v6 = vpop.permute.xlu1 %4927 }
 0x45e   : > { %v13971_v34 = vpop.permute.xlu0 %4405 }
 0x45f   : > { %6111 = vrot.lane.b32.xlu1 %v13873_v49, %s16017_s7 }
 0x460   : > { %6394 = vrot.lane.b32.xlu0 %v13764_v13, %s16022_s3 }
 0x461   : > { %v13977_v27 = vpop.permute.xlu1 %4931 }
 0x462   : > { %v13979_v25 = vpop.permute.xlu0 %5222 }
 0x463   : > { %6701 = vrot.lane.b32.xlu1 %v13817_v14, %s16034_s6 }
 0x464   : > { %6699 = vrot.lane.b32.xlu0 %v13836_v19, %s16034_s6 }
 0x465   : > { %v13985_v54 = vpop.permute.xlu1 %5218 }
 0x466   : > { %v13988_v0 = vpop.permute.xlu0 %5804 }
 0x467   : > { %6408 = vrot.lane.b32.xlu1 %v13873_v49, %s16022_s3 }
 0x468   : > { %6703 = vrot.lane.b32.xlu0 %v13844_v53, %s16034_s6 }
 0x469   : > { %v13994_v61 = vpop.permute.xlu1 %5509 }
 0x46a   : > { %v4410_v56 = vpop.permute.xlu0 %4409 }
 0x46b   : > { %6705 = vrot.lane.b32.xlu1 %v13873_v49, %s16034_s6 }
 0x46c   : > { %6113 = vrot.lane.b32.xlu0 %v4383_v42, %s16017_s7 }
 0x46d   : > { %v14000_v58 = vpop.permute.xlu1 %5513 }
 0x46e   : > { %v14002_v59 = vpop.permute.xlu0 %4935 }
 0x46f   : > { %6687 = vrot.lane.b32.xlu1 %v13754_v11, %s16034_s6 }
 0x470   : > { %6697 = vrot.lane.b32.xlu0 %v13794_v16, %s16034_s6 }
 0x471   : > { %v14008_v63 = vpop.permute.xlu1 %5800 }
 0x472   : > { %v14010_v38 = vpop.permute.xlu0 %5226 }
 0x473   : > { %6691 = vrot.lane.b32.xlu1 %v13764_v13, %s16034_s6 }
 0x474   : > { %6410 = vrot.lane.b32.xlu0 %v4383_v42, %s16022_s3  ;;  %s12061_s3 = smov 124  }
 0x475   : > { %v4414_v30 = vpop.permute.xlu1 %4413 }
 0x476   : > { %v14015_v2 = vpop.permute.xlu0 %5517 }
 0x477   : > { %6685 = vrot.lane.b32.xlu1 %v13721_v44, %s16034_s6 }
 0x478   : > { %6689 = vrot.lane.b32.xlu0 %v13730_v28, %s16034_s6 }
 0x479   : > { %v14021_v9 = vpop.permute.xlu1 %4939 }
 0x47a   : > { %v14023_v17 = vpop.permute.xlu0 %5808 }
 0x47b   : > { %6695 = vrot.lane.b32.xlu1 %v4377_v20, %s16034_s6  ;;  %v4419_v20 = vsel %vm837_vm1, %v13915_v12, %v13960_v1 }
 0x47c   : > { %6693 = vrot.lane.b32.xlu0 %v13856_v60, %s16034_s6 }
 0x47d   : > { %v14031_v40 = vpop.permute.xlu1 %5230 }
 0x47e   : > { %v14033_v5 = vpop.permute.xlu0 %6103 }
 0x47f   : > { %6993 = vperm.xlu1 %12036, %v6989_v46  }
 0x480   : > { %6707 = vrot.lane.b32.xlu0 %v4383_v42, %s16034_s6 }
 0x481   : > { %v14039_v24 = vpop.permute.xlu1 %5521 }
 0x482   : > { %v4412_v55 = vpop.permute.xlu0 %4411 }
 0x483   : > { %v4423_v43 = vsel %vm837_vm1, %v4410_v56, %v4412_v55  ;;  %7015 = vperm.xlu1 %12036, %v7011_v45   ;;  %v4424_v8 = vsel %vm837_vm1, %v4412_v55, %v4414_v30  ;;  %v4421_v45 = vsel %vm837_vm1, %v13925_v50, %v13971_v34 }
 0x484   : > { %6998 = vperm.xlu0 %12035, %v6990_v21   ;;  %11553 = vmatprep.subr.msk.mxu1 %vm1703_vm9, %v4424_v8  ;;  %v11576_v8 = vld [vmem:[%s16037_s0 + $0x28] sm:$0x3] }
 0x485   : > { %11554 = vmatpush1.msk.msra.mxu1 %vm1703_vm9, %v4423_v43  ;;  %v14048_v36 = vpop.permute.xlu1 %5812 }
 0x486   : > { %v4416_v35 = vpop.permute.xlu0 %4415  ;;  %4478 = vmatprep.subr.mxu1 %v4420_v47 }
 0x487   : > { %4479 = vmatpush1.msra.mxu1 %v4419_v20  ;;  %v4425_v42 = vsel %vm837_vm1, %v4414_v30, %v4416_v35 }
 0x488   : > { %7020 = vperm.xlu0 %12035, %v7012_v3   ;;  %11555 = vmatmul.mubr.msk.f32.vlgmr.msra.gmra.mxu1 %vm1696_vm10, %v11551_v31  ;;  %v4947_v3 = vsel %vm933_vm2, %v13935_v37, %v13977_v27 }
 0x489   : > { %v14063_v32 = vpop.permute.xlu1 %6107  ;;  %4518 = vmatprep.mubr.f32.mxu1 %v16038_v52 }
 0x48a   : > { %v4938_v57 = vpop.permute.xlu0 %4937 }
 0x48c   : > { %11556 = vmatmul.mubr.msk.f32.gmra.mxu1 %vm1696_vm10, %v11552_v4 }
 0x48d   : > { %v4408_v22 = vpop.permute.xlu1 %4407  ;;  %11875 = vmatprep.mubr.msk.f32.mxu1 %vm1696_vm10, %v11551_v31 }
 0x48e   : > { %v14071_v26 = vpop.permute.xlu0 %4941  ;;  %v4422_v56 = vsel %vm837_vm1, %v13971_v34, %v4408_v22  ;;  %v4384_v34 = vld [vmem:[%s16037_s0] sm:$0xff] }
 0x48f   : > { %v4951_v30 = vsel %vm933_vm2, %v14021_v9, %v14071_v26 }
 0x491   : > { %v14073_v12 = vpop.permute.xlu1 %5224 }
 0x492   : > { %v14075_v1 = vpop.permute.xlu0 %5228 }
 0x493   : > { %v5241_v20 = vsel %vm1029_vm3, %v14075_v1, %v14031_v40 }
 0x495   : > { %v14077_v23 = vpop.permute.xlu1 %5806 }
 0x496   : > { %v14079_v15 = vpop.permute.xlu0 %5232 }
 0x499   : > { %v4418_v51 = vpop.permute.xlu1 %4417 }
 0x49a   : > { %v14081_v10 = vpop.permute.xlu0 %5519  ;;  %11871 = vmatprep.subr.msk.mxu1 %vm1703_vm9, %v4418_v51  ;;  %v4426_v18 = vsel %vm837_vm1, %v4416_v35, %v4418_v51 }
 0x49b   : > { %11557 = vmatprep.subr.msk.mxu0 %vm1703_vm9, %v4426_v18  ;;  %11872 = vmatpush3.msk.msra.mxu1 %vm1703_vm9, %v4418_v51  ;;  %v5531_v51 = vsel %vm1125_vm4, %v14015_v2, %v14081_v10  ;;  %v5527_v2 = vsel %vm1125_vm4, %v13941_v62, %v13994_v61  ;;  %v11601_v62 = vld [vmem:[%s16037_s0 + $0x40] sm:$0xff] }
 0x49c   : > { %11558 = vmatpush1.msk.msra.mxu0 %vm1703_vm9, %v4425_v42  ;;  %11873 = vmatprep.subr.mxu1 %v4408_v22 }
 0x49d   : > { %4555 = vmatprep.subr.mxu0 %v4422_v56  ;;  %11874 = vmatpush3.msra.mxu1 %v4408_v22  ;;  %v14091_v46 = vpop.permute.xlu1 %6093  ;;  %v5242_v22 = vsel %vm1029_vm3, %v14031_v40, %v14079_v15  ;;  %v5532_v40 = vsel %vm1125_vm4, %v14081_v10, %v14039_v24 }
 0x49e   : > { %v14096_v21 = vpop.permute.xlu0 %5523  ;;  %4556 = vmatpush1.msra.mxu0 %v4421_v45  ;;  %11876 = vmatmul.mubr.msk.f32.vlgmr.msra.gmra.mxu1 %vm1696_vm10, %v11552_v4  ;;  %v11602_v45 = vld [vmem:[%s16037_s0 + $0x48] sm:$0x3] }
 0x49f   : > { %11564 = vmatprep.subr.msk.mxu1 %vm1703_vm9, %v13836_v19  ;;  %11559 = vmatmul.mubr.msk.f32.vlgmr.msra.gmra.mxu0 %vm1696_vm10, %v11551_v31 }
 0x4a0   : > { %11565 = vmatpush1.msk.msra.mxu1 %vm1703_vm9, %v13794_v16  ;;  %11568 = vmatprep.subr.msk.mxu0 %vm1703_vm9, %v13844_v53  ;;  %v4949_v16 = vsel %vm933_vm2, %v14002_v59, %v4938_v57  ;;  %v4946_v53 = vsel %vm933_vm2, %v13969_v6, %v13935_v37  ;;  %v4945_v59 = vsel %vm933_vm2, %v13921_v29, %v13969_v6  ;;  %v11575_v6 = vld [vmem:[%s16037_s0 + $0x20] sm:$0xff] }
 0x4a1   : > { %4723 = vmatprep.subr.mxu1 %v13754_v11  ;;  %11569 = vmatpush1.msk.msra.mxu0 %vm1703_vm9, %v13817_v14  ;;  %v14109_v50 = vpop.permute.xlu1 %6097  ;;  %v5240_v37 = vsel %vm1029_vm3, %v14010_v38, %v14075_v1  ;;  %v5239_v1 = vsel %vm1029_vm3, %v13979_v25, %v14073_v12 }
 0x4a2   : > { %4724 = vmatpush1.msra.mxu1 %v13721_v44  ;;  %4757 = vmatprep.mubr.f32.mxu1 %v16038_v52  ;;  %v14116_v19 = vpop.permute.xlu0 %5810  ;;  %v4950_v44 = vsel %vm933_vm2, %v4938_v57, %v14021_v9  ;;  %v5236_v57 = vsel %vm1029_vm3, %v13931_v41, %v13985_v54  ;;  %v11588_v41 = vld [vmem:[%s16037_s0 + $0x30] sm:$0xff] }
 0x4a3   : > { %4800 = vmatprep.subr.mxu0 %v13764_v13  ;;  %4595 = vmatprep.mubr.f32.mxu0 %v16038_v52 }
 0x4a4   : > { %11566 = vmatmul.mubr.msk.f32.vlgmr.msra.gmra.mxu1 %vm1696_vm10, %v4384_v34  ;;  %4801 = vmatpush1.msra.mxu0 %v13730_v28  ;;  %v4385_v28 = vld [vmem:[%s16037_s0 + $0x8] sm:$0x3] }
 0x4a5   : > { %11878 = vmatprep.subr.msk.mxu1 %vm1703_vm9, %v13873_v49  ;;  %11560 = vmatmul.mubr.msk.f32.gmra.mxu0 %vm1696_vm10, %v11552_v4  ;;  %v14127_v11 = vpop.permute.xlu1 %6091 }
 0x4a6   : > { %11879 = vmatpush3.msk.msra.mxu1 %vm1703_vm9, %v13873_v49  ;;  %11577 = vmatprep.subr.msk.mxu0 %vm1703_vm9, %v4950_v44  ;;  %v14132_v13 = vpop.permute.xlu0 %5814 }
 0x4a7   : > { %11880 = vmatprep.subr.mxu1 %v13856_v60  ;;  %4763 = vmatprep.mubr.f32.mxu1 %v16038_v52 }
 0x4a8   : > { %11881 = vmatpush3.msra.mxu1 %v13856_v60  ;;  %4834 = vmatprep.mubr.f32.mxu0 %v16038_v52 }
 0x4a9   : > { %11567 = vmatmul.mubr.msk.f32.gmra.mxu1 %vm1696_vm10, %v4385_v28  ;;  %11570 = vmatmul.mubr.msk.f32.vlgmr.msra.gmra.mxu0 %vm1696_vm10, %v4384_v34  ;;  %v4944_v14 = vpop.permute.xlu1 %4943 }
 0x4aa   : > { %11578 = vmatpush1.msk.msra.mxu0 %vm1703_vm9, %v4949_v16  ;;  %11882 = vmatprep.mubr.msk.f32.mxu1 %vm1696_vm10, %v4384_v34  ;;  %v14150_v49 = vpop.permute.xlu0 %6105  ;;  %v4952_v60 = vsel %vm933_vm2, %v14071_v26, %v4944_v14  ;;  %v5533_v34 = vsel %vm1125_vm4, %v14039_v24, %v14096_v21  ;;  %v5529_v24 = vsel %vm1125_vm4, %v13953_v39, %v14000_v58 }
 0x4ab   : > { %5004 = vmatprep.subr.mxu0 %v4946_v53  ;;  %4840 = vmatprep.mubr.f32.mxu0 %v16038_v52 }
 0x4ac   : > { %5005 = vmatpush1.msra.mxu0 %v4945_v59  ;;  %11581 = vmatprep.subr.msk.mxu1 %vm1703_vm9, %v4952_v60  ;;  %v5821_v59 = vsel %vm1221_vm5, %v13988_v0, %v14077_v23 }
 0x4ad   : > { %11883 = vmatmul.mubr.msk.f32.vlgmr.msra.gmra.mxu1 %vm1696_vm10, %v4385_v28  ;;  %11885 = vmatprep.subr.msk.mxu0 %vm1703_vm9, %v4944_v14  ;;  %v14164_v55 = vpop.permute.xlu1 %6402 }
 0x4ae   : > { %11571 = vmatmul.mubr.msk.f32.gmra.mxu0 %vm1696_vm10, %v4385_v28  ;;  %11582 = vmatpush1.msk.msra.mxu1 %vm1703_vm9, %v4951_v30  ;;  %v14168_v29 = vpop.permute.xlu0 %6109 }
 0x4af   : > { %5038 = vmatprep.mubr.f32.mxu0 %v16038_v52  ;;  %5115 = vmatprep.mubr.f32.mxu1 %v16038_v52 }
 0x4b1   : > { %v14175_v9 = vpop.permute.xlu1 %6400 }
 0x4b2   : > { %11579 = vmatmul.mubr.msk.f32.vlgmr.msra.gmra.mxu0 %vm1696_vm10, %v11575_v6  ;;  %v4934_v43 = vpop.permute.xlu0 %4933 }
 0x4b3   : > { %11886 = vmatpush3.msk.msra.mxu0 %vm1703_vm9, %v4944_v14  ;;  %5044 = vmatprep.mubr.f32.mxu0 %v16038_v52  ;;  %v4948_v47 = vsel %vm933_vm2, %v13977_v27, %v4934_v43  ;;  %v5237_v27 = vsel %vm1029_vm3, %v13985_v54, %v13945_v33  ;;  %v5238_v54 = vsel %vm1029_vm3, %v13945_v33, %v13979_v25  ;;  %v11589_v25 = vld [vmem:[%s16037_s0 + $0x38] sm:$0x3] }
 0x4b4   : > { %11887 = vmatprep.subr.mxu0 %v4934_v43  ;;  %5081 = vmatprep.subr.mxu1 %v4948_v47  ;;  %v5528_v33 = vsel %vm1125_vm4, %v13994_v61, %v13953_v39  ;;  %v5822_v14 = vsel %vm1221_vm5, %v14023_v17, %v14116_v19  ;;  %v5819_v39 = vsel %vm1221_vm5, %v14008_v63, %v13963_v7 }
 0x4b5   : > { %11888 = vmatpush3.msra.mxu0 %v4934_v43  ;;  %5082 = vmatpush1.msra.mxu1 %v4947_v3  ;;  %v5235_v31 = vpop.permute.xlu1 %5234  ;;  %v5818_v17 = vsel %vm1221_vm5, %v13950_v48, %v14008_v63  ;;  %v5820_v48 = vsel %vm1221_vm5, %v13963_v7, %v13988_v0  ;;  %v11614_v63 = vld [vmem:[%s16037_s0 + $0x50] sm:$0xff]  ;;  %v6120_v7 = vsel %vm1330_vm6, %v14033_v5, %v14150_v49  ;;  %v11615_v43 = vld [vmem:[%s16037_s0 + $0x58] sm:$0x3]  ;;  %v11628_v3 = vld [vmem:[%s16037_s0 + $0x68] sm:$0x3] }
 0x4b6   : > { %11580 = vmatmul.mubr.msk.f32.gmra.mxu0 %vm1696_vm10, %v11576_v8  ;;  %v14189_v35 = vpop.permute.xlu0 %5515  ;;  %11583 = vmatmul.mubr.msk.f32.vlgmr.msra.gmra.mxu1 %vm1696_vm10, %v11575_v6  ;;  %v5243_v4 = vsel %vm1029_vm3, %v14079_v15, %v5235_v31  ;;  %v6115_v5 = vsel %vm1330_vm6, %v14127_v11, %v14091_v46 }
 0x4b7   : > { %11889 = vmatprep.mubr.msk.f32.mxu0 %vm1696_vm10, %v11575_v6  ;;  %11590 = vmatprep.subr.msk.mxu1 %vm1703_vm9, %v5241_v20  ;;  %v5530_v28 = vsel %vm1125_vm4, %v14000_v58, %v14189_v35 }
 0x4b8   : > { %11591 = vmatpush1.msk.msra.mxu1 %vm1703_vm9, %v5240_v37  ;;  %11594 = vmatprep.subr.msk.mxu0 %vm1703_vm9, %v5243_v4 }
 0x4b9   : > { %5295 = vmatprep.subr.mxu1 %v5237_v27  ;;  %5121 = vmatprep.mubr.f32.mxu1 %v16038_v52  ;;  %v14211_v38 = vpop.permute.xlu1 %6390  ;;  %v6417_v27 = vsel %vm1436_vm7, %v14175_v9, %v14164_v55 }
 0x4ba   : > { %11890 = vmatmul.mubr.msk.f32.vlgmr.msra.gmra.mxu0 %vm1696_vm10, %v11576_v8  ;;  %5296 = vmatpush1.msra.mxu1 %v5236_v57  ;;  %v14217_v26 = vpop.permute.xlu0 %6095 }
 0x4bb   : > { %11595 = vmatpush1.msk.msra.mxu0 %vm1703_vm9, %v5242_v22  ;;  %11584 = vmatmul.mubr.msk.f32.gmra.mxu1 %vm1696_vm10, %v11576_v8  ;;  %v6116_v6 = vsel %vm1330_vm6, %v14091_v46, %v14217_v26  ;;  %v11627_v46 = vld [vmem:[%s16037_s0 + $0x60] sm:$0xff]  ;;  %v6117_v37 = vsel %vm1330_vm6, %v14217_v26, %v14109_v50 }
 0x4bc   : > { %5372 = vmatprep.subr.mxu0 %v5239_v1  ;;  %5406 = vmatprep.mubr.f32.mxu0 %v16038_v52 }
 0x4bd   : > { %5373 = vmatpush1.msra.mxu0 %v5238_v54  ;;  %11892 = vmatprep.subr.msk.mxu1 %vm1703_vm9, %v5235_v31  ;;  %v5526_v15 = vpop.permute.xlu1 %5525 }
 0x4be   : > { %11596 = vmatmul.mubr.msk.f32.vlgmr.msra.gmra.mxu0 %vm1696_vm10, %v11588_v41  ;;  %11603 = vmatprep.subr.msk.mxu0 %vm1703_vm9, %v5532_v40  ;;  %v14240_v18 = vpop.permute.xlu0 %6099  ;;  %v5534_v56 = vsel %vm1125_vm4, %v14096_v21, %v5526_v15  ;;  %v5823_v21 = vsel %vm1221_vm5, %v14116_v19, %v14048_v36  ;;  %v5824_v19 = vsel %vm1221_vm5, %v14048_v36, %v14132_v13  ;;  %vm11312_vm4 = vcmask 754688  }
 0x4bf   : > { %11604 = vmatpush1.msk.msra.mxu0 %vm1703_vm9, %v5531_v51  ;;  %5329 = vmatprep.mubr.f32.mxu1 %v16038_v52  ;;  %v6118_v4 = vsel %vm1330_vm6, %v14109_v50, %v14240_v18 }
 0x4c0   : > { %5586 = vmatprep.subr.mxu0 %v5528_v33  ;;  %11592 = vmatmul.mubr.msk.f32.vlgmr.msra.gmra.mxu1 %vm1696_vm10, %v11588_v41  ;;  %v11641_v33 = vld [vmem:[%s16037_s0 + $0x78] sm:$0x3] }
 0x4c1   : > { %5412 = vmatprep.mubr.f32.mxu0 %v16038_v52  ;;  %11893 = vmatpush3.msk.msra.mxu1 %vm1703_vm9, %v5235_v31  ;;  %v14256_v10 = vpop.permute.xlu1 %6388 }
 0x4c2   : > { %5587 = vmatpush1.msra.mxu0 %v5527_v2  ;;  %11894 = vmatprep.subr.mxu1 %v14073_v12  ;;  %v14259_v42 = vpop.permute.xlu0 %6404  ;;  %v6412_v22 = vsel %vm1436_vm7, %v14256_v10, %v14211_v38 }
 0x4c3   : > { %11597 = vmatmul.mubr.msk.f32.gmra.mxu0 %vm1696_vm10, %v11589_v25  ;;  %11899 = vmatprep.subr.msk.mxu0 %vm1703_vm9, %v5526_v15 }
 0x4c4   : > { %11895 = vmatpush3.msra.mxu1 %v14073_v12  ;;  %5335 = vmatprep.mubr.f32.mxu1 %v16038_v52 }
 0x4c5   : > { %11607 = vmatprep.subr.msk.mxu1 %vm1703_vm9, %v5534_v56  ;;  %11593 = vmatmul.mubr.msk.f32.gmra.mxu1 %vm1696_vm10, %v11589_v25  ;;  %v14272_v61 = vpop.permute.xlu1 %6396 }
 0x4c6   : > { %5620 = vmatprep.mubr.f32.mxu0 %v16038_v52  ;;  %11896 = vmatprep.mubr.msk.f32.mxu1 %vm1696_vm10, %v11588_v41  ;;  %v14276_v12 = vpop.permute.xlu0 %6101 }
 0x4c7   : > { %11605 = vmatmul.mubr.msk.f32.vlgmr.msra.gmra.mxu0 %vm1696_vm10, %v11601_v62 }
 0x4c8   : > { %11900 = vmatpush3.msk.msra.mxu0 %vm1703_vm9, %v5526_v15  ;;  %5626 = vmatprep.mubr.f32.mxu0 %v16038_v52 }
 0x4c9   : > { %11901 = vmatprep.subr.mxu0 %v14189_v35  ;;  %11897 = vmatmul.mubr.msk.f32.vlgmr.msra.gmra.mxu1 %vm1696_vm10, %v11589_v25  ;;  %v5817_v44 = vpop.permute.xlu1 %5816 }
 0x4ca   : > { %11902 = vmatpush3.msra.mxu0 %v14189_v35  ;;  %11608 = vmatpush1.msk.msra.mxu1 %vm1703_vm9, %v5533_v34  ;;  %v14294_v16 = vpop.permute.xlu0 %6392  ;;  %v5825_v53 = vsel %vm1221_vm5, %v14132_v13, %v5817_v44  ;;  %v6121_v13 = vsel %vm1330_vm6, %v14150_v49, %v14063_v32  ;;  %v6122_v35 = vsel %vm1330_vm6, %v14063_v32, %v14168_v29  ;;  %vm11345_vm5 = vcmask 7168  }
 0x4cb   : > { %11606 = vmatmul.mubr.msk.f32.gmra.mxu0 %vm1696_vm10, %v11602_v45  ;;  %5663 = vmatprep.subr.mxu1 %v5530_v28  ;;  %v6418_v32 = vsel %vm1436_vm7, %v14164_v55, %v14259_v42  ;;  %v6413_v50 = vsel %vm1436_vm7, %v14211_v38, %v14294_v16  ;;  %v6119_v55 = vsel %vm1330_vm6, %v14240_v18, %v14276_v12  ;;  %v11640_v38 = vld [vmem:[%s16037_s0 + $0x70] sm:$0xff] }
 0x4cc   : > { %5664 = vmatpush1.msra.mxu1 %v5529_v24  ;;  %5697 = vmatprep.mubr.f32.mxu1 %v16038_v52  ;;  %v11654_v24 = vld [vmem:[%s16037_s0 + $0x88] sm:$0x3] }
 0x4cd   : > { %11616 = vmatprep.subr.msk.mxu1 %vm1703_vm9, %v5823_v21  ;;  %11609 = vmatmul.mubr.msk.f32.vlgmr.msra.gmra.mxu1 %vm1696_vm10, %v11601_v62  ;;  %v14311_v60 = vpop.permute.xlu1 %6398 }
 0x4ce   : > { %11903 = vmatprep.mubr.msk.f32.mxu0 %vm1696_vm10, %v11601_v62  ;;  %11617 = vmatpush1.msk.msra.mxu1 %vm1703_vm9, %v5822_v14  ;;  %v14318_v58 = vpop.permute.xlu0 %6406 }
 0x4cf   : > { %11904 = vmatmul.mubr.msk.f32.vlgmr.msra.gmra.mxu0 %vm1696_vm10, %v11602_v45  ;;  %5877 = vmatprep.subr.mxu1 %v5819_v39  ;;  %v6419_v1 = vsel %vm1436_vm7, %v14259_v42, %v14318_v58  ;;  %v6416_v42 = vsel %vm1436_vm7, %v14272_v61, %v14311_v60 }
 0x4d0   : > { %11620 = vmatprep.subr.msk.mxu0 %vm1703_vm9, %v5825_v53  ;;  %5878 = vmatpush1.msra.mxu1 %v5818_v17 }
 0x4d1   : > { %11621 = vmatpush1.msk.msra.mxu0 %vm1703_vm9, %v5824_v19  ;;  %5703 = vmatprep.mubr.f32.mxu1 %v16038_v52  ;;  %v6112_v30 = vpop.permute.xlu1 %6111 }
 0x4d2   : > { %5954 = vmatprep.subr.mxu0 %v5821_v59  ;;  %11906 = vmatprep.subr.msk.mxu1 %vm1703_vm9, %v5817_v44  ;;  %v14340_v36 = vpop.permute.xlu0 %6394  ;;  %v6123_v47 = vsel %vm1330_vm6, %v14168_v29, %v6112_v30 }
 0x4d3   : > { %11610 = vmatmul.mubr.msk.f32.gmra.mxu1 %vm1696_vm10, %v11602_v45  ;;  %5955 = vmatpush1.msra.mxu0 %v5820_v48  ;;  %v6415_v40 = vsel %vm1436_vm7, %v14340_v36, %v14272_v61  ;;  %v6414_v51 = vsel %vm1436_vm7, %v14294_v16, %v14340_v36  ;;  %v11653_v61 = vld [vmem:[%s16037_s0 + $0x80] sm:$0xff]  ;;  %s16074_s0 = smov 14  }
 0x4d4   : > { %5988 = vmatprep.mubr.f32.mxu0 %v16038_v52  ;;  %11629 = vmatprep.subr.msk.mxu0 %vm1703_vm9, %v6121_v13 }
 0x4d5   : > { %11622 = vmatmul.mubr.msk.f32.vlgmr.msra.gmra.mxu0 %vm1696_vm10, %v11614_v63  ;;  %5911 = vmatprep.mubr.f32.mxu1 %v16038_v52  ;;  %v14353_v0 = vpop.permute.xlu1 %6701 }
 0x4d6   : > { %11630 = vmatpush1.msk.msra.mxu0 %vm1703_vm9, %v6120_v7  ;;  %5994 = vmatprep.mubr.f32.mxu0 %v16038_v52  ;;  %v14363_v8 = vpop.permute.xlu0 %6699 }
 0x4d7   : > { %6176 = vmatprep.subr.mxu0 %v6116_v6  ;;  %11618 = vmatmul.mubr.msk.f32.vlgmr.msra.gmra.mxu1 %vm1696_vm10, %v11614_v63  ;;  %v6715_v18 = vsel %vm1542_vm8, %v14363_v8, %v14353_v0 }
 0x4d8   : > { %11907 = vmatpush3.msk.msra.mxu1 %vm1703_vm9, %v5817_v44  ;;  %6177 = vmatpush1.msra.mxu0 %v6115_v5 }
 0x4d9   : > { %11623 = vmatmul.mubr.msk.f32.gmra.mxu0 %vm1696_vm10, %v11615_v43  ;;  %11908 = vmatprep.subr.mxu1 %v14077_v23  ;;  %v6409_v49 = vpop.permute.xlu1 %6408 }
 0x4da   : > { %11909 = vmatpush3.msra.mxu1 %v14077_v23  ;;  %5917 = vmatprep.mubr.f32.mxu1 %v16038_v52  ;;  %v14379_v11 = vpop.permute.xlu0 %6703  ;;  %v6420_v26 = vsel %vm1436_vm7, %v14318_v58, %v6409_v49 }
 0x4db   : > { %11633 = vmatprep.subr.msk.mxu1 %vm1703_vm9, %v6123_v47  ;;  %11619 = vmatmul.mubr.msk.f32.gmra.mxu1 %vm1696_vm10, %v11615_v43  ;;  %v6716_v44 = vsel %vm1542_vm8, %v14353_v0, %v14379_v11 }
 0x4dc   : > { %6210 = vmatprep.mubr.f32.mxu0 %v16038_v52  ;;  %11910 = vmatprep.mubr.msk.f32.mxu1 %vm1696_vm10, %v11614_v63 }
 0x4dd   : > { %11631 = vmatmul.mubr.msk.f32.vlgmr.msra.gmra.mxu0 %vm1696_vm10, %v11627_v46  ;;  %v14386_v23 = vpop.permute.xlu1 %6705 }
 0x4de   : > { %6216 = vmatprep.mubr.f32.mxu0 %v16038_v52  ;;  %v6114_v31 = vpop.permute.xlu0 %6113  ;;  %v6717_v62 = vsel %vm1542_vm8, %v14379_v11, %v14386_v23 }
 0x4df   : > { %11911 = vmatmul.mubr.msk.f32.vlgmr.msra.gmra.mxu1 %vm1696_vm10, %v11615_v43  ;;  %v6124_v20 = vsel %vm1330_vm6, %v6112_v30, %v6114_v31 }
 0x4e0   : > { %11634 = vmatpush1.msk.msra.mxu1 %vm1703_vm9, %v6122_v35  ;;  %6287 = vmatprep.mubr.f32.mxu1 %v16038_v52 }
 0x4e1   : > { %11632 = vmatmul.mubr.msk.f32.gmra.mxu0 %vm1696_vm10, %v11628_v3  ;;  %6253 = vmatprep.subr.mxu1 %v6118_v4  ;;  %v6688_v57 = vpop.permute.xlu1 %6687 }
 0x4e2   : > { %6254 = vmatpush1.msra.mxu1 %v6117_v37  ;;  %11913 = vmatprep.subr.msk.mxu0 %vm1703_vm9, %v6124_v20  ;;  %v6698_v29 = vpop.permute.xlu0 %6697 }
 0x4e3   : > { %11642 = vmatprep.subr.msk.mxu1 %vm1703_vm9, %v6418_v32  ;;  %11635 = vmatmul.mubr.msk.f32.vlgmr.msra.gmra.mxu1 %vm1696_vm10, %v11627_v46  ;;  %v6714_v25 = vsel %vm1542_vm8, %v6698_v29, %v14363_v8 }
 0x4e4   : > { %11643 = vmatpush1.msk.msra.mxu1 %vm1703_vm9, %v6417_v27  ;;  %6293 = vmatprep.mubr.f32.mxu1 %v16038_v52 }
 0x4e5   : > { %6473 = vmatprep.subr.mxu1 %v6413_v50  ;;  %11914 = vmatpush3.msk.msra.mxu0 %vm1703_vm9, %v6124_v20  ;;  %v6692_v41 = vpop.permute.xlu1 %6691 }
 0x4e6   : > { %6474 = vmatpush1.msra.mxu1 %v6412_v22  ;;  %11915 = vmatprep.subr.mxu0 %v6119_v55  ;;  %v6411_v9 = vpop.permute.xlu0 %6410 }
 0x4e7   : > { %11636 = vmatmul.mubr.msk.f32.gmra.mxu1 %vm1696_vm10, %v11628_v3  ;;  %11916 = vmatpush3.msra.mxu0 %v6119_v55  ;;  %v6421_v54 = vsel %vm1436_vm7, %v6409_v49, %v6411_v9 }
 0x4e8   : > { %11917 = vmatprep.mubr.msk.f32.mxu0 %vm1696_vm10, %v11627_v46  ;;  %11646 = vmatprep.subr.msk.mxu0 %vm1703_vm9, %v6420_v26 }
 0x4e9   : > { %11918 = vmatmul.mubr.msk.f32.vlgmr.msra.gmra.mxu0 %vm1696_vm10, %v11628_v3  ;;  %6507 = vmatprep.mubr.f32.mxu1 %v16038_v52  ;;  %v6686_v10 = vpop.permute.xlu1 %6685 }
 0x4ea   : > { %11647 = vmatpush1.msk.msra.mxu0 %vm1703_vm9, %v6419_v1  ;;  %6584 = vmatprep.mubr.f32.mxu0 %v16038_v52  ;;  %v6690_v15 = vpop.permute.xlu0 %6689  ;;  %v6709_v12 = vsel %vm1542_vm8, %v6686_v10, %v6688_v57 }
 0x4eb   : > { %11644 = vmatmul.mubr.msk.f32.vlgmr.msra.gmra.mxu1 %vm1696_vm10, %v11640_v38  ;;  %6550 = vmatprep.subr.mxu0 %v6415_v40  ;;  %v6710_v56 = vsel %vm1542_vm8, %v6688_v57, %v6690_v15  ;;  %v6711_v16 = vsel %vm1542_vm8, %v6690_v15, %v6692_v41 }
 0x4ec   : > { %6551 = vmatpush1.msra.mxu0 %v6414_v51  ;;  %11920 = vmatprep.subr.msk.mxu1 %vm1703_vm9, %v6421_v54 }
 0x4ed   : > { %11648 = vmatmul.mubr.msk.f32.vlgmr.msra.gmra.mxu0 %vm1696_vm10, %v11640_v38  ;;  %11655 = vmatprep.subr.msk.mxu0 %vm1703_vm9, %v6715_v18  ;;  %v6696_v21 = vpop.permute.xlu1 %6695 }
 0x4ee   : > { %6513 = vmatprep.mubr.f32.mxu1 %v16038_v52  ;;  %11921 = vmatpush3.msk.msra.mxu1 %vm1703_vm9, %v6421_v54  ;;  %v6694_v2 = vpop.permute.xlu0 %6693 }
 0x4ef   : > { %11656 = vmatpush1.msk.msra.mxu0 %vm1703_vm9, %v6714_v25  ;;  %11645 = vmatmul.mubr.msk.f32.gmra.mxu1 %vm1696_vm10, %v11641_v33  ;;  %v6712_v34 = vsel %vm1542_vm8, %v6692_v41, %v6694_v2  ;;  %v6713_v14 = vsel %vm1542_vm8, %v6694_v2, %v6696_v21 }
 0x4f0   : > { %11922 = vmatprep.subr.mxu1 %v6416_v42  ;;  %6590 = vmatprep.mubr.f32.mxu0 %v16038_v52 }
 0x4f1   : > { %11923 = vmatpush3.msra.mxu1 %v6416_v42  ;;  %11649 = vmatmul.mubr.msk.f32.gmra.mxu0 %vm1696_vm10, %v11641_v33 }
 0x4f2   : > { %6770 = vmatprep.subr.mxu0 %v6710_v56  ;;  %11659 = vmatprep.subr.msk.mxu1 %vm1703_vm9, %v6717_v62  ;;  %v6708_v45 = vpop.permute.xlu0 %6707 }
 0x4f3   : > { %11924 = vmatprep.mubr.msk.f32.mxu1 %vm1696_vm10, %v11640_v38  ;;  %6771 = vmatpush1.msra.mxu0 %v6709_v12  ;;  %v6718_v28 = vsel %vm1542_vm8, %v14386_v23, %v6708_v45 }
 0x4f4   : > { %11925 = vmatmul.mubr.msk.f32.vlgmr.msra.gmra.mxu1 %vm1696_vm10, %v11641_v33  ;;  %6804 = vmatprep.mubr.f32.mxu0 %v16038_v52 }
 0x4f5   : > { %11660 = vmatpush1.msk.msra.mxu1 %vm1703_vm9, %v6716_v44  ;;  %11657 = vmatmul.mubr.msk.f32.vlgmr.msra.gmra.mxu0 %vm1696_vm10, %v11653_v61 }
 0x4f6   : > { %6847 = vmatprep.subr.mxu1 %v6712_v34  ;;  %6881 = vmatprep.mubr.f32.mxu1 %v16038_v52 }
 0x4f7   : > { %6848 = vmatpush1.msra.mxu1 %v6711_v16  ;;  %6810 = vmatprep.mubr.f32.mxu0 %v16038_v52 }
 0x4f8   : > { %11661 = vmatmul.mubr.msk.f32.vlgmr.msra.gmra.mxu1 %vm1696_vm10, %v11653_v61  ;;  %11927 = vmatprep.subr.msk.mxu0 %vm1703_vm9, %v6718_v28 }
 0x4f9   : > { %11658 = vmatmul.mubr.msk.f32.gmra.mxu0 %vm1696_vm10, %v11654_v24  ;;  %6887 = vmatprep.mubr.f32.mxu1 %v16038_v52 }
 0x4fa   : > { %11928 = vmatpush3.msk.msra.mxu0 %vm1703_vm9, %v6718_v28  ;;  %11931 = vmatprep.mubr.msk.f32.mxu0 %vm1696_vm10, %v11653_v61 }
 0x4fb   : > { %11929 = vmatprep.subr.mxu0 %v6713_v14 }
 0x4fc   : > { %11662 = vmatmul.mubr.msk.f32.gmra.mxu1 %vm1696_vm10, %v11654_v24  ;;  %11930 = vmatpush3.msra.mxu0 %v6713_v14 }
 0x4fd   : > { %11932 = vmatmul.mubr.msk.f32.vlgmr.msra.gmra.mxu0 %vm1696_vm10, %v11654_v24  ;;  %7236 = vmatprep.mubr.f32.mxu1 %v16038_v52 }
 0x4fe   : > { %7313 = vmatprep.mubr.f32.mxu0 %v16038_v52 }
 0x548   : > { %v4514_v53 = vpop.f32.mrf.mxu1 }
 0x54a   : > { %v14507_v60 = vpop.f32.mrf.mxu1 }
 0x54c   : > { %v14509_v39 = vpop.f32.mrf.mxu1 }
 0x54e   : > { %v14511_v58 = vpop.f32.mrf.mxu1 }
 0x55e   : > { %v14513_v17 = vpop.f32.mrf.mxu1 }
 0x55f   : > { %v14515_v19 = vpop.f32.mrf.mxu0 }
 0x560   : > { %v14517_v59 = vpop.f32.mrf.mxu1 }
 0x561   : > { %v14519_v30 = vpop.f32.mrf.mxu0 }
 0x564   : > { %v4759_v48 = vpop.f32.mrf.mxu1 }
 0x565   : > { %v4760_v63 = vadd.f32 %v4759_v48, %v4514_v53  ;;  %v14521_v36 = vpop.f32.mrf.mxu0 }
 0x566   : > { %v4761_v13 = vpop.f32.mrf.mxu1 }
 0x567   : > { %v14523_v7 = vpop.f32.mrf.mxu0 }
 0x569   : > { %v4765_v0 = vpop.f32.mrf.mxu1  ;;  %v4836_v6 = vpop.f32.mrf.mxu0 }
 0x56b   : > { %v4838_v43 = vpop.f32.mrf.mxu0  ;;  %v4767_v8 = vpop.f32.mrf.mxu1 }
 0x56d   : > { %v11884_v49 = vpop.f32.mrf.mxu1 }
 0x56e   : > { %v4842_v5 = vpop.f32.mrf.mxu0 }
 0x56f   : > { %v4913_v23 = vpop.f32.mrf.mxu1 }
 0x570   : > { %v4844_v47 = vpop.f32.mrf.mxu0 }
 0x572   : > { %v5040_v46 = vpop.f32.mrf.mxu0 }
 0x573   : > { %v14525_v11 = vadd.f32 %v5040_v46, %v4760_v63 }
 0x574   : > { %v5042_v3 = vpop.f32.mrf.mxu0 }
 0x576   : > { %v5046_v31 = vpop.f32.mrf.mxu0  ;;  %v5117_v35 = vpop.f32.mrf.mxu1 }
 0x578   : > { %v5048_v20 = vpop.f32.mrf.mxu0  ;;  %v5119_v4 = vpop.f32.mrf.mxu1 }
 0x57a   : > { %v11891_v37 = vpop.f32.mrf.mxu0 }
 0x57b   : > { %v5123_v32 = vpop.f32.mrf.mxu1 }
 0x57c   : > { %v5194_v29 = vpop.f32.mrf.mxu0 }
 0x57d   : > { %v14527_v27 = vpop.f32.mrf.mxu1 }
 0x57e   : > { %v5408_v57 = vpop.f32.mrf.mxu0 }
 0x580   : > { %v5410_v50 = vpop.f32.mrf.mxu0  ;;  %v5331_v22 = vpop.f32.mrf.mxu1 }
 0x582   : > { %v5333_v55 = vpop.f32.mrf.mxu1 }
 0x583   : > { %v14529_v9 = vpop.f32.mrf.mxu0 }
 0x585   : > { %v14531_v26 = vpop.f32.mrf.mxu0  ;;  %v5337_v38 = vpop.f32.mrf.mxu1 }
 0x587   : > { %v14533_v1 = vpop.f32.mrf.mxu0  ;;  %v5339_v41 = vpop.f32.mrf.mxu1 }
 0x589   : > { %v5624_v54 = vpop.f32.mrf.mxu0  ;;  %v14535_v40 = vpop.f32.mrf.mxu1 }
 0x58b   : > { %v14537_v15 = vpop.f32.mrf.mxu0  ;;  %v14539_v51 = vpop.f32.mrf.mxu1 }
 0x58d   : > { %v14541_v18 = vpop.f32.mrf.mxu0  ;;  %v5699_v33 = vpop.f32.mrf.mxu1 }
 0x58f   : > { %v14543_v25 = vpop.f32.mrf.mxu0  ;;  %v14545_v2 = vpop.f32.mrf.mxu1 }
 0x591   : > { %v14547_v10 = vpop.f32.mrf.mxu0 }
 0x593   : > { %v14549_v42 = vpop.f32.mrf.mxu1 }
 0x595   : > { %v14551_v56 = vpop.f32.mrf.mxu0  ;;  %v14553_v62 = vpop.f32.mrf.mxu1 }
 0x597   : > { %v14555_v12 = vpop.f32.mrf.mxu0  ;;  %v14557_v61 = vpop.f32.mrf.mxu1 }
 0x598   : > { %16039 = vst [vmem:[#allocation20_spill] sm:$0xff] %v14555_v12  ;;  %16040 = vst [vmem:[#allocation22_spill] sm:$0xff] %v14557_v61 }
 0x599   : > { %v14559_v45 = vpop.f32.mrf.mxu0  ;;  %v5915_v34 = vpop.f32.mrf.mxu1 }
 0x59a   : > { %16041 = vst [vmem:[#allocation24_spill] sm:$0xff] %v14559_v45 }
 0x59b   : > { %v14561_v44 = vpop.f32.mrf.mxu0  ;;  %v5919_v28 = vpop.f32.mrf.mxu1 }
 0x59c   : > { %16042 = vst [vmem:[#allocation25_spill] sm:$0xff] %v14561_v44 }
 0x59d   : > { %v14563_v16 = vpop.f32.mrf.mxu0  ;;  %v14565_v24 = vpop.f32.mrf.mxu1 }
 0x59e   : > { %16043 = vst [vmem:[#allocation35_spill] sm:$0xff] %v14563_v16  ;;  %16044 = vst [vmem:[#allocation32_spill] sm:$0xff] %v14565_v24  ;;  %v4762_v16 = vadd.f32 %v4761_v13, %v14507_v60  ;;  %v4766_v24 = vadd.f32 %v4765_v0, %v14509_v39  ;;  %v4845_v60 = vadd.f32 %v4844_v47, %v14523_v7 }
 0x59f   : > { %v6214_v21 = vpop.f32.mrf.mxu0  ;;  %v14567_v14 = vpop.f32.mrf.mxu1 }
 0x5a0   : > { %16045 = vst [vmem:[#allocation34_spill] sm:$0xff] %v14567_v14  ;;  %v4837_v14 = vadd.f32 %v4836_v6, %v14515_v19  ;;  %v5204_v13 = vadd.f32 %v5042_v3, %v4762_v16  ;;  %v5208_v39 = vadd.f32 %v5046_v31, %v4766_v24 }
 0x5a1   : > { %v14569_v53 = vpop.f32.mrf.mxu1  ;;  %v14571_v48 = vpop.f32.mrf.mxu0 }
 0x5a2   : > { %16046 = vst [vmem:[#allocation27_spill] sm:$0xff] %v14569_v53  ;;  %16047 = vst [vmem:[#allocation28_spill] sm:$0xff] %v14571_v48  ;;  %v4768_v53 = vadd.f32 %v4767_v8, %v14511_v58  ;;  %v4839_v48 = vadd.f32 %v4838_v43, %v14519_v30  ;;  %v5205_v19 = vadd.f32 %v5117_v35, %v4837_v14 }
 0x5a3   : > { %v6289_v63 = vpop.f32.mrf.mxu1  ;;  %v14575_v52 = vpop.f32.mrf.mxu0  ;;  %v5499_v47 = vadd.f32 %v5337_v38, %v5208_v39 }
 0x5a4   : > { %16049 = vst [vmem:[#allocation36_spill] sm:$0xff] %v14575_v52  ;;  %v5209_v0 = vadd.f32 %v5048_v20, %v4768_v53  ;;  %v5206_v6 = vadd.f32 %v5119_v4, %v4839_v48 }
 0x5a5   : > { %v14573_v46 = vpop.f32.mrf.mxu1 }
 0x5a6   : > { %16048 = vst [vmem:[#allocation29_spill] sm:$0xff] %v14573_v46  ;;  %v4919_v46 = vadd.f32 %v11884_v49, %v14513_v17  ;;  %v5495_v49 = vadd.f32 %v5333_v55, %v5204_v13 }
 0x5a7   : > { %v14577_v45 = vpop.f32.mrf.mxu1 }
 0x5a8   : > { %16050 = vst [vmem:[#allocation30_spill] sm:$0xff] %v14577_v45  ;;  %v5212_v30 = vadd.f32 %v11891_v37, %v4919_v46  ;;  %v5497_v45 = vadd.f32 %v5410_v50, %v5206_v6  ;;  %v5786_v3 = vadd.f32 %v5624_v54, %v5495_v49 }
 0x5a9   : > { %v14579_v44 = vpop.f32.mrf.mxu1  ;;  %v14581_v61 = vpop.f32.mrf.mxu0 }
 0x5aa   : > { %16051 = vst [vmem:[#allocation31_spill] sm:$0xff] %v14579_v44  ;;  %16052 = vst [vmem:[#allocation33_spill] sm:$0xff] %v14581_v61  ;;  %v4843_v44 = vadd.f32 %v4842_v5, %v14521_v36  ;;  %v4914_v61 = vadd.f32 %v4913_v23, %v14517_v59  ;;  %v5494_v36 = vadd.f32 %v5331_v22, %v14525_v11 }
 0x5ab   : > { %v14589_v12 = vpop.f32.mrf.mxu0  ;;  %v14591_v52 = vpop.f32.mrf.mxu1  ;;  %v5500_v23 = vadd.f32 %v5339_v41, %v5209_v0  ;;  %v5503_v20 = vadd.f32 %v14535_v40, %v5212_v30  ;;  %v5788_v22 = vadd.f32 %v14545_v2, %v5497_v45  ;;  %v16055_v40 = vld [vmem:[#allocation20_spill] sm:$0xff] }
 0x5ac   : > { %16053 = vst [vmem:[#allocation26_spill] sm:$0xff] %v14589_v12  ;;  %16054 = vst [vmem:[#allocation37_spill] sm:$0xff] %v14591_v52  ;;  %v5207_v43 = vadd.f32 %v5194_v29, %v4914_v61  ;;  %v5210_v17 = vadd.f32 %v5123_v32, %v4843_v44  ;;  %v5496_v12 = vadd.f32 %v5408_v57, %v5205_v19  ;;  %v16058_v61 = vld [vmem:[#allocation25_spill] sm:$0xff]  ;;  %v16059_v45 = vld [vmem:[#allocation32_spill] sm:$0xff] }
 0x5ad   : > { %v6511_v58 = vpop.f32.mrf.mxu1  ;;  %v6586_v8 = vpop.f32.mrf.mxu0  ;;  %v5211_v52 = vadd.f32 %v14527_v27, %v4845_v60  ;;  %v5785_v35 = vadd.f32 %v14533_v1, %v5494_v36  ;;  %v5790_v29 = vadd.f32 %v14537_v15, %v5499_v47  ;;  %v5791_v27 = vadd.f32 %v14541_v18, %v5500_v23  ;;  %v16063_v53 = vld [vmem:[#allocation29_spill] sm:$0xff]  ;;  %v16065_v39 = vld [vmem:[#allocation36_spill] sm:$0xff] }
 0x5ae   : > { %v5501_v7 = vadd.f32 %v14529_v9, %v5210_v17  ;;  %v5787_v4 = vadd.f32 %v5699_v33, %v5496_v12  ;;  %v5498_v11 = vadd.f32 %v14539_v51, %v5207_v43  ;;  %v6077_v57 = vadd.f32 %v5915_v34, %v5786_v3  ;;  %v16056_v51 = vld [vmem:[#allocation22_spill] sm:$0xff]  ;;  %v16057_v33 = vld [vmem:[#allocation24_spill] sm:$0xff] }
 0x5af   : > { %v6515_v59 = vpop.f32.mrf.mxu1  ;;  %v6588_v5 = vpop.f32.mrf.mxu0  ;;  %v5502_v31 = vadd.f32 %v14531_v26, %v5211_v52  ;;  %v5794_v50 = vadd.f32 %v14543_v25, %v5503_v20  ;;  %v6081_v1 = vadd.f32 %v5919_v28, %v5790_v29  ;;  %v6079_v15 = vadd.f32 %v16055_v40, %v5788_v22  ;;  %v16060_v34 = vld [vmem:[#allocation28_spill] sm:$0xff]  ;;  %v16061_v28 = vld [vmem:[#allocation35_spill] sm:$0xff]  ;;  %v16066_v43 = vld [vmem:[#allocation30_spill] sm:$0xff] }
 0x5b0   : > { %v5792_v52 = vadd.f32 %v14549_v42, %v5501_v7  ;;  %v6078_v55 = vadd.f32 %v14551_v56, %v5787_v4  ;;  %v5789_v26 = vadd.f32 %v14547_v10, %v5498_v11  ;;  %v6376_v41 = vadd.f32 %v6214_v21, %v6077_v57  ;;  %v16062_v21 = vld [vmem:[#allocation34_spill] sm:$0xff] }
 0x5b1   : > { %v6517_v37 = vpop.f32.mrf.mxu1  ;;  %v6592_v32 = vpop.f32.mrf.mxu0  ;;  %v5793_v38 = vadd.f32 %v14553_v62, %v5502_v31  ;;  %v6076_v18 = vadd.f32 %v16056_v51, %v5785_v35  ;;  %v6082_v56 = vadd.f32 %v16059_v45, %v5791_v27  ;;  %v6380_v44 = vadd.f32 %v16060_v34, %v6081_v1  ;;  %v16067_v17 = vld [vmem:[#allocation31_spill] sm:$0xff]  ;;  %v16068_v23 = vld [vmem:[#allocation33_spill] sm:$0xff] }
 0x5b2   : > { %v6083_v25 = vadd.f32 %v16057_v33, %v5792_v52  ;;  %v6377_v12 = vadd.f32 %v6289_v63, %v6078_v55  ;;  %v6673_v10 = vadd.f32 %v6511_v58, %v6376_v41  ;;  %v14617_v62 = vpop.permute.xlu1 %6993  ;;  %v6085_v14 = vadd.f32 %v16062_v21, %v5794_v50  ;;  %v16064_v63 = vld [vmem:[#allocation27_spill] sm:$0xff]  ;;  %v6999_v50 = vpop.permute.xlu0 %6998 }
 0x5b3   : > { %v6594_v9 = vpop.f32.mrf.mxu0  ;;  %v6084_v42 = vadd.f32 %v16058_v61, %v5793_v38  ;;  %v6375_v24 = vadd.f32 %v16061_v28, %v6076_v18  ;;  %v6378_v48 = vadd.f32 %v16063_v53, %v6079_v15  ;;  %v6080_v13 = vadd.f32 %v16064_v63, %v5789_v26  ;;  %v16069_v4 = vld [vmem:[#allocation26_spill] sm:$0xff]  ;;  %v16070_v45 = vld [vmem:[#allocation37_spill] sm:$0xff] }
 0x5b4   : > { %v11926_v54 = vpop.f32.mrf.mxu1  ;;  %v6674_v46 = vadd.f32 %v6586_v8, %v6377_v12  ;;  %v6381_v0 = vadd.f32 %v16065_v39, %v6082_v56  ;;  %v6677_v19 = vadd.f32 %v6515_v59, %v6380_v44  ;;  %v6382_v58 = vadd.f32 %v16066_v43, %v6083_v25 }
 0x5b5   : > { %v6806_v2 = vpop.f32.mrf.mxu0  ;;  %v6383_v49 = vadd.f32 %v16067_v17, %v6084_v42  ;;  %v6675_v36 = vadd.f32 %v6588_v5, %v6378_v48  ;;  %v6384_v3 = vadd.f32 %v16068_v23, %v6085_v14  ;;  %v6379_v29 = vadd.f32 %v16069_v4, %v6080_v13 }
 0x5b6   : > { %v6663_v16 = vpop.f32.mrf.mxu1  ;;  %v6678_v31 = vadd.f32 %v6517_v37, %v6381_v0  ;;  %v6679_v11 = vadd.f32 %v6592_v32, %v6382_v58  ;;  %v7016_v38 = vpop.permute.xlu1 %7015  ;;  %v6672_v56 = vadd.f32 %v16070_v45, %v6375_v24 }
 0x5b7   : > { %v6808_v60 = vpop.f32.mrf.mxu0  ;;  %v6681_v22 = vadd.f32 %v11926_v54, %v6384_v3  ;;  %v6680_v1 = vadd.f32 %v6594_v9, %v6383_v49  ;;  %v6676_v9 = vadd.f32 %v6663_v16, %v6379_v29  ;;  %v7021_v44 = vpop.permute.xlu0 %7020 }
 0x5b8   : > { %v6970_v6 = vadd.f32 %v6808_v60, %v6673_v10  ;;  %v6883_v30 = vpop.f32.mrf.mxu1  ;;  %v6969_v10 = vadd.f32 %v6806_v2, %v6672_v56 }
 0x5b9   : > { %v6971_v7 = vadd.f32 %v6883_v30, %v6674_v46  ;;  %v6812_v47 = vpop.f32.mrf.mxu0 }
 0x5ba   : > { %v6980_v35 = vmax.f32 %v6970_v6, 0.0  ;;  %v6974_v8 = vadd.f32 %v6812_v47, %v6677_v19  ;;  %v6885_v20 = vpop.f32.mrf.mxu1  ;;  %v6979_v24 = vmax.f32 %v6969_v10, 0.0 }
 0x5bb   : > { %v6981_v27 = vmax.f32 %v6971_v7, 0.0  ;;  %v6972_v59 = vadd.f32 %v6885_v20, %v6675_v36  ;;  %v6814_v57 = vpop.f32.mrf.mxu0 }
 0x5bc   : > { %v7002_v52 = vmul.f32 %v14617_v62, %v6980_v35  ;;  %v6984_v55 = vmax.f32 %v6974_v8, 0.0  ;;  %v6975_v5 = vadd.f32 %v6814_v57, %v6678_v31  ;;  %v6889_v26 = vpop.f32.mrf.mxu1  ;;  %v7001_v2 = vmul.f32 %v14617_v62, %v6979_v24 }
 0x5bd   : > { %v7003_v37 = vmul.f32 %v14617_v62, %v6981_v27  ;;  %v6982_v41 = vmax.f32 %v6972_v59, 0.0  ;;  %v6976_v40 = vadd.f32 %v6889_v26, %v6679_v11  ;;  %v11933_v15 = vpop.f32.mrf.mxu0 }
 0x5be   : > { %v7024_v51 = vadd.f32 %v7016_v38, %v7002_v52  ;;  %v7006_v18 = vmul.f32 %v6999_v50, %v6984_v55  ;;  %v6985_v32 = vmax.f32 %v6975_v5, 0.0  ;;  %v6891_v33 = vpop.f32.mrf.mxu1  ;;  %v6978_v25 = vadd.f32 %v11933_v15, %v6681_v22  ;;  %v7434_v15 = vld [vmem:[%s15820_s12 + $0x8] sm:$0xff] }
 0x5bf   : > { %v7025_v12 = vadd.f32 %v7016_v38, %v7003_v37  ;;  %v7004_v54 = vmul.f32 %v14617_v62, %v6982_v41  ;;  %v6986_v61 = vmax.f32 %v6976_v40, 0.0  ;;  %v6977_v42 = vadd.f32 %v6891_v33, %v6680_v1  ;;  %v6960_v34 = vpop.f32.mrf.mxu0  ;;  %v7412_v41 = vld [vmem:[%s15819_s11 + $0x8] sm:$0xff] }
 0x5c0   : > { %7045 = vrot.lane.b32.xlu0 %v7024_v51, %s16071_s28  ;;  %v7007_v21 = vmul.f32 %v6999_v50, %v6985_v32  ;;  %v7028_v53 = vadd.f32 %v7021_v44, %v7006_v18  ;;  %v6988_v46 = vmax.f32 %v6978_v25, 0.0  ;;  %v6973_v60 = vadd.f32 %v6960_v34, %v6676_v9  ;;  %v7433_v18 = vld [vmem:[%s15820_s12] sm:$0xff] }
 0x5c1   : > { %7047 = vrot.lane.b32.xlu1 %v7025_v12, %s16071_s28  ;;  %v7026_v28 = vadd.f32 %v7016_v38, %v7004_v54  ;;  %v6987_v14 = vmax.f32 %v6977_v42, 0.0  ;;  %v7008_v48 = vmul.f32 %v6999_v50, %v6986_v61  ;;  %v7023_v43 = vadd.f32 %v7016_v38, %v7001_v2 }
 0x5c2   : > { %v7029_v63 = vadd.f32 %v7021_v44, %v7007_v21  ;;  %v7010_v16 = vmul.f32 %v6999_v50, %v6988_v46  ;;  %v6983_v0 = vmax.f32 %v6973_v60, 0.0  ;;  %v7149_v60 = vld [vmem:[%s15818_s10] sm:$0xff] }
 0x5c3   : > { %v7009_v13 = vmul.f32 %v6999_v50, %v6987_v14  ;;  %v7030_v39 = vadd.f32 %v7021_v44, %v7008_v48 }
 0x5c4   : > { %7049 = vrot.lane.b32.xlu0 %v7026_v28, %s16071_s28  ;;  %v7032_v6 = vadd.f32 %v7021_v44, %v7010_v16  ;;  %v7005_v30 = vmul.f32 %v14617_v62, %v6983_v0 }
 0x5c5   : > { %7053 = vrot.lane.b32.xlu1 %v7028_v53, %s16071_s28  ;;  %v7031_v19 = vadd.f32 %v7021_v44, %v7009_v13 }
 0x5c6   : > { %v7027_v58 = vadd.f32 %v7016_v38, %v7005_v30 }
 0x5c8   : > { %7055 = vrot.lane.b32.xlu0 %v7029_v63, %s16071_s28 }
 0x5c9   : > { %7057 = vrot.lane.b32.xlu1 %v7030_v39, %s16071_s28 }
 0x5cc   : > { %7059 = vrot.lane.b32.xlu0 %v7031_v19, %s16071_s28 }
 0x5cd   : > { %7061 = vrot.lane.b32.xlu1 %v7032_v6, %s16071_s28 }
 0x5d0   : > { %7043 = vrot.lane.b32.xlu0 %v7023_v43, %s16071_s28 }
 0x5d1   : > { %7051 = vrot.lane.b32.xlu1 %v7027_v58, %s16071_s28  ;;  %s12065_s28 = smov 12  }
 0x632   : > { %v7046_v17 = vpop.permute.xlu0 %7045 }
 0x633   : > { %v7048_v49 = vpop.permute.xlu1 %7047 }
 0x634   : > { %v7064_v36 = vsel %vm837_vm1, %v7046_v17, %v7048_v49 }
 0x635   : > { %v14645_v7 = vmax.f32 %v7024_v51, %v7064_v36  ;;  %v7411_v51 = vld [vmem:[%s15819_s11] sm:$0xff] }
 0x636   : > { %v7050_v47 = vpop.permute.xlu0 %7049 }
 0x637   : > { %v7054_v23 = vpop.permute.xlu1 %7053  ;;  %7103 = vrot.lane.b32.xlu1 %v14645_v7, %s16015_s29  ;;  %v7065_v62 = vsel %vm837_vm1, %v7048_v49, %v7050_v47 }
 0x638   : > { %v14650_v3 = vmax.f32 %v7025_v12, %v7065_v62 }
 0x63a   : > { %v7056_v31 = vpop.permute.xlu0 %7055  ;;  %7105 = vrot.lane.b32.xlu0 %v14650_v3, %s16015_s29 }
 0x63b   : > { %v7058_v35 = vpop.permute.xlu1 %7057  ;;  %v7067_v4 = vsel %vm837_vm1, %v7054_v23, %v7056_v31 }
 0x63c   : > { %v7068_v8 = vsel %vm837_vm1, %v7056_v31, %v7058_v35  ;;  %v7086_v27 = vmax.f32 %v7028_v53, %v7067_v4 }
 0x63d   : > { %v7087_v20 = vmax.f32 %v7029_v63, %v7068_v8 }
 0x63e   : > { %v7060_v29 = vpop.permute.xlu0 %7059 }
 0x63f   : > { %v7062_v11 = vpop.permute.xlu1 %7061  ;;  %7113 = vrot.lane.b32.xlu0 %v7087_v20, %s16015_s29  ;;  %v7069_v55 = vsel %vm837_vm1, %v7058_v35, %v7060_v29 }
 0x640   : > { %v7090_v52 = vmax.f32 %v7032_v6, %v7062_v11  ;;  %v7088_v26 = vmax.f32 %v7030_v39, %v7069_v55  ;;  %v7070_v38 = vsel %vm837_vm1, %v7060_v29, %v7062_v11  ;;  %v16072_v6 = vmov 0.0  }
 0x641   : > { %v7089_v37 = vmax.f32 %v7031_v19, %v7070_v38  ;;  %v7150_v19 = vld [vmem:[%s15818_s10 + $0x8] sm:$0xff] }
 0x642   : > { %v7044_v59 = vpop.permute.xlu0 %7043 }
 0x643   : > { %v7052_v57 = vpop.permute.xlu1 %7051  ;;  %7111 = vrot.lane.b32.xlu0 %v7086_v27, %s16015_s29  ;;  %v7063_v50 = vsel %vm837_vm1, %v7044_v59, %v7046_v17 }
 0x644   : > { %v7081_v22 = vmax.f32 %v7023_v43, %v7063_v50  ;;  %v7066_v5 = vsel %vm837_vm1, %v7050_v47, %v7052_v57  ;;  %v7085_v40 = vmax.f32 %v7027_v58, %v7052_v57 }
 0x645   : > { %v7084_v1 = vmax.f32 %v7026_v28, %v7066_v5 }
 0x646   : > { %7101 = vrot.lane.b32.xlu1 %v7081_v22, %s16015_s29 }
 0x647   : > { %7119 = vrot.lane.b32.xlu0 %v7090_v52, %s16015_s29 }
 0x64a   : > { %7115 = vrot.lane.b32.xlu1 %v7088_v26, %s16015_s29 }
 0x64b   : > { %7107 = vrot.lane.b32.xlu0 %v7084_v1, %s16015_s29 }
 0x64e   : > { %7117 = vrot.lane.b32.xlu1 %v7089_v37, %s16015_s29 }
 0x64f   : > { %7420 = vperm.xlu0 %12035, %v7412_v41  }
 0x652   : > { %7109 = vrot.lane.b32.xlu1 %v7085_v40, %s16015_s29  ;;  %s16073_s29 = smov 16  }
 0x653   : > { %7442 = vperm.xlu0 %12035, %v7434_v15  }
 0x656   : > { %7415 = vperm.xlu1 %12036, %v7411_v51  }
 0x65a   : > { %7437 = vperm.xlu1 %12036, %v7433_v18  }
 0x6a9   : > { %v7104_v25 = vpop.permute.xlu1 %7103 }
 0x6ac   : > { %v7106_v32 = vpop.permute.xlu0 %7105 }
 0x6ad   : > { %v7122_v56 = vsel %vm1029_vm3, %v7104_v25, %v7106_v32 }
 0x6ae   : > { %v7140_v21 = vmax.f32 %v14645_v7, %v7122_v56 }
 0x6b1   : > { %v7114_v33 = vpop.permute.xlu0 %7113 }
 0x6b5   : > { %v7112_v12 = vpop.permute.xlu0 %7111 }
 0x6b6   : > { %v7125_v42 = vsel %vm1029_vm3, %v7112_v12, %v7114_v33 }
 0x6b7   : > { %v7144_v10 = vmax.f32 %v7086_v27, %v7125_v42 }
 0x6b8   : > { %v7102_v54 = vpop.permute.xlu1 %7101 }
 0x6b9   : > { %v7120_v61 = vpop.permute.xlu0 %7119  ;;  %v7121_v9 = vsel %vm1029_vm3, %v7102_v54, %v7104_v25 }
 0x6ba   : > { %v7139_v14 = vmax.f32 %v7081_v22, %v7121_v9  ;;  %v7148_v13 = vmax.f32 %v7090_v52, %v7120_v61 }
 0x6bc   : > { %v7116_v45 = vpop.permute.xlu1 %7115 }
 0x6bd   : > { %v7126_v34 = vsel %vm1029_vm3, %v7114_v33, %v7116_v45  ;;  %v7108_v53 = vpop.permute.xlu0 %7107 }
 0x6be   : > { %v7145_v44 = vmax.f32 %v7087_v20, %v7126_v34  ;;  %v7123_v39 = vsel %vm1029_vm3, %v7106_v32, %v7108_v53 }
 0x6bf   : > { %v7141_v43 = vmax.f32 %v14650_v3, %v7123_v39 }
 0x6c0   : > { %v7118_v28 = vpop.permute.xlu1 %7117  ;;  %11666 = vmatprep.subr.msk.mxu1 %vm1703_vm9, %v7145_v44 }
 0x6c1   : > { %v7127_v48 = vsel %vm1029_vm3, %v7116_v45, %v7118_v28  ;;  %v7128_v46 = vsel %vm1029_vm3, %v7118_v28, %v7120_v61  ;;  %11667 = vmatpush1.msk.msra.mxu1 %vm1703_vm9, %v7144_v10 }
 0x6c2   : > { %v7146_v24 = vmax.f32 %v7088_v26, %v7127_v48  ;;  %v7147_v63 = vmax.f32 %v7089_v37, %v7128_v46  ;;  %7202 = vmatprep.subr.mxu1 %v7140_v21 }
 0x6c3   : > { %7203 = vmatpush1.msra.mxu1 %v7139_v14 }
 0x6c4   : > { %v7110_v16 = vpop.permute.xlu1 %7109  ;;  %11668 = vmatmul.mubr.msk.f32.vlgmr.msra.gmra.mxu1 %vm1696_vm10, %v7149_v60  ;;  %11670 = vmatprep.subr.msk.mxu0 %vm1703_vm9, %v7147_v63 }
 0x6c5   : > { %v7124_v0 = vsel %vm1029_vm3, %v7108_v53, %v7110_v16  ;;  %v7143_v2 = vmax.f32 %v7085_v40, %v7110_v16  ;;  %11934 = vmatprep.subr.msk.mxu1 %vm1703_vm9, %v7148_v13  ;;  %11671 = vmatpush1.msk.msra.mxu0 %vm1703_vm9, %v7146_v24  ;;  %vm11304_vm3 = vcmask 760832  }
 0x6c6   : > { %11935 = vmatpush3.msk.msra.mxu1 %vm1703_vm9, %v7148_v13  ;;  %7242 = vmatprep.mubr.f32.mxu1 %v16072_v6  ;;  %v7142_v30 = vmax.f32 %v7084_v1, %v7124_v0 }
 0x6c7   : > { %11936 = vmatprep.subr.mxu1 %v7143_v2 }
 0x6c8   : > { %11669 = vmatmul.mubr.msk.f32.gmra.mxu1 %vm1696_vm10, %v7150_v19  ;;  %7279 = vmatprep.subr.mxu0 %v7142_v30  ;;  %v9276_v30 = vld [vmem:[%s15822_s14] sm:$0xff] }
 0x6c9   : > { %11937 = vmatpush3.msra.mxu1 %v7143_v2  ;;  %7280 = vmatpush1.msra.mxu0 %v7141_v43 }
 0x6ca   : > { %11672 = vmatmul.mubr.msk.f32.vlgmr.msra.gmra.mxu0 %vm1696_vm10, %v7149_v60  ;;  %11938 = vmatprep.mubr.msk.f32.mxu1 %vm1696_vm10, %v7149_v60  ;;  %v7421_v22 = vpop.permute.xlu0 %7420 }
 0x6cb   : > { %7319 = vmatprep.mubr.f32.mxu0 %v16072_v6 }
 0x6cc   : > { %11939 = vmatmul.mubr.msk.f32.vlgmr.msra.gmra.mxu1 %vm1696_vm10, %v7150_v19 }
 0x6cd   : > { %7646 = vmatprep.mubr.f32.mxu1 %v16072_v6 }
 0x6ce   : > { %11673 = vmatmul.mubr.msk.f32.gmra.mxu0 %vm1696_vm10, %v7150_v19  ;;  %v7443_v55 = vpop.permute.xlu0 %7442 }
 0x6cf   : > { %7569 = vmatprep.mubr.f32.mxu0 %v16072_v6 }
 0x6d1   : > { %v14712_v58 = vpop.permute.xlu1 %7415 }
 0x6d5   : > { %v14715_v7 = vpop.permute.xlu1 %7437 }
 0x784   : > { %v7238_v17 = vpop.f32.mrf.mxu1 }
 0x785   : > { %v7401_v49 = vmax.f32 %v7238_v17, 0.0  ;;  %v9296_v17 = vld [vmem:[%s15823_s15] sm:$0xff] }
 0x786   : > { %v7240_v35 = vpop.f32.mrf.mxu1 }
 0x787   : > { %v7423_v36 = vmul.f32 %v14712_v58, %v7401_v49  ;;  %v7402_v8 = vmax.f32 %v7240_v35, 0.0 }
 0x788   : > { %v7244_v57 = vpop.f32.mrf.mxu1 }
 0x789   : > { %v14718_v47 = vadd.f32 %v14715_v7, %v7423_v36  ;;  %v7424_v4 = vmul.f32 %v14712_v58, %v7402_v8  ;;  %v7406_v50 = vmax.f32 %v7244_v57, 0.0  ;;  %v9277_v36 = vld [vmem:[%s15822_s14 + $0x8] sm:$0xff] }
 0x78a   : > { %v7315_v23 = vpop.f32.mrf.mxu0  ;;  %v7246_v41 = vpop.f32.mrf.mxu1 }
 0x78b   : > { %v7403_v62 = vmax.f32 %v7315_v23, 0.0  ;;  %7468 = vrot.lane.b32.xlu1 %v14718_v47, %s16014_s5  ;;  %v14746_v11 = vadd.f32 %v14715_v7, %v7424_v4  ;;  %v7428_v52 = vmul.f32 %v7421_v22, %v7406_v50  ;;  %v7407_v40 = vmax.f32 %v7246_v41, 0.0 }
 0x78c   : > { %v7317_v20 = vpop.f32.mrf.mxu0  ;;  %v11940_v12 = vpop.f32.mrf.mxu1 }
 0x78d   : > { %v7425_v3 = vmul.f32 %v14712_v58, %v7403_v62  ;;  %v7404_v29 = vmax.f32 %v7317_v20, 0.0  ;;  %v14774_v5 = vadd.f32 %v7443_v55, %v7428_v52  ;;  %v7429_v51 = vmul.f32 %v7421_v22, %v7407_v40  ;;  %v9297_v62 = vld [vmem:[%s15823_s15 + $0x8] sm:$0xff] }
 0x78e   : > { %v7321_v26 = vpop.f32.mrf.mxu0  ;;  %v7392_v54 = vpop.f32.mrf.mxu1  ;;  %v7410_v42 = vmax.f32 %v11940_v12, 0.0 }
 0x78f   : > { %v14724_v31 = vadd.f32 %v14715_v7, %v7425_v3  ;;  %7822 = vrot.lane.b32.xlu1 %v14718_v47, %s12061_s3  ;;  %v7426_v27 = vmul.f32 %v14712_v58, %v7404_v29  ;;  %v7408_v38 = vmax.f32 %v7321_v26, 0.0  ;;  %v14806_v32 = vadd.f32 %v7443_v55, %v7429_v51 }
 0x790   : > { %v7323_v15 = vpop.f32.mrf.mxu0  ;;  %v7405_v61 = vmax.f32 %v7392_v54, 0.0  ;;  %v7432_v56 = vmul.f32 %v7421_v22, %v7410_v42 }
 0x791   : > { %7472 = vrot.lane.b32.xlu0 %v14724_v31, %s16014_s5  ;;  %v14754_v59 = vadd.f32 %v14715_v7, %v7426_v27  ;;  %v7430_v1 = vmul.f32 %v7421_v22, %v7408_v38  ;;  %v7409_v18 = vmax.f32 %v7323_v15, 0.0 }
 0x792   : > { %v7427_v45 = vmul.f32 %v14712_v58, %v7405_v61  ;;  %v7454_v9 = vadd.f32 %v7443_v55, %v7432_v56  ;;  %v11678_v56 = vld [vmem:[%s15821_s13 + $0x18] sm:$0xff] }
 0x793   : > { %8026 = vrot.lane.b32.xlu1 %v14718_v47, %s16017_s7  ;;  %v14790_v37 = vadd.f32 %v7443_v55, %v7430_v1  ;;  %v7431_v33 = vmul.f32 %v7421_v22, %v7409_v18  ;;  %v11677_v18 = vld [vmem:[%s15821_s13 + $0x10] sm:$0xff] }
 0x794   : > { %v7449_v34 = vadd.f32 %v14715_v7, %v7427_v45 }
 0x795   : > { %7826 = vrot.lane.b32.xlu0 %v14724_v31, %s12061_s3  ;;  %v14812_v25 = vadd.f32 %v7443_v55, %v7431_v33 }
 0x797   : > { %8233 = vrot.lane.b32.xlu1 %v14718_v47, %s16034_s6 }
 0x799   : > { %8030 = vrot.lane.b32.xlu0 %v14724_v31, %s16017_s7 }
 0x79b   : > { %8440 = vrot.lane.b32.xlu1 %v14718_v47, %s12062_s27 }
 0x79d   : > { %8237 = vrot.lane.b32.xlu0 %v14724_v31, %s16034_s6 }
 0x79f   : > { %8648 = vrot.lane.b32.xlu1 %v14718_v47, %s15898_s1 }
 0x7a1   : > { %8444 = vrot.lane.b32.xlu0 %v14724_v31, %s12062_s27 }
 0x7a3   : > { %7470 = vrot.lane.b32.xlu1 %v14746_v11, %s16014_s5 }
 0x7a5   : > { %8652 = vrot.lane.b32.xlu0 %v14724_v31, %s15898_s1 }
 0x7a7   : > { %7474 = vrot.lane.b32.xlu1 %v14754_v59, %s16014_s5 }
 0x7a9   : > { %8032 = vrot.lane.b32.xlu0 %v14754_v59, %s16017_s7 }
 0x7ab   : > { %7824 = vrot.lane.b32.xlu1 %v14746_v11, %s12061_s3 }
 0x7ad   : > { %8239 = vrot.lane.b32.xlu0 %v14754_v59, %s16034_s6 }
 0x7af   : > { %7828 = vrot.lane.b32.xlu1 %v14754_v59, %s12061_s3 }
 0x7b1   : > { %8446 = vrot.lane.b32.xlu0 %v14754_v59, %s12062_s27 }
 0x7b3   : > { %8028 = vrot.lane.b32.xlu1 %v14746_v11, %s16017_s7 }
 0x7b5   : > { %8654 = vrot.lane.b32.xlu0 %v14754_v59, %s15898_s1 }
 0x7b7   : > { %8235 = vrot.lane.b32.xlu1 %v14746_v11, %s16034_s6 }
 0x7b9   : > { %7476 = vrot.lane.b32.xlu0 %v14774_v5, %s16014_s5 }
 0x7bb   : > { %8442 = vrot.lane.b32.xlu1 %v14746_v11, %s12062_s27 }
 0x7bd   : > { %7830 = vrot.lane.b32.xlu0 %v14774_v5, %s12061_s3 }
 0x7bf   : > { %8650 = vrot.lane.b32.xlu1 %v14746_v11, %s15898_s1 }
 0x7c1   : > { %8036 = vrot.lane.b32.xlu0 %v14774_v5, %s16017_s7 }
 0x7c3   : > { %8857 = vrot.lane.b32.xlu1 %v14746_v11, %s15896_s2 }
 0x7c5   : > { %8243 = vrot.lane.b32.xlu0 %v14774_v5, %s16034_s6 }
 0x7c7   : > { %7480 = vrot.lane.b32.xlu1 %v14790_v37, %s16014_s5 }
 0x7c9   : > { %8450 = vrot.lane.b32.xlu0 %v14774_v5, %s12062_s27 }
 0x7cb   : > { %7834 = vrot.lane.b32.xlu1 %v14790_v37, %s12061_s3 }
 0x7cd   : > { %8658 = vrot.lane.b32.xlu0 %v14774_v5, %s15898_s1 }
 0x7cf   : > { %8040 = vrot.lane.b32.xlu1 %v14790_v37, %s16017_s7 }
 0x7d1   : > { %8865 = vrot.lane.b32.xlu0 %v14774_v5, %s15896_s2 }
 0x7d3   : > { %8247 = vrot.lane.b32.xlu1 %v14790_v37, %s16034_s6 }
 0x7d5   : > { %7478 = vrot.lane.b32.xlu0 %v14806_v32, %s16014_s5 }
 0x7d7   : > { %8454 = vrot.lane.b32.xlu1 %v14790_v37, %s12062_s27 }
 0x7d9   : > { %7482 = vrot.lane.b32.xlu0 %v14812_v25, %s16014_s5 }
 0x7db   : > { %8662 = vrot.lane.b32.xlu1 %v14790_v37, %s15898_s1 }
 0x7dd   : > { %7832 = vrot.lane.b32.xlu0 %v14806_v32, %s12061_s3 }
 0x7df   : > { %8869 = vrot.lane.b32.xlu1 %v14790_v37, %s15896_s2 }
 0x7e1   : > { %7836 = vrot.lane.b32.xlu0 %v14812_v25, %s12061_s3 }
 0x7e3   : > { %8042 = vrot.lane.b32.xlu1 %v14812_v25, %s16017_s7 }
 0x7e5   : > { %8038 = vrot.lane.b32.xlu0 %v14806_v32, %s16017_s7 }
 0x7e7   : > { %8249 = vrot.lane.b32.xlu1 %v14812_v25, %s16034_s6 }
 0x7e9   : > { %8245 = vrot.lane.b32.xlu0 %v14806_v32, %s16034_s6 }
 0x7eb   : > { %8456 = vrot.lane.b32.xlu1 %v14812_v25, %s12062_s27 }
 0x7ed   : > { %8452 = vrot.lane.b32.xlu0 %v14806_v32, %s12062_s27 }
 0x7ef   : > { %8664 = vrot.lane.b32.xlu1 %v14812_v25, %s15898_s1 }
 0x7f1   : > { %8660 = vrot.lane.b32.xlu0 %v14806_v32, %s15898_s1 }
 0x7f3   : > { %8871 = vrot.lane.b32.xlu1 %v14812_v25, %s15896_s2 }
 0x7f5   : > { %8867 = vrot.lane.b32.xlu0 %v14806_v32, %s15896_s2 }
 0x7f7   : > { %8034 = vrot.lane.b32.xlu1 %v7449_v34, %s16017_s7 }
 0x7f9   : > { %8044 = vrot.lane.b32.xlu0 %v7454_v9, %s16017_s7 }
 0x7fb   : > { %8855 = vrot.lane.b32.xlu1 %v14718_v47, %s15896_s2 }
 0x7fd   : > { %v14852_v44 = vpop.permute.xlu1 %7468  ;;  %8859 = vrot.lane.b32.xlu0 %v14724_v31, %s15896_s2 }
 0x7ff   : > { %8241 = vrot.lane.b32.xlu1 %v7449_v34, %s16034_s6 }
 0x801   : > { %v14857_v10 = vpop.permute.xlu1 %7822  ;;  %8251 = vrot.lane.b32.xlu0 %v7454_v9, %s16034_s6 }
 0x803   : > { %9077 = vrot.lane.b32.xlu1 %v14790_v37, %s12065_s28  ;;  %v14862_v28 = vpop.permute.xlu0 %7472 }
 0x805   : > { %v14864_v21 = vpop.permute.xlu1 %8026  ;;  %8458 = vrot.lane.b32.xlu0 %v7454_v9, %s12062_s27 }
 0x807   : > { %8448 = vrot.lane.b32.xlu1 %v7449_v34, %s12062_s27  ;;  %v14868_v14 = vpop.permute.xlu0 %7826 }
 0x809   : > { %v14870_v53 = vpop.permute.xlu1 %8233  ;;  %8666 = vrot.lane.b32.xlu0 %v7454_v9, %s15898_s1 }
 0x80b   : > { %9065 = vrot.lane.b32.xlu1 %v14746_v11, %s12065_s28  ;;  %v14875_v48 = vpop.permute.xlu0 %8030 }
 0x80d   : > { %v14877_v46 = vpop.permute.xlu1 %8440  ;;  %8873 = vrot.lane.b32.xlu0 %v7454_v9, %s15896_s2 }
 0x80f   : > { %8656 = vrot.lane.b32.xlu1 %v7449_v34, %s15898_s1  ;;  %v14881_v60 = vpop.permute.xlu0 %8237 }
 0x811   : > { %v14883_v24 = vpop.permute.xlu1 %8648  ;;  %8861 = vrot.lane.b32.xlu0 %v14754_v59, %s15896_s2 }
 0x813   : > { %9079 = vrot.lane.b32.xlu1 %v14812_v25, %s12065_s28  ;;  %v14889_v63 = vpop.permute.xlu0 %8444 }
 0x815   : > { %v7471_v13 = vpop.permute.xlu1 %7470  ;;  %9075 = vrot.lane.b32.xlu0 %v14806_v32, %s12065_s28 }
 0x816   : > { %v7485_v51 = vsel %vm933_vm2, %v7471_v13, %v14862_v28  ;;  %v7484_v12 = vsel %vm933_vm2, %v14852_v44, %v7471_v13 }
 0x817   : > { %8863 = vrot.lane.b32.xlu1 %v7449_v34, %s15896_s2  ;;  %v14894_v39 = vpop.permute.xlu0 %8652 }
 0x819   : > { %v7475_v16 = vpop.permute.xlu1 %7474  ;;  %9073 = vrot.lane.b32.xlu0 %v14774_v5, %s12065_s28 }
 0x81a   : > { %v7486_v42 = vsel %vm933_vm2, %v14862_v28, %v7475_v16 }
 0x81b   : > { %9063 = vrot.lane.b32.xlu1 %v14718_v47, %s12065_s28  ;;  %v14900_v0 = vpop.permute.xlu0 %8032 }
 0x81d   : > { %v14902_v2 = vpop.permute.xlu1 %7824  ;;  %9067 = vrot.lane.b32.xlu0 %v14724_v31, %s12065_s28 }
 0x81f   : > { %9071 = vrot.lane.b32.xlu1 %v7449_v34, %s12065_s28  ;;  %v14907_v19 = vpop.permute.xlu0 %8239 }
 0x821   : > { %v14912_v43 = vpop.permute.xlu1 %7828  ;;  %9081 = vrot.lane.b32.xlu0 %v7454_v9, %s12065_s28  ;;  %v7839_v9 = vsel %vm7838_vm12, %v14857_v10, %v14902_v2 }
 0x822   : > { %v7841_v10 = vsel %vm7838_vm12, %v14868_v14, %v14912_v43 }
 0x823   : > { %9280 = vperm.xlu1 %12036, %v9276_v30   ;;  %v14915_v58 = vpop.permute.xlu0 %8446 }
 0x825   : > { %v14920_v49 = vpop.permute.xlu1 %8028  ;;  %9069 = vrot.lane.b32.xlu0 %v14754_v59, %s12065_s28 }
 0x827   : > { %9300 = vperm.xlu1 %12036, %v9296_v17   ;;  %v14927_v7 = vpop.permute.xlu0 %8654 }
 0x829   : > { %v14929_v23 = vpop.permute.xlu1 %8235  ;;  %9285 = vperm.xlu0 %12035, %v9277_v36   ;;  %v11688_v36 = vld [vmem:[%s15821_s13 + $0x28] sm:$0xff] }
 0x82b   : > { %v7477_v3 = vpop.permute.xlu0 %7476 }
 0x82d   : > { %v14934_v35 = vpop.permute.xlu1 %8442  ;;  %9305 = vperm.xlu0 %12035, %v9297_v62   ;;  %v8046_v62 = vsel %vm1330_vm6, %v14864_v21, %v14920_v49  ;;  %v11693_v21 = vld [vmem:[%s15821_s13 + $0x30] sm:$0xff] }
 0x82f   : > { %v7831_v8 = vpop.permute.xlu0 %7830 }
 0x831   : > { %v14936_v20 = vpop.permute.xlu1 %8650 }
 0x833   : > { %v14938_v4 = vpop.permute.xlu0 %8036 }
 0x835   : > { %v14940_v29 = vpop.permute.xlu1 %8857 }
 0x837   : > { %v14942_v27 = vpop.permute.xlu0 %8243 }
 0x839   : > { %v7481_v57 = vpop.permute.xlu1 %7480 }
 0x83b   : > { %v14944_v50 = vpop.permute.xlu0 %8450 }
 0x83d   : > { %v14946_v22 = vpop.permute.xlu1 %7834 }
 0x83f   : > { %v14948_v52 = vpop.permute.xlu0 %8658 }
 0x841   : > { %v14950_v55 = vpop.permute.xlu1 %8040 }
 0x843   : > { %v14952_v26 = vpop.permute.xlu0 %8865 }
 0x845   : > { %v14954_v38 = vpop.permute.xlu1 %8247 }
 0x847   : > { %v7479_v1 = vpop.permute.xlu0 %7478 }
 0x848   : > { %v7488_v41 = vsel %vm933_vm2, %v7479_v1, %v7481_v57  ;;  %v7487_v40 = vsel %vm933_vm2, %v7477_v3, %v7479_v1  ;;  %v8254_v1 = vsel %vm1542_vm8, %v14929_v23, %v14881_v60 }
 0x849   : > { %v14958_v15 = vpop.permute.xlu1 %8454  ;;  %7533 = vmatprep.subr.mxu0 %v7488_v41  ;;  %v11694_v41 = vld [vmem:[%s15821_s13 + $0x38] sm:$0xff] }
 0x84a   : > { %7534 = vmatpush1.msra.mxu0 %v7487_v40 }
 0x84b   : > { %7535 = vmatprep.subr.mxu0 %v7485_v51  ;;  %v7483_v33 = vpop.permute.xlu0 %7482 }
 0x84c   : > { %7536 = vmatpush1.msra.mxu0 %v7484_v12  ;;  %7610 = vmatprep.subr.mxu1 %v7483_v33  ;;  %v7489_v54 = vsel %vm933_vm2, %v7481_v57, %v7483_v33  ;;  %v11699_v12 = vld [vmem:[%s15821_s13 + $0x40] sm:$0xff] }
 0x84d   : > { %v14968_v61 = vpop.permute.xlu1 %8662  ;;  %11679 = vmatmul.mubr.msk.f32.vlgmr.msra.gmra.mxu0 %vm7498_vm11, %v11677_v18  ;;  %7611 = vmatpush1.msra.mxu1 %v7489_v54 }
 0x84e   : > { %7693 = vmatprep.subr.mxu0 %v14806_v32  ;;  %7612 = vmatprep.subr.mxu1 %v7475_v16 }
 0x84f   : > { %7694 = vmatpush1.msra.mxu0 %v14774_v5  ;;  %7613 = vmatpush1.msra.mxu1 %v7486_v42  ;;  %v7833_v45 = vpop.permute.xlu0 %7832 }
 0x850   : > { %7695 = vmatprep.subr.mxu0 %v14746_v11  ;;  %7575 = vmatprep.mubr.f32.mxu0 %v16072_v6  ;;  %v7843_v32 = vsel %vm7838_vm12, %v7833_v45, %v14946_v22  ;;  %v7455_v11 = vld [vmem:[%s15821_s13] sm:$0xff] }
 0x851   : > { %11681 = vmatmul.mubr.msk.f32.vlgmr.msra.gmra.mxu1 %vm7498_vm11, %v11677_v18  ;;  %7696 = vmatpush1.msra.mxu0 %v14718_v47  ;;  %v14984_v34 = vpop.permute.xlu1 %8869 }
 0x852   : > { %7770 = vmatprep.subr.mxu1 %v14812_v25  ;;  %11680 = vmatmul.mubr.msk.f32.gmra.mxu0 %vm7498_vm11, %v11678_v56  ;;  %v7840_v25 = vsel %vm7838_vm12, %v14902_v2, %v14868_v14  ;;  %v11687_v2 = vld [vmem:[%s15821_s13 + $0x20] sm:$0xff] }
 0x853   : > { %7771 = vmatpush1.msra.mxu1 %v14790_v37  ;;  %7887 = vmatprep.subr.mxu0 %v7843_v32  ;;  %v7837_v5 = vpop.permute.xlu0 %7836  ;;  %v7842_v37 = vsel %vm7838_vm12, %v7831_v8, %v7833_v45  ;;  %v11700_v32 = vld [vmem:[%s15821_s13 + $0x48] sm:$0xff] }
 0x854   : > { %7772 = vmatprep.subr.mxu1 %v14754_v59  ;;  %7652 = vmatprep.mubr.f32.mxu1 %v16072_v6  ;;  %v7844_v13 = vsel %vm7838_vm12, %v14946_v22, %v7837_v5 }
 0x855   : > { %7773 = vmatpush1.msra.mxu1 %v14724_v31  ;;  %7729 = vmatprep.mubr.f32.mxu0 %v16072_v6  ;;  %v14996_v47 = vpop.permute.xlu1 %8042  ;;  %v7456_v31 = vld [vmem:[%s15821_s13 + $0x8] sm:$0xff] }
 0x856   : > { %11682 = vmatmul.mubr.msk.f32.gmra.mxu1 %vm7498_vm11, %v11678_v56  ;;  %7964 = vmatprep.subr.mxu1 %v7837_v5  ;;  %v8048_v56 = vsel %vm1330_vm6, %v14875_v48, %v14900_v0 }
 0x857   : > { %11683 = vmatmul.mubr.msk.f32.vlgmr.msra.gmra.mxu0 %vm7498_vm11, %v7455_v11  ;;  %7806 = vmatprep.mubr.f32.mxu1 %v16072_v6  ;;  %v8039_v59 = vpop.permute.xlu0 %8038 }
 0x858   : > { %7888 = vmatpush1.msra.mxu0 %v7842_v37  ;;  %7735 = vmatprep.mubr.f32.mxu0 %v16072_v6  ;;  %v8051_v28 = vsel %vm1330_vm6, %v8039_v59, %v14950_v55  ;;  %v8050_v17 = vsel %vm1330_vm6, %v14938_v4, %v8039_v59 }
 0x859   : > { %7889 = vmatprep.subr.mxu0 %v7840_v25  ;;  %v15012_v44 = vpop.permute.xlu1 %8249 }
 0x85a   : > { %7890 = vmatpush1.msra.mxu0 %v7839_v9  ;;  %11685 = vmatmul.mubr.msk.f32.vlgmr.msra.gmra.mxu1 %vm7498_vm11, %v7455_v11 }
 0x85b   : > { %7965 = vmatpush1.msra.mxu1 %v7844_v13  ;;  %11684 = vmatmul.mubr.msk.f32.gmra.mxu0 %vm7498_vm11, %v7456_v31  ;;  %v8246_v16 = vpop.permute.xlu0 %8245 }
 0x85c   : > { %7966 = vmatprep.subr.mxu1 %v14912_v43  ;;  %8096 = vmatprep.subr.mxu0 %v8051_v28  ;;  %v8047_v43 = vsel %vm1330_vm6, %v14920_v49, %v14875_v48  ;;  %v8258_v8 = vsel %vm1542_vm8, %v8246_v16, %v14954_v38  ;;  %v8257_v57 = vsel %vm1542_vm8, %v14942_v27, %v8246_v16  ;;  %v11711_v16 = vld [vmem:[%s15821_s13 + $0x60] sm:$0xff] }
 0x85d   : > { %7967 = vmatpush1.msra.mxu1 %v7841_v10  ;;  %7812 = vmatprep.mubr.f32.mxu1 %v16072_v6  ;;  %v15028_v30 = vpop.permute.xlu1 %8456  ;;  %v8253_v27 = vsel %vm1542_vm8, %v14870_v53, %v14929_v23  ;;  %v8052_v23 = vsel %vm1330_vm6, %v14950_v55, %v14996_v47  ;;  %v8462_v55 = vsel %vm8460_vm13, %v14934_v35, %v14889_v63 }
 0x85e   : > { %11686 = vmatmul.mubr.msk.f32.gmra.mxu1 %vm7498_vm11, %v7456_v31  ;;  %7923 = vmatprep.mubr.f32.mxu0 %v16072_v6  ;;  %v8669_v31 = vsel %vm7498_vm11, %v14936_v20, %v14894_v39 }
 0x85f   : > { %11689 = vmatmul.mubr.msk.f32.vlgmr.msra.gmra.mxu0 %vm7498_vm11, %v11687_v2  ;;  %8000 = vmatprep.mubr.f32.mxu1 %v16072_v6  ;;  %v8453_v14 = vpop.permute.xlu0 %8452 }
 0x860   : > { %8097 = vmatpush1.msra.mxu0 %v8050_v17  ;;  %7929 = vmatprep.mubr.f32.mxu0 %v16072_v6  ;;  %v8466_v51 = vsel %vm8460_vm13, %v8453_v14, %v14958_v15  ;;  %v8465_v42 = vsel %vm8460_vm13, %v14944_v50, %v8453_v14  ;;  %v8461_v50 = vsel %vm8460_vm13, %v14877_v46, %v14934_v35  ;;  %v11705_v35 = vld [vmem:[%s15821_s13 + $0x50] sm:$0xff] }
 0x861   : > { %8098 = vmatprep.subr.mxu0 %v8047_v43  ;;  %v15046_v3 = vpop.permute.xlu1 %8664 }
 0x862   : > { %8099 = vmatpush1.msra.mxu0 %v8046_v62  ;;  %11691 = vmatmul.mubr.msk.f32.vlgmr.msra.gmra.mxu1 %vm7498_vm11, %v11687_v2  ;;  %v8463_v2 = vsel %vm8460_vm13, %v14889_v63, %v14915_v58  ;;  %v11712_v63 = vld [vmem:[%s15821_s13 + $0x68] sm:$0xff] }
 0x863   : > { %8303 = vmatprep.subr.mxu0 %v8258_v8  ;;  %11690 = vmatmul.mubr.msk.f32.gmra.mxu0 %vm7498_vm11, %v11688_v36  ;;  %v8661_v4 = vpop.permute.xlu0 %8660  ;;  %v8670_v8 = vsel %vm7498_vm11, %v14894_v39, %v14927_v7  ;;  %v11718_v39 = vld [vmem:[%s15821_s13 + $0x78] sm:$0xff] }
 0x864   : > { %8006 = vmatprep.mubr.f32.mxu1 %v16072_v6  ;;  %8132 = vmatprep.mubr.f32.mxu0 %v16072_v6  ;;  %v8673_v48 = vsel %vm7498_vm11, %v8661_v4, %v14968_v61  ;;  %v8672_v37 = vsel %vm7498_vm11, %v14948_v52, %v8661_v4  ;;  %v8668_v52 = vsel %vm7498_vm11, %v14883_v24, %v14936_v20 }
 0x865   : > { %v15057_v49 = vpop.permute.xlu1 %8871  ;;  %v8467_v20 = vsel %vm8460_vm13, %v14958_v15, %v15028_v30 }
 0x866   : > { %11692 = vmatmul.mubr.msk.f32.gmra.mxu1 %vm7498_vm11, %v11688_v36  ;;  %v8674_v36 = vsel %vm7498_vm11, %v14968_v61, %v15046_v3 }
 0x867   : > { %11695 = vmatmul.mubr.msk.f32.vlgmr.msra.gmra.mxu0 %vm7498_vm11, %v11693_v21  ;;  %v15063_v22 = vpop.permute.xlu0 %8867  ;;  %8209 = vmatprep.mubr.f32.mxu1 %v16072_v6 }
 0x868   : > { %8304 = vmatpush1.msra.mxu0 %v8257_v57  ;;  %8138 = vmatprep.mubr.f32.mxu0 %v16072_v6  ;;  %v8881_v28 = vsel %vm8875_vm14, %v15063_v22, %v14984_v34 }
 0x869   : > { %8305 = vmatprep.subr.mxu0 %v8254_v1  ;;  %v8035_v40 = vpop.permute.xlu1 %8034  ;;  %v8882_v1 = vsel %vm8875_vm14, %v14984_v34, %v15057_v49  ;;  %v11723_v34 = vld [vmem:[%s15821_s13 + $0x80] sm:$0xff] }
 0x86a   : > { %8306 = vmatpush1.msra.mxu0 %v8253_v27  ;;  %v8049_v54 = vsel %vm1330_vm6, %v14900_v0, %v8035_v40 }
 0x86b   : > { %8511 = vmatprep.subr.mxu0 %v8466_v51  ;;  %11696 = vmatmul.mubr.msk.f32.gmra.mxu0 %vm7498_vm11, %v11694_v41  ;;  %v8045_v18 = vpop.permute.xlu0 %8044 }
 0x86c   : > { %8339 = vmatprep.mubr.f32.mxu0 %v16072_v6  ;;  %v8053_v33 = vsel %vm1330_vm6, %v14996_v47, %v8045_v18  ;;  %v8259_v47 = vsel %vm1542_vm8, %v14954_v38, %v15012_v44  ;;  %v8255_v38 = vsel %vm1542_vm8, %v14881_v60, %v14907_v19 }
 0x86d   : > { %v15085_v53 = vpop.permute.xlu1 %8855  ;;  %8173 = vmatprep.subr.mxu1 %v8053_v33 }
 0x86e   : > { %8174 = vmatpush1.msra.mxu1 %v8052_v23 }
 0x86f   : > { %11701 = vmatmul.mubr.msk.f32.vlgmr.msra.gmra.mxu0 %vm7498_vm11, %v11699_v12  ;;  %8175 = vmatprep.subr.mxu1 %v8049_v54  ;;  %v15095_v45 = vpop.permute.xlu0 %8859 }
 0x870   : > { %8512 = vmatpush1.msra.mxu0 %v8465_v42  ;;  %8176 = vmatpush1.msra.mxu1 %v8048_v56  ;;  %v8877_v14 = vsel %vm8875_vm14, %v14940_v29, %v15095_v45 }
 0x871   : > { %8513 = vmatprep.subr.mxu0 %v8462_v55  ;;  %8345 = vmatprep.mubr.f32.mxu0 %v16072_v6  ;;  %v8242_v5 = vpop.permute.xlu1 %8241 }
 0x872   : > { %8514 = vmatpush1.msra.mxu0 %v8461_v50  ;;  %11697 = vmatmul.mubr.msk.f32.vlgmr.msra.gmra.mxu1 %vm7498_vm11, %v11693_v21  ;;  %v8256_v59 = vsel %vm1542_vm8, %v14907_v19, %v8242_v5 }
 0x873   : > { %8718 = vmatprep.subr.mxu0 %v8673_v48  ;;  %11702 = vmatmul.mubr.msk.f32.gmra.mxu0 %vm7498_vm11, %v11700_v32  ;;  %v8252_v0 = vpop.permute.xlu0 %8251 }
 0x874   : > { %8215 = vmatprep.mubr.f32.mxu1 %v16072_v6  ;;  %8547 = vmatprep.mubr.f32.mxu0 %v16072_v6  ;;  %v8260_v46 = vsel %vm1542_vm8, %v15012_v44, %v8252_v0  ;;  %v11706_v44 = vld [vmem:[%s15821_s13 + $0x58] sm:$0xff] }
 0x875   : > { %v15121_v11 = vpop.permute.xlu1 %9077  ;;  %8380 = vmatprep.subr.mxu1 %v8260_v46 }
 0x876   : > { %11698 = vmatmul.mubr.msk.f32.gmra.mxu1 %vm7498_vm11, %v11694_v41 }
 0x877   : > { %11707 = vmatmul.mubr.msk.f32.vlgmr.msra.gmra.mxu0 %vm7498_vm11, %v11705_v35  ;;  %8381 = vmatpush1.msra.mxu1 %v8259_v47  ;;  %v8459_v25 = vpop.permute.xlu0 %8458 }
 0x878   : > { %8719 = vmatpush1.msra.mxu0 %v8672_v37  ;;  %8382 = vmatprep.subr.mxu1 %v8256_v59  ;;  %v8468_v60 = vsel %vm8460_vm13, %v15028_v30, %v8459_v25  ;;  %v8880_v30 = vsel %vm8875_vm14, %v14952_v26, %v15063_v22 }
 0x879   : > { %8720 = vmatprep.subr.mxu0 %v8669_v31  ;;  %8383 = vmatpush1.msra.mxu1 %v8255_v38  ;;  %v8449_v9 = vpop.permute.xlu1 %8448 }
 0x87a   : > { %8721 = vmatpush1.msra.mxu0 %v8668_v52  ;;  %8416 = vmatprep.mubr.f32.mxu1 %v16072_v6  ;;  %v8464_v19 = vsel %vm8460_vm13, %v14915_v58, %v8449_v9  ;;  %v8876_v58 = vsel %vm8875_vm14, %v15085_v53, %v14940_v29  ;;  %v11717_v29 = vld [vmem:[%s15821_s13 + $0x70] sm:$0xff] }
 0x87b   : > { %8553 = vmatprep.mubr.f32.mxu0 %v16072_v6  ;;  %8926 = vmatprep.subr.mxu0 %v8881_v28  ;;  %v8667_v24 = vpop.permute.xlu0 %8666 }
 0x87c   : > { %11703 = vmatmul.mubr.msk.f32.vlgmr.msra.gmra.mxu1 %vm7498_vm11, %v11699_v12  ;;  %11708 = vmatmul.mubr.msk.f32.gmra.mxu0 %vm7498_vm11, %v11706_v44  ;;  %v8675_v10 = vsel %vm7498_vm11, %v15046_v3, %v8667_v24  ;;  %v11724_v12 = vld [vmem:[%s15821_s13 + $0x88] sm:$0xff] }
 0x87d   : > { %8588 = vmatprep.subr.mxu1 %v8468_v60  ;;  %8422 = vmatprep.mubr.f32.mxu1 %v16072_v6  ;;  %v15159_v13 = vpop.permute.xlu1 %9065 }
 0x87e   : > { %8589 = vmatpush1.msra.mxu1 %v8467_v20  ;;  %8754 = vmatprep.mubr.f32.mxu0 %v16072_v6 }
 0x87f   : > { %8590 = vmatprep.subr.mxu1 %v8464_v19  ;;  %v8874_v15 = vpop.permute.xlu0 %8873 }
 0x880   : > { %8591 = vmatpush1.msra.mxu1 %v8463_v2  ;;  %11713 = vmatmul.mubr.msk.f32.vlgmr.msra.gmra.mxu0 %vm7498_vm11, %v11711_v16  ;;  %v8883_v3 = vsel %vm8875_vm14, %v15057_v49, %v8874_v15 }
 0x881   : > { %11704 = vmatmul.mubr.msk.f32.gmra.mxu1 %vm7498_vm11, %v11700_v32  ;;  %8795 = vmatprep.subr.mxu1 %v8675_v10  ;;  %v8657_v17 = vpop.permute.xlu1 %8656 }
 0x882   : > { %8927 = vmatpush1.msra.mxu0 %v8880_v30  ;;  %8624 = vmatprep.mubr.f32.mxu1 %v16072_v6  ;;  %v8671_v43 = vsel %vm7498_vm11, %v14927_v7, %v8657_v17 }
 0x883   : > { %8928 = vmatprep.subr.mxu0 %v8877_v14  ;;  %8760 = vmatprep.mubr.f32.mxu0 %v16072_v6  ;;  %v8862_v26 = vpop.permute.xlu0 %8861 }
 0x884   : > { %8929 = vmatpush1.msra.mxu0 %v8876_v58  ;;  %v8878_v27 = vsel %vm8875_vm14, %v15095_v45, %v8862_v26 }
 0x885   : > { %11709 = vmatmul.mubr.msk.f32.vlgmr.msra.gmra.mxu1 %vm7498_vm11, %v11705_v35  ;;  %11714 = vmatmul.mubr.msk.f32.gmra.mxu0 %vm7498_vm11, %v11712_v63  ;;  %v9080_v62 = vpop.permute.xlu1 %9079 }
 0x886   : > { %8796 = vmatpush1.msra.mxu1 %v8674_v36  ;;  %8630 = vmatprep.mubr.f32.mxu1 %v16072_v6  ;;  %v9090_v53 = vsel %vm9083_vm15, %v15121_v11, %v9080_v62 }
 0x887   : > { %8797 = vmatprep.subr.mxu1 %v8671_v43  ;;  %8962 = vmatprep.mubr.f32.mxu0 %v16072_v6  ;;  %v9076_v4 = vpop.permute.xlu0 %9075 }
 0x888   : > { %8798 = vmatpush1.msra.mxu1 %v8670_v8  ;;  %v9089_v61 = vsel %vm9083_vm15, %v9076_v4, %v15121_v11 }
 0x889   : > { %11710 = vmatmul.mubr.msk.f32.gmra.mxu1 %vm7498_vm11, %v11706_v44  ;;  %11719 = vmatmul.mubr.msk.f32.vlgmr.msra.gmra.mxu0 %vm7498_vm11, %v11717_v29  ;;  %v8864_v21 = vpop.permute.xlu1 %8863 }
 0x88a   : > { %9003 = vmatprep.subr.mxu1 %v8883_v3  ;;  %8831 = vmatprep.mubr.f32.mxu1 %v16072_v6  ;;  %v8879_v57 = vsel %vm8875_vm14, %v8862_v26, %v8864_v21 }
 0x88b   : > { %8968 = vmatprep.mubr.f32.mxu0 %v16072_v6  ;;  %9134 = vmatprep.subr.mxu0 %v9089_v61  ;;  %v9074_v7 = vpop.permute.xlu0 %9073 }
 0x88c   : > { %v9088_v22 = vsel %vm9083_vm15, %v9074_v7, %v9076_v4 }
 0x88d   : > { %11715 = vmatmul.mubr.msk.f32.vlgmr.msra.gmra.mxu1 %vm7498_vm11, %v11711_v16  ;;  %11720 = vmatmul.mubr.msk.f32.gmra.mxu0 %vm7498_vm11, %v11718_v39  ;;  %v9064_v41 = vpop.permute.xlu1 %9063 }
 0x88e   : > { %9004 = vmatpush1.msra.mxu1 %v8882_v1  ;;  %8837 = vmatprep.mubr.f32.mxu1 %v16072_v6  ;;  %v9084_v49 = vsel %vm9083_vm15, %v9064_v41, %v15159_v13 }
 0x88f   : > { %9005 = vmatprep.subr.mxu1 %v8879_v57  ;;  %9135 = vmatpush1.msra.mxu0 %v9088_v22  ;;  %v9068_v40 = vpop.permute.xlu0 %9067 }
 0x890   : > { %9006 = vmatpush1.msra.mxu1 %v8878_v27  ;;  %v9085_v51 = vsel %vm9083_vm15, %v15159_v13, %v9068_v40  ;;  %9170 = vmatprep.mubr.f32.mxu0 %v16072_v6 }
 0x891   : > { %11716 = vmatmul.mubr.msk.f32.gmra.mxu1 %vm7498_vm11, %v11712_v63  ;;  %9136 = vmatprep.subr.mxu0 %v9085_v51  ;;  %v9072_v23 = vpop.permute.xlu1 %9071 }
 0x892   : > { %9039 = vmatprep.mubr.f32.mxu1 %v16072_v6  ;;  %9137 = vmatpush1.msra.mxu0 %v9084_v49 }
 0x893   : > { %11725 = vmatmul.mubr.msk.f32.vlgmr.msra.gmra.mxu0 %vm7498_vm11, %v11723_v34  ;;  %v9082_v18 = vpop.permute.xlu0 %9081 }
 0x894   : > { %v9091_v33 = vsel %vm9083_vm15, %v9080_v62, %v9082_v18  ;;  %9176 = vmatprep.mubr.f32.mxu0 %v16072_v6 }
 0x895   : > { %11721 = vmatmul.mubr.msk.f32.vlgmr.msra.gmra.mxu1 %vm7498_vm11, %v11717_v29  ;;  %9211 = vmatprep.subr.mxu1 %v9091_v33 }
 0x896   : > { %9045 = vmatprep.mubr.f32.mxu1 %v16072_v6  ;;  %9212 = vmatpush1.msra.mxu1 %v9090_v53 }
 0x897   : > { %11726 = vmatmul.mubr.msk.f32.gmra.mxu0 %vm7498_vm11, %v11724_v12  ;;  %v9070_v54 = vpop.permute.xlu0 %9069 }
 0x898   : > { %v9086_v42 = vsel %vm9083_vm15, %v9068_v40, %v9070_v54  ;;  %v9087_v45 = vsel %vm9083_vm15, %v9070_v54, %v9072_v23  ;;  %9419 = vmatprep.mubr.f32.mxu0 %v16072_v6 }
 0x899   : > { %11722 = vmatmul.mubr.msk.f32.gmra.mxu1 %vm7498_vm11, %v11718_v39  ;;  %9213 = vmatprep.subr.mxu1 %v9087_v45 }
 0x89a   : > { %9214 = vmatpush1.msra.mxu1 %v9086_v42  ;;  %9247 = vmatprep.mubr.f32.mxu1 %v16072_v6 }
 0x89d   : > { %11727 = vmatmul.mubr.msk.f32.vlgmr.msra.gmra.mxu1 %vm7498_vm11, %v11723_v34 }
 0x89e   : > { %9253 = vmatprep.mubr.f32.mxu1 %v16072_v6 }
 0x8a1   : > { %11728 = vmatmul.mubr.msk.f32.gmra.mxu1 %vm7498_vm11, %v11724_v12 }
 0x90d   : > { %v7571_v56 = vpop.f32.mrf.mxu0 }
 0x90f   : > { %v7573_v55 = vpop.f32.mrf.mxu0 }
 0x911   : > { %v15251_v32 = vpop.f32.mrf.mxu1 }
 0x912   : > { %v7577_v50 = vpop.f32.mrf.mxu0 }
 0x913   : > { %v15253_v5 = vpop.f32.mrf.mxu1 }
 0x914   : > { %v7579_v48 = vpop.f32.mrf.mxu0 }
 0x916   : > { %v7654_v0 = vpop.f32.mrf.mxu1 }
 0x917   : > { %v7731_v46 = vpop.f32.mrf.mxu0 }
 0x918   : > { %v7656_v35 = vpop.f32.mrf.mxu1  ;;  %v7732_v45 = vadd.f32 %v7731_v46, %v7571_v56 }
 0x919   : > { %v7733_v11 = vpop.f32.mrf.mxu0 }
 0x91a   : > { %v7734_v47 = vadd.f32 %v7733_v11, %v7573_v55  ;;  %v15255_v37 = vpop.f32.mrf.mxu1 }
 0x91b   : > { %v7737_v59 = vpop.f32.mrf.mxu0 }
 0x91c   : > { %v7738_v25 = vadd.f32 %v7737_v59, %v7577_v50  ;;  %v15257_v31 = vpop.f32.mrf.mxu1 }
 0x91d   : > { %v7739_v38 = vpop.f32.mrf.mxu0 }
 0x91e   : > { %v7740_v52 = vadd.f32 %v7739_v38, %v7579_v48  ;;  %v7814_v9 = vpop.f32.mrf.mxu1 }
 0x91f   : > { %v15259_v44 = vadd.f32 %v7814_v9, %v7654_v0  ;;  %v7925_v28 = vpop.f32.mrf.mxu0 }
 0x920   : > { %v7816_v60 = vpop.f32.mrf.mxu1  ;;  %v8013_v11 = vadd.f32 %v7925_v28, %v7732_v45 }
 0x921   : > { %v7817_v24 = vadd.f32 %v7816_v60, %v7656_v35  ;;  %v7927_v19 = vpop.f32.mrf.mxu0 }
 0x922   : > { %v15261_v20 = vadd.f32 %v7927_v19, %v7734_v47  ;;  %v8002_v13 = vpop.f32.mrf.mxu1 }
 0x923   : > { %v7931_v16 = vpop.f32.mrf.mxu0 }
 0x924   : > { %v8017_v10 = vadd.f32 %v7931_v16, %v7738_v25  ;;  %v15263_v2 = vpop.f32.mrf.mxu1 }
 0x925   : > { %v7933_v15 = vpop.f32.mrf.mxu0 }
 0x926   : > { %v8018_v30 = vadd.f32 %v7933_v15, %v7740_v52  ;;  %v15265_v17 = vpop.f32.mrf.mxu1 }
 0x927   : > { %v8134_v14 = vpop.f32.mrf.mxu0 }
 0x928   : > { %v8010_v63 = vpop.f32.mrf.mxu1  ;;  %v8222_v38 = vadd.f32 %v8134_v14, %v8013_v11 }
 0x929   : > { %v8020_v58 = vadd.f32 %v8010_v63, %v7817_v24  ;;  %v15267_v26 = vpop.f32.mrf.mxu0  ;;  %v9281_v63 = vpop.permute.xlu1 %9280 }
 0x92b   : > { %v8140_v43 = vpop.f32.mrf.mxu0 }
 0x92c   : > { %v8226_v36 = vadd.f32 %v8140_v43, %v8017_v10  ;;  %v7809_v10 = vadd.f32 %v15255_v37, %v15251_v32 }
 0x92d   : > { %v8142_v62 = vpop.f32.mrf.mxu0 }
 0x92e   : > { %v8227_v29 = vadd.f32 %v8142_v62, %v8018_v30  ;;  %v7811_v62 = vadd.f32 %v15257_v31, %v15253_v5 }
 0x92f   : > { %v8341_v8 = vpop.f32.mrf.mxu0 }
 0x930   : > { %v8429_v60 = vadd.f32 %v8341_v8, %v8222_v38  ;;  %v8019_v38 = vadd.f32 %v15265_v17, %v15259_v44 }
 0x931   : > { %v15269_v4 = vpop.f32.mrf.mxu0 }
 0x932   : > { %v8211_v61 = vpop.f32.mrf.mxu1 }
 0x933   : > { %v8347_v3 = vpop.f32.mrf.mxu0 }
 0x934   : > { %v8433_v21 = vadd.f32 %v8347_v3, %v8226_v36  ;;  %v8213_v39 = vpop.f32.mrf.mxu1 }
 0x935   : > { %v8349_v7 = vpop.f32.mrf.mxu0 }
 0x936   : > { %v8434_v57 = vadd.f32 %v8349_v7, %v8227_v29  ;;  %v15271_v22 = vpop.f32.mrf.mxu1 }
 0x937   : > { %v8549_v1 = vpop.f32.mrf.mxu0 }
 0x938   : > { %v8219_v41 = vpop.f32.mrf.mxu1  ;;  %v8637_v56 = vadd.f32 %v8549_v1, %v8429_v60 }
 0x939   : > { %v8229_v27 = vadd.f32 %v8219_v41, %v8020_v58  ;;  %v15273_v40 = vpop.f32.mrf.mxu0  ;;  %v8015_v58 = vadd.f32 %v8002_v13, %v7809_v10 }
 0x93b   : > { %v8224_v29 = vadd.f32 %v8211_v61, %v8015_v58 }
 0x93c   : > { %v8418_v51 = vpop.f32.mrf.mxu1  ;;  %v8555_v34 = vpop.f32.mrf.mxu0 }
 0x93d   : > { %v15275_v49 = vadd.f32 %v8555_v34, %v8433_v21  ;;  %v8016_v21 = vadd.f32 %v15263_v2, %v7811_v62  ;;  %v8431_v7 = vadd.f32 %v8418_v51, %v8224_v29  ;;  %v15362_v29 = vld [vmem:[%s15824_s16 + $0x10] sm:$0xff] }
 0x93e   : > { %v8420_v18 = vpop.f32.mrf.mxu1  ;;  %v8557_v33 = vpop.f32.mrf.mxu0  ;;  %11945 = vmatprep.mubr.msk.f32.mxu1 %vm7498_vm11, %v15362_v29 }
 0x93f   : > { %v8642_v12 = vadd.f32 %v8557_v33, %v8434_v57  ;;  %v8225_v57 = vadd.f32 %v8213_v39, %v8016_v21 }
 0x940   : > { %v8756_v53 = vpop.f32.mrf.mxu0 }
 0x941   : > { %v15277_v23 = vpop.f32.mrf.mxu1  ;;  %v8844_v15 = vadd.f32 %v8756_v53, %v8637_v56  ;;  %v8432_v34 = vadd.f32 %v8420_v18, %v8225_v57  ;;  %v8223_v18 = vadd.f32 %v15267_v26, %v15261_v20 }
 0x942   : > { %v15279_v54 = vpop.f32.mrf.mxu0 }
 0x943   : > { %v8426_v42 = vpop.f32.mrf.mxu1 }
 0x944   : > { %v15281_v55 = vadd.f32 %v8426_v42, %v8229_v27  ;;  %v9301_v27 = vpop.permute.xlu1 %9300 }
 0x945   : > { %v8626_v50 = vpop.f32.mrf.mxu1  ;;  %v15283_v48 = vpop.f32.mrf.mxu0 }
 0x946   : > { %v8639_v1 = vadd.f32 %v8626_v50, %v8431_v7 }
 0x947   : > { %v8628_v0 = vpop.f32.mrf.mxu1  ;;  %v8764_v35 = vpop.f32.mrf.mxu0 }
 0x948   : > { %v8849_v47 = vadd.f32 %v8764_v35, %v8642_v12  ;;  %v8640_v5 = vadd.f32 %v8628_v0, %v8432_v34  ;;  %v8430_v0 = vadd.f32 %v15269_v4, %v8223_v18  ;;  %v8228_v4 = vadd.f32 %v15271_v22, %v8019_v38  ;;  %v11032_v34 = vld [vmem:[%s15825_s17] sm:$0xff]  ;;  %v11051_v18 = vld [vmem:[%s15826_s18 + $0x8] sm:$0x3] }
 0x949   : > { %v15285_v59 = vpop.f32.mrf.mxu1  ;;  %v8964_v25 = vpop.f32.mrf.mxu0 }
 0x94a   : > { %v9052_v14 = vadd.f32 %v8964_v25, %v8844_v15  ;;  %v9286_v15 = vpop.permute.xlu0 %9285 }
 0x94b   : > { %v15287_v52 = vpop.f32.mrf.mxu1  ;;  %v8966_v9 = vpop.f32.mrf.mxu0 }
 0x94d   : > { %v8833_v24 = vpop.f32.mrf.mxu1  ;;  %v15289_v19 = vpop.f32.mrf.mxu0 }
 0x94e   : > { %v8846_v33 = vadd.f32 %v8833_v24, %v8639_v1  ;;  %v9306_v58 = vpop.permute.xlu0 %9305 }
 0x94f   : > { %v8835_v46 = vpop.f32.mrf.mxu1  ;;  %v8972_v16 = vpop.f32.mrf.mxu0 }
 0x950   : > { %v15293_v28 = vadd.f32 %v8972_v16, %v8849_v47  ;;  %v8847_v61 = vadd.f32 %v8835_v46, %v8640_v5  ;;  %v8638_v47 = vadd.f32 %v15273_v40, %v8430_v0  ;;  %v8435_v40 = vadd.f32 %v15277_v23, %v8228_v4  ;;  %v11244_v0 = vld [vmem:[%s15828_s20 + $0x8] sm:$0x3] }
 0x951   : > { %v8839_v30 = vpop.f32.mrf.mxu1 }
 0x952   : > { %v8845_v20 = vadd.f32 %v15279_v54, %v8638_v47  ;;  %v8643_v44 = vadd.f32 %v15285_v59, %v8435_v40 }
 0x953   : > { %v15295_v43 = vpop.f32.mrf.mxu1  ;;  %v9172_v36 = vpop.f32.mrf.mxu0 }
 0x954   : > { %v9260_v8 = vadd.f32 %v9172_v36, %v9052_v14  ;;  %v9053_v60 = vadd.f32 %v8966_v9, %v8845_v20  ;;  %v8850_v54 = vadd.f32 %v8839_v30, %v8643_v44  ;;  %v11262_v20 = vld [vmem:[%s15829_s21 + $0x8] sm:$0x3] }
 0x955   : > { %v9041_v3 = vpop.f32.mrf.mxu1  ;;  %v9174_v26 = vpop.f32.mrf.mxu0 }
 0x956   : > { %v9268_v32 = vmax.f32 %v9260_v8, 0.0  ;;  %v9054_v31 = vadd.f32 %v9041_v3, %v8846_v33  ;;  %v9261_v56 = vadd.f32 %v9174_v26, %v9053_v60 }
 0x957   : > { %v9043_v37 = vpop.f32.mrf.mxu1  ;;  %v9178_v14 = vpop.f32.mrf.mxu0 }
 0x958   : > { %v9288_v41 = vmul.f32 %v9281_v63, %v9268_v32  ;;  %v9055_v39 = vadd.f32 %v9043_v37, %v8847_v61  ;;  %v9269_v22 = vmax.f32 %v9261_v56, 0.0 }
 0x959   : > { %v9047_v13 = vpop.f32.mrf.mxu1 }
 0x95a   : > { %v15300_v12 = vadd.f32 %v9301_v27, %v9288_v41  ;;  %v9058_v46 = vadd.f32 %v9047_v13, %v8850_v54  ;;  %v9289_v23 = vmul.f32 %v9281_v63, %v9269_v22 }
 0x95b   : > { %v15302_v53 = vpop.f32.mrf.mxu1 }
 0x95c   : > { %9327 = vrot.lane.b32.xlu1 %v15300_v12, %s16014_s5  ;;  %v15342_v59 = vadd.f32 %v9301_v27, %v9289_v23 }
 0x95d   : > { %v9249_v2 = vpop.f32.mrf.mxu1 }
 0x95e   : > { %v9262_v51 = vadd.f32 %v9249_v2, %v9054_v31  ;;  %v11243_v2 = vld [vmem:[%s15828_s20] sm:$0xff] }
 0x95f   : > { %v9251_v42 = vpop.f32.mrf.mxu1 }
 0x960   : > { %v9270_v45 = vmax.f32 %v9262_v51, 0.0  ;;  %9668 = vrot.lane.b32.xlu1 %v15300_v12, %s12061_s3  ;;  %v9263_v35 = vadd.f32 %v9251_v42, %v9055_v39  ;;  %v11033_v51 = vld [vmem:[%s15825_s17 + $0x8] sm:$0x3]  ;;  %v11261_v39 = vld [vmem:[%s15829_s21] sm:$0xff] }
 0x961   : > { %v9255_v9 = vpop.f32.mrf.mxu1 }
 0x962   : > { %v9290_v50 = vmul.f32 %v9281_v63, %v9270_v45  ;;  %v9271_v25 = vmax.f32 %v9263_v35, 0.0  ;;  %v9266_v16 = vadd.f32 %v9255_v9, %v9058_v46 }
 0x963   : > { %v9257_v3 = vpop.f32.mrf.mxu1 }
 0x964   : > { %v15311_v11 = vadd.f32 %v9301_v27, %v9290_v50  ;;  %9859 = vrot.lane.b32.xlu1 %v15300_v12, %s16017_s7  ;;  %v9291_v24 = vmul.f32 %v9281_v63, %v9271_v25  ;;  %v9274_v10 = vmax.f32 %v9266_v16, 0.0  ;;  %v8848_v63 = vadd.f32 %v15283_v48, %v15275_v49 }
 0x965   : > { %v8644_v48 = vadd.f32 %v15287_v52, %v15281_v55 }
 0x966   : > { %9331 = vrot.lane.b32.xlu0 %v15311_v11, %s16014_s5  ;;  %v15330_v17 = vadd.f32 %v9301_v27, %v9291_v24  ;;  %v9294_v30 = vmul.f32 %v9286_v15, %v9274_v10  ;;  %v9056_v36 = vadd.f32 %v15289_v19, %v8848_v63  ;;  %v11730_v63 = vld [vmem:[%s15824_s16 + $0x18] sm:$0x3] }
 0x967   : > { %v8851_v19 = vadd.f32 %v15295_v43, %v8644_v48  ;;  %v9180_v43 = vpop.f32.mrf.mxu0 }
 0x968   : > { %10054 = vrot.lane.b32.xlu1 %v15300_v12, %s16034_s6  ;;  %v15355_v62 = vadd.f32 %v9306_v58, %v9294_v30  ;;  %v9264_v49 = vadd.f32 %v9178_v14, %v9056_v36  ;;  %v9265_v57 = vadd.f32 %v9180_v43, %v15293_v28  ;;  %v9316_v36 = vld [vmem:[%s15824_s16] sm:$0xff] }
 0x969   : > { %v9059_v21 = vadd.f32 %v15302_v53, %v8851_v19  ;;  %v11050_v53 = vld [vmem:[%s15826_s18] sm:$0xff]  ;;  %v9317_v19 = vld [vmem:[%s15824_s16 + $0x8] sm:$0x3] }
 0x96a   : > { %9672 = vrot.lane.b32.xlu0 %v15311_v11, %s12061_s3  ;;  %v9272_v8 = vmax.f32 %v9264_v49, 0.0  ;;  %v9273_v41 = vmax.f32 %v9265_v57, 0.0 }
 0x96b   : > { %v9267_v32 = vadd.f32 %v9257_v3, %v9059_v21  ;;  %v11740_v3 = vld [vmem:[%s15824_s16 + $0x28] sm:$0x3] }
 0x96c   : > { %10249 = vrot.lane.b32.xlu1 %v15300_v12, %s12062_s27  ;;  %v9292_v7 = vmul.f32 %v9286_v15, %v9272_v8  ;;  %v9293_v27 = vmul.f32 %v9286_v15, %v9273_v41 }
 0x96d   : > { %v9275_v52 = vmax.f32 %v9267_v32, 0.0 }
 0x96e   : > { %9863 = vrot.lane.b32.xlu0 %v15311_v11, %s16017_s7  ;;  %v15382_v55 = vadd.f32 %v9306_v58, %v9292_v7  ;;  %v15400_v13 = vadd.f32 %v9306_v58, %v9293_v27 }
 0x96f   : > { %v9295_v37 = vmul.f32 %v9286_v15, %v9275_v52 }
 0x970   : > { %9865 = vrot.lane.b32.xlu1 %v15330_v17, %s16017_s7 }
 0x971   : > { %v9315_v1 = vadd.f32 %v9306_v58, %v9295_v37 }
 0x972   : > { %10058 = vrot.lane.b32.xlu0 %v15311_v11, %s16034_s6 }
 0x974   : > { %10060 = vrot.lane.b32.xlu1 %v15330_v17, %s16034_s6 }
 0x976   : > { %10253 = vrot.lane.b32.xlu0 %v15311_v11, %s12062_s27 }
 0x978   : > { %10255 = vrot.lane.b32.xlu1 %v15330_v17, %s12062_s27 }
 0x97a   : > { %9861 = vrot.lane.b32.xlu0 %v15342_v59, %s16017_s7 }
 0x97c   : > { %9329 = vrot.lane.b32.xlu1 %v15342_v59, %s16014_s5 }
 0x97e   : > { %10251 = vrot.lane.b32.xlu0 %v15342_v59, %s12062_s27 }
 0x980   : > { %9670 = vrot.lane.b32.xlu1 %v15342_v59, %s12061_s3 }
 0x982   : > { %9871 = vrot.lane.b32.xlu0 %v15355_v62, %s16017_s7 }
 0x984   : > { %10056 = vrot.lane.b32.xlu1 %v15342_v59, %s16034_s6 }
 0x986   : > { %10066 = vrot.lane.b32.xlu0 %v15355_v62, %s16034_s6 }
 0x988   : > { %9337 = vrot.lane.b32.xlu1 %v15355_v62, %s16014_s5 }
 0x98a   : > { %10261 = vrot.lane.b32.xlu0 %v15355_v62, %s12062_s27 }
 0x98c   : > { %9678 = vrot.lane.b32.xlu1 %v15355_v62, %s12061_s3 }
 0x98e   : > { %10456 = vrot.lane.b32.xlu0 %v15355_v62, %s16073_s29 }
 0x990   : > { %9867 = vrot.lane.b32.xlu1 %v15382_v55, %s16017_s7 }
 0x992   : > { %9333 = vrot.lane.b32.xlu0 %v15382_v55, %s16014_s5 }
 0x994   : > { %10257 = vrot.lane.b32.xlu1 %v15382_v55, %s12062_s27 }
 0x996   : > { %9674 = vrot.lane.b32.xlu0 %v15382_v55, %s12061_s3 }
 0x998   : > { %9873 = vrot.lane.b32.xlu1 %v9315_v1, %s16017_s7 }
 0x99a   : > { %10062 = vrot.lane.b32.xlu0 %v15382_v55, %s16034_s6 }
 0x99c   : > { %10263 = vrot.lane.b32.xlu1 %v9315_v1, %s12062_s27 }
 0x99e   : > { %10068 = vrot.lane.b32.xlu0 %v9315_v1, %s16034_s6 }
 0x9a0   : > { %10446 = vrot.lane.b32.xlu1 %v15342_v59, %s16073_s29 }
 0x9a2   : > { %9335 = vrot.lane.b32.xlu0 %v15400_v13, %s16014_s5 }
 0x9a4   : > { %10444 = vrot.lane.b32.xlu1 %v15300_v12, %s16073_s29 }
 0x9a6   : > { %10452 = vrot.lane.b32.xlu0 %v15382_v55, %s16073_s29 }
 0x9a8   : > { %10450 = vrot.lane.b32.xlu1 %v15330_v17, %s16073_s29 }
 0x9aa   : > { %10448 = vrot.lane.b32.xlu0 %v15311_v11, %s16073_s29 }
 0x9ac   : > { %10653 = vrot.lane.b32.xlu1 %v9315_v1, %s16074_s0 }
 0x9ae   : > { %9676 = vrot.lane.b32.xlu0 %v15400_v13, %s12061_s3 }
 0x9b0   : > { %10064 = vrot.lane.b32.xlu1 %v15400_v13, %s16034_s6 }
 0x9b2   : > { %10458 = vrot.lane.b32.xlu0 %v9315_v1, %s16073_s29 }
 0x9b4   : > { %10645 = vrot.lane.b32.xlu1 %v15330_v17, %s16074_s0 }
 0x9b6   : > { %10651 = vrot.lane.b32.xlu0 %v15355_v62, %s16074_s0 }
 0x9b8   : > { %10647 = vrot.lane.b32.xlu1 %v15382_v55, %s16074_s0 }
 0x9ba   : > { %9869 = vrot.lane.b32.xlu0 %v15400_v13, %s16017_s7 }
 0x9bc   : > { %10454 = vrot.lane.b32.xlu1 %v15400_v13, %s16073_s29  ;;  %s707_s29 = scalar_lea.vmem %s15831_s23, %s11790_s9 }
 0x9be   : > { %10643 = vrot.lane.b32.xlu0 %v15311_v11, %s16074_s0 }
 0x9c0   : > { %10639 = vrot.lane.b32.xlu1 %v15300_v12, %s16074_s0 }
 0x9c2   : > { %10641 = vrot.lane.b32.xlu0 %v15342_v59, %s16074_s0 }
 0x9c4   : > { %10836 = vrot.lane.b32.xlu1 %v15342_v59, %s12065_s28 }
 0x9c6   : > { %10259 = vrot.lane.b32.xlu0 %v15400_v13, %s12062_s27 }
 0x9c8   : > { %10844 = vrot.lane.b32.xlu1 %v15400_v13, %s12065_s28 }
 0x9ca   : > { %10846 = vrot.lane.b32.xlu0 %v15355_v62, %s12065_s28 }
 0x9cc   : > { %10834 = vrot.lane.b32.xlu1 %v15300_v12, %s12065_s28 }
 0x9ce   : > { %10842 = vrot.lane.b32.xlu0 %v15382_v55, %s12065_s28  ;;  %v15448_v28 = vpop.permute.xlu1 %9327 }
 0x9d0   : > { %10840 = vrot.lane.b32.xlu1 %v15330_v17, %s12065_s28 }
 0x9d2   : > { %10649 = vrot.lane.b32.xlu0 %v15400_v13, %s16074_s0  ;;  %v15457_v33 = vpop.permute.xlu1 %9668 }
 0x9d4   : > { %11036 = vperm.xlu1 %12036, %v11032_v34  }
 0x9d6   : > { %10838 = vrot.lane.b32.xlu0 %v15311_v11, %s12065_s28  ;;  %v9860_v5 = vpop.permute.xlu1 %9859 }
 0x9d8   : > { %v15464_v31 = vpop.permute.xlu0 %9331  ;;  %11054 = vperm.xlu1 %12036, %v11050_v53  }
 0x9da   : > { %10848 = vrot.lane.b32.xlu0 %v9315_v1, %s12065_s28  ;;  %v15470_v61 = vpop.permute.xlu1 %10054 }
 0x9dc   : > { %v15475_v42 = vpop.permute.xlu0 %9672  ;;  %11247 = vperm.xlu1 %12036, %v11243_v2  }
 0x9de   : > { %11041 = vperm.xlu0 %12035, %v11033_v51   ;;  %v10250_v45 = vpop.permute.xlu1 %10249 }
 0x9e0   : > { %v9864_v50 = vpop.permute.xlu0 %9863  ;;  %11265 = vperm.xlu1 %12036, %v11261_v39  }
 0x9e2   : > { %11059 = vperm.xlu0 %12035, %v11051_v18   ;;  %v9866_v35 = vpop.permute.xlu1 %9865 }
 0x9e3   : > { %v15487_v47 = vsel %vm1330_vm6, %v9864_v50, %v9866_v35 }
 0x9e4   : > { %v15489_v25 = vpop.permute.xlu0 %10058 }
 0x9e6   : > { %11252 = vperm.xlu0 %12035, %v11244_v0   ;;  %v10061_v38 = vpop.permute.xlu1 %10060 }
 0x9e7   : > { %v15496_v26 = vsel %vm1542_vm8, %v15489_v25, %v10061_v38 }
 0x9e8   : > { %v10254_v4 = vpop.permute.xlu0 %10253 }
 0x9ea   : > { %11270 = vperm.xlu0 %12035, %v11262_v20   ;;  %v10256_v60 = vpop.permute.xlu1 %10255 }
 0x9eb   : > { %v15499_v24 = vsel %vm8460_vm13, %v10254_v4, %v10256_v60 }
 0x9ec   : > { %v9862_v40 = vpop.permute.xlu0 %9861 }
 0x9ed   : > { %v15502_v56 = vsel %vm1330_vm6, %v9860_v5, %v9862_v40  ;;  %v15505_v44 = vsel %vm1330_vm6, %v9862_v40, %v9864_v50  ;;  %v11746_v50 = vld [vmem:[%s15824_s16 + $0x38] sm:$0x3] }
 0x9ee   : > { %v9330_v17 = vpop.permute.xlu1 %9329 }
 0x9ef   : > { %v9340_v41 = vsel %vm933_vm2, %v9330_v17, %v15464_v31  ;;  %v9339_v27 = vsel %vm933_vm2, %v15448_v28, %v9330_v17  ;;  %v11751_v17 = vld [vmem:[%s15824_s16 + $0x40] sm:$0xff] }
 0x9f0   : > { %v10252_v54 = vpop.permute.xlu0 %10251 }
 0x9f1   : > { %v15508_v22 = vsel %vm8460_vm13, %v10250_v45, %v10252_v54  ;;  %v15511_v9 = vsel %vm8460_vm13, %v10252_v54, %v10254_v4 }
 0x9f2   : > { %v15513_v46 = vpop.permute.xlu1 %9670 }
 0x9f3   : > { %v9680_v2 = vsel %vm7838_vm12, %v15457_v33, %v15513_v46  ;;  %v11745_v33 = vld [vmem:[%s15824_s16 + $0x30] sm:$0xff] }
 0x9f4   : > { %v15515_v23 = vpop.permute.xlu0 %9871 }
 0x9f6   : > { %v15517_v16 = vpop.permute.xlu1 %10056 }
 0x9f7   : > { %v10071_v4 = vsel %vm1542_vm8, %v15517_v16, %v15489_v25  ;;  %v10070_v60 = vsel %vm1542_vm8, %v15470_v61, %v15517_v16 }
 0x9f8   : > { %v15519_v10 = vpop.permute.xlu0 %10066 }
 0x9fa   : > { %v9338_v15 = vpop.permute.xlu1 %9337 }
 0x9fb   : > { %11941 = vmatprep.subr.mxu1 %v9338_v15 }
 0x9fc   : > { %v15521_v30 = vpop.permute.xlu0 %10261  ;;  %11942 = vmatpush3.msra.mxu1 %v9338_v15 }
 0x9fd   : > { %11943 = vmatprep.subr.mxu1 %v15464_v31 }
 0x9fe   : > { %v9679_v58 = vpop.permute.xlu1 %9678  ;;  %11944 = vmatpush3.msra.mxu1 %v15464_v31 }
 0x9ff   : > { %9541 = vmatprep.subr.mxu1 %v15400_v13  ;;  %11946 = vmatmul.mubr.msk.f32.vlgmr.msra.gmra.mxu1 %vm7498_vm11, %v11730_v63 }
 0xa00   : > { %v15530_v14 = vpop.permute.xlu0 %10456  ;;  %9542 = vmatpush1.msra.mxu1 %v15382_v55  ;;  %9577 = vmatprep.mubr.f32.mxu1 %v16072_v6 }
 0xa01   : > { %9543 = vmatprep.subr.mxu1 %v15342_v59  ;;  %v11739_v59 = vld [vmem:[%s15824_s16 + $0x20] sm:$0xff] }
 0xa02   : > { %v15538_v49 = vpop.permute.xlu1 %9867  ;;  %9544 = vmatpush1.msra.mxu1 %v15300_v12 }
 0xa03   : > { %11955 = vmatprep.subr.mxu1 %v9679_v58  ;;  %11735 = vmatmul.mubr.msk.f32.vlgmr.msra.gmra.mxu1 %vm7498_vm11, %v9316_v36 }
 0xa04   : > { %v9334_v48 = vpop.permute.xlu0 %9333  ;;  %11956 = vmatpush3.msra.mxu1 %v9679_v58  ;;  %9583 = vmatprep.mubr.f32.mxu1 %v16072_v6 }
 0xa05   : > { %11957 = vmatprep.subr.mxu1 %v15475_v42 }
 0xa06   : > { %v15550_v8 = vpop.permute.xlu1 %10257  ;;  %11958 = vmatpush3.msra.mxu1 %v15475_v42 }
 0xa07   : > { %11736 = vmatmul.mubr.msk.f32.gmra.mxu1 %vm7498_vm11, %v9317_v19 }
 0xa08   : > { %v9675_v12 = vpop.permute.xlu0 %9674  ;;  %11959 = vmatprep.mubr.msk.f32.mxu1 %vm7498_vm11, %v11739_v59 }
 0xa0a   : > { %v9874_v21 = vpop.permute.xlu1 %9873 }
 0xa0b   : > { %11960 = vmatmul.mubr.msk.f32.vlgmr.msra.gmra.mxu1 %vm7498_vm11, %v11740_v3  ;;  %v9880_v39 = vsel %vm1330_vm6, %v15515_v23, %v9874_v21 }
 0xa0c   : > { %v10063_v7 = vpop.permute.xlu0 %10062  ;;  %9957 = vmatprep.mubr.f32.mxu1 %v16072_v6 }
 0xa0e   : > { %v15560_v32 = vpop.permute.xlu1 %10263 }
 0xa0f   : > { %v10270_v25 = vsel %vm8460_vm13, %v15521_v30, %v15560_v32 }
 0xa10   : > { %v15562_v55 = vpop.permute.xlu0 %10068 }
 0xa11   : > { %v10075_v61 = vsel %vm1542_vm8, %v15519_v10, %v15562_v55 }
 0xa12   : > { %v15564_v52 = vpop.permute.xlu1 %10446 }
 0xa14   : > { %v9336_v43 = vpop.permute.xlu0 %9335 }
 0xa15   : > { %v9341_v37 = vsel %vm933_vm2, %v9334_v48, %v9336_v43  ;;  %v9342_v57 = vsel %vm933_vm2, %v9336_v43, %v9338_v15  ;;  %v11758_v15 = vld [vmem:[%s15824_s16 + $0x58] sm:$0x3]  ;;  %v11763_v48 = vld [vmem:[%s15824_s16 + $0x60] sm:$0xff] }
 0xa16   : > { %9383 = vmatprep.subr.mxu0 %v9342_v57  ;;  %v15568_v1 = vpop.permute.xlu1 %10444  ;;  %v11770_v43 = vld [vmem:[%s15824_s16 + $0x78] sm:$0x3] }
 0xa17   : > { %9384 = vmatpush1.msra.mxu0 %v9341_v37 }
 0xa18   : > { %9385 = vmatprep.subr.mxu0 %v9340_v41  ;;  %v15574_v13 = vpop.permute.xlu0 %10452 }
 0xa19   : > { %9386 = vmatpush1.msra.mxu0 %v9339_v27 }
 0xa1a   : > { %11731 = vmatmul.mubr.msk.f32.vlgmr.msra.gmra.mxu0 %vm7498_vm11, %v15362_v29  ;;  %11948 = vmatprep.subr.mxu0 %v15355_v62  ;;  %v15579_v34 = vpop.permute.xlu1 %10450 }
 0xa1b   : > { %11949 = vmatpush3.msra.mxu0 %v15355_v62  ;;  %9425 = vmatprep.mubr.f32.mxu0 %v16072_v6 }
 0xa1c   : > { %11950 = vmatprep.subr.mxu0 %v15311_v11  ;;  %v15584_v53 = vpop.permute.xlu0 %10448 }
 0xa1d   : > { %11951 = vmatpush3.msra.mxu0 %v15311_v11  ;;  %v9681_v11 = vsel %vm7838_vm12, %v15513_v46, %v15475_v42 }
 0xa1e   : > { %11732 = vmatmul.mubr.msk.f32.gmra.mxu0 %vm7498_vm11, %v11730_v63  ;;  %v15588_v28 = vpop.permute.xlu1 %10653 }
 0xa1f   : > { %11952 = vmatprep.mubr.msk.f32.mxu0 %vm7498_vm11, %v9316_v36  ;;  %v10461_v36 = vsel %vm7498_vm11, %v15564_v52, %v15584_v53 }
 0xa20   : > { %v9677_v29 = vpop.permute.xlu0 %9676 }
 0xa21   : > { %v9682_v5 = vsel %vm7838_vm12, %v9675_v12, %v9677_v29  ;;  %v9683_v31 = vsel %vm7838_vm12, %v9677_v29, %v9679_v58  ;;  %v10462_v12 = vsel %vm7498_vm11, %v15584_v53, %v15579_v34  ;;  %v11775_v34 = vld [vmem:[%s15824_s16 + $0x80] sm:$0xff]  ;;  %v11776_v29 = vld [vmem:[%s15824_s16 + $0x88] sm:$0x3] }
 0xa22   : > { %11953 = vmatmul.mubr.msk.f32.vlgmr.msra.gmra.mxu0 %vm7498_vm11, %v9317_v19  ;;  %9724 = vmatprep.subr.mxu0 %v9683_v31  ;;  %v10065_v62 = vpop.permute.xlu1 %10064 }
 0xa23   : > { %9725 = vmatpush1.msra.mxu0 %v9682_v5  ;;  %9760 = vmatprep.mubr.f32.mxu0 %v16072_v6  ;;  %v10074_v18 = vsel %vm1542_vm8, %v10065_v62, %v15519_v10  ;;  %v10073_v20 = vsel %vm1542_vm8, %v10063_v7, %v10065_v62  ;;  %v11769_v7 = vld [vmem:[%s15824_s16 + $0x70] sm:$0xff]  ;;  %v15770_v62 = vld [vmem:[%s15827_s19] sm:$0xff] }
 0xa24   : > { %9726 = vmatprep.subr.mxu0 %v9681_v11  ;;  %v15601_v51 = vpop.permute.xlu0 %10458 }
 0xa25   : > { %9727 = vmatpush1.msra.mxu0 %v9680_v2 }
 0xa26   : > { %11741 = vmatmul.mubr.msk.f32.vlgmr.msra.gmra.mxu0 %vm7498_vm11, %v11739_v59  ;;  %11962 = vmatprep.subr.mxu0 %v9880_v39  ;;  %v15606_v45 = vpop.permute.xlu1 %10645 }
 0xa27   : > { %11963 = vmatpush3.msra.mxu0 %v9880_v39  ;;  %9766 = vmatprep.mubr.f32.mxu0 %v16072_v6 }
 0xa28   : > { %11964 = vmatprep.subr.mxu0 %v15487_v47  ;;  %v15610_v42 = vpop.permute.xlu0 %10651 }
 0xa29   : > { %11965 = vmatpush3.msra.mxu0 %v15487_v47  ;;  %v10660_v59 = vsel %vm8875_vm14, %v15610_v42, %v15588_v28 }
 0xa2a   : > { %11742 = vmatmul.mubr.msk.f32.gmra.mxu0 %vm7498_vm11, %v11740_v3  ;;  %10116 = vmatprep.subr.mxu0 %v10074_v18  ;;  %v15623_v35 = vpop.permute.xlu1 %10647 }
 0xa2b   : > { %11966 = vmatprep.mubr.msk.f32.mxu0 %vm7498_vm11, %v11745_v33 }
 0xa2c   : > { %v9870_v0 = vpop.permute.xlu0 %9869 }
 0xa2d   : > { %v9878_v38 = vsel %vm1330_vm6, %v15538_v49, %v9870_v0  ;;  %v9879_v47 = vsel %vm1330_vm6, %v9870_v0, %v15515_v23  ;;  %v11757_v23 = vld [vmem:[%s15824_s16 + $0x50] sm:$0xff]  ;;  %v10460_v49 = vsel %vm7498_vm11, %v15568_v1, %v15564_v52  ;;  %vm11347_vm6 = vcmask 1024  }
 0xa2e   : > { %9921 = vmatprep.subr.mxu1 %v9879_v47  ;;  %11967 = vmatmul.mubr.msk.f32.vlgmr.msra.gmra.mxu0 %vm7498_vm11, %v11746_v50  ;;  %v10455_v54 = vpop.permute.xlu1 %10454 }
 0xa2f   : > { %10117 = vmatpush1.msra.mxu0 %v10073_v20  ;;  %9922 = vmatpush1.msra.mxu1 %v9878_v38  ;;  %v10464_v46 = vsel %vm7498_vm11, %v10455_v54, %v15530_v14  ;;  %v10463_v58 = vsel %vm7498_vm11, %v15574_v13, %v10455_v54 }
 0xa30   : > { %10118 = vmatprep.subr.mxu0 %v10071_v4  ;;  %9923 = vmatprep.subr.mxu1 %v15505_v44  ;;  %v15638_v40 = vpop.permute.xlu0 %10643 }
 0xa31   : > { %10119 = vmatpush1.msra.mxu0 %v10070_v60  ;;  %9924 = vmatpush1.msra.mxu1 %v15502_v56  ;;  %v11752_v56 = vld [vmem:[%s15824_s16 + $0x48] sm:$0x3] }
 0xa32   : > { %10152 = vmatprep.mubr.f32.mxu0 %v16072_v6  ;;  %11976 = vmatprep.subr.mxu0 %v10270_v25  ;;  %v15668_v16 = vpop.permute.xlu1 %10639 }
 0xa33   : > { %11747 = vmatmul.mubr.msk.f32.vlgmr.msra.gmra.mxu1 %vm7498_vm11, %v11745_v33  ;;  %11753 = vmatmul.mubr.msk.f32.vlgmr.msra.gmra.mxu0 %vm7498_vm11, %v11751_v17 }
 0xa34   : > { %11969 = vmatprep.subr.mxu1 %v10075_v61  ;;  %11977 = vmatpush3.msra.mxu0 %v10270_v25  ;;  %v15653_v44 = vpop.permute.xlu0 %10641 }
 0xa35   : > { %11970 = vmatpush3.msra.mxu1 %v10075_v61  ;;  %11978 = vmatprep.subr.mxu0 %v15499_v24  ;;  %v10656_v1 = vsel %vm8875_vm14, %v15653_v44, %v15638_v40  ;;  %v10655_v13 = vsel %vm8875_vm14, %v15668_v16, %v15653_v44 }
 0xa36   : > { %11971 = vmatprep.subr.mxu1 %v15496_v26  ;;  %11979 = vmatpush3.msra.mxu0 %v15499_v24 }
 0xa37   : > { %9963 = vmatprep.mubr.f32.mxu1 %v16072_v6  ;;  %10158 = vmatprep.mubr.f32.mxu0 %v16072_v6 }
 0xa38   : > { %11972 = vmatpush3.msra.mxu1 %v15496_v26  ;;  %10506 = vmatprep.subr.mxu0 %v10464_v46  ;;  %v10260_v24 = vpop.permute.xlu0 %10259 }
 0xa39   : > { %11748 = vmatmul.mubr.msk.f32.gmra.mxu1 %vm7498_vm11, %v11746_v50  ;;  %11754 = vmatmul.mubr.msk.f32.gmra.mxu0 %vm7498_vm11, %v11752_v56  ;;  %v10269_v10 = vsel %vm8460_vm13, %v10260_v24, %v15521_v30  ;;  %v10268_v26 = vsel %vm8460_vm13, %v15550_v8, %v10260_v24  ;;  %v10837_v30 = vpop.permute.xlu1 %10836  ;;  %v10657_v8 = vsel %vm8875_vm14, %v15638_v40, %v15606_v45 }
 0xa3a   : > { %11973 = vmatprep.mubr.msk.f32.mxu1 %vm7498_vm11, %v11751_v17  ;;  %11980 = vmatprep.mubr.msk.f32.mxu0 %vm7498_vm11, %v11757_v23 }
 0xa3b   : > { %10311 = vmatprep.subr.mxu1 %v10269_v10 }
 0xa3c   : > { %v15682_v63 = vpop.permute.xlu0 %10846 }
 0xa3d   : > { %11974 = vmatmul.mubr.msk.f32.vlgmr.msra.gmra.mxu1 %vm7498_vm11, %v11752_v56  ;;  %11981 = vmatmul.mubr.msk.f32.vlgmr.msra.gmra.mxu0 %vm7498_vm11, %v11758_v15 }
 0xa3e   : > { %10507 = vmatpush1.msra.mxu0 %v10463_v58  ;;  %10312 = vmatpush1.msra.mxu1 %v10268_v26 }
 0xa3f   : > { %10508 = vmatprep.subr.mxu0 %v10461_v36  ;;  %10313 = vmatprep.subr.mxu1 %v15511_v9  ;;  %v10845_v9 = vpop.permute.xlu1 %10844 }
 0xa40   : > { %10509 = vmatpush1.msra.mxu0 %v10460_v49  ;;  %10314 = vmatpush1.msra.mxu1 %v15508_v22  ;;  %v10843_v19 = vpop.permute.xlu0 %10842  ;;  %v10465_v22 = vsel %vm7498_vm11, %v15530_v14, %v15601_v51  ;;  %v11764_v14 = vld [vmem:[%s15824_s16 + $0x68] sm:$0x3]  ;;  %v10854_v21 = vsel %vm9083_vm15, %v10845_v9, %v15682_v63 }
 0xa41   : > { %10347 = vmatprep.mubr.f32.mxu1 %v16072_v6  ;;  %10542 = vmatprep.mubr.f32.mxu0 %v16072_v6  ;;  %v10853_v57 = vsel %vm9083_vm15, %v10843_v19, %v10845_v9 }
 0xa42   : > { %11990 = vmatprep.subr.mxu0 %v10660_v59  ;;  %11759 = vmatmul.mubr.msk.f32.vlgmr.msra.gmra.mxu1 %vm7498_vm11, %v11757_v23 }
 0xa43   : > { %11765 = vmatmul.mubr.msk.f32.vlgmr.msra.gmra.mxu0 %vm7498_vm11, %v11763_v48  ;;  %11983 = vmatprep.subr.mxu1 %v10465_v22  ;;  %v10835_v37 = vpop.permute.xlu1 %10834 }
 0xa44   : > { %11991 = vmatpush3.msra.mxu0 %v10660_v59  ;;  %11984 = vmatpush3.msra.mxu1 %v10465_v22  ;;  %v10650_v3 = vpop.permute.xlu0 %10649  ;;  %v10850_v53 = vsel %vm9083_vm15, %v10835_v37, %v10837_v30 }
 0xa45   : > { %11992 = vmatprep.subr.mxu0 %v10657_v8  ;;  %11985 = vmatprep.subr.mxu1 %v10462_v12  ;;  %v10659_v32 = vsel %vm8875_vm14, %v10650_v3, %v15610_v42  ;;  %v10658_v52 = vsel %vm8875_vm14, %v15623_v35, %v10650_v3 }
 0xa46   : > { %11993 = vmatpush3.msra.mxu0 %v10657_v8  ;;  %10353 = vmatprep.mubr.f32.mxu1 %v16072_v6 }
 0xa47   : > { %10548 = vmatprep.mubr.f32.mxu0 %v16072_v6  ;;  %11986 = vmatpush3.msra.mxu1 %v10462_v12  ;;  %v10841_v5 = vpop.permute.xlu1 %10840 }
 0xa48   : > { %10896 = vmatprep.subr.mxu0 %v10854_v21  ;;  %11760 = vmatmul.mubr.msk.f32.gmra.mxu1 %vm7498_vm11, %v11758_v15  ;;  %v10839_v55 = vpop.permute.xlu0 %10838 }
 0xa49   : > { %11766 = vmatmul.mubr.msk.f32.gmra.mxu0 %vm7498_vm11, %v11764_v14  ;;  %11987 = vmatprep.mubr.msk.f32.mxu1 %vm7498_vm11, %v11763_v48  ;;  %v10851_v41 = vsel %vm9083_vm15, %v10837_v30, %v10839_v55  ;;  %v10852_v31 = vsel %vm9083_vm15, %v10839_v55, %v10841_v5 }
 0xa4a   : > { %11994 = vmatprep.mubr.msk.f32.mxu0 %vm7498_vm11, %v11769_v7  ;;  %10701 = vmatprep.subr.mxu1 %v10659_v32 }
 0xa4c   : > { %11988 = vmatmul.mubr.msk.f32.vlgmr.msra.gmra.mxu1 %vm7498_vm11, %v11764_v14  ;;  %v10849_v27 = vpop.permute.xlu0 %10848 }
 0xa4d   : > { %11995 = vmatmul.mubr.msk.f32.vlgmr.msra.gmra.mxu0 %vm7498_vm11, %v11770_v43  ;;  %10702 = vmatpush1.msra.mxu1 %v10658_v52  ;;  %v10855_v28 = vsel %vm9083_vm15, %v15682_v63, %v10849_v27 }
 0xa4e   : > { %10897 = vmatpush1.msra.mxu0 %v10853_v57  ;;  %10703 = vmatprep.subr.mxu1 %v10656_v1 }
 0xa4f   : > { %10704 = vmatpush1.msra.mxu1 %v10655_v13  ;;  %10737 = vmatprep.mubr.f32.mxu1 %v16072_v6 }
 0xa50   : > { %11771 = vmatmul.mubr.msk.f32.vlgmr.msra.gmra.mxu1 %vm7498_vm11, %v11769_v7  ;;  %10898 = vmatprep.subr.mxu0 %v10851_v41 }
 0xa51   : > { %10899 = vmatpush1.msra.mxu0 %v10850_v53  ;;  %10932 = vmatprep.mubr.f32.mxu0 %v16072_v6 }
 0xa52   : > { %11777 = vmatmul.mubr.msk.f32.vlgmr.msra.gmra.mxu0 %vm7498_vm11, %v11775_v34  ;;  %10743 = vmatprep.mubr.f32.mxu1 %v16072_v6 }
 0xa53   : > { %11997 = vmatprep.subr.mxu1 %v10855_v28  ;;  %10938 = vmatprep.mubr.f32.mxu0 %v16072_v6 }
 0xa54   : > { %11772 = vmatmul.mubr.msk.f32.gmra.mxu1 %vm7498_vm11, %v11770_v43 }
 0xa55   : > { %11998 = vmatpush3.msra.mxu1 %v10855_v28  ;;  %12001 = vmatprep.mubr.msk.f32.mxu1 %vm7498_vm11, %v11775_v34 }
 0xa56   : > { %11778 = vmatmul.mubr.msk.f32.gmra.mxu0 %vm7498_vm11, %v11776_v29  ;;  %11999 = vmatprep.subr.mxu1 %v10852_v31 }
 0xa57   : > { %12000 = vmatpush3.msra.mxu1 %v10852_v31  ;;  %12008 = vmatprep.mubr.msk.f32.mxu0 %vm1696_vm10, %v15770_v62 }
 0xa58   : > { %12002 = vmatmul.mubr.msk.f32.vlgmr.msra.gmra.mxu1 %vm7498_vm11, %v11776_v29 }
 0xa59   : > { %11149 = vmatprep.mubr.f32.mxu1 %v16072_v6 }
 0xabf   : > { %v11947_v11 = vpop.f32.mrf.mxu1 }
 0xac1   : > { %v9498_v51 = vpop.f32.mrf.mxu1 }
 0xac3   : > { %v9579_v42 = vpop.f32.mrf.mxu1 }
 0xac5   : > { %v9581_v50 = vpop.f32.mrf.mxu1 }
 0xac7   : > { %v9585_v38 = vpop.f32.mrf.mxu1 }
 0xac9   : > { %v9587_v4 = vpop.f32.mrf.mxu1 }
 0xacb   : > { %v11961_v40 = vpop.f32.mrf.mxu1 }
 0xacd   : > { %v9839_v54 = vpop.f32.mrf.mxu1 }
 0xada   : > { %v9421_v2 = vpop.f32.mrf.mxu0 }
 0xadb   : > { %v9580_v30 = vadd.f32 %v9579_v42, %v9421_v2 }
 0xadc   : > { %v9423_v39 = vpop.f32.mrf.mxu0 }
 0xadd   : > { %v9582_v49 = vadd.f32 %v9581_v50, %v9423_v39 }
 0xade   : > { %v9427_v45 = vpop.f32.mrf.mxu0 }
 0xadf   : > { %v9586_v22 = vadd.f32 %v9585_v38, %v9427_v45 }
 0xae0   : > { %v9429_v33 = vpop.f32.mrf.mxu0 }
 0xae1   : > { %v9588_v14 = vadd.f32 %v9587_v4, %v9429_v33 }
 0xae2   : > { %v11954_v18 = vpop.f32.mrf.mxu0 }
 0xae3   : > { %v9662_v12 = vadd.f32 %v11954_v18, %v11947_v11 }
 0xae4   : > { %v9656_v35 = vpop.f32.mrf.mxu0 }
 0xae5   : > { %v9657_v21 = vadd.f32 %v9656_v35, %v9498_v51  ;;  %v9853_v57 = vadd.f32 %v11961_v40, %v9662_v12 }
 0xae6   : > { %v9762_v0 = vpop.f32.mrf.mxu0 }
 0xae7   : > { %v9848_v19 = vadd.f32 %v9762_v0, %v9580_v30  ;;  %v9850_v27 = vadd.f32 %v9839_v54, %v9657_v21  ;;  %v11042_v30 = vpop.permute.xlu0 %11041 }
 0xae8   : > { %v9764_v47 = vpop.f32.mrf.mxu0 }
 0xae9   : > { %v9849_v9 = vadd.f32 %v9764_v47, %v9582_v49 }
 0xaea   : > { %v9768_v20 = vpop.f32.mrf.mxu0 }
 0xaeb   : > { %v9851_v7 = vadd.f32 %v9768_v20, %v9586_v22 }
 0xaec   : > { %v9770_v60 = vpop.f32.mrf.mxu0 }
 0xaed   : > { %v9852_v52 = vadd.f32 %v9770_v60, %v9588_v14 }
 0xaee   : > { %v11968_v17 = vpop.f32.mrf.mxu0 }
 0xaef   : > { %v10050_v28 = vadd.f32 %v11968_v17, %v9853_v57  ;;  %v11060_v57 = vpop.permute.xlu0 %11059 }
 0xaf0   : > { %v10036_v25 = vpop.f32.mrf.mxu0 }
 0xaf1   : > { %v10047_v31 = vadd.f32 %v10036_v25, %v9850_v27 }
 0xaf3   : > { %v9959_v61 = vpop.f32.mrf.mxu1  ;;  %v10154_v44 = vpop.f32.mrf.mxu0 }
 0xaf4   : > { %v10045_v3 = vadd.f32 %v9959_v61, %v9848_v19 }
 0xaf5   : > { %v9961_v56 = vpop.f32.mrf.mxu1  ;;  %v10156_v46 = vpop.f32.mrf.mxu0 }
 0xaf6   : > { %v10046_v32 = vadd.f32 %v9961_v56, %v9849_v9  ;;  %v10240_v1 = vadd.f32 %v10154_v44, %v10045_v3 }
 0xaf8   : > { %v10241_v13 = vadd.f32 %v10156_v46, %v10046_v32 }
 0xaf9   : > { %v9965_v23 = vpop.f32.mrf.mxu1  ;;  %v10160_v16 = vpop.f32.mrf.mxu0 }
 0xafa   : > { %v10048_v43 = vadd.f32 %v9965_v23, %v9851_v7 }
 0xafb   : > { %v9967_v24 = vpop.f32.mrf.mxu1  ;;  %v10162_v10 = vpop.f32.mrf.mxu0 }
 0xafc   : > { %v10049_v34 = vadd.f32 %v9967_v24, %v9852_v52  ;;  %v10243_v11 = vadd.f32 %v10160_v16, %v10048_v43 }
 0xafd   : > { %v11975_v15 = vpop.f32.mrf.mxu1  ;;  %v11982_v26 = vpop.f32.mrf.mxu0 }
 0xafe   : > { %v10245_v39 = vadd.f32 %v11975_v15, %v10050_v28  ;;  %v10244_v42 = vadd.f32 %v10162_v10, %v10049_v34 }
 0xaff   : > { %v10231_v63 = vpop.f32.mrf.mxu1  ;;  %v10426_v58 = vpop.f32.mrf.mxu0 }
 0xb00   : > { %v10242_v33 = vadd.f32 %v10231_v63, %v10047_v31  ;;  %v10440_v20 = vadd.f32 %v11982_v26, %v10245_v39  ;;  %v11253_v39 = vpop.permute.xlu0 %11252 }
 0xb02   : > { %v10349_v36 = vpop.f32.mrf.mxu1  ;;  %v10437_v17 = vadd.f32 %v10426_v58, %v10242_v33 }
 0xb03   : > { %v10544_v48 = vpop.f32.mrf.mxu0  ;;  %v10435_v29 = vadd.f32 %v10349_v36, %v10240_v1 }
 0xb04   : > { %v10351_v59 = vpop.f32.mrf.mxu1 }
 0xb05   : > { %v10546_v8 = vpop.f32.mrf.mxu0  ;;  %v10436_v2 = vadd.f32 %v10351_v59, %v10241_v13  ;;  %v10630_v50 = vadd.f32 %v10544_v48, %v10435_v29 }
 0xb07   : > { %v10631_v38 = vadd.f32 %v10546_v8, %v10436_v2  ;;  %v11037_v8 = vpop.permute.xlu1 %11036 }
 0xb08   : > { %v10355_v55 = vpop.f32.mrf.mxu1 }
 0xb09   : > { %v10550_v37 = vpop.f32.mrf.mxu0  ;;  %v10438_v18 = vadd.f32 %v10355_v55, %v10243_v11  ;;  %v11069_v11 = vld [vmem:[%s15827_s19 + $0x8] sm:$0x3] }
 0xb0a   : > { %v10357_v41 = vpop.f32.mrf.mxu1 }
 0xb0b   : > { %v10552_v53 = vpop.f32.mrf.mxu0  ;;  %v10439_v47 = vadd.f32 %v10357_v41, %v10244_v42  ;;  %v10633_v54 = vadd.f32 %v10550_v37, %v10438_v18  ;;  %v11055_v34 = vpop.permute.xlu1 %11054 }
 0xb0c   : > { %v11989_v5 = vpop.f32.mrf.mxu1 }
 0xb0d   : > { %v11996_v51 = vpop.f32.mrf.mxu0  ;;  %v10635_v61 = vadd.f32 %v11989_v5, %v10440_v20  ;;  %v10634_v46 = vadd.f32 %v10552_v53, %v10439_v47 }
 0xb0e   : > { %v10621_v45 = vpop.f32.mrf.mxu1 }
 0xb0f   : > { %v10816_v0 = vpop.f32.mrf.mxu0  ;;  %v10632_v23 = vadd.f32 %v10621_v45, %v10437_v17  ;;  %v10830_v26 = vadd.f32 %v11996_v51, %v10635_v61  ;;  %v11248_v2 = vpop.permute.xlu1 %11247  ;;  %v16076_v17 = vld [vmem:[#allocation3_spill] sm:$0xff] }
 0xb10   : > { %v10739_v35 = vpop.f32.mrf.mxu1  ;;  %vm11295_vm1 = vcmp.eq.s32.totalorder %v16076_v17, 1  ;;  %v11271_v61 = vpop.permute.xlu0 %11270 }
 0xb11   : > { %v10825_v4 = vadd.f32 %v10739_v35, %v10630_v50  ;;  %v10827_v59 = vadd.f32 %v10816_v0, %v10632_v23 }
 0xb12   : > { %v10741_v60 = vpop.f32.mrf.mxu1  ;;  %v10934_v40 = vpop.f32.mrf.mxu0 }
 0xb13   : > { %v10826_v25 = vadd.f32 %v10741_v60, %v10631_v38  ;;  %v11020_v10 = vadd.f32 %v10934_v40, %v10825_v4  ;;  %v11266_v38 = vpop.permute.xlu1 %11265 }
 0xb14   : > { %v10745_v44 = vpop.f32.mrf.mxu1  ;;  %v10936_v56 = vpop.f32.mrf.mxu0 }
 0xb15   : > { %v10828_v16 = vadd.f32 %v10745_v44, %v10633_v54  ;;  %v11021_v24 = vadd.f32 %v10936_v56, %v10826_v25  ;;  %v11026_v12 = vmax.f32 %v11020_v10, 0.0 }
 0xb16   : > { %v10747_v15 = vpop.f32.mrf.mxu1  ;;  %v10940_v63 = vpop.f32.mrf.mxu0 }
 0xb17   : > { %v10829_v36 = vadd.f32 %v10747_v15, %v10634_v46  ;;  %v11023_v49 = vadd.f32 %v10940_v63, %v10828_v16  ;;  %v11027_v58 = vmax.f32 %v11021_v24, 0.0  ;;  %v11044_v1 = vmul.f32 %v11037_v8, %v11026_v12  ;;  %v16077_v24 = vld [vmem:[#allocation4_spill] sm:$0xff] }
 0xb18   : > { %v10942_v48 = vpop.f32.mrf.mxu0  ;;  %v12003_v19 = vpop.f32.mrf.mxu1  ;;  %vm11296_vm2 = vcmp.eq.s32.totalorder %v16077_v24, 1 }
 0xb19   : > { %v11029_v22 = vmax.f32 %v11023_v49, 0.0  ;;  %v11024_v9 = vadd.f32 %v10942_v48, %v10829_v36  ;;  %v11025_v3 = vadd.f32 %v12003_v19, %v10830_v26  ;;  %v11045_v52 = vmul.f32 %v11037_v8, %v11027_v58 }
 0xb1a   : > { %v11011_v14 = vpop.f32.mrf.mxu1  ;;  %v11062_v31 = vadd.f32 %v11055_v34, %v11044_v1 }
 0xb1b   : > { %v11030_v21 = vmax.f32 %v11024_v9, 0.0  ;;  %v11022_v7 = vadd.f32 %v11011_v14, %v10827_v59  ;;  %v11047_v32 = vmul.f32 %v11042_v30, %v11029_v22  ;;  %v11031_v55 = vmax.f32 %v11025_v3, 0.0 }
 0xb1c   : > { %v11063_v29 = vadd.f32 %v11055_v34, %v11045_v52 }
 0xb1d   : > { %v11048_v43 = vmul.f32 %v11042_v30, %v11030_v21  ;;  %v11028_v37 = vmax.f32 %v11022_v7, 0.0  ;;  %v11049_v41 = vmul.f32 %v11042_v30, %v11031_v55  ;;  %v11065_v53 = vadd.f32 %v11060_v57, %v11047_v32 }
 0xb1f   : > { %v11066_v27 = vadd.f32 %v11060_v57, %v11048_v43  ;;  %v11046_v13 = vmul.f32 %v11037_v8, %v11028_v37  ;;  %v11067_v28 = vadd.f32 %v11060_v57, %v11049_v41 }
 0xb21   : > { %11781 = vmatprep.subr.msk.mxu1 %vm1703_vm9, %v11066_v27  ;;  %v11064_v5 = vadd.f32 %v11055_v34, %v11046_v13  ;;  %12004 = vmatprep.subr.msk.mxu0 %vm1703_vm9, %v11067_v28 }
 0xb22   : > { %11782 = vmatpush1.msk.msra.mxu1 %vm1703_vm9, %v11065_v53  ;;  %12005 = vmatpush3.msk.msra.mxu0 %vm1703_vm9, %v11067_v28 }
 0xb23   : > { %11115 = vmatprep.subr.mxu1 %v11063_v29  ;;  %12006 = vmatprep.subr.mxu0 %v11064_v5 }
 0xb24   : > { %11116 = vmatpush1.msra.mxu1 %v11062_v31  ;;  %12007 = vmatpush3.msra.mxu0 %v11064_v5 }
 0xb25   : > { %11783 = vmatmul.mubr.msk.f32.vlgmr.msra.gmra.mxu1 %vm1696_vm10, %v15770_v62  ;;  %12009 = vmatmul.mubr.msk.f32.vlgmr.msra.gmra.mxu0 %vm1696_vm10, %v11069_v11 }
 0xb26   : > { %11155 = vmatprep.mubr.f32.mxu1 %v16072_v6  ;;  %v16075_v6 = vld [vmem:[#allocation2_spill] sm:$0xff] }
 0xb27   : > { %vm11294_vm0 = vcmp.eq.s32.totalorder %v16075_v6, 1 }
 0xb29   : > { %11784 = vmatmul.mubr.msk.f32.gmra.mxu1 %vm1696_vm10, %v11069_v11 }
 0xbe5   : > { %v11151_v51 = vpop.f32.mrf.mxu1  ;;  %v12010_v42 = vpop.f32.mrf.mxu0 }
 0xbe6   : > { %v11237_v45 = vmax.f32 %v11151_v51, 0.0  ;;  %v11242_v33 = vmax.f32 %v12010_v42, 0.0 }
 0xbe7   : > { %v11153_v18 = vpop.f32.mrf.mxu1  ;;  %v11228_v0 = vpop.f32.mrf.mxu0 }
 0xbe8   : > { %v11255_v50 = vmul.f32 %v11248_v2, %v11237_v45  ;;  %v11238_v35 = vmax.f32 %v11153_v18, 0.0  ;;  %v11260_v47 = vmul.f32 %v11253_v39, %v11242_v33  ;;  %v11239_v20 = vmax.f32 %v11228_v0, 0.0 }
 0xbe9   : > { %v11157_v62 = vpop.f32.mrf.mxu1 }
 0xbea   : > { %v11273_v4 = vadd.f32 %v11266_v38, %v11255_v50  ;;  %v11256_v60 = vmul.f32 %v11248_v2, %v11238_v35  ;;  %v11240_v40 = vmax.f32 %v11157_v62, 0.0  ;;  %v11257_v54 = vmul.f32 %v11248_v2, %v11239_v20 }
 0xbeb   : > { %v11159_v25 = vpop.f32.mrf.mxu1  ;;  %v11278_v23 = vadd.f32 %v11271_v61, %v11260_v47 }
 0xbec   : > { %v11274_v44 = vadd.f32 %v11266_v38, %v11256_v60  ;;  %v11258_v56 = vmul.f32 %v11253_v39, %v11240_v40  ;;  %v11241_v46 = vmax.f32 %v11159_v25, 0.0  ;;  %v11275_v16 = vadd.f32 %v11266_v38, %v11257_v54 }
 0xbed   : > { %v11297_v10 = vsel %vm11294_vm0, %v11273_v4, 0.0  ;;  %v11302_v22 = vsel %vm11296_vm2, %v11278_v23, 0.0 }
 0xbee   : > { %v11298_v15 = vsel %vm11295_vm1, %v11274_v44, 0.0  ;;  %v11276_v63 = vadd.f32 %v11271_v61, %v11258_v56  ;;  %v11259_v30 = vmul.f32 %v11253_v39, %v11241_v46  ;;  %v11299_v36 = vsel %vm11296_vm2, %v11275_v16, 0.0 }
 0xbef   : > { %v11303_v49 = vadd.f32 %v11298_v15, %v11297_v10  ;;  %v11305_v19 = vsel %vm11304_vm3, %v11299_v36, 0.0  ;;  %v11313_v3 = vsel %vm11312_vm4, %v11302_v22, 0.0 }
 0xbf0   : > { %v11300_v26 = vsel %vm11294_vm0, %v11276_v63, 0.0  ;;  %v11277_v48 = vadd.f32 %v11271_v61, %v11259_v30 }
 0xbf1   : > { %v11306_v59 = vadd.f32 %v11305_v19, %v11303_v49  ;;  %v11309_v8 = vsel %vm1703_vm9, %v11300_v26, 0.0 }
 0xbf2   : > { %v11301_v58 = vsel %vm11295_vm1, %v11277_v48, 0.0 }
 0xbf3   : > { %v11310_v9 = vsel %vm1703_vm9, %v11301_v58, 0.0  ;;  %11307 = vadd.xlane.f32.xlu1 %v11306_v59 }
 0xbf4   : > { %v11311_v12 = vadd.f32 %v11310_v9, %v11309_v8 }
 0xbf6   : > { %v11314_v14 = vadd.f32 %v11313_v3, %v11311_v12 }
 0xbf8   : > { %11315 = vadd.xlane.f32.xlu0 %v11314_v14 }
 0xc7c   : > { %v11308_v21 = vpop.xlane.xlu1 %11307 }
 0xc7d   : > { %v11317_v55 = vmul.f32 0.020408163, %v11308_v21 }
 0xc81   : > { %v11316_v7 = vpop.xlane.xlu0 %11315 }
 0xc82   : > { %v11318_v32 = vmul.f32 0.020408163, %v11316_v7 }
 0xc84   : > { %v11319_v52 = vsel %vm1703_vm9, %v11318_v32, -inf }
 0xc85   : > { %v11320_v43 = vmax.f32 %v11317_v55, %v11319_v52 }
 0xc87   : > { %v11321_v37 = vrot.slane %v11320_v43, 4 }
 0xc89   : > { %v11322_v57 = vmax.f32 %v11320_v43, %v11321_v37 }
 0xc8b   : > { %v11323_v1 = vrot.slane %v11322_v57, 2 }
 0xc8d   : > { %v11324_v41 = vmax.f32 %v11322_v57, %v11323_v1 }
 0xc8f   : > { %v11325_v27 = vrot.slane %v11324_v41, 1 }
 0xc91   : > { %v11326_v13 = vmax.f32 %v11324_v41, %v11325_v27 }
 0xc93   : > { %v11327_v34 = vsub.f32 %v11317_v55, %v11326_v13  ;;  %v11328_v53 = vsub.f32 %v11318_v32, %v11326_v13 }
 0xc95   : > { %v11329_v28 = vmul.f32 1.442695, %v11327_v34  ;;  %v11331_v29 = vmul.f32 1.442695, %v11328_v53 }
 0xc97   : > { %12037 = vpow2.f32 %v11329_v28 }
 0xc98   : > { %12039 = vpow2.f32 %v11331_v29 }
 0xca4   : > { %v12038_v5 = vpop.eup %12037 }
 0xca5   : > { %v12040_v31 = vpop.eup %12039 }
 0xca6   : > { %v11333_v11 = vsel %vm1703_vm9, %v12040_v31, 0.0 }
 0xca7   : > { %v11334_v2 = vadd.f32 %v12038_v5, %v11333_v11 }
 0xca9   : > { %v11335_v51 = vrot.slane %v11334_v2, 4 }
 0xcab   : > { %v11336_v39 = vadd.f32 %v11335_v51, %v11334_v2 }
 0xcad   : > { %v11337_v45 = vrot.slane %v11336_v39, 2 }
 0xcaf   : > { %v11338_v42 = vadd.f32 %v11337_v45, %v11336_v39 }
 0xcb1   : > { %v11339_v33 = vrot.slane %v11338_v42, 1 }
 0xcb3   : > { %v11340_v18 = vadd.f32 %v11339_v33, %v11338_v42 }
 0xcb5   : > { %12041 = vlog2.f32 %v11340_v18 }
 0xcc2   : > { %v12042_v50 = vpop.eup %12041 }
 0xcc3   : > { %v11342_v35 = vmul.f32 0.6931472, %v12042_v50 }
 0xcc5   : > { %v11343_v0 = vsub.f32 %v11327_v34, %v11342_v35  ;;  %v11344_v38 = vsub.f32 %v11328_v53, %v11342_v35 }
 0xcc7   : > { %11346 = vst.msk [vmem:[%s707_s29] sm:$0xff] %vm11345_vm5, %v11343_v0 }
 0xcc8   : > { %11348 = vst.msk [vmem:[%s707_s29 + $0x8] sm:$0x3] %vm11347_vm6, %v11344_v38 }
 0xcc9 PF: > { %s33_s4 = sadd.s32 1, %s12049_s4  }
 0xcca   : > { %p30_p4 = scmp.ge.s32.totalorder %s33_s4, 4  }
 0xccc   :  { %32 = sbr.rel (!%p30_p4) target bundleno = 12 (0xc), region = 182 }

</bundles_post_ra>
